<compile_context>
chip_gen: v7x
topology: tpu7x:2x2x1
jax: 0.10.0
libtpu: 0.0.40
codegen_flags: <defaults>
</compile_context>

<pallas_src>
import jax
import jax.numpy as jnp
from jax import lax
from jax.experimental import pallas as pl
from jax.experimental.pallas import tpu as pltpu

solvent_dict = {'ACN': [3.92 * 0.1, 36.6 * 0.01]}


# ---------------------------------------------------------------------------
# Fused whole-forward kernel (built per static graph/iteration configuration)
# ---------------------------------------------------------------------------

def make_fused_kernel(*, num_redox, n_pot, depth, N, E, H):
    """One kernel = initial GCN + `num_redox` x (heads + gate + GCN) + final head + losses."""

    def kernel(x_ref, ea_ref, A_ref, G_ref, S_ref, P_ref,
               wix_ref, wie_ref, bi_ref, wh_ref, bh_ref, wox_ref, wom_ref, bo_ref,
               wg_ref, bg_ref,
               w1h_ref, w1s_ref, b1_ref, w2_ref, b2_ref, w3_ref, b3_ref,
               sol_ref, tgt_ref,
               heads_ref, loss_ref):
        f32 = jnp.float32

        # ---- load operands / weights once (VMEM-resident for the whole call)
        A = A_ref[...]          # (E, E)  = G@S - R   (fused message operator)
        G = G_ref[...]          # (E, N)  gather by src
        S = S_ref[...]          # (N, E)  scatter-sum by dst
        P = P_ref[...]          # (1, N)  mean pool
        ea = ea_ref[...]        # (E, bond)
        wix = wix_ref[...]; wie = wie_ref[...]
        wh = wh_ref[...]; wox = wox_ref[...]; wom = wom_ref[...]
        wg = wg_ref[...]
        w1h = w1h_ref[...]; w1s = w1s_ref[...]; b1 = b1_ref[...]
        w2 = w2_ref[...]; b2 = b2_ref[...]
        w3 = w3_ref[...]; b3 = b3_ref[...]

        # ---- hoisted, loop-invariant broadcasts (JAX does not CSE broadcast_in_dim)
        bi_b = jnp.broadcast_to(bi_ref[...], (E, H))
        bh_b = jnp.broadcast_to(bh_ref[...], (E, H))
        bo_b = jnp.broadcast_to(bo_ref[...], (N, H))
        bg_b = jnp.broadcast_to(bg_ref[...], (N, H))

        # edge-attr projection of W_i is invariant across all GCN passes
        e_proj = jnp.dot(ea, wie, preferred_element_type=f32) + bi_b            # (E, H)

        # solvent contribution to the merged head's first layer (invariant)
        sol_term = (sol_ref[0, 0] * w1s[0:1, :]
                    + sol_ref[0, 1] * w1s[1:2, :])                               # (1, 1536)

        lane_iota = lax.broadcasted_iota(jnp.int32, (1, 128), 1)

        # ---- BondMessagePassing (depth unrolled) + readout + mean pool -------
        def gcn(x_nodes):
            xs = jnp.dot(G, x_nodes, preferred_element_type=f32)                # x[src]   (E, H)
            h0 = jnp.dot(xs, wix, preferred_element_type=f32) + e_proj          # W_i([x[src], ea])
            h = jnp.maximum(h0, 0.0)
            for _ in range(1, depth):
                m = jnp.dot(A, h, preferred_element_type=f32)                   # == G@(S@h) - R@h
                h = jnp.maximum(h0 + jnp.dot(m, wh, preferred_element_type=f32) + bh_b, 0.0)
            m_node = jnp.dot(S, h, preferred_element_type=f32)                  # (N, H)
            # h >= 0 post-ReLU, so an exact-zero row sum is equivalent to "no message"
            row_sum = jnp.sum(m_node, axis=1, keepdims=True)
            m_node = jnp.where(row_sum == 0.0, x_nodes, m_node)
            hout = jnp.maximum(
                jnp.dot(x_nodes, wox, preferred_element_type=f32)
                + jnp.dot(m_node, wom, preferred_element_type=f32) + bo_b, 0.0)  # (N, H)
            pooled = jnp.dot(P, hout, preferred_element_type=f32)                # (1, H)
            return hout, pooled

        # ---- merged cla/IP/delta heads: three matmuls, lane-dense (1,128) row -
        def heads(pooled):
            h1 = jnp.maximum(jnp.dot(pooled, w1h, preferred_element_type=f32)
                             + sol_term + b1, 0.0)                               # (1, 1536)
            h2 = jnp.maximum(jnp.dot(h1, w2, preferred_element_type=f32) + b2, 0.0)  # (1, 384)
            return jnp.dot(h2, w3, preferred_element_type=f32) + b3              # (1, 128)

        def lane_pick(row, lane):   # -> (1, 1)
            return jnp.sum(jnp.where(lane_iota == lane, row, 0.0),
                           axis=1, keepdims=True)

        def cross_entropy(row, label):   # logits live in lanes 0..4  -> (1, 1)
            masked = jnp.where(lane_iota < 5, row, -1e30)
            mx = jnp.max(masked, axis=1, keepdims=True)
            lse = mx + jnp.log(jnp.sum(jnp.exp(masked - mx), axis=1, keepdims=True))
            return lse - lane_pick(row, label)

        # ---- forward ---------------------------------------------------------
        node_h, pooled = gcn(x_ref[...])

        losses = jnp.zeros((1, 1), f32)
        loss_clas = jnp.zeros((1, 1), f32)
        loss_regs = jnp.zeros((1, 1), f32)

        for i in range(num_redox):
            row = heads(pooled)                              # [cla(5) | ip | delta | 0...]
            heads_ref[pl.ds(i, 1), :] = row

            true_ip = tgt_ref[0, i]
            true_pot = tgt_ref[1, i]
            l_cla = cross_entropy(row, n_pot - i)
            l_reg = (lane_pick(row, 5) - true_ip) ** 2
            l_delta = (lane_pick(row, 6) - (true_ip - true_pot)) ** 2

            losses = losses + l_cla + l_reg + l_delta
            # faithful to the reference's `loss_clas += loss_clas + loss_cla` (doubling)
            loss_clas = loss_clas + loss_clas + l_cla
            loss_regs = loss_regs + loss_regs + l_reg

            # redox_node = node_h * tanh(W_gate(node_h)) + node_h ; then rerun GCN
            gate = jnp.tanh(jnp.dot(node_h, wg, preferred_element_type=f32) + bg_b)
            redox = node_h * gate + node_h
            node_h, pooled = gcn(redox)

        # final classification head (no redox peak)
        row = heads(pooled)
        heads_ref[pl.ds(num_redox, 1), :] = row
        l_cla = cross_entropy(row, n_pot - num_redox)
        losses = losses + l_cla
        loss_clas = loss_clas + l_cla

        loss_ref[...] = (jnp.where(lane_iota == 0, losses, 0.0)
                         + jnp.where(lane_iota == 1, loss_clas, 0.0)
                         + jnp.where(lane_iota == 2, loss_regs, 0.0))

    return kernel


# ---------------------------------------------------------------------------
# Parameter init (deterministic, PyTorch-Linear-like uniform) + head merging
# ---------------------------------------------------------------------------

def init_linear(key, in_dim, out_dim):
    k1, k2 = jax.random.split(key)
    bound = 1.0 / (in_dim ** 0.5)
    w = jax.random.uniform(k1, (in_dim, out_dim), jnp.float32, -bound, bound)
    b = jax.random.uniform(k2, (1, out_dim), jnp.float32, -bound, bound)
    return w, b


def init_head(key, in_dim, out_dim):
    k1, k2, k3 = jax.random.split(key, 3)
    w1, b1 = init_linear(k1, in_dim, 512)
    w2, b2 = init_linear(k2, 512, 128)
    w3, b3 = init_linear(k3, 128, out_dim)
    return dict(w1=w1, b1=b1, w2=w2, b2=b2, w3=w3, b3=b3)


def build_merged_head(cla, ip, delta, H, out_dim):
    """Merge the 3 heads: shared layer-1 (solvent rows zero-padded), block-diag
    layers 2/3, third layer zero-padded to a lane-dense 128-wide output."""
    assert out_dim == 1, "merged head lane packing assumes output_dim == 1"
    z = jnp.zeros((2, 512), jnp.float32)
    w1h = jnp.concatenate([cla['w1'], ip['w1'], delta['w1'][:H]], axis=1)       # (H, 1536)
    w1s = jnp.concatenate([z, z, delta['w1'][H:H + 2]], axis=1)                 # (2, 1536)
    b1 = jnp.concatenate([cla['b1'], ip['b1'], delta['b1']], axis=1)            # (1, 1536)
    w2 = jnp.zeros((3 * 512, 3 * 128), jnp.float32)
    w2 = w2.at[0:512, 0:128].set(cla['w2'])
    w2 = w2.at[512:1024, 128:256].set(ip['w2'])
    w2 = w2.at[1024:1536, 256:384].set(delta['w2'])
    b2 = jnp.concatenate([cla['b2'], ip['b2'], delta['b2']], axis=1)            # (1, 384)
    w3 = jnp.zeros((3 * 128, 128), jnp.float32)
    w3 = w3.at[0:128, 0:5].set(cla['w3'])
    w3 = w3.at[128:256, 5:5 + out_dim].set(ip['w3'])
    w3 = w3.at[256:384, 5 + out_dim:5 + 2 * out_dim].set(delta['w3'])
    b3 = jnp.zeros((1, 128), jnp.float32)
    b3 = b3.at[:, 0:5].set(cla['b3'])
    b3 = b3.at[:, 5:5 + out_dim].set(ip['b3'])
    b3 = b3.at[:, 5 + out_dim:5 + 2 * out_dim].set(delta['b3'])
    return dict(w1h=w1h, w1s=w1s, b1=b1, w2=w2, b2=b2, w3=w3, b3=b3)


def build_params(key, node_dim, bond_dim, hidden_dim, output_dim):
    ks = jax.random.split(key, 12)
    wi, bi = init_linear(ks[0], node_dim + bond_dim, hidden_dim)
    wh, bh = init_linear(ks[1], hidden_dim, hidden_dim)
    wo, bo = init_linear(ks[2], node_dim + hidden_dim, hidden_dim)
    gcn = dict(wix=wi[:node_dim], wie=wi[node_dim:], bi=bi,
               wh=wh, bh=bh,
               wox=wo[:node_dim], wom=wo[node_dim:], bo=bo)
    gate_w, gate_b = init_linear(ks[3], hidden_dim, hidden_dim)
    cla = init_head(ks[4], hidden_dim, 5)
    ip = init_head(ks[5], hidden_dim, output_dim)
    delta = init_head(ks[6], hidden_dim + 2, output_dim)
    head = build_merged_head(cla, ip, delta, hidden_dim, output_dim)
    return dict(gcn=gcn, gate_w=gate_w, gate_b=gate_b, head=head)


# ---------------------------------------------------------------------------
# Forward wrapper: ONE pallas_call for the whole Solvent_OrganicMetal_GNN
# ---------------------------------------------------------------------------

def solvent_gnn_forward(params, x, edge_attr, A, G, S, P,
                        true_IPs, true_potentials, solvent):
    N, node_dim = x.shape
    E = edge_attr.shape[0]
    H = params['gcn']['wh'].shape[0]
    assert node_dim == H, "model recurrence requires node_dim == hidden_dim"
    K = len(true_IPs)
    n_pot = len(true_potentials)

    sol = jnp.asarray(solvent_dict[solvent], jnp.float32).reshape(1, 2)
    tgt = jnp.asarray([list(true_IPs), list(true_potentials)], jnp.float32)     # (2, K)

    kernel = make_fused_kernel(num_redox=K, n_pot=n_pot, depth=3, N=N, E=E, H=H)

    g = params['gcn']
    hd = params['head']
    args = (x, edge_attr, A, G, S, P,
            g['wix'], g['wie'], g['bi'], g['wh'], g['bh'], g['wox'], g['wom'], g['bo'],
            params['gate_w'], params['gate_b'],
            hd['w1h'], hd['w1s'], hd['b1'], hd['w2'], hd['b2'], hd['w3'], hd['b3'],
            sol, tgt)

    vmem = pl.BlockSpec(memory_space=pltpu.MemorySpace.VMEM)
    smem = pl.BlockSpec(memory_space=pltpu.MemorySpace.SMEM)

    heads_out, loss_out = pl.pallas_call(
        kernel,
        out_shape=(jax.ShapeDtypeStruct((K + 1, 128), jnp.float32),   # lane-dense head slab
                   jax.ShapeDtypeStruct((1, 128), jnp.float32)),      # lane-dense loss slab
        in_specs=[vmem] * 23 + [smem, smem],
        out_specs=(vmem, vmem),
        compiler_params=pltpu.CompilerParams(vmem_limit_bytes=32 * 1024 * 1024),
    )(*args)

    potential_clas = heads_out[:, 0:5]            # (K+1, 5)
    potential_regs = heads_out[:K, 5:6]           # (K, 1)
    losses = loss_out[0, 0]
    loss_clas = loss_out[0, 1]
    loss_regs = loss_out[0, 2]
    return potential_clas, potential_regs, (losses, loss_clas, loss_regs)


# ---------------------------------------------------------------------------
# Main
# ---------------------------------------------------------------------------

if __name__ == "__main__":
    key = jax.random.PRNGKey(0)
    node_dim = 32     # must equal hidden_dim (model reuses GCN output as node input)
    bond_dim = 8
    hidden_dim = 32
    output_dim = 1
    N = 12            # nodes, single graph

    # ring graph, both directions -> every edge has a reverse edge
    src_list, dst_list = [], []
    for i in range(N):
        j = (i + 1) % N
        src_list += [i, j]
        dst_list += [j, i]
    E = len(src_list)

    # reverse-edge table, same as OrganicMetal_GNN._rev_edge_index (-1 -> last row, torch semantics)
    edge_to_index = {(src_list[i], dst_list[i]): i for i in range(E)}
    rev_list = [edge_to_index.get((dst_list[i], src_list[i]), -1) for i in range(E)]
    rev_list = [r if r >= 0 else E - 1 for r in rev_list]

    src = jnp.asarray(src_list, jnp.int32)
    dst = jnp.asarray(dst_list, jnp.int32)
    rev = jnp.asarray(rev_list, jnp.int32)
    batch1 = jnp.zeros((N,), jnp.int32)     # single graph
    num_graphs = 1

    # one-hot scatter/gather/pool matrices (setup glue; all hot-path matmuls run in-kernel)
    S = (jnp.arange(N)[:, None] == dst[None, :]).astype(jnp.float32)       # (N, E) scatter by dst
    G = (src[:, None] == jnp.arange(N)[None, :]).astype(jnp.float32)       # (E, N) gather by src
    R = (rev[:, None] == jnp.arange(E)[None, :]).astype(jnp.float32)       # (E, E) gather by rev
    A = jnp.dot(G, S) - R                                                  # (E, E) fused message op
    P = (jnp.arange(num_graphs)[:, None] == batch1[None, :]).astype(jnp.float32)
    P = P / jnp.sum(P, axis=1, keepdims=True)                              # (1, N) mean-pool
    # NOTE: the dense E x E operator A is fine at small E; for large molecules
    # (E ~ thousands) it would exhaust VMEM (esp. v7x's 64 MiB) and should be
    # replaced by SMEM index tables + gathers over a grid.

    params = build_params(key, node_dim, bond_dim, hidden_dim, output_dim)

    # --- inputs ---
    kx, ke = jax.random.split(jax.random.split(key, 12)[7])
    x = jax.random.normal(kx, (N, node_dim), jnp.float32)
    edge_attr = jax.random.normal(ke, (E, bond_dim), jnp.float32)
    true_IPs = [1.3, 0.7]
    true_potentials = [0.9, 0.4]
    solvent = 'ACN'

    p_clas, p_regs, (losses, loss_clas, loss_regs) = solvent_gnn_forward(
        params, x, edge_attr, A, G, S, P, true_IPs, true_potentials, solvent)

    jax.block_until_ready((p_clas, p_regs, losses, loss_clas, loss_regs))
    assert p_clas.shape == (len(true_IPs) + 1, 5)
    assert p_regs.shape == (len(true_IPs), output_dim)
    assert bool(jnp.isfinite(p_clas).all())
    assert bool(jnp.isfinite(p_regs).all())
    assert bool(jnp.isfinite(losses)) and bool(jnp.isfinite(loss_clas)) and bool(jnp.isfinite(loss_regs))
    print("KERNEL_OK")
</pallas_src>

<mosaic_0001>
module attributes {stable_mosaic.version = 11 : i64} {
  func.func @kernel(%arg0: memref<12x32xf32, #tpu.memory_space<vmem>>, %arg1: memref<24x8xf32, #tpu.memory_space<vmem>>, %arg2: memref<24x24xf32, #tpu.memory_space<vmem>>, %arg3: memref<24x12xf32, #tpu.memory_space<vmem>>, %arg4: memref<12x24xf32, #tpu.memory_space<vmem>>, %arg5: memref<1x12xf32, #tpu.memory_space<vmem>>, %arg6: memref<32x32xf32, #tpu.memory_space<vmem>>, %arg7: memref<8x32xf32, #tpu.memory_space<vmem>>, %arg8: memref<1x32xf32, #tpu.memory_space<vmem>>, %arg9: memref<32x32xf32, #tpu.memory_space<vmem>>, %arg10: memref<1x32xf32, #tpu.memory_space<vmem>>, %arg11: memref<32x32xf32, #tpu.memory_space<vmem>>, %arg12: memref<32x32xf32, #tpu.memory_space<vmem>>, %arg13: memref<1x32xf32, #tpu.memory_space<vmem>>, %arg14: memref<32x32xf32, #tpu.memory_space<vmem>>, %arg15: memref<1x32xf32, #tpu.memory_space<vmem>>, %arg16: memref<32x1536xf32, #tpu.memory_space<vmem>>, %arg17: memref<2x1536xf32, #tpu.memory_space<vmem>>, %arg18: memref<1x1536xf32, #tpu.memory_space<vmem>>, %arg19: memref<1536x384xf32, #tpu.memory_space<vmem>>, %arg20: memref<1x384xf32, #tpu.memory_space<vmem>>, %arg21: memref<384x128xf32, #tpu.memory_space<vmem>>, %arg22: memref<1x128xf32, #tpu.memory_space<vmem>>, %arg23: memref<1x2xf32, #tpu.memory_space<smem>>, %arg24: memref<2x2xf32, #tpu.memory_space<smem>>, %arg25: memref<3x128xf32, #tpu.memory_space<vmem>>, %arg26: memref<1x128xf32, #tpu.memory_space<vmem>>) attributes {dimension_semantics = [], scalar_prefetch = 0 : i64, scratch_operands = 0 : i64, tpu.core_type = #tpu.core_type<tc>} {
    %c0 = arith.constant 0 : index
    %c0_0 = arith.constant 0 : index
    %0 = vector.load %arg2[%c0, %c0_0] : memref<24x24xf32, #tpu.memory_space<vmem>>, vector<24x24xf32>
    %c0_1 = arith.constant 0 : index
    %c0_2 = arith.constant 0 : index
    %1 = vector.load %arg3[%c0_1, %c0_2] : memref<24x12xf32, #tpu.memory_space<vmem>>, vector<24x12xf32>
    %c0_3 = arith.constant 0 : index
    %c0_4 = arith.constant 0 : index
    %2 = vector.load %arg4[%c0_3, %c0_4] : memref<12x24xf32, #tpu.memory_space<vmem>>, vector<12x24xf32>
    %c0_5 = arith.constant 0 : index
    %c0_6 = arith.constant 0 : index
    %3 = vector.load %arg5[%c0_5, %c0_6] : memref<1x12xf32, #tpu.memory_space<vmem>>, vector<1x12xf32>
    %c0_7 = arith.constant 0 : index
    %c0_8 = arith.constant 0 : index
    %4 = vector.load %arg1[%c0_7, %c0_8] : memref<24x8xf32, #tpu.memory_space<vmem>>, vector<24x8xf32>
    %c0_9 = arith.constant 0 : index
    %c0_10 = arith.constant 0 : index
    %5 = vector.load %arg6[%c0_9, %c0_10] : memref<32x32xf32, #tpu.memory_space<vmem>>, vector<32x32xf32>
    %c0_11 = arith.constant 0 : index
    %c0_12 = arith.constant 0 : index
    %6 = vector.load %arg7[%c0_11, %c0_12] : memref<8x32xf32, #tpu.memory_space<vmem>>, vector<8x32xf32>
    %c0_13 = arith.constant 0 : index
    %c0_14 = arith.constant 0 : index
    %7 = vector.load %arg9[%c0_13, %c0_14] : memref<32x32xf32, #tpu.memory_space<vmem>>, vector<32x32xf32>
    %c0_15 = arith.constant 0 : index
    %c0_16 = arith.constant 0 : index
    %8 = vector.load %arg11[%c0_15, %c0_16] : memref<32x32xf32, #tpu.memory_space<vmem>>, vector<32x32xf32>
    %c0_17 = arith.constant 0 : index
    %c0_18 = arith.constant 0 : index
    %9 = vector.load %arg12[%c0_17, %c0_18] : memref<32x32xf32, #tpu.memory_space<vmem>>, vector<32x32xf32>
    %c0_19 = arith.constant 0 : index
    %c0_20 = arith.constant 0 : index
    %10 = vector.load %arg14[%c0_19, %c0_20] : memref<32x32xf32, #tpu.memory_space<vmem>>, vector<32x32xf32>
    %c0_21 = arith.constant 0 : index
    %c0_22 = arith.constant 0 : index
    %11 = vector.load %arg16[%c0_21, %c0_22] : memref<32x1536xf32, #tpu.memory_space<vmem>>, vector<32x1536xf32>
    %c0_23 = arith.constant 0 : index
    %c0_24 = arith.constant 0 : index
    %12 = vector.load %arg17[%c0_23, %c0_24] : memref<2x1536xf32, #tpu.memory_space<vmem>>, vector<2x1536xf32>
    %c0_25 = arith.constant 0 : index
    %c0_26 = arith.constant 0 : index
    %13 = vector.load %arg18[%c0_25, %c0_26] : memref<1x1536xf32, #tpu.memory_space<vmem>>, vector<1x1536xf32>
    %c0_27 = arith.constant 0 : index
    %c0_28 = arith.constant 0 : index
    %14 = vector.load %arg19[%c0_27, %c0_28] : memref<1536x384xf32, #tpu.memory_space<vmem>>, vector<1536x384xf32>
    %c0_29 = arith.constant 0 : index
    %c0_30 = arith.constant 0 : index
    %15 = vector.load %arg20[%c0_29, %c0_30] : memref<1x384xf32, #tpu.memory_space<vmem>>, vector<1x384xf32>
    %c0_31 = arith.constant 0 : index
    %c0_32 = arith.constant 0 : index
    %16 = vector.load %arg21[%c0_31, %c0_32] : memref<384x128xf32, #tpu.memory_space<vmem>>, vector<384x128xf32>
    %c0_33 = arith.constant 0 : index
    %c0_34 = arith.constant 0 : index
    %17 = vector.load %arg22[%c0_33, %c0_34] : memref<1x128xf32, #tpu.memory_space<vmem>>, vector<1x128xf32>
    %c0_35 = arith.constant 0 : index
    %c0_36 = arith.constant 0 : index
    %18 = vector.load %arg8[%c0_35, %c0_36] : memref<1x32xf32, #tpu.memory_space<vmem>>, vector<1x32xf32>
    %19 = vector.shape_cast %18 : vector<1x32xf32> to vector<1x32xf32>
    %20 = vector.broadcast %19 : vector<1x32xf32> to vector<24x32xf32>
    %c0_37 = arith.constant 0 : index
    %c0_38 = arith.constant 0 : index
    %21 = vector.load %arg10[%c0_37, %c0_38] : memref<1x32xf32, #tpu.memory_space<vmem>>, vector<1x32xf32>
    %22 = vector.shape_cast %21 : vector<1x32xf32> to vector<1x32xf32>
    %23 = vector.broadcast %22 : vector<1x32xf32> to vector<24x32xf32>
    %c0_39 = arith.constant 0 : index
    %c0_40 = arith.constant 0 : index
    %24 = vector.load %arg13[%c0_39, %c0_40] : memref<1x32xf32, #tpu.memory_space<vmem>>, vector<1x32xf32>
    %25 = vector.shape_cast %24 : vector<1x32xf32> to vector<1x32xf32>
    %26 = vector.broadcast %25 : vector<1x32xf32> to vector<12x32xf32>
    %c0_41 = arith.constant 0 : index
    %c0_42 = arith.constant 0 : index
    %27 = vector.load %arg15[%c0_41, %c0_42] : memref<1x32xf32, #tpu.memory_space<vmem>>, vector<1x32xf32>
    %28 = vector.shape_cast %27 : vector<1x32xf32> to vector<1x32xf32>
    %29 = vector.broadcast %28 : vector<1x32xf32> to vector<12x32xf32>
    %cst = arith.constant dense<0.000000e+00> : vector<24x32xf32>
    %30 = tpu.matmul %4, %6, %cst {dimension_numbers = #tpu.dot_dimension_numbers<[1], [0], [0], [1], [0, 0, 1, 1], [], []>} : vector<24x8xf32>, vector<8x32xf32>, vector<24x32xf32> -> vector<24x32xf32>
    %31 = arith.addf %30, %20 : vector<24x32xf32>
    %c0_43 = arith.constant 0 : index
    %c0_44 = arith.constant 0 : index
    %32 = memref.load %arg23[%c0_43, %c0_44] : memref<1x2xf32, #tpu.memory_space<smem>>
    %33 = vector.extract_strided_slice %12 {offsets = [0, 0], sizes = [1, 1536], strides = [1, 1]} : vector<2x1536xf32> to vector<1x1536xf32>
    %34 = vector.broadcast %32 : f32 to vector<1x1536xf32>
    %35 = arith.mulf %34, %33 : vector<1x1536xf32>
    %c0_45 = arith.constant 0 : index
    %c1 = arith.constant 1 : index
    %36 = memref.load %arg23[%c0_45, %c1] : memref<1x2xf32, #tpu.memory_space<smem>>
    %37 = vector.extract_strided_slice %12 {offsets = [1, 0], sizes = [1, 1536], strides = [1, 1]} : vector<2x1536xf32> to vector<1x1536xf32>
    %38 = vector.broadcast %36 : f32 to vector<1x1536xf32>
    %39 = arith.mulf %38, %37 : vector<1x1536xf32>
    %40 = arith.addf %35, %39 : vector<1x1536xf32>
    %41 = tpu.iota {dimensions = array<i32: 1>} : vector<1x128xi32>
    %c0_46 = arith.constant 0 : index
    %c0_47 = arith.constant 0 : index
    %42 = vector.load %arg0[%c0_46, %c0_47] : memref<12x32xf32, #tpu.memory_space<vmem>>, vector<12x32xf32>
    %cst_48 = arith.constant dense<0.000000e+00> : vector<24x32xf32>
    %43 = tpu.matmul %1, %42, %cst_48 {dimension_numbers = #tpu.dot_dimension_numbers<[1], [0], [0], [1], [0, 0, 1, 1], [], []>} : vector<24x12xf32>, vector<12x32xf32>, vector<24x32xf32> -> vector<24x32xf32>
    %cst_49 = arith.constant dense<0.000000e+00> : vector<24x32xf32>
    %44 = tpu.matmul %43, %5, %cst_49 {dimension_numbers = #tpu.dot_dimension_numbers<[1], [0], [0], [1], [0, 0, 1, 1], [], []>} : vector<24x32xf32>, vector<32x32xf32>, vector<24x32xf32> -> vector<24x32xf32>
    %45 = arith.addf %44, %31 : vector<24x32xf32>
    %cst_50 = arith.constant 0.000000e+00 : f32
    %46 = vector.broadcast %cst_50 : f32 to vector<24x32xf32>
    %47 = arith.maximumf %45, %46 : vector<24x32xf32>
    %cst_51 = arith.constant dense<0.000000e+00> : vector<24x32xf32>
    %48 = tpu.matmul %0, %47, %cst_51 {dimension_numbers = #tpu.dot_dimension_numbers<[1], [0], [0], [1], [0, 0, 1, 1], [], []>} : vector<24x24xf32>, vector<24x32xf32>, vector<24x32xf32> -> vector<24x32xf32>
    %cst_52 = arith.constant dense<0.000000e+00> : vector<24x32xf32>
    %49 = tpu.matmul %48, %7, %cst_52 {dimension_numbers = #tpu.dot_dimension_numbers<[1], [0], [0], [1], [0, 0, 1, 1], [], []>} : vector<24x32xf32>, vector<32x32xf32>, vector<24x32xf32> -> vector<24x32xf32>
    %50 = arith.addf %45, %49 : vector<24x32xf32>
    %51 = arith.addf %50, %23 : vector<24x32xf32>
    %cst_53 = arith.constant 0.000000e+00 : f32
    %52 = vector.broadcast %cst_53 : f32 to vector<24x32xf32>
    %53 = arith.maximumf %51, %52 : vector<24x32xf32>
    %cst_54 = arith.constant dense<0.000000e+00> : vector<24x32xf32>
    %54 = tpu.matmul %0, %53, %cst_54 {dimension_numbers = #tpu.dot_dimension_numbers<[1], [0], [0], [1], [0, 0, 1, 1], [], []>} : vector<24x24xf32>, vector<24x32xf32>, vector<24x32xf32> -> vector<24x32xf32>
    %cst_55 = arith.constant dense<0.000000e+00> : vector<24x32xf32>
    %55 = tpu.matmul %54, %7, %cst_55 {dimension_numbers = #tpu.dot_dimension_numbers<[1], [0], [0], [1], [0, 0, 1, 1], [], []>} : vector<24x32xf32>, vector<32x32xf32>, vector<24x32xf32> -> vector<24x32xf32>
    %56 = arith.addf %45, %55 : vector<24x32xf32>
    %57 = arith.addf %56, %23 : vector<24x32xf32>
    %cst_56 = arith.constant 0.000000e+00 : f32
    %58 = vector.broadcast %cst_56 : f32 to vector<24x32xf32>
    %59 = arith.maximumf %57, %58 : vector<24x32xf32>
    %cst_57 = arith.constant dense<0.000000e+00> : vector<12x32xf32>
    %60 = tpu.matmul %2, %59, %cst_57 {dimension_numbers = #tpu.dot_dimension_numbers<[1], [0], [0], [1], [0, 0, 1, 1], [], []>} : vector<12x24xf32>, vector<24x32xf32>, vector<12x32xf32> -> vector<12x32xf32>
    %cst_58 = arith.constant dense<0.000000e+00> : vector<12xf32>
    %61 = vector.multi_reduction <add>, %60, %cst_58 [1] : vector<12x32xf32> to vector<12xf32>
    %62 = vector.shape_cast %61 : vector<12xf32> to vector<12x1xf32>
    %cst_59 = arith.constant 0.000000e+00 : f32
    %63 = vector.broadcast %cst_59 : f32 to vector<12x1xf32>
    %64 = arith.cmpf oeq, %62, %63 : vector<12x1xf32>
    %65 = vector.shape_cast %64 : vector<12x1xi1> to vector<12x1xi1>
    %66 = vector.broadcast %65 : vector<12x1xi1> to vector<12x32xi1>
    %67 = arith.select %66, %42, %60 : vector<12x32xi1>, vector<12x32xf32>
    %cst_60 = arith.constant dense<0.000000e+00> : vector<12x32xf32>
    %68 = tpu.matmul %42, %8, %cst_60 {dimension_numbers = #tpu.dot_dimension_numbers<[1], [0], [0], [1], [0, 0, 1, 1], [], []>} : vector<12x32xf32>, vector<32x32xf32>, vector<12x32xf32> -> vector<12x32xf32>
    %cst_61 = arith.constant dense<0.000000e+00> : vector<12x32xf32>
    %69 = tpu.matmul %67, %9, %cst_61 {dimension_numbers = #tpu.dot_dimension_numbers<[1], [0], [0], [1], [0, 0, 1, 1], [], []>} : vector<12x32xf32>, vector<32x32xf32>, vector<12x32xf32> -> vector<12x32xf32>
    %70 = arith.addf %68, %69 : vector<12x32xf32>
    %71 = arith.addf %70, %26 : vector<12x32xf32>
    %cst_62 = arith.constant 0.000000e+00 : f32
    %72 = vector.broadcast %cst_62 : f32 to vector<12x32xf32>
    %73 = arith.maximumf %71, %72 : vector<12x32xf32>
    %cst_63 = arith.constant dense<0.000000e+00> : vector<1x32xf32>
    %74 = tpu.matmul %3, %73, %cst_63 {dimension_numbers = #tpu.dot_dimension_numbers<[1], [0], [0], [1], [0, 0, 1, 1], [], []>} : vector<1x12xf32>, vector<12x32xf32>, vector<1x32xf32> -> vector<1x32xf32>
    %cst_64 = arith.constant 0.000000e+00 : f32
    %75 = vector.broadcast %cst_64 : f32 to vector<1x1xf32>
    %cst_65 = arith.constant 0.000000e+00 : f32
    %76 = vector.broadcast %cst_65 : f32 to vector<1x1xf32>
    %cst_66 = arith.constant 0.000000e+00 : f32
    %77 = vector.broadcast %cst_66 : f32 to vector<1x1xf32>
    %cst_67 = arith.constant dense<0.000000e+00> : vector<1x1536xf32>
    %78 = tpu.matmul %74, %11, %cst_67 {dimension_numbers = #tpu.dot_dimension_numbers<[1], [0], [0], [1], [0, 0, 1, 1], [], []>} : vector<1x32xf32>, vector<32x1536xf32>, vector<1x1536xf32> -> vector<1x1536xf32>
    %79 = arith.addf %78, %40 : vector<1x1536xf32>
    %80 = arith.addf %79, %13 : vector<1x1536xf32>
    %cst_68 = arith.constant 0.000000e+00 : f32
    %81 = vector.broadcast %cst_68 : f32 to vector<1x1536xf32>
    %82 = arith.maximumf %80, %81 : vector<1x1536xf32>
    %cst_69 = arith.constant dense<0.000000e+00> : vector<1x384xf32>
    %83 = tpu.matmul %82, %14, %cst_69 {dimension_numbers = #tpu.dot_dimension_numbers<[1], [0], [0], [1], [0, 0, 1, 1], [], []>} : vector<1x1536xf32>, vector<1536x384xf32>, vector<1x384xf32> -> vector<1x384xf32>
    %84 = arith.addf %83, %15 : vector<1x384xf32>
    %cst_70 = arith.constant 0.000000e+00 : f32
    %85 = vector.broadcast %cst_70 : f32 to vector<1x384xf32>
    %86 = arith.maximumf %84, %85 : vector<1x384xf32>
    %cst_71 = arith.constant dense<0.000000e+00> : vector<1x128xf32>
    %87 = tpu.matmul %86, %16, %cst_71 {dimension_numbers = #tpu.dot_dimension_numbers<[1], [0], [0], [1], [0, 0, 1, 1], [], []>} : vector<1x384xf32>, vector<384x128xf32>, vector<1x128xf32> -> vector<1x128xf32>
    %88 = arith.addf %87, %17 : vector<1x128xf32>
    %c0_72 = arith.constant 0 : index
    %c0_73 = arith.constant 0 : index
    %89 = vector.load %arg25[%c0_72, %c0_73] : memref<3x128xf32, #tpu.memory_space<vmem>>, vector<1x128xf32>
    tpu.vector_store %arg25[%c0_72, %c0_73], %88 {strides = array<i32>} : memref<3x128xf32, #tpu.memory_space<vmem>>, vector<1x128xf32>,
    %c0_74 = arith.constant 0 : index
    %c0_75 = arith.constant 0 : index
    %90 = memref.load %arg24[%c0_74, %c0_75] : memref<2x2xf32, #tpu.memory_space<smem>>
    %c1_76 = arith.constant 1 : index
    %c0_77 = arith.constant 0 : index
    %91 = memref.load %arg24[%c1_76, %c0_77] : memref<2x2xf32, #tpu.memory_space<smem>>
    %c5_i32 = arith.constant 5 : i32
    %92 = vector.broadcast %c5_i32 : i32 to vector<1x128xi32>
    %93 = arith.cmpi slt, %41, %92 : vector<1x128xi32>
    %cst_78 = arith.constant -1.000000e+30 : f32
    %94 = vector.broadcast %cst_78 : f32 to vector<1x128xf32>
    %95 = arith.select %93, %88, %94 : vector<1x128xi1>, vector<1x128xf32>
    %cst_79 = arith.constant dense<0xFF800000> : vector<1xf32>
    %96 = vector.multi_reduction <maximumf>, %95, %cst_79 [1] : vector<1x128xf32> to vector<1xf32>
    %97 = vector.shape_cast %96 : vector<1xf32> to vector<1x1xf32>
    %98 = vector.broadcast %97 : vector<1x1xf32> to vector<1x128xf32>
    %99 = arith.subf %95, %98 : vector<1x128xf32>
    %100 = math.exp %99 : vector<1x128xf32>
    %cst_80 = arith.constant dense<0.000000e+00> : vector<1xf32>
    %101 = vector.multi_reduction <add>, %100, %cst_80 [1] : vector<1x128xf32> to vector<1xf32>
    %102 = vector.shape_cast %101 : vector<1xf32> to vector<1x1xf32>
    %103 = math.log %102 : vector<1x1xf32>
    %104 = arith.addf %97, %103 : vector<1x1xf32>
    %c2_i32 = arith.constant 2 : i32
    %105 = vector.broadcast %c2_i32 : i32 to vector<1x128xi32>
    %106 = arith.cmpi eq, %41, %105 : vector<1x128xi32>
    %cst_81 = arith.constant 0.000000e+00 : f32
    %107 = vector.broadcast %cst_81 : f32 to vector<1x128xf32>
    %108 = arith.select %106, %88, %107 : vector<1x128xi1>, vector<1x128xf32>
    %cst_82 = arith.constant dense<0.000000e+00> : vector<1xf32>
    %109 = vector.multi_reduction <add>, %108, %cst_82 [1] : vector<1x128xf32> to vector<1xf32>
    %110 = vector.shape_cast %109 : vector<1xf32> to vector<1x1xf32>
    %111 = arith.subf %104, %110 : vector<1x1xf32>
    %c5_i32_83 = arith.constant 5 : i32
    %112 = vector.broadcast %c5_i32_83 : i32 to vector<1x128xi32>
    %113 = arith.cmpi eq, %41, %112 : vector<1x128xi32>
    %cst_84 = arith.constant 0.000000e+00 : f32
    %114 = vector.broadcast %cst_84 : f32 to vector<1x128xf32>
    %115 = arith.select %113, %88, %114 : vector<1x128xi1>, vector<1x128xf32>
    %cst_85 = arith.constant dense<0.000000e+00> : vector<1xf32>
    %116 = vector.multi_reduction <add>, %115, %cst_85 [1] : vector<1x128xf32> to vector<1xf32>
    %117 = vector.shape_cast %116 : vector<1xf32> to vector<1x1xf32>
    %118 = vector.broadcast %90 : f32 to vector<1x1xf32>
    %119 = arith.subf %117, %118 : vector<1x1xf32>
    %120 = arith.mulf %119, %119 : vector<1x1xf32>
    %c6_i32 = arith.constant 6 : i32
    %121 = vector.broadcast %c6_i32 : i32 to vector<1x128xi32>
    %122 = arith.cmpi eq, %41, %121 : vector<1x128xi32>
    %cst_86 = arith.constant 0.000000e+00 : f32
    %123 = vector.broadcast %cst_86 : f32 to vector<1x128xf32>
    %124 = arith.select %122, %88, %123 : vector<1x128xi1>, vector<1x128xf32>
    %cst_87 = arith.constant dense<0.000000e+00> : vector<1xf32>
    %125 = vector.multi_reduction <add>, %124, %cst_87 [1] : vector<1x128xf32> to vector<1xf32>
    %126 = vector.shape_cast %125 : vector<1xf32> to vector<1x1xf32>
    %127 = arith.subf %90, %91 : f32
    %128 = vector.broadcast %127 : f32 to vector<1x1xf32>
    %129 = arith.subf %126, %128 : vector<1x1xf32>
    %130 = arith.mulf %129, %129 : vector<1x1xf32>
    %131 = arith.addf %75, %111 : vector<1x1xf32>
    %132 = arith.addf %131, %120 : vector<1x1xf32>
    %133 = arith.addf %132, %130 : vector<1x1xf32>
    %134 = arith.addf %76, %76 : vector<1x1xf32>
    %135 = arith.addf %134, %111 : vector<1x1xf32>
    %136 = arith.addf %77, %77 : vector<1x1xf32>
    %137 = arith.addf %136, %120 : vector<1x1xf32>
    %cst_88 = arith.constant dense<0.000000e+00> : vector<12x32xf32>
    %138 = tpu.matmul %73, %10, %cst_88 {dimension_numbers = #tpu.dot_dimension_numbers<[1], [0], [0], [1], [0, 0, 1, 1], [], []>} : vector<12x32xf32>, vector<32x32xf32>, vector<12x32xf32> -> vector<12x32xf32>
    %139 = arith.addf %138, %29 : vector<12x32xf32>
    %140 = math.tanh %139 : vector<12x32xf32>
    %141 = arith.mulf %73, %140 : vector<12x32xf32>
    %142 = arith.addf %141, %73 : vector<12x32xf32>
    %cst_89 = arith.constant dense<0.000000e+00> : vector<24x32xf32>
    %143 = tpu.matmul %1, %142, %cst_89 {dimension_numbers = #tpu.dot_dimension_numbers<[1], [0], [0], [1], [0, 0, 1, 1], [], []>} : vector<24x12xf32>, vector<12x32xf32>, vector<24x32xf32> -> vector<24x32xf32>
    %cst_90 = arith.constant dense<0.000000e+00> : vector<24x32xf32>
    %144 = tpu.matmul %143, %5, %cst_90 {dimension_numbers = #tpu.dot_dimension_numbers<[1], [0], [0], [1], [0, 0, 1, 1], [], []>} : vector<24x32xf32>, vector<32x32xf32>, vector<24x32xf32> -> vector<24x32xf32>
    %145 = arith.addf %144, %31 : vector<24x32xf32>
    %cst_91 = arith.constant 0.000000e+00 : f32
    %146 = vector.broadcast %cst_91 : f32 to vector<24x32xf32>
    %147 = arith.maximumf %145, %146 : vector<24x32xf32>
    %cst_92 = arith.constant dense<0.000000e+00> : vector<24x32xf32>
    %148 = tpu.matmul %0, %147, %cst_92 {dimension_numbers = #tpu.dot_dimension_numbers<[1], [0], [0], [1], [0, 0, 1, 1], [], []>} : vector<24x24xf32>, vector<24x32xf32>, vector<24x32xf32> -> vector<24x32xf32>
    %cst_93 = arith.constant dense<0.000000e+00> : vector<24x32xf32>
    %149 = tpu.matmul %148, %7, %cst_93 {dimension_numbers = #tpu.dot_dimension_numbers<[1], [0], [0], [1], [0, 0, 1, 1], [], []>} : vector<24x32xf32>, vector<32x32xf32>, vector<24x32xf32> -> vector<24x32xf32>
    %150 = arith.addf %145, %149 : vector<24x32xf32>
    %151 = arith.addf %150, %23 : vector<24x32xf32>
    %cst_94 = arith.constant 0.000000e+00 : f32
    %152 = vector.broadcast %cst_94 : f32 to vector<24x32xf32>
    %153 = arith.maximumf %151, %152 : vector<24x32xf32>
    %cst_95 = arith.constant dense<0.000000e+00> : vector<24x32xf32>
    %154 = tpu.matmul %0, %153, %cst_95 {dimension_numbers = #tpu.dot_dimension_numbers<[1], [0], [0], [1], [0, 0, 1, 1], [], []>} : vector<24x24xf32>, vector<24x32xf32>, vector<24x32xf32> -> vector<24x32xf32>
    %cst_96 = arith.constant dense<0.000000e+00> : vector<24x32xf32>
    %155 = tpu.matmul %154, %7, %cst_96 {dimension_numbers = #tpu.dot_dimension_numbers<[1], [0], [0], [1], [0, 0, 1, 1], [], []>} : vector<24x32xf32>, vector<32x32xf32>, vector<24x32xf32> -> vector<24x32xf32>
    %156 = arith.addf %145, %155 : vector<24x32xf32>
    %157 = arith.addf %156, %23 : vector<24x32xf32>
    %cst_97 = arith.constant 0.000000e+00 : f32
    %158 = vector.broadcast %cst_97 : f32 to vector<24x32xf32>
    %159 = arith.maximumf %157, %158 : vector<24x32xf32>
    %cst_98 = arith.constant dense<0.000000e+00> : vector<12x32xf32>
    %160 = tpu.matmul %2, %159, %cst_98 {dimension_numbers = #tpu.dot_dimension_numbers<[1], [0], [0], [1], [0, 0, 1, 1], [], []>} : vector<12x24xf32>, vector<24x32xf32>, vector<12x32xf32> -> vector<12x32xf32>
    %cst_99 = arith.constant dense<0.000000e+00> : vector<12xf32>
    %161 = vector.multi_reduction <add>, %160, %cst_99 [1] : vector<12x32xf32> to vector<12xf32>
    %162 = vector.shape_cast %161 : vector<12xf32> to vector<12x1xf32>
    %cst_100 = arith.constant 0.000000e+00 : f32
    %163 = vector.broadcast %cst_100 : f32 to vector<12x1xf32>
    %164 = arith.cmpf oeq, %162, %163 : vector<12x1xf32>
    %165 = vector.shape_cast %164 : vector<12x1xi1> to vector<12x1xi1>
    %166 = vector.broadcast %165 : vector<12x1xi1> to vector<12x32xi1>
    %167 = arith.select %166, %142, %160 : vector<12x32xi1>, vector<12x32xf32>
    %cst_101 = arith.constant dense<0.000000e+00> : vector<12x32xf32>
    %168 = tpu.matmul %142, %8, %cst_101 {dimension_numbers = #tpu.dot_dimension_numbers<[1], [0], [0], [1], [0, 0, 1, 1], [], []>} : vector<12x32xf32>, vector<32x32xf32>, vector<12x32xf32> -> vector<12x32xf32>
    %cst_102 = arith.constant dense<0.000000e+00> : vector<12x32xf32>
    %169 = tpu.matmul %167, %9, %cst_102 {dimension_numbers = #tpu.dot_dimension_numbers<[1], [0], [0], [1], [0, 0, 1, 1], [], []>} : vector<12x32xf32>, vector<32x32xf32>, vector<12x32xf32> -> vector<12x32xf32>
    %170 = arith.addf %168, %169 : vector<12x32xf32>
    %171 = arith.addf %170, %26 : vector<12x32xf32>
    %cst_103 = arith.constant 0.000000e+00 : f32
    %172 = vector.broadcast %cst_103 : f32 to vector<12x32xf32>
    %173 = arith.maximumf %171, %172 : vector<12x32xf32>
    %cst_104 = arith.constant dense<0.000000e+00> : vector<1x32xf32>
    %174 = tpu.matmul %3, %173, %cst_104 {dimension_numbers = #tpu.dot_dimension_numbers<[1], [0], [0], [1], [0, 0, 1, 1], [], []>} : vector<1x12xf32>, vector<12x32xf32>, vector<1x32xf32> -> vector<1x32xf32>
    %cst_105 = arith.constant dense<0.000000e+00> : vector<1x1536xf32>
    %175 = tpu.matmul %174, %11, %cst_105 {dimension_numbers = #tpu.dot_dimension_numbers<[1], [0], [0], [1], [0, 0, 1, 1], [], []>} : vector<1x32xf32>, vector<32x1536xf32>, vector<1x1536xf32> -> vector<1x1536xf32>
    %176 = arith.addf %175, %40 : vector<1x1536xf32>
    %177 = arith.addf %176, %13 : vector<1x1536xf32>
    %cst_106 = arith.constant 0.000000e+00 : f32
    %178 = vector.broadcast %cst_106 : f32 to vector<1x1536xf32>
    %179 = arith.maximumf %177, %178 : vector<1x1536xf32>
    %cst_107 = arith.constant dense<0.000000e+00> : vector<1x384xf32>
    %180 = tpu.matmul %179, %14, %cst_107 {dimension_numbers = #tpu.dot_dimension_numbers<[1], [0], [0], [1], [0, 0, 1, 1], [], []>} : vector<1x1536xf32>, vector<1536x384xf32>, vector<1x384xf32> -> vector<1x384xf32>
    %181 = arith.addf %180, %15 : vector<1x384xf32>
    %cst_108 = arith.constant 0.000000e+00 : f32
    %182 = vector.broadcast %cst_108 : f32 to vector<1x384xf32>
    %183 = arith.maximumf %181, %182 : vector<1x384xf32>
    %cst_109 = arith.constant dense<0.000000e+00> : vector<1x128xf32>
    %184 = tpu.matmul %183, %16, %cst_109 {dimension_numbers = #tpu.dot_dimension_numbers<[1], [0], [0], [1], [0, 0, 1, 1], [], []>} : vector<1x384xf32>, vector<384x128xf32>, vector<1x128xf32> -> vector<1x128xf32>
    %185 = arith.addf %184, %17 : vector<1x128xf32>
    %c1_110 = arith.constant 1 : index
    %c0_111 = arith.constant 0 : index
    %186 = vector.load %arg25[%c1_110, %c0_111] : memref<3x128xf32, #tpu.memory_space<vmem>>, vector<1x128xf32>
    tpu.vector_store %arg25[%c1_110, %c0_111], %185 {strides = array<i32>} : memref<3x128xf32, #tpu.memory_space<vmem>>, vector<1x128xf32>,
    %c0_112 = arith.constant 0 : index
    %c1_113 = arith.constant 1 : index
    %187 = memref.load %arg24[%c0_112, %c1_113] : memref<2x2xf32, #tpu.memory_space<smem>>
    %c1_114 = arith.constant 1 : index
    %c1_115 = arith.constant 1 : index
    %188 = memref.load %arg24[%c1_114, %c1_115] : memref<2x2xf32, #tpu.memory_space<smem>>
    %c5_i32_116 = arith.constant 5 : i32
    %189 = vector.broadcast %c5_i32_116 : i32 to vector<1x128xi32>
    %190 = arith.cmpi slt, %41, %189 : vector<1x128xi32>
    %cst_117 = arith.constant -1.000000e+30 : f32
    %191 = vector.broadcast %cst_117 : f32 to vector<1x128xf32>
    %192 = arith.select %190, %185, %191 : vector<1x128xi1>, vector<1x128xf32>
    %cst_118 = arith.constant dense<0xFF800000> : vector<1xf32>
    %193 = vector.multi_reduction <maximumf>, %192, %cst_118 [1] : vector<1x128xf32> to vector<1xf32>
    %194 = vector.shape_cast %193 : vector<1xf32> to vector<1x1xf32>
    %195 = vector.broadcast %194 : vector<1x1xf32> to vector<1x128xf32>
    %196 = arith.subf %192, %195 : vector<1x128xf32>
    %197 = math.exp %196 : vector<1x128xf32>
    %cst_119 = arith.constant dense<0.000000e+00> : vector<1xf32>
    %198 = vector.multi_reduction <add>, %197, %cst_119 [1] : vector<1x128xf32> to vector<1xf32>
    %199 = vector.shape_cast %198 : vector<1xf32> to vector<1x1xf32>
    %200 = math.log %199 : vector<1x1xf32>
    %201 = arith.addf %194, %200 : vector<1x1xf32>
    %c1_i32 = arith.constant 1 : i32
    %202 = vector.broadcast %c1_i32 : i32 to vector<1x128xi32>
    %203 = arith.cmpi eq, %41, %202 : vector<1x128xi32>
    %cst_120 = arith.constant 0.000000e+00 : f32
    %204 = vector.broadcast %cst_120 : f32 to vector<1x128xf32>
    %205 = arith.select %203, %185, %204 : vector<1x128xi1>, vector<1x128xf32>
    %cst_121 = arith.constant dense<0.000000e+00> : vector<1xf32>
    %206 = vector.multi_reduction <add>, %205, %cst_121 [1] : vector<1x128xf32> to vector<1xf32>
    %207 = vector.shape_cast %206 : vector<1xf32> to vector<1x1xf32>
    %208 = arith.subf %201, %207 : vector<1x1xf32>
    %c5_i32_122 = arith.constant 5 : i32
    %209 = vector.broadcast %c5_i32_122 : i32 to vector<1x128xi32>
    %210 = arith.cmpi eq, %41, %209 : vector<1x128xi32>
    %cst_123 = arith.constant 0.000000e+00 : f32
    %211 = vector.broadcast %cst_123 : f32 to vector<1x128xf32>
    %212 = arith.select %210, %185, %211 : vector<1x128xi1>, vector<1x128xf32>
    %cst_124 = arith.constant dense<0.000000e+00> : vector<1xf32>
    %213 = vector.multi_reduction <add>, %212, %cst_124 [1] : vector<1x128xf32> to vector<1xf32>
    %214 = vector.shape_cast %213 : vector<1xf32> to vector<1x1xf32>
    %215 = vector.broadcast %187 : f32 to vector<1x1xf32>
    %216 = arith.subf %214, %215 : vector<1x1xf32>
    %217 = arith.mulf %216, %216 : vector<1x1xf32>
    %c6_i32_125 = arith.constant 6 : i32
    %218 = vector.broadcast %c6_i32_125 : i32 to vector<1x128xi32>
    %219 = arith.cmpi eq, %41, %218 : vector<1x128xi32>
    %cst_126 = arith.constant 0.000000e+00 : f32
    %220 = vector.broadcast %cst_126 : f32 to vector<1x128xf32>
    %221 = arith.select %219, %185, %220 : vector<1x128xi1>, vector<1x128xf32>
    %cst_127 = arith.constant dense<0.000000e+00> : vector<1xf32>
    %222 = vector.multi_reduction <add>, %221, %cst_127 [1] : vector<1x128xf32> to vector<1xf32>
    %223 = vector.shape_cast %222 : vector<1xf32> to vector<1x1xf32>
    %224 = arith.subf %187, %188 : f32
    %225 = vector.broadcast %224 : f32 to vector<1x1xf32>
    %226 = arith.subf %223, %225 : vector<1x1xf32>
    %227 = arith.mulf %226, %226 : vector<1x1xf32>
    %228 = arith.addf %133, %208 : vector<1x1xf32>
    %229 = arith.addf %228, %217 : vector<1x1xf32>
    %230 = arith.addf %229, %227 : vector<1x1xf32>
    %231 = arith.addf %135, %135 : vector<1x1xf32>
    %232 = arith.addf %231, %208 : vector<1x1xf32>
    %233 = arith.addf %137, %137 : vector<1x1xf32>
    %234 = arith.addf %233, %217 : vector<1x1xf32>
    %cst_128 = arith.constant dense<0.000000e+00> : vector<12x32xf32>
    %235 = tpu.matmul %173, %10, %cst_128 {dimension_numbers = #tpu.dot_dimension_numbers<[1], [0], [0], [1], [0, 0, 1, 1], [], []>} : vector<12x32xf32>, vector<32x32xf32>, vector<12x32xf32> -> vector<12x32xf32>
    %236 = arith.addf %235, %29 : vector<12x32xf32>
    %237 = math.tanh %236 : vector<12x32xf32>
    %238 = arith.mulf %173, %237 : vector<12x32xf32>
    %239 = arith.addf %238, %173 : vector<12x32xf32>
    %cst_129 = arith.constant dense<0.000000e+00> : vector<24x32xf32>
    %240 = tpu.matmul %1, %239, %cst_129 {dimension_numbers = #tpu.dot_dimension_numbers<[1], [0], [0], [1], [0, 0, 1, 1], [], []>} : vector<24x12xf32>, vector<12x32xf32>, vector<24x32xf32> -> vector<24x32xf32>
    %cst_130 = arith.constant dense<0.000000e+00> : vector<24x32xf32>
    %241 = tpu.matmul %240, %5, %cst_130 {dimension_numbers = #tpu.dot_dimension_numbers<[1], [0], [0], [1], [0, 0, 1, 1], [], []>} : vector<24x32xf32>, vector<32x32xf32>, vector<24x32xf32> -> vector<24x32xf32>
    %242 = arith.addf %241, %31 : vector<24x32xf32>
    %cst_131 = arith.constant 0.000000e+00 : f32
    %243 = vector.broadcast %cst_131 : f32 to vector<24x32xf32>
    %244 = arith.maximumf %242, %243 : vector<24x32xf32>
    %cst_132 = arith.constant dense<0.000000e+00> : vector<24x32xf32>
    %245 = tpu.matmul %0, %244, %cst_132 {dimension_numbers = #tpu.dot_dimension_numbers<[1], [0], [0], [1], [0, 0, 1, 1], [], []>} : vector<24x24xf32>, vector<24x32xf32>, vector<24x32xf32> -> vector<24x32xf32>
    %cst_133 = arith.constant dense<0.000000e+00> : vector<24x32xf32>
    %246 = tpu.matmul %245, %7, %cst_133 {dimension_numbers = #tpu.dot_dimension_numbers<[1], [0], [0], [1], [0, 0, 1, 1], [], []>} : vector<24x32xf32>, vector<32x32xf32>, vector<24x32xf32> -> vector<24x32xf32>
    %247 = arith.addf %242, %246 : vector<24x32xf32>
    %248 = arith.addf %247, %23 : vector<24x32xf32>
    %cst_134 = arith.constant 0.000000e+00 : f32
    %249 = vector.broadcast %cst_134 : f32 to vector<24x32xf32>
    %250 = arith.maximumf %248, %249 : vector<24x32xf32>
    %cst_135 = arith.constant dense<0.000000e+00> : vector<24x32xf32>
    %251 = tpu.matmul %0, %250, %cst_135 {dimension_numbers = #tpu.dot_dimension_numbers<[1], [0], [0], [1], [0, 0, 1, 1], [], []>} : vector<24x24xf32>, vector<24x32xf32>, vector<24x32xf32> -> vector<24x32xf32>
    %cst_136 = arith.constant dense<0.000000e+00> : vector<24x32xf32>
    %252 = tpu.matmul %251, %7, %cst_136 {dimension_numbers = #tpu.dot_dimension_numbers<[1], [0], [0], [1], [0, 0, 1, 1], [], []>} : vector<24x32xf32>, vector<32x32xf32>, vector<24x32xf32> -> vector<24x32xf32>
    %253 = arith.addf %242, %252 : vector<24x32xf32>
    %254 = arith.addf %253, %23 : vector<24x32xf32>
    %cst_137 = arith.constant 0.000000e+00 : f32
    %255 = vector.broadcast %cst_137 : f32 to vector<24x32xf32>
    %256 = arith.maximumf %254, %255 : vector<24x32xf32>
    %cst_138 = arith.constant dense<0.000000e+00> : vector<12x32xf32>
    %257 = tpu.matmul %2, %256, %cst_138 {dimension_numbers = #tpu.dot_dimension_numbers<[1], [0], [0], [1], [0, 0, 1, 1], [], []>} : vector<12x24xf32>, vector<24x32xf32>, vector<12x32xf32> -> vector<12x32xf32>
    %cst_139 = arith.constant dense<0.000000e+00> : vector<12xf32>
    %258 = vector.multi_reduction <add>, %257, %cst_139 [1] : vector<12x32xf32> to vector<12xf32>
    %259 = vector.shape_cast %258 : vector<12xf32> to vector<12x1xf32>
    %cst_140 = arith.constant 0.000000e+00 : f32
    %260 = vector.broadcast %cst_140 : f32 to vector<12x1xf32>
    %261 = arith.cmpf oeq, %259, %260 : vector<12x1xf32>
    %262 = vector.shape_cast %261 : vector<12x1xi1> to vector<12x1xi1>
    %263 = vector.broadcast %262 : vector<12x1xi1> to vector<12x32xi1>
    %264 = arith.select %263, %239, %257 : vector<12x32xi1>, vector<12x32xf32>
    %cst_141 = arith.constant dense<0.000000e+00> : vector<12x32xf32>
    %265 = tpu.matmul %239, %8, %cst_141 {dimension_numbers = #tpu.dot_dimension_numbers<[1], [0], [0], [1], [0, 0, 1, 1], [], []>} : vector<12x32xf32>, vector<32x32xf32>, vector<12x32xf32> -> vector<12x32xf32>
    %cst_142 = arith.constant dense<0.000000e+00> : vector<12x32xf32>
    %266 = tpu.matmul %264, %9, %cst_142 {dimension_numbers = #tpu.dot_dimension_numbers<[1], [0], [0], [1], [0, 0, 1, 1], [], []>} : vector<12x32xf32>, vector<32x32xf32>, vector<12x32xf32> -> vector<12x32xf32>
    %267 = arith.addf %265, %266 : vector<12x32xf32>
    %268 = arith.addf %267, %26 : vector<12x32xf32>
    %cst_143 = arith.constant 0.000000e+00 : f32
    %269 = vector.broadcast %cst_143 : f32 to vector<12x32xf32>
    %270 = arith.maximumf %268, %269 : vector<12x32xf32>
    %cst_144 = arith.constant dense<0.000000e+00> : vector<1x32xf32>
    %271 = tpu.matmul %3, %270, %cst_144 {dimension_numbers = #tpu.dot_dimension_numbers<[1], [0], [0], [1], [0, 0, 1, 1], [], []>} : vector<1x12xf32>, vector<12x32xf32>, vector<1x32xf32> -> vector<1x32xf32>
    %cst_145 = arith.constant dense<0.000000e+00> : vector<1x1536xf32>
    %272 = tpu.matmul %271, %11, %cst_145 {dimension_numbers = #tpu.dot_dimension_numbers<[1], [0], [0], [1], [0, 0, 1, 1], [], []>} : vector<1x32xf32>, vector<32x1536xf32>, vector<1x1536xf32> -> vector<1x1536xf32>
    %273 = arith.addf %272, %40 : vector<1x1536xf32>
    %274 = arith.addf %273, %13 : vector<1x1536xf32>
    %cst_146 = arith.constant 0.000000e+00 : f32
    %275 = vector.broadcast %cst_146 : f32 to vector<1x1536xf32>
    %276 = arith.maximumf %274, %275 : vector<1x1536xf32>
    %cst_147 = arith.constant dense<0.000000e+00> : vector<1x384xf32>
    %277 = tpu.matmul %276, %14, %cst_147 {dimension_numbers = #tpu.dot_dimension_numbers<[1], [0], [0], [1], [0, 0, 1, 1], [], []>} : vector<1x1536xf32>, vector<1536x384xf32>, vector<1x384xf32> -> vector<1x384xf32>
    %278 = arith.addf %277, %15 : vector<1x384xf32>
    %cst_148 = arith.constant 0.000000e+00 : f32
    %279 = vector.broadcast %cst_148 : f32 to vector<1x384xf32>
    %280 = arith.maximumf %278, %279 : vector<1x384xf32>
    %cst_149 = arith.constant dense<0.000000e+00> : vector<1x128xf32>
    %281 = tpu.matmul %280, %16, %cst_149 {dimension_numbers = #tpu.dot_dimension_numbers<[1], [0], [0], [1], [0, 0, 1, 1], [], []>} : vector<1x384xf32>, vector<384x128xf32>, vector<1x128xf32> -> vector<1x128xf32>
    %282 = arith.addf %281, %17 : vector<1x128xf32>
    %c2 = arith.constant 2 : index
    %c0_150 = arith.constant 0 : index
    %283 = vector.load %arg25[%c2, %c0_150] : memref<3x128xf32, #tpu.memory_space<vmem>>, vector<1x128xf32>
    tpu.vector_store %arg25[%c2, %c0_150], %282 {strides = array<i32>} : memref<3x128xf32, #tpu.memory_space<vmem>>, vector<1x128xf32>,
    %c5_i32_151 = arith.constant 5 : i32
    %284 = vector.broadcast %c5_i32_151 : i32 to vector<1x128xi32>
    %285 = arith.cmpi slt, %41, %284 : vector<1x128xi32>
    %cst_152 = arith.constant -1.000000e+30 : f32
    %286 = vector.broadcast %cst_152 : f32 to vector<1x128xf32>
    %287 = arith.select %285, %282, %286 : vector<1x128xi1>, vector<1x128xf32>
    %cst_153 = arith.constant dense<0xFF800000> : vector<1xf32>
    %288 = vector.multi_reduction <maximumf>, %287, %cst_153 [1] : vector<1x128xf32> to vector<1xf32>
    %289 = vector.shape_cast %288 : vector<1xf32> to vector<1x1xf32>
    %290 = vector.broadcast %289 : vector<1x1xf32> to vector<1x128xf32>
    %291 = arith.subf %287, %290 : vector<1x128xf32>
    %292 = math.exp %291 : vector<1x128xf32>
    %cst_154 = arith.constant dense<0.000000e+00> : vector<1xf32>
    %293 = vector.multi_reduction <add>, %292, %cst_154 [1] : vector<1x128xf32> to vector<1xf32>
    %294 = vector.shape_cast %293 : vector<1xf32> to vector<1x1xf32>
    %295 = math.log %294 : vector<1x1xf32>
    %296 = arith.addf %289, %295 : vector<1x1xf32>
    %c0_i32 = arith.constant 0 : i32
    %297 = vector.broadcast %c0_i32 : i32 to vector<1x128xi32>
    %298 = arith.cmpi eq, %41, %297 : vector<1x128xi32>
    %cst_155 = arith.constant 0.000000e+00 : f32
    %299 = vector.broadcast %cst_155 : f32 to vector<1x128xf32>
    %300 = arith.select %298, %282, %299 : vector<1x128xi1>, vector<1x128xf32>
    %cst_156 = arith.constant dense<0.000000e+00> : vector<1xf32>
    %301 = vector.multi_reduction <add>, %300, %cst_156 [1] : vector<1x128xf32> to vector<1xf32>
    %302 = vector.shape_cast %301 : vector<1xf32> to vector<1x1xf32>
    %303 = arith.subf %296, %302 : vector<1x1xf32>
    %304 = arith.addf %230, %303 : vector<1x1xf32>
    %305 = arith.addf %232, %303 : vector<1x1xf32>
    %c0_i32_157 = arith.constant 0 : i32
    %306 = vector.broadcast %c0_i32_157 : i32 to vector<1x128xi32>
    %307 = arith.cmpi eq, %41, %306 : vector<1x128xi32>
    %cst_158 = arith.constant 0.000000e+00 : f32
    %308 = vector.shape_cast %304 : vector<1x1xf32> to vector<1x1xf32>
    %309 = vector.broadcast %308 : vector<1x1xf32> to vector<1x128xf32>
    %310 = vector.broadcast %cst_158 : f32 to vector<1x128xf32>
    %311 = arith.select %307, %309, %310 : vector<1x128xi1>, vector<1x128xf32>
    %c1_i32_159 = arith.constant 1 : i32
    %312 = vector.broadcast %c1_i32_159 : i32 to vector<1x128xi32>
    %313 = arith.cmpi eq, %41, %312 : vector<1x128xi32>
    %cst_160 = arith.constant 0.000000e+00 : f32
    %314 = vector.shape_cast %305 : vector<1x1xf32> to vector<1x1xf32>
    %315 = vector.broadcast %314 : vector<1x1xf32> to vector<1x128xf32>
    %316 = vector.broadcast %cst_160 : f32 to vector<1x128xf32>
    %317 = arith.select %313, %315, %316 : vector<1x128xi1>, vector<1x128xf32>
    %318 = arith.addf %311, %317 : vector<1x128xf32>
    %c2_i32_161 = arith.constant 2 : i32
    %319 = vector.broadcast %c2_i32_161 : i32 to vector<1x128xi32>
    %320 = arith.cmpi eq, %41, %319 : vector<1x128xi32>
    %cst_162 = arith.constant 0.000000e+00 : f32
    %321 = vector.shape_cast %234 : vector<1x1xf32> to vector<1x1xf32>
    %322 = vector.broadcast %321 : vector<1x1xf32> to vector<1x128xf32>
    %323 = vector.broadcast %cst_162 : f32 to vector<1x128xf32>
    %324 = arith.select %320, %322, %323 : vector<1x128xi1>, vector<1x128xf32>
    %325 = arith.addf %318, %324 : vector<1x128xf32>
    %c0_163 = arith.constant 0 : index
    %c0_164 = arith.constant 0 : index
    %326 = vector.load %arg26[%c0_163, %c0_164] : memref<1x128xf32, #tpu.memory_space<vmem>>, vector<1x128xf32>
    tpu.vector_store %arg26[%c0_163, %c0_164], %325 {strides = array<i32>} : memref<1x128xf32, #tpu.memory_space<vmem>>, vector<1x128xf32>,
    return
  }
}

</mosaic_0001>

<bundles_post_ra>
// kernel: tpu_custom_call.1
= control target key start
LH: loop header
LB: loop body
LE: loop exit
PB: predicated region body
PF: predicated region fallthrough
CT: control target
= control target key end

     0   :  { %s16406_s0 = inlined_call_operand.hbm [shape: f32[12,32], index: 0, kind: input, shape index: {}]   ;;  %s16407_s1 = inlined_call_operand.vmem [shape: f32[24,8], index: 1, kind: input, shape index: {}]   ;;  %s16408_s2 = inlined_call_operand.hbm [shape: f32[24,24], index: 2, kind: input, shape index: {}]   ;;  %s16409_s3 = inlined_call_operand.vmem [shape: f32[24,12], index: 3, kind: input, shape index: {}]   ;;  %s16410_s4 = inlined_call_operand.hbm [shape: f32[12,24], index: 4, kind: input, shape index: {}]   ;;  %s16411_s5 = inlined_call_operand.hbm [shape: f32[1,12], index: 5, kind: input, shape index: {}]   ;;  %s16412_s6 = inlined_call_operand.hbm [shape: f32[32,32], index: 6, kind: input, shape index: {}]   ;;  %s16413_s7 = inlined_call_operand.hbm [shape: f32[8,32], index: 7, kind: input, shape index: {}]   ;;  %s16414_s8 = inlined_call_operand.hbm [shape: f32[1,32], index: 8, kind: input, shape index: {}]   ;;  %s16415_s9 = inlined_call_operand.hbm [shape: f32[32,32], index: 9, kind: input, shape index: {}]   ;;  %s16416_s10 = inlined_call_operand.hbm [shape: f32[1,32], index: 10, kind: input, shape index: {}]   ;;  %s16417_s11 = inlined_call_operand.hbm [shape: f32[32,32], index: 11, kind: input, shape index: {}]   ;;  %s16418_s12 = inlined_call_operand.hbm [shape: f32[32,32], index: 12, kind: input, shape index: {}]   ;;  %s16419_s13 = inlined_call_operand.hbm [shape: f32[1,32], index: 13, kind: input, shape index: {}]   ;;  %s16420_s14 = inlined_call_operand.hbm [shape: f32[32,32], index: 14, kind: input, shape index: {}]   ;;  %s16421_s15 = inlined_call_operand.hbm [shape: f32[1,32], index: 15, kind: input, shape index: {}]   ;;  %s16422_s16 = inlined_call_operand.hbm [shape: f32[32,1536], index: 16, kind: input, shape index: {}]   ;;  %s16423_s17 = inlined_call_operand.hbm [shape: f32[2,1536], index: 17, kind: input, shape index: {}]   ;;  %s16424_s18 = inlined_call_operand.hbm [shape: f32[1,1536], index: 18, kind: input, shape index: {}]   ;;  %s16425_s19 = inlined_call_operand.hbm [shape: f32[1536,384], index: 19, kind: input, shape index: {}]   ;;  %s16426_s20 = inlined_call_operand.hbm [shape: f32[1,384], index: 20, kind: input, shape index: {}]   ;;  %s16427_s21 = inlined_call_operand.hbm [shape: f32[384,128], index: 21, kind: input, shape index: {}]   ;;  %s16428_s22 = inlined_call_operand.hbm [shape: f32[1,128], index: 22, kind: input, shape index: {}]   ;;  %s16429_s23 = inlined_call_operand.hbm [shape: f32[1,2], index: 23, kind: input, shape index: {}]   ;;  %s16430_s24 = inlined_call_operand.hbm [shape: f32[2,2], index: 24, kind: input, shape index: {}]   ;;  %s16431_s25 = inlined_call_operand.hbm [shape: f32[3,128], index: 25, kind: output, shape index: {0}]   ;;  %s16432_s26 = inlined_call_operand.hbm [shape: f32[1,128], index: 26, kind: output, shape index: {1}]  }
   0x1   :  { %17167 = sst [smem:[#allocation424_spill]] %s16406_s0 }
   0x2   :  { %17168 = sst [smem:[#allocation425_spill]] %s16407_s1 }
   0x3   :  { %17169 = sst [smem:[#allocation426_spill]] %s16408_s2 }
   0x4   :  { %17170 = sst [smem:[#allocation427_spill]] %s16409_s3 }
   0x5   :  { %17171 = sst [smem:[#allocation428_spill]] %s16410_s4 }
   0x6   :  { %17172 = sst [smem:[#allocation429_spill]] %s16411_s5 }
   0x7   :  { %17173 = sst [smem:[#allocation430_spill]] %s16412_s6 }
   0x8   :  { %17174 = sst [smem:[#allocation431_spill]] %s16413_s7 }
   0x9   :  { %17175 = sst [smem:[#allocation432_spill]] %s16414_s8 }
   0xa   :  { %17176 = sst [smem:[#allocation433_spill]] %s16415_s9 }
   0xb   :  { %17177 = sst [smem:[#allocation434_spill]] %s16416_s10 }
   0xc   :  { %17178 = sst [smem:[#allocation435_spill]] %s16431_s25 }
   0xd   :  { %17179 = sst [smem:[#allocation436_spill]] %s16432_s26 }
   0xe   :  { %32 = vsyncpa [#allocation3], 0 }
   0xf   :  { %33 = vsyncpa [#allocation7], 0 }
  0x10   :  { %34 = vsyncpa [#allocation10], 0 }
  0x11   :  { %35 = vsyncpa [#allocation13], 0 }
  0x12   :  { %36 = vsyncpa [#allocation16], 0 }
  0x13   :  { %37 = vsyncpa [#allocation19], 0 }
  0x14   :  { %38 = vsyncpa [#allocation22], 0 }
  0x15   :  { %39 = vsyncpa [#allocation25], 0 }
  0x16   :  { %40 = vsyncpa [#allocation28], 0 }
  0x17   :  { %41 = vsyncpa [#allocation31], 0 }
  0x18   :  { %42 = vsyncpa [#allocation34], 0 }
  0x19   :  { %43 = vsyncpa [#allocation5], 0 }
  0x1a   :  { %44 = vsyncpa [#allocation38], 0 }
  0x1b   :  { %45 = vsyncpa [#allocation4], 0 }
  0x1c   :  { %46 = vsyncpa [#allocation41], 0  ;;  %s13150_s27 = smov [#allocation6]   ;;  %s13151_s7 = smov [#allocation9]  }
  0x1d   :  { %s66_s3 = sshll.u32 %s13150_s27, 4  ;;  %s93_s28 = sshll.u32 %s13151_s7, 4  ;;  %s67_s3 = int_to_ptr.vmem [resolvable:$true] %s66_s3  ;;  %s13320_s28 = int_to_ptr.vmem [resolvable:$true] %s93_s28 }
  0x1e   :  { %s17180_s29 = sld [smem:[#allocation426_spill]] }
  0x24   :  { %s12594_s0 = scalar_lea.hbm %s17180_s29, 384 }
  0x25   :  { %p12595_p0 = scmp.ne.s32.totalorder %s17180_s29, %s12594_s0  ;;  %p12598_p1 = scmp.lt.u32.totalorder %s12594_s0, %s17180_s29 }
  0x27   :  { %p12600_p2 = pnand %p12598_p1, %p12595_p0 }
  0x29   :  { %12603 = shalt.err (!%p12600_p2)
}
  0x2a   :  { %s12604_s10 = scalar_lea.vmem %s67_s3, 384  ;;  %p12609_p4 = scmp.lt.s32.totalorder %s67_s3, %s67_s3 }
  0x2b   :  { %p12605_p3 = scmp.ne.s32.totalorder %s67_s3, %s12604_s10  ;;  %p12610_p5 = scmp.lt.s32.totalorder %s12604_s10, %s12604_s10 }
  0x2d   :  { %p12611_p6 = por %p12610_p5, %p12609_p4 }
  0x2f   :  { %p12612_p7 = pnand %p12611_p6, %p12605_p3 }
  0x31   :  { %12615 = shalt.err (!%p12612_p7)
}
  0x32   :  { %s16444_s6 = smov 128   ;;  %s16446_s1 = smov 8  }
  0x33   :  { %72 = dma.hbm_to_vmem [thread:$0]  %s17180_s29, 384, %s67_s3, [#allocation7], %s16444_s6, %s16444_s6, %s16446_s1  }
  0x34   :  { %s17181_s0 = sld [smem:[#allocation429_spill]] }
  0x3a   :  { %s12616_s9 = scalar_lea.hbm %s17181_s0, 16 }
  0x3b   :  { %p12617_p8 = scmp.ne.s32.totalorder %s17181_s0, %s12616_s9  ;;  %p12620_p9 = scmp.lt.u32.totalorder %s12616_s9, %s17181_s0 }
  0x3d   :  { %p12622_p10 = pnand %p12620_p9, %p12617_p8 }
  0x3f   :  { %12625 = shalt.err (!%p12622_p10)
}
  0x40   :  { %s12626_s27 = scalar_lea.vmem %s13320_s28, 16  ;;  %s12630_s3 = scalar_lea.vmem %s13320_s28, 32 }
  0x41   :  { %p12627_p11 = scmp.ne.s32.totalorder %s13320_s28, %s12626_s27  ;;  %p12631_p12 = scmp.lt.s32.totalorder %s13320_s28, %s13320_s28 }
  0x42   :  { %p12632_p13 = scmp.lt.s32.totalorder %s12630_s3, %s12626_s27 }
  0x44   :  { %p12633_p0 = por %p12632_p13, %p12631_p12 }
  0x46   :  { %p12634_p1 = pnand %p12633_p0, %p12627_p11 }
  0x48   :  { %12637 = shalt.err (!%p12634_p1)
}
  0x49   :  { %96 = dma.hbm_to_vmem [thread:$0]  %s17181_s0, 16, %s13320_s28, [#allocation10]  }
  0x4a   :  { %s13154_s8 = smov [#allocation12]   ;;  %s13155_s9 = smov [#allocation15]  }
  0x4b   :  { %s115_s4 = sshll.u32 %s13154_s8, 4  ;;  %s134_s30 = sshll.u32 %s13155_s9, 4  ;;  %s116_s4 = int_to_ptr.vmem [resolvable:$true] %s115_s4  ;;  %s13355_s30 = int_to_ptr.vmem [resolvable:$true] %s134_s30 }
  0x4c   :  { %s17182_s10 = sld [smem:[#allocation431_spill]] }
  0x52   :  { %s12638_s6 = scalar_lea.hbm %s17182_s10, 128 }
  0x53   :  { %p12639_p2 = scmp.ne.s32.totalorder %s17182_s10, %s12638_s6  ;;  %p12642_p3 = scmp.lt.u32.totalorder %s12638_s6, %s17182_s10 }
  0x55   :  { %p12644_p4 = pnand %p12642_p3, %p12639_p2 }
  0x57   :  { %12647 = shalt.err (!%p12644_p4)
}
  0x58   :  { %s12648_s28 = scalar_lea.vmem %s116_s4, 128  ;;  %p12653_p6 = scmp.lt.s32.totalorder %s116_s4, %s116_s4 }
  0x59   :  { %p12649_p5 = scmp.ne.s32.totalorder %s116_s4, %s12648_s28  ;;  %p12654_p7 = scmp.lt.s32.totalorder %s12648_s28, %s12648_s28 }
  0x5b   :  { %p12655_p8 = por %p12654_p7, %p12653_p6 }
  0x5d   :  { %p12656_p9 = pnand %p12655_p8, %p12649_p5 }
  0x5f   :  { %12659 = shalt.err (!%p12656_p9)
}
  0x60   :  { %118 = dma.hbm_to_vmem [thread:$0]  %s17182_s10, 128, %s116_s4, [#allocation13]  }
  0x61   :  { %s17183_s9 = sld [smem:[#allocation433_spill]] }
  0x67   :  { %s12660_s2 = scalar_lea.hbm %s17183_s9, 512 }
  0x68   :  { %p12661_p10 = scmp.ne.s32.totalorder %s17183_s9, %s12660_s2  ;;  %p12664_p11 = scmp.lt.u32.totalorder %s12660_s2, %s17183_s9 }
  0x6a   :  { %p12666_p12 = pnand %p12664_p11, %p12661_p10 }
  0x6c   :  { %12669 = shalt.err (!%p12666_p12)
}
  0x6d   :  { %s12670_s27 = scalar_lea.vmem %s13355_s30, 512  ;;  %p12675_p0 = scmp.lt.s32.totalorder %s13355_s30, %s13355_s30 }
  0x6e   :  { %p12671_p13 = scmp.ne.s32.totalorder %s13355_s30, %s12670_s27  ;;  %p12676_p1 = scmp.lt.s32.totalorder %s12670_s27, %s12670_s27 }
  0x70   :  { %p12677_p2 = por %p12676_p1, %p12675_p0 }
  0x72   :  { %p12678_p3 = pnand %p12677_p2, %p12671_p13 }
  0x74   :  { %12681 = shalt.err (!%p12678_p3)
}
  0x75   :  { %s17184_s4 = smov 8   ;;  %s17185_s10 = smov 128  }
  0x76   :  { %140 = dma.hbm_to_vmem [thread:$0]  %s17183_s9, 512, %s13355_s30, [#allocation16], %s17185_s10, %s17185_s10, %s17184_s4  }
  0x77   :  { %s13156_s0 = smov [#allocation18]   ;;  %s13157_s7 = smov [#allocation21]  }
  0x78   :  { %s156_s29 = sshll.u32 %s13156_s0, 4  ;;  %s181_s8 = sshll.u32 %s13157_s7, 4  ;;  %s157_s29 = int_to_ptr.vmem [resolvable:$true] %s156_s29  ;;  %s182_s8 = int_to_ptr.vmem [resolvable:$true] %s181_s8 }
  0x79   :  { %s12682_s26 = scalar_lea.hbm %s16417_s11, 512 }
  0x7a   :  { %p12683_p4 = scmp.ne.s32.totalorder %s16417_s11, %s12682_s26  ;;  %p12686_p5 = scmp.lt.u32.totalorder %s12682_s26, %s16417_s11 }
  0x7c   :  { %p12688_p6 = pnand %p12686_p5, %p12683_p4 }
  0x7e   :  { %12691 = shalt.err (!%p12688_p6)
}
  0x7f   :  { %s12692_s30 = scalar_lea.vmem %s157_s29, 512  ;;  %p12697_p8 = scmp.lt.s32.totalorder %s157_s29, %s157_s29 }
  0x80   :  { %p12693_p7 = scmp.ne.s32.totalorder %s157_s29, %s12692_s30  ;;  %p12698_p9 = scmp.lt.s32.totalorder %s12692_s30, %s12692_s30 }
  0x82   :  { %p12699_p10 = por %p12698_p9, %p12697_p8 }
  0x84   :  { %p12700_p11 = pnand %p12699_p10, %p12693_p7 }
  0x86   :  { %12703 = shalt.err (!%p12700_p11)
}
  0x87   :  { %162 = dma.hbm_to_vmem [thread:$0]  %s16417_s11, 512, %s157_s29, [#allocation19], %s17185_s10, %s17185_s10, %s17184_s4  }
  0x88   :  { %s12704_s25 = scalar_lea.hbm %s16419_s13, 16 }
  0x89   :  { %p12705_p12 = scmp.ne.s32.totalorder %s16419_s13, %s12704_s25  ;;  %p12708_p13 = scmp.lt.u32.totalorder %s12704_s25, %s16419_s13 }
  0x8b   :  { %p12710_p0 = pnand %p12708_p13, %p12705_p12 }
  0x8d   :  { %12713 = shalt.err (!%p12710_p0)
}
  0x8e   :  { %s12714_s6 = scalar_lea.vmem %s182_s8, 16  ;;  %s12718_s1 = scalar_lea.vmem %s182_s8, 32 }
  0x8f   :  { %p12715_p1 = scmp.ne.s32.totalorder %s182_s8, %s12714_s6  ;;  %p12719_p2 = scmp.lt.s32.totalorder %s182_s8, %s182_s8 }
  0x90   :  { %p12720_p3 = scmp.lt.s32.totalorder %s12718_s1, %s12714_s6 }
  0x92   :  { %p12721_p4 = por %p12720_p3, %p12719_p2 }
  0x94   :  { %p12722_p5 = pnand %p12721_p4, %p12715_p1 }
  0x96   :  { %12725 = shalt.err (!%p12722_p5)
}
  0x97   :  { %184 = dma.hbm_to_vmem [thread:$0]  %s16419_s13, 16, %s182_s8, [#allocation22]  }
  0x98   :  { %s13158_s27 = smov [#allocation24]   ;;  %s13159_s9 = smov [#allocation27]  }
  0x99   :  { %s203_s30 = sshll.u32 %s13158_s27, 4  ;;  %s225_s3 = sshll.u32 %s13159_s9, 4  ;;  %s204_s30 = int_to_ptr.vmem [resolvable:$true] %s203_s30  ;;  %s226_s3 = int_to_ptr.vmem [resolvable:$true] %s225_s3 }
  0x9a   :  { %s12726_s25 = scalar_lea.hbm %s16421_s15, 16 }
  0x9b   :  { %p12727_p6 = scmp.ne.s32.totalorder %s16421_s15, %s12726_s25  ;;  %p12730_p7 = scmp.lt.u32.totalorder %s12726_s25, %s16421_s15 }
  0x9d   :  { %p12732_p8 = pnand %p12730_p7, %p12727_p6 }
  0x9f   :  { %12735 = shalt.err (!%p12732_p8)
}
  0xa0   :  { %s12736_s13 = scalar_lea.vmem %s204_s30, 16  ;;  %s12740_s8 = scalar_lea.vmem %s204_s30, 32 }
  0xa1   :  { %p12737_p9 = scmp.ne.s32.totalorder %s204_s30, %s12736_s13  ;;  %p12741_p10 = scmp.lt.s32.totalorder %s204_s30, %s204_s30 }
  0xa2   :  { %p12742_p11 = scmp.lt.s32.totalorder %s12740_s8, %s12736_s13 }
  0xa4   :  { %p12743_p12 = por %p12742_p11, %p12741_p10 }
  0xa6   :  { %p12744_p13 = pnand %p12743_p12, %p12737_p9 }
  0xa8   :  { %12747 = shalt.err (!%p12744_p13)
}
  0xa9   :  { %206 = dma.hbm_to_vmem [thread:$0]  %s16421_s15, 16, %s204_s30, [#allocation25]  }
  0xaa   :  { %s12748_s27 = scalar_lea.hbm %s16423_s17, 384 }
  0xab   :  { %p12749_p0 = scmp.ne.s32.totalorder %s16423_s17, %s12748_s27  ;;  %p12752_p1 = scmp.lt.u32.totalorder %s12748_s27, %s16423_s17 }
  0xad   :  { %p12754_p2 = pnand %p12752_p1, %p12749_p0 }
  0xaf   :  { %12757 = shalt.err (!%p12754_p2)
}
  0xb0   :  { %s12758_s7 = scalar_lea.vmem %s226_s3, 384  ;;  %p12763_p4 = scmp.lt.s32.totalorder %s226_s3, %s226_s3 }
  0xb1   :  { %p12759_p3 = scmp.ne.s32.totalorder %s226_s3, %s12758_s7  ;;  %p12764_p5 = scmp.lt.s32.totalorder %s12758_s7, %s12758_s7 }
  0xb3   :  { %p12765_p6 = por %p12764_p5, %p12763_p4 }
  0xb5   :  { %p12766_p7 = pnand %p12765_p6, %p12759_p3 }
  0xb7   :  { %12769 = shalt.err (!%p12766_p7)
}
  0xb8   :  { %228 = dma.hbm_to_vmem [thread:$0]  %s16423_s17, 384, %s226_s3, [#allocation28]  }
  0xb9   :  { %s13160_s2 = smov [#allocation30]   ;;  %s12770_s8 = scalar_lea.hbm %s16425_s19, 73728 }
  0xba   :  { %s244_s5 = sshll.u32 %s13160_s2, 4  ;;  %p12771_p8 = scmp.ne.s32.totalorder %s16425_s19, %s12770_s8  ;;  %s245_s5 = int_to_ptr.vmem [resolvable:$true] %s244_s5 }
  0xbb   :  { %p12774_p9 = scmp.lt.u32.totalorder %s12770_s8, %s16425_s19 }
  0xbd   :  { %p12776_p10 = pnand %p12774_p9, %p12771_p8 }
  0xbf   :  { %12779 = shalt.err (!%p12776_p10)
}
  0xc0   :  { %s12780_s27 = scalar_lea.vmem %s245_s5, 73728  ;;  %p12785_p12 = scmp.lt.s32.totalorder %s245_s5, %s245_s5 }
  0xc1   :  { %p12781_p11 = scmp.ne.s32.totalorder %s245_s5, %s12780_s27  ;;  %p12786_p13 = scmp.lt.s32.totalorder %s12780_s27, %s12780_s27 }
  0xc3   :  { %p12787_p0 = por %p12786_p13, %p12785_p12 }
  0xc5   :  { %p12788_p1 = pnand %p12787_p0, %p12781_p11 }
  0xc7   :  { %12791 = shalt.err (!%p12788_p1)
}
  0xc8   :  { %s13161_s17 = smov 384   ;;  %s13162_s3 = smov 24  }
  0xc9   :  { %250 = dma.hbm_to_vmem [thread:$0]  %s16425_s19, 73728, %s245_s5, [#allocation31], %s13161_s17, %s13161_s17, %s13162_s3  }
  0xca   :  { %s13163_s0 = smov [#allocation33]   ;;  %s13164_s7 = smov [#allocation2]  }
  0xcb   :  { %s266_s25 = sshll.u32 %s13163_s0, 4  ;;  %s52_s15 = sshll.u32 %s13164_s7, 4  ;;  %s267_s25 = int_to_ptr.vmem [resolvable:$true] %s266_s25  ;;  %s53_s15 = int_to_ptr.vmem [resolvable:$true] %s52_s15 }
  0xcc   :  { %s12792_s26 = scalar_lea.hbm %s16427_s21, 6144 }
  0xcd   :  { %p12793_p2 = scmp.ne.s32.totalorder %s16427_s21, %s12792_s26  ;;  %p12796_p3 = scmp.lt.u32.totalorder %s12792_s26, %s16427_s21 }
  0xcf   :  { %p12798_p4 = pnand %p12796_p3, %p12793_p2 }
  0xd1   :  { %12801 = shalt.err (!%p12798_p4)
}
  0xd2   :  { %s12802_s19 = scalar_lea.vmem %s267_s25, 6144  ;;  %p12807_p6 = scmp.lt.s32.totalorder %s267_s25, %s267_s25 }
  0xd3   :  { %p12803_p5 = scmp.ne.s32.totalorder %s267_s25, %s12802_s19  ;;  %p12808_p7 = scmp.lt.s32.totalorder %s12802_s19, %s12802_s19 }
  0xd5   :  { %p12809_p8 = por %p12808_p7, %p12807_p6 }
  0xd7   :  { %p12810_p9 = pnand %p12809_p8, %p12803_p5 }
  0xd9   :  { %12813 = shalt.err (!%p12810_p9)
}
  0xda   :  { %272 = dma.hbm_to_vmem [thread:$0]  %s16427_s21, 6144, %s267_s25, [#allocation34], %s17185_s10, %s17185_s10, %s17184_s4  }
  0xdb   :  { %s17186_s17 = sld [smem:[#allocation424_spill]] }
  0xe1   :  { %s12814_s3 = scalar_lea.hbm %s17186_s17, 256 }
  0xe2   :  { %p12815_p10 = scmp.ne.s32.totalorder %s17186_s17, %s12814_s3  ;;  %p12818_p11 = scmp.lt.u32.totalorder %s12814_s3, %s17186_s17 }
  0xe4   :  { %p12820_p12 = pnand %p12818_p11, %p12815_p10 }
  0xe6   :  { %12823 = shalt.err (!%p12820_p12)
}
  0xe7   :  { %s12824_s30 = scalar_lea.vmem %s53_s15, 256  ;;  %p12829_p0 = scmp.lt.s32.totalorder %s53_s15, %s53_s15 }
  0xe8   :  { %p12825_p13 = scmp.ne.s32.totalorder %s53_s15, %s12824_s30  ;;  %p12830_p1 = scmp.lt.s32.totalorder %s12824_s30, %s12824_s30 }
  0xea   :  { %p12831_p2 = por %p12830_p1, %p12829_p0 }
  0xec   :  { %p12832_p3 = pnand %p12831_p2, %p12825_p13 }
  0xee   :  { %12835 = shalt.err (!%p12832_p3)
}
  0xef   :  { %58 = dma.hbm_to_vmem [thread:$0]  %s17186_s17, 256, %s53_s15, [#allocation3], %s17185_s10, %s17185_s10, %s17184_s4  }
  0xf0   :  { %s13165_s2 = smov [#allocation8]   ;;  %s13166_s13 = smov [#allocation11]  }
  0xf1   :  { %s80_s26 = sshll.u32 %s13165_s2, 4  ;;  %s102_s8 = sshll.u32 %s13166_s13, 4  ;;  %s81_s26 = int_to_ptr.vmem [resolvable:$true] %s80_s26  ;;  %s103_s8 = int_to_ptr.vmem [resolvable:$true] %s102_s8 }
  0xf2   :  { %s17187_s19 = sld [smem:[#allocation428_spill]] }
  0xf8   :  { %s12836_s5 = scalar_lea.hbm %s17187_s19, 256 }
  0xf9   :  { %p12837_p4 = scmp.ne.s32.totalorder %s17187_s19, %s12836_s5  ;;  %p12840_p5 = scmp.lt.u32.totalorder %s12836_s5, %s17187_s19 }
  0xfb   :  { %p12842_p6 = pnand %p12840_p5, %p12837_p4 }
  0xfd   :  { %12845 = shalt.err (!%p12842_p6)
}
  0xfe   :  { %s12846_s15 = scalar_lea.vmem %s81_s26, 256  ;;  %p12851_p8 = scmp.lt.s32.totalorder %s81_s26, %s81_s26 }
  0xff   :  { %p12847_p7 = scmp.ne.s32.totalorder %s81_s26, %s12846_s15  ;;  %p12852_p9 = scmp.lt.s32.totalorder %s12846_s15, %s12846_s15 }
 0x101   :  { %p12853_p10 = por %p12852_p9, %p12851_p8 }
 0x103   :  { %p12854_p11 = pnand %p12853_p10, %p12847_p7 }
 0x105   :  { %12857 = shalt.err (!%p12854_p11)
}
 0x106   :  { %86 = dma.hbm_to_vmem [thread:$0]  %s17187_s19, 256, %s81_s26, [#allocation7], %s17185_s10, %s17185_s10, %s17184_s4  }
 0x107   :  { %s17188_s7 = sld [smem:[#allocation430_spill]] }
 0x10d   :  { %s12858_s30 = scalar_lea.hbm %s17188_s7, 512 }
 0x10e   :  { %p12859_p12 = scmp.ne.s32.totalorder %s17188_s7, %s12858_s30  ;;  %p12862_p13 = scmp.lt.u32.totalorder %s12858_s30, %s17188_s7 }
 0x110   :  { %p12864_p0 = pnand %p12862_p13, %p12859_p12 }
 0x112   :  { %12867 = shalt.err (!%p12864_p0)
}
 0x113   :  { %s12868_s6 = scalar_lea.vmem %s103_s8, 512  ;;  %p12873_p2 = scmp.lt.s32.totalorder %s103_s8, %s103_s8 }
 0x114   :  { %p12869_p1 = scmp.ne.s32.totalorder %s103_s8, %s12868_s6  ;;  %p12874_p3 = scmp.lt.s32.totalorder %s12868_s6, %s12868_s6 }
 0x116   :  { %p12875_p4 = por %p12874_p3, %p12873_p2 }
 0x118   :  { %p12876_p5 = pnand %p12875_p4, %p12869_p1 }
 0x11a   :  { %12879 = shalt.err (!%p12876_p5)
}
 0x11b   :  { %108 = dma.hbm_to_vmem [thread:$0]  %s17188_s7, 512, %s103_s8, [#allocation10], %s17185_s10, %s17185_s10, %s17184_s4  }
 0x11c   :  { %s13167_s19 = smov [#allocation14]   ;;  %s13168_s11 = smov [#allocation17]  }
 0x11d   :  { %s125_s5 = sshll.u32 %s13167_s19, 4  ;;  %s147_s29 = sshll.u32 %s13168_s11, 4  ;;  %s126_s5 = int_to_ptr.vmem [resolvable:$true] %s125_s5  ;;  %s148_s29 = int_to_ptr.vmem [resolvable:$true] %s147_s29 }
 0x11e   :  { %s17189_s15 = sld [smem:[#allocation432_spill]] }
 0x124   :  { %s12880_s17 = scalar_lea.hbm %s17189_s15, 16 }
 0x125   :  { %p12881_p6 = scmp.ne.s32.totalorder %s17189_s15, %s12880_s17  ;;  %p12884_p7 = scmp.lt.u32.totalorder %s12880_s17, %s17189_s15 }
 0x127   :  { %p12886_p8 = pnand %p12884_p7, %p12881_p6 }
 0x129   :  { %12889 = shalt.err (!%p12886_p8)
}
 0x12a   :  { %s12890_s8 = scalar_lea.vmem %s126_s5, 16  ;;  %s12894_s7 = scalar_lea.vmem %s126_s5, 32 }
 0x12b   :  { %p12891_p9 = scmp.ne.s32.totalorder %s126_s5, %s12890_s8  ;;  %p12895_p10 = scmp.lt.s32.totalorder %s126_s5, %s126_s5 }
 0x12c   :  { %p12896_p11 = scmp.lt.s32.totalorder %s12894_s7, %s12890_s8 }
 0x12e   :  { %p12897_p12 = por %p12896_p11, %p12895_p10 }
 0x130   :  { %p12898_p13 = pnand %p12897_p12, %p12891_p9 }
 0x132   :  { %12901 = shalt.err (!%p12898_p13)
}
 0x133   :  { %128 = dma.hbm_to_vmem [thread:$0]  %s17189_s15, 16, %s126_s5, [#allocation13]  }
 0x134   :  { %s17190_s6 = sld [smem:[#allocation434_spill]] }
 0x13a   :  { %s12902_s26 = scalar_lea.hbm %s17190_s6, 16 }
 0x13b   :  { %p12903_p0 = scmp.ne.s32.totalorder %s17190_s6, %s12902_s26  ;;  %p12906_p1 = scmp.lt.u32.totalorder %s12902_s26, %s17190_s6 }
 0x13d   :  { %p12908_p2 = pnand %p12906_p1, %p12903_p0 }
 0x13f   :  { %12911 = shalt.err (!%p12908_p2)
}
 0x140   :  { %s12912_s3 = scalar_lea.vmem %s148_s29, 16  ;;  %s12916_s17 = scalar_lea.vmem %s148_s29, 32 }
 0x141   :  { %p12913_p3 = scmp.ne.s32.totalorder %s148_s29, %s12912_s3  ;;  %p12917_p4 = scmp.lt.s32.totalorder %s148_s29, %s148_s29 }
 0x142   :  { %p12918_p5 = scmp.lt.s32.totalorder %s12916_s17, %s12912_s3 }
 0x144   :  { %p12919_p6 = por %p12918_p5, %p12917_p4 }
 0x146   :  { %p12920_p7 = pnand %p12919_p6, %p12913_p3 }
 0x148   :  { %12923 = shalt.err (!%p12920_p7)
}
 0x149   :  { %150 = dma.hbm_to_vmem [thread:$0]  %s17190_s6, 16, %s148_s29, [#allocation16]  }
 0x14a   :  { %s13169_s9 = smov [#allocation20]   ;;  %s13170_s0 = smov [#allocation23]  }
 0x14b   :  { %s168_s28 = sshll.u32 %s13169_s9, 4  ;;  %s190_s30 = sshll.u32 %s13170_s0, 4  ;;  %s169_s28 = int_to_ptr.vmem [resolvable:$true] %s168_s28  ;;  %s191_s30 = int_to_ptr.vmem [resolvable:$true] %s190_s30 }
 0x14c   :  { %s12924_s21 = scalar_lea.hbm %s16418_s12, 512 }
 0x14d   :  { %p12925_p8 = scmp.ne.s32.totalorder %s16418_s12, %s12924_s21  ;;  %p12928_p9 = scmp.lt.u32.totalorder %s12924_s21, %s16418_s12 }
 0x14f   :  { %p12930_p10 = pnand %p12928_p9, %p12925_p8 }
 0x151   :  { %12933 = shalt.err (!%p12930_p10)
}
 0x152   :  { %s12934_s29 = scalar_lea.vmem %s169_s28, 512  ;;  %p12939_p12 = scmp.lt.s32.totalorder %s169_s28, %s169_s28 }
 0x153   :  { %p12935_p11 = scmp.ne.s32.totalorder %s169_s28, %s12934_s29  ;;  %p12940_p13 = scmp.lt.s32.totalorder %s12934_s29, %s12934_s29 }
 0x155   :  { %p12941_p0 = por %p12940_p13, %p12939_p12 }
 0x157   :  { %p12942_p1 = pnand %p12941_p0, %p12935_p11 }
 0x159   :  { %12945 = shalt.err (!%p12942_p1)
}
 0x15a   :  { %174 = dma.hbm_to_vmem [thread:$0]  %s16418_s12, 512, %s169_s28, [#allocation19], %s17185_s10, %s17185_s10, %s17184_s4  }
 0x15b   :  { %s12946_s27 = scalar_lea.hbm %s16420_s14, 512 }
 0x15c   :  { %p12947_p2 = scmp.ne.s32.totalorder %s16420_s14, %s12946_s27  ;;  %p12950_p3 = scmp.lt.u32.totalorder %s12946_s27, %s16420_s14 }
 0x15e   :  { %p12952_p4 = pnand %p12950_p3, %p12947_p2 }
 0x160   :  { %12955 = shalt.err (!%p12952_p4)
}
 0x161   :  { %s12956_s9 = scalar_lea.vmem %s191_s30, 512  ;;  %p12961_p6 = scmp.lt.s32.totalorder %s191_s30, %s191_s30 }
 0x162   :  { %p12957_p5 = scmp.ne.s32.totalorder %s191_s30, %s12956_s9  ;;  %p12962_p7 = scmp.lt.s32.totalorder %s12956_s9, %s12956_s9 }
 0x164   :  { %p12963_p8 = por %p12962_p7, %p12961_p6 }
 0x166   :  { %p12964_p9 = pnand %p12963_p8, %p12957_p5 }
 0x168   :  { %12967 = shalt.err (!%p12964_p9)
}
 0x169   :  { %196 = dma.hbm_to_vmem [thread:$0]  %s16420_s14, 512, %s191_s30, [#allocation22], %s17185_s10, %s17185_s10, %s17184_s4  }
 0x16a   :  { %s13171_s0 = smov [#allocation26]   ;;  %s12968_s25 = scalar_lea.hbm %s16422_s16, 6144 }
 0x16b   :  { %s212_s8 = sshll.u32 %s13171_s0, 4  ;;  %p12969_p10 = scmp.ne.s32.totalorder %s16422_s16, %s12968_s25  ;;  %s213_s8 = int_to_ptr.vmem [resolvable:$true] %s212_s8 }
 0x16c   :  { %p12972_p11 = scmp.lt.u32.totalorder %s12968_s25, %s16422_s16 }
 0x16e   :  { %p12974_p12 = pnand %p12972_p11, %p12969_p10 }
 0x170   :  { %12977 = shalt.err (!%p12974_p12)
}
 0x171   :  { %s12978_s6 = scalar_lea.vmem %s213_s8, 6144  ;;  %p12983_p0 = scmp.lt.s32.totalorder %s213_s8, %s213_s8 }
 0x172   :  { %p12979_p13 = scmp.ne.s32.totalorder %s213_s8, %s12978_s6  ;;  %p12984_p1 = scmp.lt.s32.totalorder %s12978_s6, %s12978_s6 }
 0x174   :  { %p12985_p2 = por %p12984_p1, %p12983_p0 }
 0x176   :  { %p12986_p3 = pnand %p12985_p2, %p12979_p13 }
 0x178   :  { %12989 = shalt.err (!%p12986_p3)
}
 0x179   :  { %s13172_s14 = smov 1536   ;;  %s13173_s4 = smov 96  }
 0x17a   :  { %218 = dma.hbm_to_vmem [thread:$0]  %s16422_s16, 6144, %s213_s8, [#allocation25], %s13172_s14, %s13172_s14, %s13173_s4  }
 0x17b   :  { %s13174_s1 = smov [#allocation29]   ;;  %s13175_s11 = smov [#allocation32]  }
 0x17c   :  { %s235_s19 = sshll.u32 %s13174_s1, 4  ;;  %s257_s27 = sshll.u32 %s13175_s11, 4  ;;  %s236_s19 = int_to_ptr.vmem [resolvable:$true] %s235_s19  ;;  %s258_s27 = int_to_ptr.vmem [resolvable:$true] %s257_s27 }
 0x17d   :  { %s12990_s5 = scalar_lea.hbm %s16424_s18, 192 }
 0x17e   :  { %p12991_p4 = scmp.ne.s32.totalorder %s16424_s18, %s12990_s5  ;;  %p12994_p5 = scmp.lt.u32.totalorder %s12990_s5, %s16424_s18 }
 0x180   :  { %p12996_p6 = pnand %p12994_p5, %p12991_p4 }
 0x182   :  { %12999 = shalt.err (!%p12996_p6)
}
 0x183   :  { %s13000_s16 = scalar_lea.vmem %s236_s19, 192  ;;  %p13005_p8 = scmp.lt.s32.totalorder %s236_s19, %s236_s19 }
 0x184   :  { %p13001_p7 = scmp.ne.s32.totalorder %s236_s19, %s13000_s16  ;;  %p13006_p9 = scmp.lt.s32.totalorder %s13000_s16, %s13000_s16 }
 0x186   :  { %p13007_p10 = por %p13006_p9, %p13005_p8 }
 0x188   :  { %p13008_p11 = pnand %p13007_p10, %p13001_p7 }
 0x18a   :  { %13011 = shalt.err (!%p13008_p11)
}
 0x18b   :  { %238 = dma.hbm_to_vmem [thread:$0]  %s16424_s18, 192, %s236_s19, [#allocation28]  }
 0x18c   :  { %s13012_s25 = scalar_lea.hbm %s16426_s20, 48 }
 0x18d   :  { %p13013_p12 = scmp.ne.s32.totalorder %s16426_s20, %s13012_s25  ;;  %p13016_p13 = scmp.lt.u32.totalorder %s13012_s25, %s16426_s20 }
 0x18f   :  { %p13018_p0 = pnand %p13016_p13, %p13013_p12 }
 0x191   :  { %13021 = shalt.err (!%p13018_p0)
}
 0x192   :  { %s13022_s6 = scalar_lea.vmem %s258_s27, 48  ;;  %s13026_s14 = scalar_lea.vmem %s258_s27, 64 }
 0x193   :  { %p13023_p1 = scmp.ne.s32.totalorder %s258_s27, %s13022_s6  ;;  %p13027_p2 = scmp.lt.s32.totalorder %s258_s27, %s258_s27 }
 0x194   :  { %p13028_p3 = scmp.lt.s32.totalorder %s13026_s14, %s13022_s6 }
 0x196   :  { %p13029_p4 = por %p13028_p3, %p13027_p2 }
 0x198   :  { %p13030_p5 = pnand %p13029_p4, %p13023_p1 }
 0x19a   :  { %13033 = shalt.err (!%p13030_p5)
}
 0x19b   :  { %260 = dma.hbm_to_vmem [thread:$0]  %s16426_s20, 48, %s258_s27, [#allocation31]  }
 0x19c   :  { %s13176_s10 = smov [#allocation35]   ;;  %s13034_s11 = scalar_lea.hbm %s16428_s22, 16 }
 0x19d   :  { %s279_s30 = sshll.u32 %s13176_s10, 4  ;;  %p13035_p6 = scmp.ne.s32.totalorder %s16428_s22, %s13034_s11  ;;  %s280_s30 = int_to_ptr.vmem [resolvable:$true] %s279_s30 }
 0x19e   :  { %p13038_p7 = scmp.lt.u32.totalorder %s13034_s11, %s16428_s22 }
 0x1a0   :  { %p13040_p8 = pnand %p13038_p7, %p13035_p6 }
 0x1a2   :  { %13043 = shalt.err (!%p13040_p8)
}
 0x1a3   :  { %s13044_s9 = scalar_lea.vmem %s280_s30, 16  ;;  %s13048_s20 = scalar_lea.vmem %s280_s30, 32 }
 0x1a4   :  { %p13045_p9 = scmp.ne.s32.totalorder %s280_s30, %s13044_s9  ;;  %p13049_p10 = scmp.lt.s32.totalorder %s280_s30, %s280_s30 }
 0x1a5   :  { %p13050_p11 = scmp.lt.s32.totalorder %s13048_s20, %s13044_s9 }
 0x1a7   :  { %p13051_p12 = por %p13050_p11, %p13049_p10 }
 0x1a9   :  { %p13052_p13 = pnand %p13051_p12, %p13045_p9 }
 0x1ab   :  { %13055 = shalt.err (!%p13052_p13)
}
 0x1ac   :  { %282 = dma.hbm_to_vmem [thread:$0]  %s16428_s22, 16, %s280_s30, [#allocation34]  }
 0x1ad   :  { %s13056_s0 = scalar_lea.hbm %s16429_s23, 16 }
 0x1ae   :  { %p13057_p0 = scmp.ne.s32.totalorder %s16429_s23, %s13056_s0  ;;  %p13060_p1 = scmp.lt.u32.totalorder %s13056_s0, %s16429_s23 }
 0x1b0   :  { %p13062_p2 = pnand %p13060_p1, %p13057_p0 }
 0x1b2   :  { %13065 = shalt.err (!%p13062_p2)
}
 0x1b3   :  { %s13177_s2 = smov [#allocation36]   ;;  %s13066_s6 = scalar_lea.hbm %s16430_s24, 32 }
 0x1b4   :  { %290 = dma.hbm_to_smem %s16429_s23, 16, %s13177_s2, [#allocation5]  }
 0x1b5   :  { %p13067_p3 = scmp.ne.s32.totalorder %s16430_s24, %s13066_s6  ;;  %p13070_p4 = scmp.lt.u32.totalorder %s13066_s6, %s16430_s24 }
 0x1b7   :  { %p13072_p5 = pnand %p13070_p4, %p13067_p3 }
 0x1b9   :  { %13075 = shalt.err (!%p13072_p5)
}
 0x1ba   :  { %s13178_s30 = smov [#allocation37]  }
 0x1bb   :  { %298 = dma.hbm_to_smem %s16430_s24, 32, %s13178_s30, [#allocation38]  }
 0x1bc   :  { %13120 = dma.done.wait [#allocation3], 256  }
 0x1bd   :  { %13121 = vsyncadd [#allocation3], 4294967040 }
 0x1be   :  { %13122 = dma.done.wait [#allocation7], 640  }
 0x1bf   :  { %13123 = vsyncadd [#allocation7], 4294966656 }
 0x1c0   :  { %13124 = dma.done.wait [#allocation10], 528  }
 0x1c1   :  { %13125 = vsyncadd [#allocation10], 4294966768 }
 0x1c2   :  { %13126 = dma.done.wait [#allocation13], 144  }
 0x1c3   :  { %13127 = vsyncadd [#allocation13], 4294967152 }
 0x1c4   :  { %13128 = dma.done.wait [#allocation16], 528  }
 0x1c5   :  { %13129 = vsyncadd [#allocation16], 4294966768 }
 0x1c6   :  { %13130 = dma.done.wait [#allocation19], 1024  }
 0x1c7   :  { %13131 = vsyncadd [#allocation19], 4294966272 }
 0x1c8   :  { %13132 = dma.done.wait [#allocation22], 528  }
 0x1c9   :  { %13133 = vsyncadd [#allocation22], 4294966768 }
 0x1ca   :  { %13134 = dma.done.wait [#allocation25], 6160  }
 0x1cb   :  { %13135 = vsyncadd [#allocation25], 4294961136 }
 0x1cc   :  { %13136 = dma.done.wait [#allocation28], 576  }
 0x1cd   :  { %13137 = vsyncadd [#allocation28], 4294966720 }
 0x1ce   :  { %13138 = dma.done.wait [#allocation31], 73776  }
 0x1cf   :  { %13139 = vsyncadd [#allocation31], 4294893520 }
 0x1d0   :  { %13140 = dma.done.wait [#allocation34], 6160  }
 0x1d1   :  { %13141 = vsyncadd [#allocation34], 4294961136 }
 0x1d2   :  { %13142 = dma.done.wait [#allocation5], 16  }
 0x1d3   :  { %13143 = vsyncadd [#allocation5], 4294967280 }
 0x1d4   :  { %13144 = dma.done.wait [#allocation38], 32  }
 0x1d5   :  { %13145 = vsyncadd [#allocation38], 4294967264 }
 0x1d6   :  { %368 = sfence }
 0x1d7   :  { %v385_v0 = vld [vmem:[#allocation12] sm:$0xff]  ;;  %s17191_s11 = sld [smem:[#allocation425_spill]]  ;;  %vm1109_vm0 = vcmask 64512   ;;  %v16452_v2 = vmov 0.0   ;;  %vm13180_vm1 = vmmov 0   ;;  %vm1238_vm2 = vcmask 1043456  }
 0x1d8   :  { %12470 = vmatprep.subr.mxu1 %v16452_v2  ;;  %9732 = vmatprep.mubr.msk.f32.mxu1 %vm13180_vm1, %v16452_v2  ;;  %v13644_v3 = vld [vmem:[#allocation2] sm:$0xff]  ;;  %v13646_v4 = vld [vmem:[#allocation2 + $0x8] sm:$0xf]  ;;  %vm13181_vm3 = vmmov 1   ;;  %v16450_v7 = vmov 0.0|0.0   ;;  %s17194_s9 = sld [smem:[#allocation427_spill]] }
 0x1d9   :  { %12471 = vmatpush3.msra.mxu1 %v385_v0  ;;  %v10259_v5 = vpack.c.bf16 %v13646_v4, %v13644_v3  ;;  %vm13650_vm4 = vmpackc.low %vm1238_vm2, %vm13181_vm3  ;;  %9724 = vmatprep.subr.mxu0 %v16452_v2  ;;  %v381_v9 = vld [vmem:[#allocation11] sm:$0xff]  ;;  %v382_v10 = vld [vmem:[#allocation11 + $0x8] sm:$0xff]  ;;  %vm1228_vm5 = vcmask 97280   ;;  %vm1322_vm6 = vcmask 261120   ;;  %vm1415_vm7 = vcmask 195584   ;;  %s8638_s8 = sld [smem:[#allocation36 + $0x1]] }
 0x1da   :  { %10258 = vmatprep.subr.bf16.mxu1 %v16450_v7  ;;  %v13667_v12 = vpack.c.bf16 %v382_v10, %v381_v9  ;;  %9725 = vmatpush3.msra.mxu0 %v385_v0  ;;  %v383_v16 = vld [vmem:[#allocation11 + $0x10] sm:$0xff]  ;;  %v384_v17 = vld [vmem:[#allocation11 + $0x18] sm:$0xff]  ;;  %v389_v35 = vld [vmem:[#allocation15 + $0x18] sm:$0xff]  ;;  %vm1865_vm8 = vcmask 257024   ;;  %s1199_s7 = sld [smem:[#allocation36]]  ;;  %vm3706_vm14 = vcmask 1040384  }
 0x1db   :  { %9726 = vmatprep.mubr.msk.f32.mxu0 %vm13180_vm1, %v16452_v2  ;;  %10262 = vmatprep.subr.bf16.mxu0 %v16450_v7  ;;  %v13699_v18 = vpack.c.bf16 %v384_v17, %v383_v16  ;;  %v386_v31 = vld [vmem:[#allocation15] sm:$0xff]  ;;  %v387_v32 = vld [vmem:[#allocation15 + $0x8] sm:$0xff]  ;;  %v388_v33 = vld [vmem:[#allocation15 + $0x10] sm:$0xff]  ;;  %s13183_s30 = smov [#allocation39]  }
 0x1dc   :  { %17195 = vst [vmem:[#allocation57_spill] sm:$0xff] %v13667_v12  ;;  %v13712_v34 = vpack.c.bf16 %v387_v32, %v386_v31  ;;  %v13715_v36 = vpack.c.bf16 %v389_v35, %v388_v33  ;;  %v8631_v37 = vld [vmem:[#allocation14] ss:$0 sm:$0xff]  ;;  %v369_v54 = vld [vmem:[#allocation6] sm:$0xff]  ;;  %v370_v55 = vld [vmem:[#allocation6 + $0x8] sm:$0xff]  ;;  %s8596_s1 = sshll.u32 %s13183_s30, 4  ;;  %s8597_s1 = int_to_ptr.vmem [resolvable:$true] %s8596_s1 }
 0x1dd   :  { %v380_v1 = vld [vmem:[%s17191_s11 + $0x10] sm:$0xff]  ;;  %v378_v8 = vld [vmem:[%s17191_s11] sm:$0xff]  ;;  %v379_v13 = vld [vmem:[%s17191_s11 + $0x8] sm:$0xff]  ;;  %17196 = vst [vmem:[#allocation58_spill] sm:$0xff] %v13699_v18  ;;  %s13076_s19 = scalar_lea.vmem %s8597_s1, 64  ;;  %p13081_p7 = scmp.lt.s32.totalorder %s8597_s1, %s8597_s1 }
 0x1de   :  { %9733 = vmatmul.mubr.msk.f32.vlgmr.msra.gmra.mrb[0].mxu1 %vm1109_vm0, %v380_v1  ;;  %v372_v11 = vld [vmem:[%s17194_s9] sm:$0xff]  ;;  %9727 = vmatmul.mubr.msk.f32.vlgmr.msra.gmra.mrb[0].mxu0 %vm1109_vm0, %v378_v8  ;;  %v373_v14 = vld [vmem:[%s17194_s9 + $0x8] sm:$0xff]  ;;  %v374_v15 = vld [vmem:[%s17194_s9 + $0x10] sm:$0xff]  ;;  %p13077_p6 = scmp.ne.s32.totalorder %s8597_s1, %s13076_s19  ;;  %p13082_p8 = scmp.lt.s32.totalorder %s13076_s19, %s13076_s19 }
 0x1df   :  { %10261 = vmatpush3.bf16.msk.msra.mxu1 %vm13650_vm4, %v10259_v5  ;;  %9739 = vmatprep.mubr.msk.f32.mxu1 %vm13180_vm1, %v16452_v2  ;;  %v371_v56 = vld [vmem:[#allocation6 + $0x10] sm:$0xff] }
 0x1e0   :  { %10264 = vmatpush3.bf16.msra.mxu0 %v13667_v12  ;;  %9729 = vmatprep.mubr.msk.f32.mxu0 %vm13180_vm1, %v16452_v2  ;;  %v8632_v5 = vld [vmem:[#allocation17] ss:$0 sm:$0xff]  ;;  %p13083_p9 = por %p13082_p8, %p13081_p7 }
 0x1e1   :  { %10265 = vmatprep.subr.bf16.mxu0 %v16450_v7  ;;  %10268 = vmatprep.subr.bf16.mxu1 %v16450_v7 }
 0x1e2   :  { %9740 = vmatmul.mubr.msk.f32.vlgmr.msra.gmra.mrb[2].mxu1 %vm1228_vm5, %v372_v11  ;;  %9730 = vmatmul.mubr.msk.f32.gmra.mrb[2].mxu0 %vm1109_vm0, %v379_v13  ;;  %p13084_p10 = pnand %p13083_p9, %p13077_p6 }
 0x1e3   :  { %9742 = vmatprep.mubr.msk.f32.mxu1 %vm13180_vm1, %v16452_v2  ;;  %9756 = vmatprep.mubr.msk.f32.mxu0 %vm13180_vm1, %v16452_v2 }
 0x1e4   :  { %10267 = vmatpush3.bf16.msra.mxu0 %v13699_v18 }
 0x1e5   :  { %10271 = vmatprep.subr.bf16.mxu0 %v16450_v7 }
 0x1e6   :  { %9743 = vmatmul.mubr.msk.f32.gmra.mrb[4].mxu1 %vm1228_vm5, %v373_v14 }
 0x1e7   :  { %9745 = vmatprep.mubr.msk.f32.mxu1 %vm13180_vm1, %v16452_v2 }
 0x1ea   :  { %9746 = vmatmul.mubr.msk.f32.gmra.mrb[6].mxu1 %vm1228_vm5, %v374_v15 }
 0x1eb   :  { %9771 = vmatprep.mubr.msk.f32.mxu1 %vm13180_vm1, %v16452_v2 }
 0x2b1   :  { %v1195_v19 = vpop.f32.mrb[0].mxu1  ;;  %v1185_v21 = vpop.f32.mrb[0].mxu0 }
 0x2b2   :  { %v9734_v20 = vpop.f32.mrb[1].mxu1  ;;  %v9728_v23 = vpop.f32.mrb[1].mxu0  ;;  %v13720_v39 = vadd.f32 %v8631_v37, %v1185_v21  ;;  %v13730_v46 = vadd.f32 %v8631_v37, %v1195_v19 }
 0x2b4   :  { %17197 = vst [vmem:[#allocation59_spill] sm:$0xff] %v13720_v39  ;;  %17199 = vst [vmem:[#allocation61_spill] sm:$0xff] %v13730_v46 }
 0x2b5   :  { %v1308_v22 = vpop.f32.mrb[2].mxu1  ;;  %v1190_v25 = vpop.f32.mrb[2].mxu0 }
 0x2b6   :  { %v9741_v24 = vpop.f32.mrb[3].mxu1  ;;  %9757 = vmatmul.mubr.msk.f32.vlgmr.msra.gmra.mrb[4].mxu0 %vm1322_vm6, %v1308_v22  ;;  %v9731_v27 = vpop.f32.mrb[3].mxu0  ;;  %v13722_v41 = vadd.f32 %v8631_v37, %v1190_v25 }
 0x2b7   :  { %9759 = vmatprep.mubr.msk.f32.mxu0 %vm13180_vm1, %v16452_v2  ;;  %10273 = vmatpush3.bf16.msra.mxu0 %v13712_v34 }
 0x2b8   :  { %10274 = vmatprep.subr.bf16.mxu0 %v16450_v7  ;;  %17198 = vst [vmem:[#allocation60_spill] sm:$0xff] %v13722_v41 }
 0x2b9   :  { %v1313_v26 = vpop.f32.mrb[4].mxu1 }
 0x2ba   :  { %v9744_v28 = vpop.f32.mrb[5].mxu1  ;;  %9760 = vmatmul.mubr.msk.f32.gmra.mrb[6].mxu0 %vm1322_vm6, %v1313_v26 }
 0x2bb   :  { %9762 = vmatprep.mubr.msk.f32.mxu0 %vm13180_vm1, %v16452_v2  ;;  %10276 = vmatpush3.bf16.msra.mxu0 %v13715_v36 }
 0x2bc   :  { %10280 = vmatprep.subr.bf16.mxu0 %v16450_v7 }
 0x2bd   :  { %v1318_v29 = vpop.f32.mrb[6].mxu1 }
 0x2be   :  { %9763 = vmatmul.mubr.msk.f32.gmra.mrb[8].mxu0 %vm1322_vm6, %v1318_v29  ;;  %v9747_v30 = vpop.f32.mrb[7].mxu1  ;;  %v375_v29 = vld [vmem:[#allocation8] sm:$0xff] }
 0x2bf   :  { %9788 = vmatprep.mubr.msk.f32.mxu0 %vm13180_vm1, %v16452_v2 }
 0x389   :  { %v1398_v38 = vpop.f32.mrb[4].mxu0 }
 0x38a   :  { %v9758_v40 = vpop.f32.mrb[5].mxu0  ;;  %v13725_v42 = vadd.f32 %v1398_v38, %v13720_v39 }
 0x38c   :  { %v1412_v47 = vmax.f32 %v13725_v42, 0.0 }
 0x38d   :  { %v1403_v43 = vpop.f32.mrb[6].mxu0 }
 0x38e   :  { %v13728_v44 = vadd.f32 %v1403_v43, %v13722_v41  ;;  %v9761_v45 = vpop.f32.mrb[7].mxu0 }
 0x390   :  { %v1413_v48 = vmax.f32 %v13728_v44, 0.0 }
 0x391   :  { %v1408_v49 = vpop.f32.mrb[8].mxu0 }
 0x392   :  { %v10269_v50 = vpack.c.bf16 %v1413_v48, %v1412_v47  ;;  %v13735_v51 = vadd.f32 %v1408_v49, %v13730_v46  ;;  %v9764_v52 = vpop.f32.mrb[9].mxu0 }
 0x394   :  { %10270 = vmatpush3.bf16.msra.mxu1 %v10269_v50  ;;  %v1414_v53 = vmax.f32 %v13735_v51, 0.0 }
 0x395   :  { %9769 = vmatprep.subr.mxu1 %v16452_v2 }
 0x398   :  { %9770 = vmatpush3.msra.mxu1 %v1414_v53 }
 0x399   :  { %9772 = vmatmul.mubr.msk.f32.vlgmr.msra.gmra.mrb[8].mxu1 %vm1415_vm7, %v369_v54  ;;  %10277 = vmatprep.subr.bf16.mxu1 %v16450_v7 }
 0x39a   :  { %9774 = vmatprep.mubr.msk.f32.mxu1 %vm13180_vm1, %v16452_v2 }
 0x39d   :  { %9775 = vmatmul.mubr.msk.f32.gmra.mrb[10].mxu1 %vm1415_vm7, %v370_v55 }
 0x39e   :  { %9777 = vmatprep.mubr.msk.f32.mxu1 %vm13180_vm1, %v16452_v2 }
 0x3a1   :  { %9778 = vmatmul.mubr.msk.f32.gmra.mrb[12].mxu1 %vm1415_vm7, %v371_v56 }
 0x3a2   :  { %9803 = vmatprep.mubr.msk.f32.mxu1 %vm13180_vm1, %v16452_v2 }
 0x46c   :  { %v1491_v57 = vpop.f32.mrb[8].mxu1 }
 0x46d   :  { %v9773_v58 = vpop.f32.mrb[9].mxu1  ;;  %9789 = vmatmul.mubr.msk.f32.vlgmr.msra.gmra.mrb[10].mxu0 %vm1322_vm6, %v1491_v57 }
 0x46e   :  { %9791 = vmatprep.mubr.msk.f32.mxu0 %vm13180_vm1, %v16452_v2  ;;  %10282 = vmatpush3.bf16.msra.mxu0 %v13712_v34 }
 0x46f   :  { %10283 = vmatprep.subr.bf16.mxu0 %v16450_v7 }
 0x470   :  { %v1496_v59 = vpop.f32.mrb[10].mxu1 }
 0x471   :  { %v9776_v60 = vpop.f32.mrb[11].mxu1  ;;  %9792 = vmatmul.mubr.msk.f32.gmra.mrb[12].mxu0 %vm1322_vm6, %v1496_v59  ;;  %v396_v59 = vld [vmem:[#allocation20 + $0x10] sm:$0xff] }
 0x472   :  { %9794 = vmatprep.mubr.msk.f32.mxu0 %vm13180_vm1, %v16452_v2  ;;  %10285 = vmatpush3.bf16.msra.mxu0 %v13715_v36  ;;  %v397_v60 = vld [vmem:[#allocation20 + $0x18] sm:$0xff] }
 0x474   :  { %v1501_v61 = vpop.f32.mrb[12].mxu1 }
 0x475   :  { %9795 = vmatmul.mubr.msk.f32.gmra.mrb[14].mxu0 %vm1322_vm6, %v1501_v61  ;;  %v9779_v62 = vpop.f32.mrb[13].mxu1  ;;  %v13793_v61 = vpack.c.bf16 %v397_v60, %v396_v59  ;;  %v418_v59 = vld [vmem:[#allocation26 + $0x80] sm:$0xff]  ;;  %v408_v60 = vld [vmem:[#allocation26 + $0x30] sm:$0xff] }
 0x476   :  { %9820 = vmatprep.mubr.msk.f32.mxu0 %vm13180_vm1, %v16452_v2  ;;  %v390_v62 = vld [vmem:[#allocation18] sm:$0xff] }
 0x540   :  { %v1580_v63 = vpop.f32.mrb[10].mxu0 }
 0x541   :  { %v1594_v0 = vadd.f32 %v1580_v63, %v13725_v42  ;;  %v9790_v1 = vpop.f32.mrb[11].mxu0  ;;  %v391_v63 = vld [vmem:[#allocation18 + $0x8] sm:$0xff] }
 0x543   :  { %v1597_v9 = vadd.f32 %v8632_v5, %v1594_v0  ;;  %v13797_v0 = vpack.c.bf16 %v391_v63, %v390_v62  ;;  %v420_v62 = vld [vmem:[#allocation26 + $0x90] sm:$0xff]  ;;  %v431_v63 = vld [vmem:[#allocation26 + $0xe8] sm:$0xff] }
 0x544   :  { %v1585_v8 = vpop.f32.mrb[12].mxu0 }
 0x545   :  { %v1595_v10 = vadd.f32 %v1585_v8, %v13728_v44  ;;  %v9793_v11 = vpop.f32.mrb[13].mxu0  ;;  %v1600_v15 = vmax.f32 %v1597_v9, 0.0  ;;  %v392_v8 = vld [vmem:[#allocation18 + $0x10] sm:$0xff]  ;;  %v393_v9 = vld [vmem:[#allocation18 + $0x18] sm:$0xff] }
 0x546   :  { %v13802_v11 = vpack.c.bf16 %v393_v9, %v392_v8  ;;  %v445_v8 = vld [vmem:[#allocation26 + $0x158] sm:$0xff] }
 0x547   :  { %v1598_v13 = vadd.f32 %v8632_v5, %v1595_v10 }
 0x548   :  { %v1590_v14 = vpop.f32.mrb[14].mxu0 }
 0x549   :  { %v1601_v16 = vmax.f32 %v1598_v13, 0.0  ;;  %v1596_v17 = vadd.f32 %v1590_v14, %v13735_v51  ;;  %v9796_v19 = vpop.f32.mrb[15].mxu0  ;;  %v405_v14 = vld [vmem:[#allocation26 + $0x18] sm:$0xff] }
 0x54a   :  { %v416_v19 = vld [vmem:[#allocation26 + $0x70] sm:$0xff] }
 0x54b   :  { %v10278_v20 = vpack.c.bf16 %v1601_v16, %v1600_v15  ;;  %v1599_v21 = vadd.f32 %v8632_v5, %v1596_v17  ;;  %v417_v15 = vld [vmem:[#allocation26 + $0x78] sm:$0xff]  ;;  %v404_v17 = vld [vmem:[#allocation26 + $0x10] sm:$0xff] }
 0x54c   :  { %v13814_v16 = vpack.c.bf16 %v417_v15, %v405_v14  ;;  %v442_v14 = vld [vmem:[#allocation26 + $0x140] sm:$0xff] }
 0x54d   :  { %10279 = vmatpush3.bf16.msra.mxu1 %v10278_v20  ;;  %v1602_v22 = vmax.f32 %v1599_v21, 0.0  ;;  %v13816_v20 = vpack.c.bf16 %v416_v19, %v404_v17  ;;  %v429_v21 = vld [vmem:[#allocation26 + $0xd8] sm:$0xff]  ;;  %v432_v19 = vld [vmem:[#allocation26 + $0xf0] sm:$0xff] }
 0x54e   :  { %9801 = vmatprep.subr.mxu1 %v16452_v2  ;;  %17200 = vst [vmem:[#allocation62_spill] sm:$0xff] %v13814_v16 }
 0x54f   :  { %17201 = vst [vmem:[#allocation63_spill] sm:$0xff] %v13816_v20 }
 0x551   :  { %9802 = vmatpush3.msra.mxu1 %v1602_v22  ;;  %v441_v22 = vld [vmem:[#allocation26 + $0x138] sm:$0xff] }
 0x552   :  { %9804 = vmatmul.mubr.msk.f32.vlgmr.msra.gmra.mrb[14].mxu1 %vm1415_vm7, %v369_v54  ;;  %v395_v54 = vld [vmem:[#allocation20 + $0x8] sm:$0xff] }
 0x553   :  { %9806 = vmatprep.mubr.msk.f32.mxu1 %vm13180_vm1, %v16452_v2 }
 0x556   :  { %9807 = vmatmul.mubr.msk.f32.gmra.mrb[16].mxu1 %vm1415_vm7, %v370_v55 }
 0x557   :  { %9809 = vmatprep.mubr.msk.f32.mxu1 %vm13180_vm1, %v16452_v2 }
 0x55a   :  { %9810 = vmatmul.mubr.msk.f32.gmra.mrb[18].mxu1 %vm1415_vm7, %v371_v56 }
 0x625   :  { %v1669_v23 = vpop.f32.mrb[14].mxu1 }
 0x626   :  { %v9805_v24 = vpop.f32.mrb[15].mxu1  ;;  %9821 = vmatmul.mubr.msk.f32.vlgmr.msra.gmra.mrb[16].mxu0 %vm1322_vm6, %v1669_v23  ;;  %v428_v23 = vld [vmem:[#allocation26 + $0xd0] sm:$0xff] }
 0x627   :  { %9823 = vmatprep.mubr.msk.f32.mxu0 %vm13180_vm1, %v16452_v2 }
 0x629   :  { %v1674_v25 = vpop.f32.mrb[16].mxu1 }
 0x62a   :  { %v9808_v26 = vpop.f32.mrb[17].mxu1  ;;  %9824 = vmatmul.mubr.msk.f32.gmra.mrb[18].mxu0 %vm1322_vm6, %v1674_v25  ;;  %v8633_v25 = vld [vmem:[#allocation21] ss:$0 sm:$0xff] }
 0x62b   :  { %9826 = vmatprep.mubr.msk.f32.mxu0 %vm13180_vm1, %v16452_v2 }
 0x62d   :  { %v1679_v27 = vpop.f32.mrb[18].mxu1 }
 0x62e   :  { %9827 = vmatmul.mubr.msk.f32.gmra.mrb[20].mxu0 %vm1322_vm6, %v1679_v27  ;;  %v9811_v28 = vpop.f32.mrb[19].mxu1 }
 0x62f   :  { %9835 = vmatprep.mubr.msk.f32.mxu0 %vm1415_vm7, %v375_v29 }
 0x6f9   :  { %v1758_v30 = vpop.f32.mrb[16].mxu0 }
 0x6fa   :  { %v1772_v31 = vadd.f32 %v1758_v30, %v13725_v42  ;;  %v9822_v32 = vpop.f32.mrb[17].mxu0  ;;  %v376_v42 = vld [vmem:[#allocation8 + $0x8] sm:$0xf] }
 0x6fb   :  { %v403_v30 = vld [vmem:[#allocation26 + $0x8] sm:$0xff] }
 0x6fc   :  { %v1775_v35 = vadd.f32 %v8632_v5, %v1772_v31  ;;  %v415_v31 = vld [vmem:[#allocation26 + $0x68] sm:$0xff] }
 0x6fd   :  { %v1763_v33 = vpop.f32.mrb[18].mxu0 }
 0x6fe   :  { %v1773_v37 = vadd.f32 %v1763_v33, %v13728_v44  ;;  %v9825_v38 = vpop.f32.mrb[19].mxu0  ;;  %v1778_v45 = vmax.f32 %v1775_v35, 0.0  ;;  %v394_v44 = vld [vmem:[#allocation20] sm:$0xff]  ;;  %v13830_v35 = vpack.c.bf16 %v415_v31, %v403_v30 }
 0x6ff   :  { %v13787_v55 = vpack.c.bf16 %v395_v54, %v394_v44  ;;  %v414_v38 = vld [vmem:[#allocation26 + $0x60] sm:$0xff]  ;;  %v419_v44 = vld [vmem:[#allocation26 + $0x88] sm:$0xff]  ;;  %v409_v54 = vld [vmem:[#allocation26 + $0x38] sm:$0xff] }
 0x700   :  { %v1776_v40 = vadd.f32 %v8632_v5, %v1773_v37  ;;  %17204 = vst [vmem:[#allocation66_spill] sm:$0xff] %v13830_v35  ;;  %v402_v37 = vld [vmem:[#allocation26] sm:$0xff] }
 0x701   :  { %v1768_v43 = vpop.f32.mrb[20].mxu0  ;;  %10291 = vmatprep.subr.bf16.mxu1 %v13787_v55  ;;  %v410_v30 = vld [vmem:[#allocation26 + $0x40] sm:$0xff] }
 0x702   :  { %v1779_v47 = vmax.f32 %v1776_v40, 0.0  ;;  %v1774_v48 = vadd.f32 %v1768_v43, %v13735_v51  ;;  %v9828_v49 = vpop.f32.mrb[21].mxu0  ;;  %10293 = vmatpush3.bf16.msra.mxu1 %v13787_v55  ;;  %v427_v43 = vld [vmem:[#allocation26 + $0xc8] sm:$0xff]  ;;  %v422_v31 = vld [vmem:[#allocation26 + $0xa0] sm:$0xff] }
 0x703   :  { %10295 = vmatprep.subr.bf16.mxu1 %v13793_v61 }
 0x704   :  { %v1777_v50 = vadd.f32 %v8632_v5, %v1774_v48  ;;  %v10286_v52 = vpack.c.bf16 %v1779_v47, %v1778_v45  ;;  %v439_v45 = vld [vmem:[#allocation26 + $0x128] sm:$0xff]  ;;  %v13836_v48 = vpack.c.bf16 %v414_v38, %v402_v37 }
 0x705   :  { %v377_v47 = vld [vmem:[#allocation9] sm:$0x1]  ;;  %v13839_v49 = vpack.c.bf16 %v439_v45, %v427_v43  ;;  %v424_v43 = vld [vmem:[#allocation26 + $0xb0] sm:$0xff] }
 0x706   :  { %v1780_v53 = vmax.f32 %v1777_v50, 0.0  ;;  %10287 = vmatprep.subr.bf16.mxu0 %v10286_v52  ;;  %10297 = vmatpush3.bf16.msra.mxu1 %v13793_v61  ;;  %17205 = vst [vmem:[#allocation67_spill] sm:$0xff] %v13836_v48  ;;  %v426_v50 = vld [vmem:[#allocation26 + $0xc0] sm:$0xff]  ;;  %v435_v45 = vld [vmem:[#allocation26 + $0x108] sm:$0xff] }
 0x707   :  { %10289 = vmatpush3.bf16.msra.mxu0 %v10286_v52  ;;  %10299 = vmatprep.subr.bf16.mxu1 %v13797_v0  ;;  %17206 = vst [vmem:[#allocation68_spill] sm:$0xff] %v13839_v49  ;;  %v438_v52 = vld [vmem:[#allocation26 + $0x120] sm:$0xff] }
 0x708   :  { %9833 = vmatprep.subr.mxu0 %v1780_v53 }
 0x70b   :  { %9834 = vmatpush3.msra.mxu0 %v1780_v53  ;;  %v13843_v53 = vpack.c.bf16 %v438_v52, %v426_v50  ;;  %v437_v50 = vld [vmem:[#allocation26 + $0x118] sm:$0xff] }
 0x70c   :  { %9836 = vmatmul.mubr.msk.f32.vlgmr.msra.gmra.mrb[22].mxu0 %vm1415_vm7, %v376_v42  ;;  %10306 = vmatprep.subr.bf16.mxu0 %v16450_v7  ;;  %v407_v42 = vld [vmem:[#allocation26 + $0x28] sm:$0xff]  ;;  %v449_v52 = vld [vmem:[#allocation26 + $0x178] sm:$0xff] }
 0x70d   :  { %9864 = vmatprep.mubr.msk.f32.mxu0 %vm13180_vm1, %v16452_v2  ;;  %17207 = vst [vmem:[#allocation69_spill] sm:$0xff] %v13843_v53  ;;  %v570_v7 = vld [vmem:[#allocation30 + $0x398] sm:$0xff] }
 0x7df   :  { %v9837_v51 = vpop.f32.mrb[22].mxu0 }
 0x7e0   :  { %v1853_v56 = vpop.f32.mrb[23].mxu0  ;;  %v1866_v58 = vsel %vm1865_vm8, %v9837_v51, 0.0 }
 0x7e1   :  { %v1862_v57 = vsel %vm1322_vm6, %v1853_v56, 0.0 }
 0x7e2   :  { %1863 = vadd.xlane.f32.xlu0 %v1862_v57 }
 0x7e6   :  { %1867 = vadd.xlane.f32.xlu0 %v1866_v58  ;;  %v406_v58 = vld [vmem:[#allocation26 + $0x20] sm:$0xff] }
 0x7e7   :  { %v13854_v9 = vpack.c.bf16 %v418_v59, %v406_v58  ;;  %v13892_v59 = vpack.c.bf16 %v449_v52, %v437_v50  ;;  %v464_v50 = vld [vmem:[#allocation30 + $0x48] sm:$0xff] }
 0x7e9   :  { %17210 = vst [vmem:[#allocation72_spill] sm:$0xff] %v13854_v9  ;;  %17221 = vst [vmem:[#allocation83_spill] sm:$0xff] %v13892_v59 }
 0x86f   :  { %v1864_v1 = vpop.xlane.xlu0 %1863 }
 0x870   :  { %vm1869_vm9 = vcmp.eq.f32.partialorder %v1864_v1, 0.0  ;;  %v443_v1 = vld [vmem:[#allocation26 + $0x148] sm:$0xff] }
 0x871   :  { %v1875_v5 = vsel %vm1869_vm9, %v13644_v3, %v1853_v56  ;;  %v421_v56 = vld [vmem:[#allocation26 + $0x98] sm:$0xff]  ;;  %v13858_v15 = vpack.c.bf16 %v443_v1, %v431_v63  ;;  %v456_v63 = vld [vmem:[#allocation30 + $0x8] sm:$0xff]  ;;  %v459_v1 = vld [vmem:[#allocation30 + $0x20] sm:$0xff] }
 0x872   :  { %9846 = vmatprep.mubr.msk.f32.mxu1 %vm1322_vm6, %v1875_v5  ;;  %v13850_v57 = vpack.c.bf16 %v421_v56, %v409_v54  ;;  %v433_v5 = vld [vmem:[#allocation26 + $0xf8] sm:$0xff]  ;;  %v434_v54 = vld [vmem:[#allocation26 + $0x100] sm:$0xff] }
 0x873   :  { %v1868_v10 = vpop.xlane.xlu0 %1867  ;;  %17212 = vst [vmem:[#allocation74_spill] sm:$0xff] %v13858_v15  ;;  %v13860_v17 = vpack.c.bf16 %v445_v8, %v433_v5  ;;  %v446_v56 = vld [vmem:[#allocation26 + $0x160] sm:$0xff]  ;;  %v552_v5 = vld [vmem:[#allocation30 + $0x308] sm:$0xff] }
 0x874   :  { %vm1870_vm10 = vcmp.eq.f32.partialorder %v1868_v10, 0.0  ;;  %17209 = vst [vmem:[#allocation71_spill] sm:$0xff] %v13850_v57  ;;  %v13856_v10 = vpack.c.bf16 %v420_v62, %v408_v60  ;;  %v436_v60 = vld [vmem:[#allocation26 + $0x110] sm:$0xff]  ;;  %v555_v8 = vld [vmem:[#allocation30 + $0x320] sm:$0xff] }
 0x875   :  { %v1876_v13 = vsel %vm1870_vm10, %v13646_v4, %v9837_v51  ;;  %v13848_v51 = vpack.c.bf16 %v419_v44, %v407_v42  ;;  %17213 = vst [vmem:[#allocation75_spill] sm:$0xff] %v13860_v17  ;;  %v13884_v42 = vpack.c.bf16 %v422_v31, %v410_v30  ;;  %v448_v62 = vld [vmem:[#allocation26 + $0x170] sm:$0xff]  ;;  %v558_v31 = vld [vmem:[#allocation30 + $0x338] sm:$0xff] }
 0x876   :  { %9847 = vmatmul.mubr.msk.f32.vlgmr.msra.gmra.mrb[20].mxu1 %vm1322_vm6, %v1876_v13  ;;  %17211 = vst [vmem:[#allocation73_spill] sm:$0xff] %v13856_v10  ;;  %v430_v13 = vld [vmem:[#allocation26 + $0xe0] sm:$0xff]  ;;  %v465_v30 = vld [vmem:[#allocation30 + $0x50] sm:$0xff] }
 0x877   :  { %10301 = vmatpush3.bf16.msra.mxu1 %v13797_v0  ;;  %9857 = vmatprep.mubr.msk.f32.mxu1 %vm1322_vm6, %v13644_v3  ;;  %v13819_v3 = vpack.c.bf16 %v441_v22, %v429_v21  ;;  %17208 = vst [vmem:[#allocation70_spill] sm:$0xff] %v13848_v51  ;;  %v444_v21 = vld [vmem:[#allocation26 + $0x150] sm:$0xff]  ;;  %v411_v22 = vld [vmem:[#allocation26 + $0x48] sm:$0xff]  ;;  %17218 = vst [vmem:[#allocation80_spill] sm:$0xff] %v13884_v42 }
 0x878   :  { %10303 = vmatprep.subr.bf16.mxu1 %v13802_v11 }
 0x879   :  { %17202 = vst [vmem:[#allocation64_spill] sm:$0xff] %v13819_v3 }
 0x87b   :  { %10305 = vmatpush3.bf16.msra.mxu1 %v13802_v11 }
 0x87c   :  { %10319 = vmatprep.subr.bf16.mxu1 %v13814_v16  ;;  %v662_v16 = vld [vmem:[#allocation30 + $0x678] sm:$0xff] }
 0x87e   :  { %9858 = vmatmul.mubr.msk.f32.vlgmr.msra.gmra.mrb[20].mxu1 %vm1322_vm6, %v13646_v4  ;;  %v440_v4 = vld [vmem:[#allocation26 + $0x130] sm:$0xff] }
 0x87f   :  { %2319 = vmatprep.mubr.f32.mxu1 %v16452_v2  ;;  %10321 = vmatpush1.bf16.msra.mxu1 %v13816_v20  ;;  %v13823_v24 = vpack.c.bf16 %v440_v4, %v428_v23  ;;  %v423_v4 = vld [vmem:[#allocation26 + $0xa8] sm:$0xff] }
 0x880   :  { %10323 = vmatprep.subr.bf16.mxu1 %v13819_v3  ;;  %v13876_v37 = vpack.c.bf16 %v423_v4, %v411_v22  ;;  %v13906_v22 = vpack.c.bf16 %v459_v1, %v456_v63  ;;  %v13908_v4 = vpack.c.bf16 %v555_v8, %v552_v5  ;;  %v471_v63 = vld [vmem:[#allocation30 + $0x80] sm:$0xff]  ;;  %v564_v1 = vld [vmem:[#allocation30 + $0x368] sm:$0xff] }
 0x881   :  { %17203 = vst [vmem:[#allocation65_spill] sm:$0xff] %v13823_v24  ;;  %v567_v5 = vld [vmem:[#allocation30 + $0x380] sm:$0xff]  ;;  %v660_v3 = vld [vmem:[#allocation30 + $0x668] sm:$0xff] }
 0x882   :  { %17216 = vst [vmem:[#allocation78_spill] sm:$0xff] %v13876_v37  ;;  %17224 = vst [vmem:[#allocation86_spill] sm:$0xff] %v13906_v22 }
 0x883   :  { %10325 = vmatpush1.bf16.msra.mxu1 %v13823_v24  ;;  %17225 = vst [vmem:[#allocation87_spill] sm:$0xff] %v13908_v4  ;;  %v463_v24 = vld [vmem:[#allocation30 + $0x40] sm:$0xff] }
 0x884   :  { %10335 = vmatprep.subr.bf16.mxu1 %v13850_v57 }
 0x951   :  { %v9859_v26 = vpop.f32.mrb[20].mxu1 }
 0x952   :  { %v2039_v27 = vadd.f32 %v9859_v26, %v8633_v25  ;;  %v2029_v28 = vpop.f32.mrb[21].mxu1  ;;  %v425_v26 = vld [vmem:[#allocation26 + $0xb8] sm:$0xff] }
 0x953   :  { %v2038_v29 = vadd.f32 %v8633_v25, %v2029_v28  ;;  %v413_v25 = vld [vmem:[#allocation26 + $0x58] sm:$0xff]  ;;  %v13870_v28 = vpack.c.bf16 %v442_v14, %v430_v13  ;;  %v13900_v13 = vpack.c.bf16 %v446_v56, %v434_v54  ;;  %v13902_v14 = vpack.c.bf16 %v448_v62, %v436_v60  ;;  %v560_v60 = vld [vmem:[#allocation30 + $0x348] sm:$0xff] }
 0x954   :  { %v13826_v32 = vmax.f32 %v2039_v27, 0.0  ;;  %v13878_v38 = vpack.c.bf16 %v425_v26, %v413_v25  ;;  %v551_v25 = vld [vmem:[#allocation30 + $0x300] sm:$0xff]  ;;  %v554_v26 = vld [vmem:[#allocation30 + $0x318] sm:$0xff]  ;;  %v557_v56 = vld [vmem:[#allocation30 + $0x330] sm:$0xff] }
 0x955   :  { %v13828_v33 = vmax.f32 %v2038_v29, 0.0  ;;  %17214 = vst [vmem:[#allocation76_spill] sm:$0xff] %v13870_v28  ;;  %v13872_v29 = vpack.c.bf16 %v444_v21, %v432_v19  ;;  %17222 = vst [vmem:[#allocation84_spill] sm:$0xff] %v13900_v13  ;;  %v455_v19 = vld [vmem:[#allocation30] sm:$0xff]  ;;  %v458_v21 = vld [vmem:[#allocation30 + $0x18] sm:$0xff] }
 0x956   :  { %17217 = vst [vmem:[#allocation79_spill] sm:$0xff] %v13878_v38  ;;  %17223 = vst [vmem:[#allocation85_spill] sm:$0xff] %v13902_v14  ;;  %v468_v62 = vld [vmem:[#allocation30 + $0x68] sm:$0xff] }
 0x957   :  { %v10307_v40 = vpack.c.bf16 %v13826_v32, %v13828_v33  ;;  %17215 = vst [vmem:[#allocation77_spill] sm:$0xff] %v13872_v29 }
 0x959   :  { %10309 = vmatpush3.bf16.msk.msra.mxu0 %vm13650_vm4, %v10307_v40  ;;  %v412_v40 = vld [vmem:[#allocation26 + $0x50] sm:$0xff] }
 0x95a   :  { %10311 = vmatprep.subr.bf16.mxu0 %v13830_v35  ;;  %v13886_v44 = vpack.c.bf16 %v424_v43, %v412_v40  ;;  %v561_v40 = vld [vmem:[#allocation30 + $0x350] sm:$0xff]  ;;  %v13914_v43 = vpack.c.bf16 %v458_v21, %v455_v19  ;;  %v13932_v19 = vpack.c.bf16 %v560_v60, %v557_v56  ;;  %v467_v21 = vld [vmem:[#allocation30 + $0x60] sm:$0xff]  ;;  %v476_v60 = vld [vmem:[#allocation30 + $0xa8] sm:$0xff] }
 0x95b   :  { %v13922_v54 = vpack.c.bf16 %v561_v40, %v558_v31  ;;  %v474_v31 = vld [vmem:[#allocation30 + $0x98] sm:$0xff]  ;;  %v477_v40 = vld [vmem:[#allocation30 + $0xb0] sm:$0xff]  ;;  %v535_v35 = vld [vmem:[#allocation30 + $0x280] sm:$0xff] }
 0x95c   :  { %9865 = vmatmul.mubr.msk.f32.vlgmr.msra.gmra.mrb[24].mxu0 %vm1228_vm5, %v377_v47  ;;  %v447_v47 = vld [vmem:[#allocation26 + $0x168] sm:$0xff]  ;;  %17219 = vst [vmem:[#allocation81_spill] sm:$0xff] %v13886_v44  ;;  %17226 = vst [vmem:[#allocation88_spill] sm:$0xff] %v13914_v43  ;;  %v473_v56 = vld [vmem:[#allocation30 + $0x90] sm:$0xff] }
 0x95d   :  { %10313 = vmatpush1.bf16.msra.mxu0 %v13836_v48  ;;  %2248 = vmatprep.mubr.f32.mxu0 %v16452_v2  ;;  %v13890_v58 = vpack.c.bf16 %v447_v47, %v435_v45  ;;  %v13916_v45 = vpack.c.bf16 %v554_v26, %v551_v25  ;;  %v461_v47 = vld [vmem:[#allocation30 + $0x30] sm:$0xff]  ;;  %17229 = vst [vmem:[#allocation91_spill] sm:$0xff] %v13922_v54  ;;  %17231 = vst [vmem:[#allocation93_spill] sm:$0xff] %v13932_v19  ;;  %v470_v25 = vld [vmem:[#allocation30 + $0x78] sm:$0xff] }
 0x95e   :  { %10315 = vmatprep.subr.bf16.mxu0 %v13839_v49  ;;  %v13930_v8 = vpack.c.bf16 %v464_v50, %v461_v47  ;;  %v13936_v26 = vpack.c.bf16 %v471_v63, %v468_v62  ;;  %v13942_v47 = vpack.c.bf16 %v470_v25, %v467_v21  ;;  %v13948_v62 = vpack.c.bf16 %v477_v40, %v474_v31  ;;  %v575_v31 = vld [vmem:[#allocation30 + $0x3c0] sm:$0xff]  ;;  %v578_v40 = vld [vmem:[#allocation30 + $0x3d8] sm:$0xff]  ;;  %v472_v49 = vld [vmem:[#allocation30 + $0x88] sm:$0xff] }
 0x95f   :  { %17220 = vst [vmem:[#allocation82_spill] sm:$0xff] %v13890_v58  ;;  %17227 = vst [vmem:[#allocation89_spill] sm:$0xff] %v13916_v45  ;;  %v13954_v21 = vpack.c.bf16 %v476_v60, %v473_v56  ;;  %v13968_v60 = vpack.c.bf16 %v578_v40, %v575_v31  ;;  %v491_v31 = vld [vmem:[#allocation30 + $0x120] sm:$0xff]  ;;  %v494_v40 = vld [vmem:[#allocation30 + $0x138] sm:$0xff] }
 0x960   :  { %17230 = vst [vmem:[#allocation92_spill] sm:$0xff] %v13930_v8  ;;  %17232 = vst [vmem:[#allocation94_spill] sm:$0xff] %v13936_v26  ;;  %v678_v48 = vld [vmem:[#allocation30 + $0x6f8] sm:$0xff] }
 0x961   :  { %10317 = vmatpush1.bf16.msra.mxu0 %v13843_v53  ;;  %17234 = vst [vmem:[#allocation96_spill] sm:$0xff] %v13942_v47  ;;  %17236 = vst [vmem:[#allocation98_spill] sm:$0xff] %v13948_v62 }
 0x962   :  { %10327 = vmatprep.subr.bf16.mxu0 %v13848_v51  ;;  %17238 = vst [vmem:[#allocation100_spill] sm:$0xff] %v13954_v21  ;;  %17243 = vst [vmem:[#allocation105_spill] sm:$0xff] %v13968_v60  ;;  %v460_v51 = vld [vmem:[#allocation30 + $0x28] sm:$0xff] }
 0xa2f   :  { %v13862_v23 = vpop.f32.mrb[24].mxu0 }
 0xa30   :  { %v9866_v27 = vpop.f32.mrb[25].mxu0  ;;  %8669 = vmatmul.mubr.msk.f32.vlgmr.msra.gmra.mrb[26].mxu0 %vm1322_vm6, %v13862_v23  ;;  %8670 = vmatmul.mubr.msk.f32.vlgmr.msra.gmra.mrb[22].mxu1 %vm1322_vm6, %v13862_v23 }
 0xa31   :  { %10329 = vmatpush1.bf16.msra.mxu0 %v13854_v9  ;;  %10337 = vmatpush1.bf16.msra.mxu1 %v13856_v10  ;;  %v462_v27 = vld [vmem:[#allocation30 + $0x38] sm:$0xff] }
 0xa32   :  { %10331 = vmatprep.subr.bf16.mxu0 %v13858_v15  ;;  %10339 = vmatprep.subr.bf16.mxu1 %v13860_v17  ;;  %v13920_v52 = vpack.c.bf16 %v465_v30, %v462_v27  ;;  %v13938_v27 = vpack.c.bf16 %v567_v5, %v564_v1  ;;  %v563_v30 = vld [vmem:[#allocation30 + $0x360] sm:$0xff]  ;;  %v569_v1 = vld [vmem:[#allocation30 + $0x390] sm:$0xff]  ;;  %v572_v5 = vld [vmem:[#allocation30 + $0x3a8] sm:$0xff] }
 0xa33   :  { %2390 = vmatprep.mubr.f32.mxu0 %v16452_v2  ;;  %2461 = vmatprep.mubr.f32.mxu1 %v16452_v2  ;;  %v13956_v25 = vpack.c.bf16 %v572_v5, %v569_v1  ;;  %v485_v1 = vld [vmem:[#allocation30 + $0xf0] sm:$0xff]  ;;  %v488_v5 = vld [vmem:[#allocation30 + $0x108] sm:$0xff] }
 0xa34   :  { %17228 = vst [vmem:[#allocation90_spill] sm:$0xff] %v13920_v52  ;;  %17233 = vst [vmem:[#allocation95_spill] sm:$0xff] %v13938_v27 }
 0xa35   :  { %10333 = vmatpush1.bf16.msra.mxu0 %v13870_v28  ;;  %10341 = vmatpush1.bf16.msra.mxu1 %v13872_v29  ;;  %17239 = vst [vmem:[#allocation101_spill] sm:$0xff] %v13956_v25  ;;  %v647_v28 = vld [vmem:[#allocation30 + $0x600] sm:$0xff] }
 0xa36   :  { %10343 = vmatprep.subr.bf16.mxu0 %v13876_v37  ;;  %10351 = vmatprep.subr.bf16.mxu1 %v13878_v38 }
 0xa38   :  { %8671 = vmatmul.mubr.msk.f32.vlgmr.msra.gmra.mrb[28].mxu0 %vm1322_vm6, %v13862_v23  ;;  %8672 = vmatmul.mubr.msk.f32.vlgmr.msra.gmra.mrb[24].mxu1 %vm1322_vm6, %v13862_v23 }
 0xa39   :  { %10345 = vmatpush1.bf16.msra.mxu0 %v13884_v42  ;;  %10353 = vmatpush1.bf16.msra.mxu1 %v13886_v44 }
 0xa3a   :  { %10347 = vmatprep.subr.bf16.mxu0 %v13890_v58  ;;  %10355 = vmatprep.subr.bf16.mxu1 %v13892_v59  ;;  %v466_v59 = vld [vmem:[#allocation30 + $0x58] sm:$0xff] }
 0xa3b   :  { %2532 = vmatprep.mubr.f32.mxu0 %v16452_v2  ;;  %2603 = vmatprep.mubr.f32.mxu1 %v16452_v2  ;;  %v573_v2 = vld [vmem:[#allocation30 + $0x3b0] sm:$0xff] }
 0xa3c   :  { %v13950_v63 = vpack.c.bf16 %v573_v2, %v570_v7 }
 0xa3d   :  { %10349 = vmatpush1.bf16.msra.mxu0 %v13900_v13  ;;  %10357 = vmatpush1.bf16.msra.mxu1 %v13902_v14 }
 0xa3e   :  { %10359 = vmatprep.subr.bf16.mxu1 %v13906_v22  ;;  %10423 = vmatprep.subr.bf16.mxu0 %v13908_v4  ;;  %17237 = vst [vmem:[#allocation99_spill] sm:$0xff] %v13950_v63  ;;  %v576_v4 = vld [vmem:[#allocation30 + $0x3c8] sm:$0xff] }
 0xa40   :  { %8673 = vmatmul.mubr.msk.f32.vlgmr.msra.gmra.mrb[30].mxu0 %vm1322_vm6, %v13862_v23  ;;  %8674 = vmatmul.mubr.msk.f32.vlgmr.msra.gmra.mrb[26].mxu1 %vm1322_vm6, %v13862_v23  ;;  %v566_v23 = vld [vmem:[#allocation30 + $0x378] sm:$0xff] }
 0xa41   :  { %10361 = vmatpush1.bf16.msra.mxu1 %v13914_v43  ;;  %10425 = vmatpush1.bf16.msra.mxu0 %v13916_v45  ;;  %v13944_v50 = vpack.c.bf16 %v566_v23, %v563_v30  ;;  %v483_v45 = vld [vmem:[#allocation30 + $0xe0] sm:$0xff]  ;;  %v482_v23 = vld [vmem:[#allocation30 + $0xd8] sm:$0xff] }
 0xa42   :  { %10363 = vmatprep.subr.bf16.mxu1 %v13920_v52  ;;  %10427 = vmatprep.subr.bf16.mxu0 %v13922_v54  ;;  %v480_v54 = vld [vmem:[#allocation30 + $0xc8] sm:$0xff]  ;;  %v479_v30 = vld [vmem:[#allocation30 + $0xc0] sm:$0xff] }
 0xa43   :  { %17235 = vst [vmem:[#allocation97_spill] sm:$0xff] %v13944_v50  ;;  %v13960_v2 = vpack.c.bf16 %v483_v45, %v480_v54  ;;  %v13966_v56 = vpack.c.bf16 %v482_v23, %v479_v30  ;;  %v581_v54 = vld [vmem:[#allocation30 + $0x3f0] sm:$0xff]  ;;  %v13978_v30 = vpack.c.bf16 %v488_v5, %v485_v1  ;;  %v13990_v1 = vpack.c.bf16 %v494_v40, %v491_v31 }
 0xa45   :  { %10365 = vmatpush1.bf16.msra.mxu1 %v13930_v8  ;;  %10429 = vmatpush1.bf16.msra.mxu0 %v13932_v19  ;;  %v579_v19 = vld [vmem:[#allocation30 + $0x3e0] sm:$0xff]  ;;  %17240 = vst [vmem:[#allocation102_spill] sm:$0xff] %v13960_v2  ;;  %17242 = vst [vmem:[#allocation104_spill] sm:$0xff] %v13966_v56 }
 0xa46   :  { %10367 = vmatprep.subr.bf16.mxu1 %v13936_v26  ;;  %10431 = vmatprep.subr.bf16.mxu0 %v13938_v27  ;;  %v13962_v7 = vpack.c.bf16 %v579_v19, %v576_v4  ;;  %v486_v27 = vld [vmem:[#allocation30 + $0xf8] sm:$0xff]  ;;  %v584_v19 = vld [vmem:[#allocation30 + $0x408] sm:$0xff]  ;;  %17246 = vst [vmem:[#allocation108_spill] sm:$0xff] %v13978_v30  ;;  %17250 = vst [vmem:[#allocation112_spill] sm:$0xff] %v13990_v1 }
 0xa47   :  { %v582_v26 = vld [vmem:[#allocation30 + $0x3f8] sm:$0xff]  ;;  %v13980_v23 = vpack.c.bf16 %v584_v19, %v581_v54  ;;  %v497_v54 = vld [vmem:[#allocation30 + $0x150] sm:$0xff]  ;;  %v500_v19 = vld [vmem:[#allocation30 + $0x168] sm:$0xff] }
 0xa48   :  { %17241 = vst [vmem:[#allocation103_spill] sm:$0xff] %v13962_v7  ;;  %v14002_v31 = vpack.c.bf16 %v500_v19, %v497_v54 }
 0xa49   :  { %10369 = vmatpush1.bf16.msra.mxu1 %v13942_v47  ;;  %10433 = vmatpush1.bf16.msra.mxu0 %v13944_v50  ;;  %v489_v47 = vld [vmem:[#allocation30 + $0x110] sm:$0xff]  ;;  %17247 = vst [vmem:[#allocation109_spill] sm:$0xff] %v13980_v23 }
 0xa4a   :  { %10371 = vmatprep.subr.bf16.mxu1 %v13948_v62  ;;  %10435 = vmatprep.subr.bf16.mxu0 %v13950_v63  ;;  %v585_v50 = vld [vmem:[#allocation30 + $0x410] sm:$0xff]  ;;  %v13972_v4 = vpack.c.bf16 %v489_v47, %v486_v27  ;;  %v492_v63 = vld [vmem:[#allocation30 + $0x128] sm:$0xff]  ;;  %v587_v47 = vld [vmem:[#allocation30 + $0x420] sm:$0xff]  ;;  %17254 = vst [vmem:[#allocation116_spill] sm:$0xff] %v14002_v31 }
 0xa4b   :  { %v13974_v45 = vpack.c.bf16 %v585_v50, %v582_v26  ;;  %v588_v62 = vld [vmem:[#allocation30 + $0x428] sm:$0xff]  ;;  %v590_v50 = vld [vmem:[#allocation30 + $0x438] sm:$0xff] }
 0xa4c   :  { %17244 = vst [vmem:[#allocation106_spill] sm:$0xff] %v13972_v4  ;;  %v13992_v5 = vpack.c.bf16 %v590_v50, %v587_v47  ;;  %v503_v47 = vld [vmem:[#allocation30 + $0x180] sm:$0xff]  ;;  %v506_v50 = vld [vmem:[#allocation30 + $0x198] sm:$0xff] }
 0xa4d   :  { %10373 = vmatpush1.bf16.msra.mxu1 %v13954_v21  ;;  %10437 = vmatpush1.bf16.msra.mxu0 %v13956_v25  ;;  %17245 = vst [vmem:[#allocation107_spill] sm:$0xff] %v13974_v45  ;;  %v495_v21 = vld [vmem:[#allocation30 + $0x140] sm:$0xff]  ;;  %v14014_v54 = vpack.c.bf16 %v506_v50, %v503_v47 }
 0xa4e   :  { %10375 = vmatprep.subr.bf16.mxu1 %v13960_v2  ;;  %10439 = vmatprep.subr.bf16.mxu0 %v13962_v7  ;;  %v591_v25 = vld [vmem:[#allocation30 + $0x440] sm:$0xff]  ;;  %v13984_v26 = vpack.c.bf16 %v495_v21, %v492_v63  ;;  %v498_v7 = vld [vmem:[#allocation30 + $0x158] sm:$0xff]  ;;  %17251 = vst [vmem:[#allocation113_spill] sm:$0xff] %v13992_v5  ;;  %v593_v21 = vld [vmem:[#allocation30 + $0x450] sm:$0xff] }
 0xa4f   :  { %v13986_v27 = vpack.c.bf16 %v591_v25, %v588_v62  ;;  %v594_v2 = vld [vmem:[#allocation30 + $0x458] sm:$0xff]  ;;  %v596_v25 = vld [vmem:[#allocation30 + $0x468] sm:$0xff]  ;;  %17258 = vst [vmem:[#allocation120_spill] sm:$0xff] %v14014_v54 }
 0xa50   :  { %17248 = vst [vmem:[#allocation110_spill] sm:$0xff] %v13984_v26  ;;  %v14004_v40 = vpack.c.bf16 %v596_v25, %v593_v21  ;;  %v509_v21 = vld [vmem:[#allocation30 + $0x1b0] sm:$0xff]  ;;  %v512_v25 = vld [vmem:[#allocation30 + $0x1c8] sm:$0xff] }
 0xa51   :  { %10377 = vmatpush1.bf16.msra.mxu1 %v13966_v56  ;;  %10441 = vmatpush1.bf16.msra.mxu0 %v13968_v60  ;;  %17249 = vst [vmem:[#allocation111_spill] sm:$0xff] %v13986_v27  ;;  %v501_v56 = vld [vmem:[#allocation30 + $0x170] sm:$0xff]  ;;  %v14026_v47 = vpack.c.bf16 %v512_v25, %v509_v21 }
 0xa52   :  { %10379 = vmatprep.subr.bf16.mxu1 %v13972_v4  ;;  %10443 = vmatprep.subr.bf16.mxu0 %v13974_v45  ;;  %v597_v60 = vld [vmem:[#allocation30 + $0x470] sm:$0xff]  ;;  %v13996_v62 = vpack.c.bf16 %v501_v56, %v498_v7  ;;  %v504_v45 = vld [vmem:[#allocation30 + $0x188] sm:$0xff]  ;;  %17255 = vst [vmem:[#allocation117_spill] sm:$0xff] %v14004_v40  ;;  %v599_v56 = vld [vmem:[#allocation30 + $0x480] sm:$0xff] }
 0xa53   :  { %v13998_v63 = vpack.c.bf16 %v597_v60, %v594_v2  ;;  %v600_v4 = vld [vmem:[#allocation30 + $0x488] sm:$0xff]  ;;  %v602_v60 = vld [vmem:[#allocation30 + $0x498] sm:$0xff]  ;;  %17262 = vst [vmem:[#allocation124_spill] sm:$0xff] %v14026_v47 }
 0xa54   :  { %17252 = vst [vmem:[#allocation114_spill] sm:$0xff] %v13996_v62  ;;  %v14016_v19 = vpack.c.bf16 %v602_v60, %v599_v56  ;;  %v515_v56 = vld [vmem:[#allocation30 + $0x1e0] sm:$0xff]  ;;  %v518_v60 = vld [vmem:[#allocation30 + $0x1f8] sm:$0xff] }
 0xa55   :  { %10381 = vmatpush1.bf16.msra.mxu1 %v13978_v30  ;;  %10445 = vmatpush1.bf16.msra.mxu0 %v13980_v23  ;;  %17253 = vst [vmem:[#allocation115_spill] sm:$0xff] %v13998_v63  ;;  %v507_v30 = vld [vmem:[#allocation30 + $0x1a0] sm:$0xff]  ;;  %v14038_v21 = vpack.c.bf16 %v518_v60, %v515_v56 }
 0xa56   :  { %10383 = vmatprep.subr.bf16.mxu1 %v13984_v26  ;;  %10447 = vmatprep.subr.bf16.mxu0 %v13986_v27  ;;  %v603_v23 = vld [vmem:[#allocation30 + $0x4a0] sm:$0xff]  ;;  %v14008_v2 = vpack.c.bf16 %v507_v30, %v504_v45  ;;  %v510_v27 = vld [vmem:[#allocation30 + $0x1b8] sm:$0xff]  ;;  %17259 = vst [vmem:[#allocation121_spill] sm:$0xff] %v14016_v19  ;;  %v605_v30 = vld [vmem:[#allocation30 + $0x4b0] sm:$0xff] }
 0xa57   :  { %v14010_v7 = vpack.c.bf16 %v603_v23, %v600_v4  ;;  %v606_v26 = vld [vmem:[#allocation30 + $0x4b8] sm:$0xff]  ;;  %v608_v23 = vld [vmem:[#allocation30 + $0x4c8] sm:$0xff]  ;;  %17266 = vst [vmem:[#allocation128_spill] sm:$0xff] %v14038_v21 }
 0xa58   :  { %17256 = vst [vmem:[#allocation118_spill] sm:$0xff] %v14008_v2  ;;  %v14028_v50 = vpack.c.bf16 %v608_v23, %v605_v30  ;;  %v521_v30 = vld [vmem:[#allocation30 + $0x210] sm:$0xff]  ;;  %v524_v23 = vld [vmem:[#allocation30 + $0x228] sm:$0xff] }
 0xa59   :  { %10385 = vmatpush1.bf16.msra.mxu1 %v13990_v1  ;;  %10449 = vmatpush1.bf16.msra.mxu0 %v13992_v5  ;;  %17257 = vst [vmem:[#allocation119_spill] sm:$0xff] %v14010_v7  ;;  %v513_v1 = vld [vmem:[#allocation30 + $0x1d0] sm:$0xff]  ;;  %v14050_v56 = vpack.c.bf16 %v524_v23, %v521_v30 }
 0xa5a   :  { %10387 = vmatprep.subr.bf16.mxu1 %v13996_v62  ;;  %10451 = vmatprep.subr.bf16.mxu0 %v13998_v63  ;;  %v609_v5 = vld [vmem:[#allocation30 + $0x4d0] sm:$0xff]  ;;  %v14020_v4 = vpack.c.bf16 %v513_v1, %v510_v27  ;;  %v516_v63 = vld [vmem:[#allocation30 + $0x1e8] sm:$0xff]  ;;  %17263 = vst [vmem:[#allocation125_spill] sm:$0xff] %v14028_v50  ;;  %v611_v1 = vld [vmem:[#allocation30 + $0x4e0] sm:$0xff] }
 0xa5b   :  { %v14022_v45 = vpack.c.bf16 %v609_v5, %v606_v26  ;;  %v612_v62 = vld [vmem:[#allocation30 + $0x4e8] sm:$0xff]  ;;  %v614_v5 = vld [vmem:[#allocation30 + $0x4f8] sm:$0xff]  ;;  %17270 = vst [vmem:[#allocation132_spill] sm:$0xff] %v14050_v56 }
 0xa5c   :  { %17260 = vst [vmem:[#allocation122_spill] sm:$0xff] %v14020_v4  ;;  %v14040_v25 = vpack.c.bf16 %v614_v5, %v611_v1  ;;  %v527_v1 = vld [vmem:[#allocation30 + $0x240] sm:$0xff]  ;;  %v530_v5 = vld [vmem:[#allocation30 + $0x258] sm:$0xff] }
 0xa5d   :  { %10389 = vmatpush1.bf16.msra.mxu1 %v14002_v31  ;;  %10453 = vmatpush1.bf16.msra.mxu0 %v14004_v40  ;;  %17261 = vst [vmem:[#allocation123_spill] sm:$0xff] %v14022_v45  ;;  %v519_v31 = vld [vmem:[#allocation30 + $0x200] sm:$0xff]  ;;  %v14062_v30 = vpack.c.bf16 %v530_v5, %v527_v1 }
 0xa5e   :  { %10391 = vmatprep.subr.bf16.mxu1 %v14008_v2  ;;  %10455 = vmatprep.subr.bf16.mxu0 %v14010_v7  ;;  %v615_v40 = vld [vmem:[#allocation30 + $0x500] sm:$0xff]  ;;  %v14032_v26 = vpack.c.bf16 %v519_v31, %v516_v63  ;;  %v522_v7 = vld [vmem:[#allocation30 + $0x218] sm:$0xff]  ;;  %17267 = vst [vmem:[#allocation129_spill] sm:$0xff] %v14040_v25  ;;  %v617_v31 = vld [vmem:[#allocation30 + $0x510] sm:$0xff] }
 0xa5f   :  { %v14034_v27 = vpack.c.bf16 %v615_v40, %v612_v62  ;;  %v618_v2 = vld [vmem:[#allocation30 + $0x518] sm:$0xff]  ;;  %v620_v40 = vld [vmem:[#allocation30 + $0x528] sm:$0xff]  ;;  %17274 = vst [vmem:[#allocation136_spill] sm:$0xff] %v14062_v30 }
 0xa60   :  { %17264 = vst [vmem:[#allocation126_spill] sm:$0xff] %v14032_v26  ;;  %v14052_v60 = vpack.c.bf16 %v620_v40, %v617_v31  ;;  %v533_v31 = vld [vmem:[#allocation30 + $0x270] sm:$0xff]  ;;  %v632_v40 = vld [vmem:[#allocation30 + $0x588] sm:$0xff] }
 0xa61   :  { %10393 = vmatpush1.bf16.msra.mxu1 %v14014_v54  ;;  %10457 = vmatpush1.bf16.msra.mxu0 %v14016_v19  ;;  %17265 = vst [vmem:[#allocation127_spill] sm:$0xff] %v14034_v27  ;;  %v525_v54 = vld [vmem:[#allocation30 + $0x230] sm:$0xff] }
 0xa62   :  { %10395 = vmatprep.subr.bf16.mxu1 %v14020_v4  ;;  %10459 = vmatprep.subr.bf16.mxu0 %v14022_v45  ;;  %v621_v19 = vld [vmem:[#allocation30 + $0x530] sm:$0xff]  ;;  %v14044_v62 = vpack.c.bf16 %v525_v54, %v522_v7  ;;  %v528_v45 = vld [vmem:[#allocation30 + $0x248] sm:$0xff]  ;;  %17271 = vst [vmem:[#allocation133_spill] sm:$0xff] %v14052_v60  ;;  %v623_v54 = vld [vmem:[#allocation30 + $0x540] sm:$0xff] }
 0xa63   :  { %v14046_v63 = vpack.c.bf16 %v621_v19, %v618_v2  ;;  %v624_v4 = vld [vmem:[#allocation30 + $0x548] sm:$0xff]  ;;  %v626_v19 = vld [vmem:[#allocation30 + $0x558] sm:$0xff] }
 0xa64   :  { %17268 = vst [vmem:[#allocation130_spill] sm:$0xff] %v14044_v62  ;;  %v14064_v23 = vpack.c.bf16 %v626_v19, %v623_v54  ;;  %v639_v19 = vld [vmem:[#allocation30 + $0x5c0] sm:$0xff] }
 0xa65   :  { %10397 = vmatpush1.bf16.msra.mxu1 %v14026_v47  ;;  %10461 = vmatpush1.bf16.msra.mxu0 %v14028_v50  ;;  %17269 = vst [vmem:[#allocation131_spill] sm:$0xff] %v14046_v63  ;;  %v531_v47 = vld [vmem:[#allocation30 + $0x260] sm:$0xff] }
 0xa66   :  { %10399 = vmatprep.subr.bf16.mxu1 %v14032_v26  ;;  %10463 = vmatprep.subr.bf16.mxu0 %v14034_v27  ;;  %v627_v50 = vld [vmem:[#allocation30 + $0x560] sm:$0xff]  ;;  %v14056_v2 = vpack.c.bf16 %v531_v47, %v528_v45  ;;  %v534_v27 = vld [vmem:[#allocation30 + $0x278] sm:$0xff]  ;;  %17275 = vst [vmem:[#allocation137_spill] sm:$0xff] %v14064_v23  ;;  %v536_v47 = vld [vmem:[#allocation30 + $0x288] sm:$0xff] }
 0xa67   :  { %v14058_v7 = vpack.c.bf16 %v627_v50, %v624_v4  ;;  %v630_v26 = vld [vmem:[#allocation30 + $0x578] sm:$0xff]  ;;  %v629_v50 = vld [vmem:[#allocation30 + $0x570] sm:$0xff]  ;;  %v14074_v1 = vpack.c.bf16 %v536_v47, %v533_v31  ;;  %v539_v31 = vld [vmem:[#allocation30 + $0x2a0] sm:$0xff] }
 0xa68   :  { %17272 = vst [vmem:[#allocation134_spill] sm:$0xff] %v14056_v2  ;;  %v14076_v5 = vpack.c.bf16 %v632_v40, %v629_v50  ;;  %v542_v47 = vld [vmem:[#allocation30 + $0x2b8] sm:$0xff] }
 0xa69   :  { %10401 = vmatpush1.bf16.msra.mxu1 %v14038_v21  ;;  %10465 = vmatpush1.bf16.msra.mxu0 %v14040_v25  ;;  %17273 = vst [vmem:[#allocation135_spill] sm:$0xff] %v14058_v7  ;;  %v537_v21 = vld [vmem:[#allocation30 + $0x290] sm:$0xff]  ;;  %17278 = vst [vmem:[#allocation140_spill] sm:$0xff] %v14074_v1  ;;  %v14086_v40 = vpack.c.bf16 %v542_v47, %v539_v31 }
 0xa6a   :  { %10403 = vmatprep.subr.bf16.mxu1 %v14044_v62  ;;  %10467 = vmatprep.subr.bf16.mxu0 %v14046_v63  ;;  %v633_v25 = vld [vmem:[#allocation30 + $0x590] sm:$0xff]  ;;  %v14068_v4 = vpack.c.bf16 %v537_v21, %v534_v27  ;;  %17279 = vst [vmem:[#allocation141_spill] sm:$0xff] %v14076_v5  ;;  %v540_v27 = vld [vmem:[#allocation30 + $0x2a8] sm:$0xff]  ;;  %v543_v21 = vld [vmem:[#allocation30 + $0x2c0] sm:$0xff] }
 0xa6b   :  { %v14070_v45 = vpack.c.bf16 %v633_v25, %v630_v26  ;;  %v16554_v26 = vlaneseq  ;;  %v636_v25 = vld [vmem:[#allocation30 + $0x5a8] sm:$0xff]  ;;  %v14082_v54 = vpack.c.bf16 %v543_v21, %v540_v27  ;;  %17282 = vst [vmem:[#allocation144_spill] sm:$0xff] %v14086_v40  ;;  %v546_v21 = vld [vmem:[#allocation30 + $0x2d8] sm:$0xff] }
 0xa6c   :  { %17276 = vst [vmem:[#allocation138_spill] sm:$0xff] %v14068_v4  ;;  %v14084_v50 = vpack.c.bf16 %v639_v19, %v636_v25  ;;  %v549_v25 = vld [vmem:[#allocation30 + $0x2f0] sm:$0xff]  ;;  %v642_v19 = vld [vmem:[#allocation30 + $0x5d8] sm:$0xff] }
 0xa6d   :  { %10405 = vmatpush1.bf16.msra.mxu1 %v14050_v56  ;;  %10469 = vmatpush1.bf16.msra.mxu0 %v14052_v60  ;;  %17277 = vst [vmem:[#allocation139_spill] sm:$0xff] %v14070_v45  ;;  %17280 = vst [vmem:[#allocation142_spill] sm:$0xff] %v14082_v54  ;;  %v1205_v60 = vstv %s8638_s8  ;;  %v14090_v63 = vshrl.u32 %v16554_v26, 7  ;;  %v14096_v47 = vpack.c.bf16 %v549_v25, %v546_v21  ;;  %v648_v25 = vld [vmem:[#allocation30 + $0x608] sm:$0xff]  ;;  %v450_v56 = vld [vmem:[#allocation27] sm:$0xff] }
 0xa6e   :  { %10407 = vmatprep.subr.bf16.mxu1 %v14056_v2  ;;  %10471 = vmatprep.subr.bf16.mxu0 %v14058_v7  ;;  %17281 = vst [vmem:[#allocation143_spill] sm:$0xff] %v14084_v50  ;;  %v451_v7 = vld [vmem:[#allocation27 + $0x8] sm:$0xff]  ;;  %v1206_v62 = vmul.f32 %v1205_v60, %v450_v56 }
 0xa6f   :  { %v1207_v31 = vmul.f32 %v1205_v60, %v451_v7  ;;  %17284 = vst [vmem:[#allocation146_spill] sm:$0xff] %v14096_v47  ;;  %v2131_v21 = vsub.s32 4, %v14090_v63  ;;  %v14139_v22 = vsub.s32 0, %v14090_v63 }
 0xa70   :  { %v8639_v52 = vrot.slane %v1206_v62, 9 }
 0xa71   :  { %10409 = vmatpush1.bf16.msra.mxu1 %v14062_v30  ;;  %10473 = vmatpush1.bf16.msra.mxu0 %v14064_v23  ;;  %v638_v23 = vld [vmem:[#allocation30 + $0x5b8] sm:$0xff]  ;;  %v548_v30 = vld [vmem:[#allocation30 + $0x2e8] sm:$0xff] }
 0xa72   :  { %10411 = vmatprep.subr.bf16.mxu1 %v14068_v4  ;;  %10475 = vmatprep.subr.bf16.mxu0 %v14070_v45  ;;  %v635_v45 = vld [vmem:[#allocation30 + $0x5a0] sm:$0xff]  ;;  %v545_v4 = vld [vmem:[#allocation30 + $0x2d0] sm:$0xff] }
 0xa73   :  { %v14094_v27 = vpack.c.bf16 %v638_v23, %v635_v45  ;;  %v14101_v2 = vpack.c.bf16 %v548_v30, %v545_v4  ;;  %v8640_v23 = vrot.slane %v1207_v31, 9  ;;  %v14112_v30 = vsub.s32 6, %v14090_v63  ;;  %v508_v31 = vld [vmem:[#allocation30 + $0x1a8] sm:$0xff] }
 0xa75   :  { %10413 = vmatpush1.bf16.msra.mxu1 %v14074_v1  ;;  %10477 = vmatpush1.bf16.msra.mxu0 %v14076_v5  ;;  %v1200_v5 = vstv %s1199_s7  ;;  %17283 = vst [vmem:[#allocation145_spill] sm:$0xff] %v14094_v27  ;;  %v645_v1 = vld [vmem:[#allocation30 + $0x5f0] sm:$0xff]  ;;  %17286 = vst [vmem:[#allocation148_spill] sm:$0xff] %v14101_v2 }
 0xa76   :  { %10415 = vmatprep.subr.bf16.mxu1 %v14082_v54  ;;  %10479 = vmatprep.subr.bf16.mxu0 %v14084_v50  ;;  %v1202_v54 = vmul.f32 %v1200_v5, %v451_v7  ;;  %v14099_v26 = vpack.c.bf16 %v645_v1, %v642_v19  ;;  %v641_v50 = vld [vmem:[#allocation30 + $0x5d0] sm:$0xff]  ;;  %v651_v1 = vld [vmem:[#allocation30 + $0x620] sm:$0xff]  ;;  %v1201_v8 = vmul.f32 %v1200_v5, %v450_v56 }
 0xa77   :  { %v14114_v4 = vpack.c.bf16 %v651_v1, %v648_v25  ;;  %v505_v19 = vld [vmem:[#allocation30 + $0x190] sm:$0xff] }
 0xa78   :  { %17285 = vst [vmem:[#allocation147_spill] sm:$0xff] %v14099_v26  ;;  %v14109_v7 = vadd.f32 %v8640_v23, %v1202_v54  ;;  %v14130_v25 = vpack.c.bf16 %v508_v31, %v505_v19  ;;  %v1221_v43 = vadd.f32 %v8639_v52, %v1201_v8  ;;  %v14142_v19 = vsub.s32 2, %v14090_v63 }
 0xa79   :  { %10417 = vmatpush1.bf16.msra.mxu1 %v14086_v40  ;;  %10481 = vmatpush1.bf16.msra.mxu0 %v14094_v27  ;;  %v644_v40 = vld [vmem:[#allocation30 + $0x5e8] sm:$0xff]  ;;  %17288 = vst [vmem:[#allocation150_spill] sm:$0xff] %v14114_v4  ;;  %v14116_v27 = vld [vmem:[#allocation29] sm:$0xff]  ;;  %v14145_v31 = vsub.s32 1, %v14090_v63 }
 0xa7a   :  { %10419 = vmatprep.subr.bf16.mxu1 %v14096_v47  ;;  %v14104_v45 = vpack.c.bf16 %v644_v40, %v641_v50  ;;  %10483 = vmatprep.subr.bf16.mxu0 %v14099_v26  ;;  %v14120_v50 = vrot.slane %v14109_v7, %v2131_v21  ;;  %v452_v40 = vld [vmem:[#allocation27 + $0x10] sm:$0xff]  ;;  %v14123_v54 = vrot.slane %v14116_v27, %v2131_v21 }
 0xa7b   :  { %v14127_v23 = vrot.slane %v14116_v27, %v14112_v30  ;;  %17292 = vst [vmem:[#allocation154_spill] sm:$0xff] %v14130_v25  ;;  %v1203_v1 = vmul.f32 %v1200_v5, %v452_v40  ;;  %v1208_v26 = vmul.f32 %v1205_v60, %v452_v40  ;;  %v14151_v40 = vrot.slane %v1221_v43, %v2131_v21 }
 0xa7c   :  { %17287 = vst [vmem:[#allocation149_spill] sm:$0xff] %v14104_v45  ;;  %17289 = vst [vmem:[#allocation151_spill] sm:$0xff] %v14120_v50  ;;  %v14154_v56 = vrot.slane %v1221_v43, %v14142_v19  ;;  %v14157_v52 = vrot.slane %v1221_v43, %v14112_v30  ;;  %v14161_v8 = vrot.slane %v14116_v27, %v14139_v22 }
 0xa7d   :  { %10421 = vmatpush1.bf16.msra.mxu1 %v14101_v2  ;;  %10485 = vmatpush1.bf16.msra.mxu0 %v14104_v45  ;;  %17290 = vst [vmem:[#allocation152_spill] sm:$0xff] %v14123_v54  ;;  %17291 = vst [vmem:[#allocation153_spill] sm:$0xff] %v14127_v23  ;;  %v8641_v45 = vrot.slane %v1208_v26, 9  ;;  %v16601_v26 = vsub.s32 3, %v14090_v63  ;;  %v14165_v62 = vrot.slane %v14116_v27, %v14142_v19 }
 0xa7e   :  { %10487 = vmatprep.subr.bf16.mxu0 %v14114_v4  ;;  %10743 = vmatprep.subr.bf16.mxu1 %v14130_v25  ;;  %17294 = vst [vmem:[#allocation156_spill] sm:$0xff] %v14151_v40  ;;  %17295 = vst [vmem:[#allocation157_spill] sm:$0xff] %v14154_v56  ;;  %v650_v25 = vld [vmem:[#allocation30 + $0x618] sm:$0xff] }
 0xa7f   :  { %v14133_v2 = vadd.f32 %v8641_v45, %v1203_v1  ;;  %v14149_v45 = vrot.slane %v1221_v43, %v14139_v22  ;;  %17296 = vst [vmem:[#allocation158_spill] sm:$0xff] %v14157_v52  ;;  %17297 = vst [vmem:[#allocation159_spill] sm:$0xff] %v14161_v8  ;;  %v14174_v1 = vrot.slane %v14116_v27, %v16601_v26  ;;  %v457_v26 = vld [vmem:[#allocation30 + $0x10] sm:$0xff] }
 0xa80   :  { %17298 = vst [vmem:[#allocation160_spill] sm:$0xff] %v14165_v62 }
 0xa81   :  { %v14136_v47 = vrot.slane %v14133_v2, %v2131_v21  ;;  %17293 = vst [vmem:[#allocation155_spill] sm:$0xff] %v14149_v45  ;;  %v14169_v21 = vrot.slane %v14116_v27, %v14145_v31  ;;  %17300 = vst [vmem:[#allocation162_spill] sm:$0xff] %v14174_v1 }
 0xa83   :  { %17299 = vst [vmem:[#allocation161_spill] sm:$0xff] %v14169_v21 }
 0xb03   :  { %v2250_v60 = vpop.f32.mrb[26].mxu0  ;;  %v2321_v5 = vpop.f32.mrb[22].mxu1 }
 0xb04   :  { %v2251_v43 = vadd.f32 %v2250_v60, %v14149_v45  ;;  %v2322_v4 = vadd.f32 %v2321_v5, %v14151_v40  ;;  %v2252_v13 = vpop.f32.mrb[27].mxu0  ;;  %v2323_v58 = vpop.f32.mrb[23].mxu1  ;;  %v2634_v40 = vsub.s32 5, %v14090_v63  ;;  %v14198_v45 = vpack.c.bf16 %v460_v51, %v457_v26  ;;  %v517_v26 = vld [vmem:[#allocation30 + $0x1f0] sm:$0xff] }
 0xb05   :  { %v2253_v42 = vadd.f32 %v2252_v13, %v14154_v56  ;;  %v2324_v37 = vadd.f32 %v2323_v58, %v14157_v52  ;;  %v654_v13 = vld [vmem:[#allocation30 + $0x638] sm:$0xff]  ;;  %v657_v56 = vld [vmem:[#allocation30 + $0x650] sm:$0xff]  ;;  %v14193_v58 = vrot.slane %v14109_v7, %v14142_v19 }
 0xb06   :  { %v14181_v15 = vadd.f32 %v14161_v8, %v2251_v43  ;;  %v14184_v9 = vadd.f32 %v14165_v62, %v2322_v4  ;;  %v511_v43 = vld [vmem:[#allocation30 + $0x1c0] sm:$0xff]  ;;  %v514_v52 = vld [vmem:[#allocation30 + $0x1d8] sm:$0xff]  ;;  %v14196_v8 = vpack.c.bf16 %v650_v25, %v647_v28  ;;  %17303 = vst [vmem:[#allocation165_spill] sm:$0xff] %v14198_v45  ;;  %v14202_v14 = vpack.c.bf16 %v657_v56, %v654_v13  ;;  %v520_v56 = vld [vmem:[#allocation30 + $0x208] sm:$0xff] }
 0xb07   :  { %v2673_v60 = vadd.f32 %v14169_v21, %v2253_v42  ;;  %v14188_v5 = vadd.f32 %v14174_v1, %v2324_v37  ;;  %17301 = vst [vmem:[#allocation163_spill] sm:$0xff] %v14193_v58  ;;  %v653_v42 = vld [vmem:[#allocation30 + $0x630] sm:$0xff]  ;;  %v656_v37 = vld [vmem:[#allocation30 + $0x648] sm:$0xff]  ;;  %v14209_v28 = vrot.slane %v14116_v27, %v2634_v40  ;;  %v14213_v51 = vpack.c.bf16 %v514_v52, %v511_v43  ;;  %v663_v25 = vld [vmem:[#allocation30 + $0x680] sm:$0xff] }
 0xb08   :  { %17302 = vst [vmem:[#allocation164_spill] sm:$0xff] %v14196_v8  ;;  %v16637_v1 = vmax.f32 %v14181_v15, 0.0  ;;  %17304 = vst [vmem:[#allocation166_spill] sm:$0xff] %v14202_v14  ;;  %v17307_v20 = vmax.f32 %v14184_v9, 0.0  ;;  %v14224_v52 = vpack.c.bf16 %v656_v37, %v653_v42  ;;  %v14226_v43 = vpack.c.bf16 %v466_v59, %v463_v24  ;;  %v669_v42 = vld [vmem:[#allocation30 + $0x6b0] sm:$0xff]  ;;  %v523_v24 = vld [vmem:[#allocation30 + $0x220] sm:$0xff] }
 0xb09   :  { %v2685_v4 = vmax.f32 %v2673_v60, 0.0  ;;  %v16632_v62 = vmax.f32 %v14188_v5, 0.0  ;;  %17305 = vst [vmem:[#allocation167_spill] sm:$0xff] %v14209_v28  ;;  %17306 = vst [vmem:[#allocation168_spill] sm:$0xff] %v14213_v51  ;;  %v14229_v53 = vpack.c.bf16 %v663_v25, %v660_v3  ;;  %v526_v59 = vld [vmem:[#allocation30 + $0x238] sm:$0xff]  ;;  %v665_v25 = vld [vmem:[#allocation30 + $0x690] sm:$0xff] }
 0xb0a   :  { %17308 = vst [vmem:[#allocation169_spill] sm:$0xff] %v14224_v52  ;;  %17309 = vst [vmem:[#allocation170_spill] sm:$0xff] %v14226_v43  ;;  %v478_v37 = vld [vmem:[#allocation30 + $0xb8] sm:$0xff] }
 0xb0b   :  { %v14204_v44 = vpop.f32.mrb[28].mxu0  ;;  %v14206_v60 = vpop.f32.mrb[24].mxu1  ;;  %2776 = vmatprep.mubr.f32.mxu1 %v2685_v4  ;;  %2847 = vmatprep.mubr.f32.mxu0 %v16632_v62  ;;  %v659_v62 = vld [vmem:[#allocation30 + $0x660] sm:$0xff]  ;;  %17310 = vst [vmem:[#allocation171_spill] sm:$0xff] %v14229_v53 }
 0xb0c   :  { %v2394_v13 = vpop.f32.mrb[29].mxu0  ;;  %v14215_v21 = vpop.f32.mrb[25].mxu1  ;;  %2777 = vmatmul.mubr.f32.vlgmr.msra.gmra.mrb[28].mxu1 %v16637_v1  ;;  %2848 = vmatmul.mubr.f32.vlgmr.msra.gmra.mrb[32].mxu0 %v17307_v20  ;;  %v14231_v1 = vpack.c.bf16 %v520_v56, %v517_v26  ;;  %v469_v20 = vld [vmem:[#allocation30 + $0x70] sm:$0xff]  ;;  %v14240_v3 = vpack.c.bf16 %v662_v16, %v659_v62  ;;  %v668_v26 = vld [vmem:[#allocation30 + $0x6a8] sm:$0xff] }
 0xb0d   :  { %v2395_v40 = vadd.f32 %v2394_v13, %v14193_v58  ;;  %10489 = vmatpush1.bf16.msra.mxu0 %v14196_v8  ;;  %10745 = vmatpush3.bf16.msra.mxu1 %v14198_v45  ;;  %v666_v13 = vld [vmem:[#allocation30 + $0x698] sm:$0xff]  ;;  %v529_v62 = vld [vmem:[#allocation30 + $0x250] sm:$0xff]  ;;  %v484_v45 = vld [vmem:[#allocation30 + $0xe8] sm:$0xff] }
 0xb0e   :  { %3202 = vmatprep.mubr.f32.mxu1 %v2685_v4  ;;  %10491 = vmatprep.subr.bf16.mxu0 %v14202_v14  ;;  %17311 = vst [vmem:[#allocation172_spill] sm:$0xff] %v14231_v1  ;;  %17312 = vst [vmem:[#allocation173_spill] sm:$0xff] %v14240_v3  ;;  %v14242_v4 = vpack.c.bf16 %v472_v49, %v469_v20  ;;  %v14246_v56 = vpack.c.bf16 %v669_v42, %v666_v13  ;;  %v475_v14 = vld [vmem:[#allocation30 + $0xa0] sm:$0xff]  ;;  %v532_v20 = vld [vmem:[#allocation30 + $0x268] sm:$0xff] }
 0xb0f   :  { %v14234_v8 = vadd.f32 %v14209_v28, %v2395_v40  ;;  %10747 = vmatprep.subr.bf16.mxu1 %v14213_v51  ;;  %v14248_v40 = vpack.c.bf16 %v526_v59, %v523_v24  ;;  %v672_v28 = vld [vmem:[#allocation30 + $0x6c8] sm:$0xff]  ;;  %v675_v49 = vld [vmem:[#allocation30 + $0x6e0] sm:$0xff]  ;;  %v14262_v13 = vpack.c.bf16 %v668_v26, %v665_v25  ;;  %v14264_v42 = vpack.c.bf16 %v478_v37, %v475_v14  ;;  %v674_v59 = vld [vmem:[#allocation30 + $0x6d8] sm:$0xff] }
 0xb10   :  { %17313 = vst [vmem:[#allocation174_spill] sm:$0xff] %v14242_v4  ;;  %17314 = vst [vmem:[#allocation175_spill] sm:$0xff] %v14246_v56  ;;  %v671_v24 = vld [vmem:[#allocation30 + $0x6c0] sm:$0xff]  ;;  %v481_v51 = vld [vmem:[#allocation30 + $0xd0] sm:$0xff] }
 0xb11   :  { %10493 = vmatpush1.bf16.msra.mxu0 %v14224_v52  ;;  %10749 = vmatpush3.bf16.msra.mxu1 %v14226_v43  ;;  %17315 = vst [vmem:[#allocation176_spill] sm:$0xff] %v14248_v40  ;;  %v17316_v16 = vmax.f32 %v14234_v8, 0.0  ;;  %17317 = vst [vmem:[#allocation177_spill] sm:$0xff] %v14262_v13  ;;  %v14270_v43 = vpack.c.bf16 %v532_v20, %v529_v62  ;;  %v14274_v14 = vpack.c.bf16 %v674_v59, %v671_v24  ;;  %v677_v25 = vld [vmem:[#allocation30 + $0x6f0] sm:$0xff]  ;;  %v680_v26 = vld [vmem:[#allocation30 + $0x708] sm:$0xff] }
 0xb12   :  { %10495 = vmatprep.subr.bf16.mxu0 %v14229_v53  ;;  %10751 = vmatprep.subr.bf16.mxu1 %v14231_v1  ;;  %17318 = vst [vmem:[#allocation178_spill] sm:$0xff] %v14264_v42  ;;  %v14276_v37 = vpack.c.bf16 %v484_v45, %v481_v51  ;;  %v487_v62 = vld [vmem:[#allocation30 + $0x100] sm:$0xff]  ;;  %v490_v20 = vld [vmem:[#allocation30 + $0x118] sm:$0xff]  ;;  %v14286_v45 = vpack.c.bf16 %v680_v26, %v677_v25 }
 0xb13   :  { %v14250_v52 = vpop.f32.mrb[30].mxu0  ;;  %v14252_v58 = vpop.f32.mrb[26].mxu1  ;;  %2918 = vmatprep.mubr.f32.mxu0 %v17316_v16  ;;  %v14268_v16 = vpack.c.bf16 %v675_v49, %v672_v28  ;;  %17320 = vst [vmem:[#allocation180_spill] sm:$0xff] %v14270_v43  ;;  %17321 = vst [vmem:[#allocation181_spill] sm:$0xff] %v14274_v14  ;;  %v14288_v51 = vpack.c.bf16 %v490_v20, %v487_v62  ;;  %v683_v24 = vld [vmem:[#allocation30 + $0x720] sm:$0xff]  ;;  %v686_v59 = vld [vmem:[#allocation30 + $0x738] sm:$0xff] }
 0xb14   :  { %v14256_v53 = vpop.f32.mrb[31].mxu0  ;;  %v14258_v1 = vpop.f32.mrb[27].mxu1  ;;  %17322 = vst [vmem:[#allocation182_spill] sm:$0xff] %v14276_v37  ;;  %17325 = vst [vmem:[#allocation185_spill] sm:$0xff] %v14286_v45  ;;  %v14298_v25 = vpack.c.bf16 %v686_v59, %v683_v24  ;;  %v689_v62 = vld [vmem:[#allocation30 + $0x750] sm:$0xff]  ;;  %v692_v20 = vld [vmem:[#allocation30 + $0x768] sm:$0xff] }
 0xb15   :  { %10497 = vmatpush1.bf16.msra.mxu0 %v14240_v3  ;;  %10753 = vmatpush3.bf16.msra.mxu1 %v14242_v4  ;;  %17319 = vst [vmem:[#allocation179_spill] sm:$0xff] %v14268_v16  ;;  %v681_v3 = vld [vmem:[#allocation30 + $0x710] sm:$0xff]  ;;  %v538_v4 = vld [vmem:[#allocation30 + $0x298] sm:$0xff]  ;;  %17326 = vst [vmem:[#allocation186_spill] sm:$0xff] %v14288_v51  ;;  %v14310_v24 = vpack.c.bf16 %v692_v20, %v689_v62 }
 0xb16   :  { %10499 = vmatprep.subr.bf16.mxu0 %v14246_v56  ;;  %10755 = vmatprep.subr.bf16.mxu1 %v14248_v40  ;;  %v14280_v28 = vpack.c.bf16 %v681_v3, %v678_v48  ;;  %v14282_v49 = vpack.c.bf16 %v538_v4, %v535_v35  ;;  %v684_v56 = vld [vmem:[#allocation30 + $0x728] sm:$0xff]  ;;  %v541_v40 = vld [vmem:[#allocation30 + $0x2b0] sm:$0xff]  ;;  %17329 = vst [vmem:[#allocation189_spill] sm:$0xff] %v14298_v25 }
 0xb17   :  { %v493_v3 = vld [vmem:[#allocation30 + $0x130] sm:$0xff]  ;;  %v496_v4 = vld [vmem:[#allocation30 + $0x148] sm:$0xff]  ;;  %17333 = vst [vmem:[#allocation193_spill] sm:$0xff] %v14310_v24 }
 0xb18   :  { %17323 = vst [vmem:[#allocation183_spill] sm:$0xff] %v14280_v28  ;;  %17324 = vst [vmem:[#allocation184_spill] sm:$0xff] %v14282_v49  ;;  %v14300_v26 = vpack.c.bf16 %v496_v4, %v493_v3  ;;  %v695_v3 = vld [vmem:[#allocation30 + $0x780] sm:$0xff]  ;;  %v556_v4 = vld [vmem:[#allocation30 + $0x328] sm:$0xff] }
 0xb19   :  { %10501 = vmatpush1.bf16.msra.mxu0 %v14262_v13  ;;  %10757 = vmatpush3.bf16.msra.mxu1 %v14264_v42  ;;  %v687_v13 = vld [vmem:[#allocation30 + $0x740] sm:$0xff]  ;;  %v544_v42 = vld [vmem:[#allocation30 + $0x2c8] sm:$0xff] }
 0xb1a   :  { %10503 = vmatprep.subr.bf16.mxu0 %v14268_v16  ;;  %10759 = vmatprep.subr.bf16.mxu1 %v14270_v43  ;;  %v14292_v35 = vpack.c.bf16 %v687_v13, %v684_v56  ;;  %v14294_v48 = vpack.c.bf16 %v544_v42, %v541_v40  ;;  %v690_v16 = vld [vmem:[#allocation30 + $0x758] sm:$0xff]  ;;  %v547_v43 = vld [vmem:[#allocation30 + $0x2e0] sm:$0xff]  ;;  %17330 = vst [vmem:[#allocation190_spill] sm:$0xff] %v14300_v26 }
 0xb1b   :  { %v499_v13 = vld [vmem:[#allocation30 + $0x160] sm:$0xff]  ;;  %v502_v42 = vld [vmem:[#allocation30 + $0x178] sm:$0xff] }
 0xb1c   :  { %17327 = vst [vmem:[#allocation187_spill] sm:$0xff] %v14292_v35  ;;  %17328 = vst [vmem:[#allocation188_spill] sm:$0xff] %v14294_v48  ;;  %v14312_v59 = vpack.c.bf16 %v502_v42, %v499_v13  ;;  %v701_v13 = vld [vmem:[#allocation30 + $0x7b0] sm:$0xff]  ;;  %v708_v42 = vld [vmem:[#allocation30 + $0x7e8] sm:$0xff] }
 0xb1d   :  { %10505 = vmatpush1.bf16.msra.mxu0 %v14274_v14  ;;  %10761 = vmatpush3.bf16.msra.mxu1 %v14276_v37  ;;  %v693_v14 = vld [vmem:[#allocation30 + $0x770] sm:$0xff]  ;;  %v550_v37 = vld [vmem:[#allocation30 + $0x2f8] sm:$0xff] }
 0xb1e   :  { %10507 = vmatprep.subr.bf16.mxu0 %v14280_v28  ;;  %10763 = vmatprep.subr.bf16.mxu1 %v14282_v49  ;;  %v14304_v56 = vpack.c.bf16 %v693_v14, %v690_v16  ;;  %v14306_v40 = vpack.c.bf16 %v550_v37, %v547_v43  ;;  %v696_v28 = vld [vmem:[#allocation30 + $0x788] sm:$0xff]  ;;  %v601_v49 = vld [vmem:[#allocation30 + $0x490] sm:$0xff]  ;;  %17334 = vst [vmem:[#allocation194_spill] sm:$0xff] %v14312_v59  ;;  %v698_v14 = vld [vmem:[#allocation30 + $0x798] sm:$0xff] }
 0xb1f   :  { %v553_v37 = vld [vmem:[#allocation30 + $0x310] sm:$0xff]  ;;  %v14322_v62 = vpack.c.bf16 %v698_v14, %v695_v3  ;;  %v17341_v3 = vmax.f32 %v14181_v15, 0.0 }
 0xb20   :  { %17331 = vst [vmem:[#allocation191_spill] sm:$0xff] %v14304_v56  ;;  %17332 = vst [vmem:[#allocation192_spill] sm:$0xff] %v14306_v40  ;;  %v14324_v20 = vpack.c.bf16 %v556_v4, %v553_v37  ;;  %v17344_v4 = vmax.f32 %v14188_v5, 0.0  ;;  %v565_v15 = vld [vmem:[#allocation30 + $0x370] sm:$0xff] }
 0xb21   :  { %10509 = vmatpush1.bf16.msra.mxu0 %v14286_v45  ;;  %10765 = vmatpush3.bf16.msra.mxu1 %v14288_v51  ;;  %v699_v45 = vld [vmem:[#allocation30 + $0x7a0] sm:$0xff]  ;;  %v604_v51 = vld [vmem:[#allocation30 + $0x4a8] sm:$0xff]  ;;  %17337 = vst [vmem:[#allocation197_spill] sm:$0xff] %v14322_v62 }
 0xb22   :  { %10511 = vmatprep.subr.bf16.mxu0 %v14292_v35  ;;  %10767 = vmatprep.subr.bf16.mxu1 %v14294_v48  ;;  %v14316_v43 = vpack.c.bf16 %v699_v45, %v696_v28  ;;  %v14318_v16 = vpack.c.bf16 %v604_v51, %v601_v49  ;;  %v702_v35 = vld [vmem:[#allocation30 + $0x7b8] sm:$0xff]  ;;  %v607_v48 = vld [vmem:[#allocation30 + $0x4c0] sm:$0xff]  ;;  %17338 = vst [vmem:[#allocation198_spill] sm:$0xff] %v14324_v20  ;;  %v704_v28 = vld [vmem:[#allocation30 + $0x7c8] sm:$0xff] }
 0xb23   :  { %v559_v45 = vld [vmem:[#allocation30 + $0x340] sm:$0xff]  ;;  %v562_v51 = vld [vmem:[#allocation30 + $0x358] sm:$0xff]  ;;  %v14336_v14 = vpack.c.bf16 %v704_v28, %v701_v13  ;;  %v717_v13 = vld [vmem:[#allocation30 + $0x830] sm:$0xff] }
 0xb24   :  { %17335 = vst [vmem:[#allocation195_spill] sm:$0xff] %v14316_v43  ;;  %17336 = vst [vmem:[#allocation196_spill] sm:$0xff] %v14318_v16  ;;  %v14338_v37 = vpack.c.bf16 %v562_v51, %v559_v45  ;;  %v619_v28 = vld [vmem:[#allocation30 + $0x520] sm:$0xff]  ;;  %v622_v45 = vld [vmem:[#allocation30 + $0x538] sm:$0xff] }
 0xb25   :  { %10513 = vmatpush1.bf16.msra.mxu0 %v14298_v25  ;;  %10769 = vmatpush3.bf16.msra.mxu1 %v14300_v26  ;;  %v705_v25 = vld [vmem:[#allocation30 + $0x7d0] sm:$0xff]  ;;  %v610_v26 = vld [vmem:[#allocation30 + $0x4d8] sm:$0xff]  ;;  %17342 = vst [vmem:[#allocation201_spill] sm:$0xff] %v14336_v14 }
 0xb26   :  { %10515 = vmatprep.subr.bf16.mxu0 %v14304_v56  ;;  %10771 = vmatprep.subr.bf16.mxu1 %v14306_v40  ;;  %v14328_v49 = vpack.c.bf16 %v705_v25, %v702_v35  ;;  %v14330_v56 = vpack.c.bf16 %v610_v26, %v607_v48  ;;  %v613_v40 = vld [vmem:[#allocation30 + $0x4f0] sm:$0xff]  ;;  %17343 = vst [vmem:[#allocation202_spill] sm:$0xff] %v14338_v37  ;;  %v707_v35 = vld [vmem:[#allocation30 + $0x7e0] sm:$0xff]  ;;  %v710_v25 = vld [vmem:[#allocation30 + $0x7f8] sm:$0xff] }
 0xb27   :  { %v14350_v5 = vpack.c.bf16 %v710_v25, %v707_v35 }
 0xb28   :  { %17339 = vst [vmem:[#allocation199_spill] sm:$0xff] %v14328_v49  ;;  %17340 = vst [vmem:[#allocation200_spill] sm:$0xff] %v14330_v56 }
 0xb29   :  { %10517 = vmatpush1.bf16.msra.mxu0 %v14310_v24  ;;  %10773 = vmatpush3.bf16.msra.mxu1 %v14312_v59  ;;  %v711_v24 = vld [vmem:[#allocation30 + $0x800] sm:$0xff]  ;;  %v616_v59 = vld [vmem:[#allocation30 + $0x508] sm:$0xff]  ;;  %17347 = vst [vmem:[#allocation205_spill] sm:$0xff] %v14350_v5 }
 0xb2a   :  { %10519 = vmatprep.subr.bf16.mxu0 %v14316_v43  ;;  %10775 = vmatprep.subr.bf16.mxu1 %v14318_v16  ;;  %v14343_v48 = vpack.c.bf16 %v711_v24, %v708_v42  ;;  %v14345_v26 = vpack.c.bf16 %v616_v59, %v613_v40  ;;  %v713_v24 = vld [vmem:[#allocation30 + $0x810] sm:$0xff]  ;;  %v716_v42 = vld [vmem:[#allocation30 + $0x828] sm:$0xff]  ;;  %v14358_v59 = vpack.c.bf16 %v622_v45, %v619_v28 }
 0xb2b   :  { %v720_v43 = vld [vmem:[#allocation30 + $0x848] sm:$0xff]  ;;  %v14362_v35 = vpack.c.bf16 %v716_v42, %v713_v24  ;;  %v577_v28 = vld [vmem:[#allocation30 + $0x3d0] sm:$0xff] }
 0xb2c   :  { %3203 = vmatmul.mubr.f32.vlgmr.msra.gmra.mrb[30].mxu1 %v17341_v3  ;;  %17345 = vst [vmem:[#allocation203_spill] sm:$0xff] %v14343_v48  ;;  %17346 = vst [vmem:[#allocation204_spill] sm:$0xff] %v14345_v26  ;;  %v568_v3 = vld [vmem:[#allocation30 + $0x388] sm:$0xff]  ;;  %v725_v42 = vld [vmem:[#allocation30 + $0x870] sm:$0xff] }
 0xb2d   :  { %10521 = vmatpush1.bf16.msra.mxu0 %v14322_v62  ;;  %10777 = vmatpush3.bf16.msra.mxu1 %v14324_v20  ;;  %v714_v62 = vld [vmem:[#allocation30 + $0x818] sm:$0xff]  ;;  %v14352_v51 = vpack.c.bf16 %v568_v3, %v565_v15  ;;  %17350 = vst [vmem:[#allocation208_spill] sm:$0xff] %v14358_v59  ;;  %17351 = vst [vmem:[#allocation209_spill] sm:$0xff] %v14362_v35  ;;  %v719_v15 = vld [vmem:[#allocation30 + $0x840] sm:$0xff] }
 0xb2e   :  { %3272 = vmatprep.mubr.f32.mxu1 %v17344_v4  ;;  %10523 = vmatprep.subr.bf16.mxu0 %v14328_v49  ;;  %v14356_v40 = vpack.c.bf16 %v717_v13, %v714_v62  ;;  %v571_v4 = vld [vmem:[#allocation30 + $0x3a0] sm:$0xff]  ;;  %v574_v49 = vld [vmem:[#allocation30 + $0x3b8] sm:$0xff]  ;;  %v580_v45 = vld [vmem:[#allocation30 + $0x3e8] sm:$0xff] }
 0xb2f   :  { %10779 = vmatprep.subr.bf16.mxu1 %v14330_v56  ;;  %17348 = vst [vmem:[#allocation206_spill] sm:$0xff] %v14352_v51  ;;  %v625_v56 = vld [vmem:[#allocation30 + $0x550] sm:$0xff]  ;;  %v14364_v25 = vpack.c.bf16 %v574_v49, %v571_v4  ;;  %v722_v3 = vld [vmem:[#allocation30 + $0x858] sm:$0xff]  ;;  %v14376_v24 = vpack.c.bf16 %v580_v45, %v577_v28  ;;  %v728_v4 = vld [vmem:[#allocation30 + $0x888] sm:$0xff] }
 0xb30   :  { %17349 = vst [vmem:[#allocation207_spill] sm:$0xff] %v14356_v40  ;;  %v14374_v49 = vpack.c.bf16 %v722_v3, %v719_v15  ;;  %v14386_v15 = vpack.c.bf16 %v728_v4, %v725_v42  ;;  %v731_v28 = vld [vmem:[#allocation30 + $0x8a0] sm:$0xff]  ;;  %v734_v45 = vld [vmem:[#allocation30 + $0x8b8] sm:$0xff]  ;;  %v14402_v4 = vrot.slane %v14109_v7, %v14112_v30 }
 0xb31   :  { %10525 = vmatpush1.bf16.msra.mxu0 %v14336_v14  ;;  %10781 = vmatpush3.bf16.msra.mxu1 %v14338_v37  ;;  %v723_v14 = vld [vmem:[#allocation30 + $0x860] sm:$0xff]  ;;  %v628_v37 = vld [vmem:[#allocation30 + $0x568] sm:$0xff]  ;;  %17352 = vst [vmem:[#allocation210_spill] sm:$0xff] %v14364_v25  ;;  %17356 = vst [vmem:[#allocation214_spill] sm:$0xff] %v14376_v24 }
 0xb32   :  { %10527 = vmatprep.subr.bf16.mxu0 %v14343_v48  ;;  %10783 = vmatprep.subr.bf16.mxu1 %v14345_v26  ;;  %v14368_v62 = vpack.c.bf16 %v723_v14, %v720_v43  ;;  %v14370_v13 = vpack.c.bf16 %v628_v37, %v625_v56  ;;  %v726_v48 = vld [vmem:[#allocation30 + $0x878] sm:$0xff]  ;;  %v631_v26 = vld [vmem:[#allocation30 + $0x580] sm:$0xff]  ;;  %17355 = vst [vmem:[#allocation213_spill] sm:$0xff] %v14374_v49  ;;  %17359 = vst [vmem:[#allocation217_spill] sm:$0xff] %v14386_v15 }
 0xb33   :  { %v583_v14 = vld [vmem:[#allocation30 + $0x400] sm:$0xff]  ;;  %v586_v37 = vld [vmem:[#allocation30 + $0x418] sm:$0xff]  ;;  %17364 = vst [vmem:[#allocation222_spill] sm:$0xff] %v14402_v4 }
 0xb34   :  { %17353 = vst [vmem:[#allocation211_spill] sm:$0xff] %v14368_v62  ;;  %17354 = vst [vmem:[#allocation212_spill] sm:$0xff] %v14370_v13  ;;  %v14388_v3 = vpack.c.bf16 %v586_v37, %v583_v14  ;;  %v738_v42 = vld [vmem:[#allocation30 + $0x8d8] sm:$0xff]  ;;  %v2642_v14 = vsub.s32 7, %v14090_v63  ;;  %v741_v37 = vld [vmem:[#allocation30 + $0x8f0] sm:$0xff] }
 0xb35   :  { %10529 = vmatpush1.bf16.msra.mxu0 %v14350_v5  ;;  %10785 = vmatpush3.bf16.msra.mxu1 %v14352_v51  ;;  %v729_v5 = vld [vmem:[#allocation30 + $0x890] sm:$0xff]  ;;  %v634_v51 = vld [vmem:[#allocation30 + $0x598] sm:$0xff] }
 0xb36   :  { %10531 = vmatprep.subr.bf16.mxu0 %v14356_v40  ;;  %10787 = vmatprep.subr.bf16.mxu1 %v14358_v59  ;;  %v14380_v56 = vpack.c.bf16 %v729_v5, %v726_v48  ;;  %v14382_v43 = vpack.c.bf16 %v634_v51, %v631_v26  ;;  %v732_v40 = vld [vmem:[#allocation30 + $0x8a8] sm:$0xff]  ;;  %v637_v59 = vld [vmem:[#allocation30 + $0x5b0] sm:$0xff]  ;;  %17360 = vst [vmem:[#allocation218_spill] sm:$0xff] %v14388_v3 }
 0xb37   :  { %v14392_v48 = vrot.slane %v14109_v7, %v14139_v22  ;;  %v589_v51 = vld [vmem:[#allocation30 + $0x430] sm:$0xff]  ;;  %v14415_v7 = vpack.c.bf16 %v741_v37, %v738_v42  ;;  %v746_v37 = vld [vmem:[#allocation30 + $0x918] sm:$0xff] }
 0xb38   :  { %17357 = vst [vmem:[#allocation215_spill] sm:$0xff] %v14380_v56  ;;  %17358 = vst [vmem:[#allocation216_spill] sm:$0xff] %v14382_v43 }
 0xb39   :  { %10533 = vmatpush1.bf16.msra.mxu0 %v14362_v35  ;;  %10789 = vmatpush3.bf16.msra.mxu1 %v14364_v25  ;;  %v735_v35 = vld [vmem:[#allocation30 + $0x8c0] sm:$0xff]  ;;  %v640_v25 = vld [vmem:[#allocation30 + $0x5c8] sm:$0xff]  ;;  %17361 = vst [vmem:[#allocation219_spill] sm:$0xff] %v14392_v48  ;;  %17367 = vst [vmem:[#allocation225_spill] sm:$0xff] %v14415_v7 }
 0xb3a   :  { %10535 = vmatprep.subr.bf16.mxu0 %v14368_v62  ;;  %10791 = vmatprep.subr.bf16.mxu1 %v14370_v13  ;;  %v14396_v26 = vpack.c.bf16 %v735_v35, %v732_v40  ;;  %v14398_v5 = vpack.c.bf16 %v640_v25, %v637_v59  ;;  %v643_v62 = vld [vmem:[#allocation30 + $0x5e0] sm:$0xff]  ;;  %v14407_v40 = vpack.c.bf16 %v734_v45, %v731_v28  ;;  %v737_v35 = vld [vmem:[#allocation30 + $0x8d0] sm:$0xff]  ;;  %v740_v25 = vld [vmem:[#allocation30 + $0x8e8] sm:$0xff] }
 0xb3b   :  { %v598_v13 = vld [vmem:[#allocation30 + $0x478] sm:$0xff]  ;;  %v14422_v28 = vrot.slane %v14116_v27, %v2642_v14  ;;  %v747_v45 = vld [vmem:[#allocation30 + $0x920] sm:$0xff]  ;;  %v14426_v42 = vpack.c.bf16 %v740_v25, %v737_v35  ;;  %v649_v35 = vld [vmem:[#allocation30 + $0x610] sm:$0xff] }
 0xb3c   :  { %17362 = vst [vmem:[#allocation220_spill] sm:$0xff] %v14396_v26  ;;  %17363 = vst [vmem:[#allocation221_spill] sm:$0xff] %v14398_v5  ;;  %v743_v14 = vld [vmem:[#allocation30 + $0x900] sm:$0xff]  ;;  %v652_v25 = vld [vmem:[#allocation30 + $0x628] sm:$0xff] }
 0xb3d   :  { %10537 = vmatpush1.bf16.msra.mxu0 %v14374_v49  ;;  %10793 = vmatpush3.bf16.msra.mxu1 %v14376_v24  ;;  %v592_v49 = vld [vmem:[#allocation30 + $0x448] sm:$0xff]  ;;  %v646_v24 = vld [vmem:[#allocation30 + $0x5f8] sm:$0xff]  ;;  %17365 = vst [vmem:[#allocation223_spill] sm:$0xff] %v14407_v40  ;;  %17369 = vst [vmem:[#allocation227_spill] sm:$0xff] %v14422_v28 }
 0xb3e   :  { %10539 = vmatprep.subr.bf16.mxu0 %v14380_v56  ;;  %10795 = vmatprep.subr.bf16.mxu1 %v14382_v43  ;;  %v14409_v59 = vpack.c.bf16 %v592_v49, %v589_v51  ;;  %v2393_v56 = vadd.f32 %v14204_v44, %v14392_v48  ;;  %v14417_v43 = vpack.c.bf16 %v646_v24, %v643_v62  ;;  %v697_v51 = vld [vmem:[#allocation30 + $0x790] sm:$0xff]  ;;  %v700_v44 = vld [vmem:[#allocation30 + $0x7a8] sm:$0xff]  ;;  %v715_v48 = vld [vmem:[#allocation30 + $0x820] sm:$0xff] }
 0xb3f   :  { %v2466_v49 = vadd.f32 %v14215_v21, %v14402_v4  ;;  %17370 = vst [vmem:[#allocation228_spill] sm:$0xff] %v14426_v42  ;;  %v14437_v21 = vpack.c.bf16 %v700_v44, %v697_v51  ;;  %v752_v51 = vld [vmem:[#allocation30 + $0x948] sm:$0xff]  ;;  %v655_v44 = vld [vmem:[#allocation30 + $0x640] sm:$0xff]  ;;  %v658_v4 = vld [vmem:[#allocation30 + $0x658] sm:$0xff] }
 0xb40   :  { %17366 = vst [vmem:[#allocation224_spill] sm:$0xff] %v14409_v59  ;;  %17368 = vst [vmem:[#allocation226_spill] sm:$0xff] %v14417_v43  ;;  %v14431_v24 = vadd.f32 %v14123_v54, %v2393_v56  ;;  %v706_v56 = vld [vmem:[#allocation30 + $0x7d8] sm:$0xff] }
 0xb41   :  { %10541 = vmatpush1.bf16.msra.mxu0 %v14386_v15  ;;  %10797 = vmatpush3.bf16.msra.mxu1 %v14388_v3  ;;  %v595_v15 = vld [vmem:[#allocation30 + $0x460] sm:$0xff]  ;;  %v744_v3 = vld [vmem:[#allocation30 + $0x908] sm:$0xff]  ;;  %17373 = vst [vmem:[#allocation231_spill] sm:$0xff] %v14437_v21 }
 0xb42   :  { %10543 = vmatprep.subr.bf16.mxu0 %v14396_v26  ;;  %10799 = vmatprep.subr.bf16.mxu1 %v14398_v5  ;;  %v14428_v62 = vpack.c.bf16 %v598_v13, %v595_v15  ;;  %v14435_v27 = vpack.c.bf16 %v747_v45, %v744_v3  ;;  %v750_v13 = vld [vmem:[#allocation30 + $0x938] sm:$0xff]  ;;  %v753_v15 = vld [vmem:[#allocation30 + $0x950] sm:$0xff]  ;;  %v703_v26 = vld [vmem:[#allocation30 + $0x7c0] sm:$0xff]  ;;  %v16768_v3 = vmax.f32 %v14431_v24, 0.0 }
 0xb43   :  { %v749_v45 = vld [vmem:[#allocation30 + $0x930] sm:$0xff]  ;;  %v14452_v54 = vpack.c.bf16 %v753_v15, %v750_v13  ;;  %v14468_v15 = vpack.c.bf16 %v658_v4, %v655_v44 }
 0xb44   :  { %17371 = vst [vmem:[#allocation229_spill] sm:$0xff] %v14428_v62  ;;  %17372 = vst [vmem:[#allocation230_spill] sm:$0xff] %v14435_v27  ;;  %v14463_v13 = vpack.c.bf16 %v752_v51, %v749_v45  ;;  %v664_v45 = vld [vmem:[#allocation30 + $0x688] sm:$0xff]  ;;  %v762_v51 = vld [vmem:[#allocation30 + $0x998] sm:$0xff] }
 0xb45   :  { %10545 = vmatpush1.bf16.msra.mxu0 %v14407_v40  ;;  %10801 = vmatpush3.bf16.msra.mxu1 %v14409_v59  ;;  %v14440_v40 = vadd.f32 %v14422_v28, %v2466_v49  ;;  %v14449_v49 = vpack.c.bf16 %v652_v25, %v649_v35  ;;  %17376 = vst [vmem:[#allocation234_spill] sm:$0xff] %v14452_v54  ;;  %v709_v35 = vld [vmem:[#allocation30 + $0x7f0] sm:$0xff]  ;;  %v712_v25 = vld [vmem:[#allocation30 + $0x808] sm:$0xff]  ;;  %17381 = vst [vmem:[#allocation237_spill] sm:$0xff] %v14468_v15 }
 0xb46   :  { %10547 = vmatprep.subr.bf16.mxu0 %v14415_v7  ;;  %10803 = vmatprep.subr.bf16.mxu1 %v14417_v43  ;;  %v14444_v7 = vpack.c.bf16 %v746_v37, %v743_v14  ;;  %v756_v14 = vld [vmem:[#allocation30 + $0x968] sm:$0xff]  ;;  %v759_v37 = vld [vmem:[#allocation30 + $0x980] sm:$0xff]  ;;  %17379 = vst [vmem:[#allocation236_spill] sm:$0xff] %v14463_v13 }
 0xb47   :  { %17375 = vst [vmem:[#allocation233_spill] sm:$0xff] %v14449_v49  ;;  %v16771_v28 = vmax.f32 %v14440_v40, 0.0 }
 0xb48   :  { %17374 = vst [vmem:[#allocation232_spill] sm:$0xff] %v14444_v7 }
 0xb49   :  { %10549 = vmatpush1.bf16.msra.mxu0 %v14426_v42  ;;  %10805 = vmatpush3.bf16.msra.mxu1 %v14428_v62  ;;  %v14454_v42 = vpack.c.bf16 %v706_v56, %v703_v26  ;;  %v17380_v26 = vmax.f32 %v14234_v8, 0.0  ;;  %v14470_v56 = vpack.c.bf16 %v759_v37, %v756_v14  ;;  %v761_v14 = vld [vmem:[#allocation30 + $0x990] sm:$0xff]  ;;  %v764_v37 = vld [vmem:[#allocation30 + $0x9a8] sm:$0xff] }
 0xb4a   :  { %10551 = vmatprep.subr.bf16.mxu0 %v14435_v27  ;;  %10807 = vmatprep.subr.bf16.mxu1 %v14437_v21  ;;  %v17378_v27 = vmax.f32 %v14184_v9, 0.0  ;;  %v755_v9 = vld [vmem:[#allocation30 + $0x960] sm:$0xff] }
 0xb4b   :  { %17377 = vst [vmem:[#allocation235_spill] sm:$0xff] %v14454_v42  ;;  %17382 = vst [vmem:[#allocation238_spill] sm:$0xff] %v14470_v56 }
 0xb4c   :  { %2919 = vmatmul.mubr.f32.vlgmr.msra.gmra.mrb[32].mxu0 %v16768_v3  ;;  %3273 = vmatmul.mubr.f32.vlgmr.msra.gmra.mrb[32].mxu1 %v17378_v27  ;;  %v758_v27 = vld [vmem:[#allocation30 + $0x978] sm:$0xff]  ;;  %v661_v3 = vld [vmem:[#allocation30 + $0x670] sm:$0xff] }
 0xb4d   :  { %10553 = vmatpush1.bf16.msra.mxu0 %v14444_v7  ;;  %2989 = vmatprep.mubr.f32.mxu0 %v16771_v28  ;;  %v14474_v7 = vpack.c.bf16 %v712_v25, %v709_v35  ;;  %v765_v28 = vld [vmem:[#allocation30 + $0x9b0] sm:$0xff]  ;;  %v14477_v8 = vpack.c.bf16 %v758_v27, %v755_v9  ;;  %v14481_v4 = vpack.c.bf16 %v664_v45, %v661_v3  ;;  %v667_v35 = vld [vmem:[#allocation30 + $0x6a0] sm:$0xff]  ;;  %v724_v27 = vld [vmem:[#allocation30 + $0x868] sm:$0xff] }
 0xb4e   :  { %10809 = vmatpush3.bf16.msra.mxu1 %v14449_v49  ;;  %3342 = vmatprep.mubr.f32.mxu1 %v17380_v26  ;;  %v718_v49 = vld [vmem:[#allocation30 + $0x838] sm:$0xff]  ;;  %v14483_v44 = vpack.c.bf16 %v765_v28, %v762_v51  ;;  %v721_v9 = vld [vmem:[#allocation30 + $0x850] sm:$0xff]  ;;  %v767_v45 = vld [vmem:[#allocation30 + $0x9c0] sm:$0xff] }
 0xb4f   :  { %10555 = vmatprep.subr.bf16.mxu0 %v14452_v54  ;;  %10811 = vmatprep.subr.bf16.mxu1 %v14454_v42  ;;  %17383 = vst [vmem:[#allocation239_spill] sm:$0xff] %v14474_v7  ;;  %17384 = vst [vmem:[#allocation240_spill] sm:$0xff] %v14477_v8  ;;  %v14486_v25 = vpack.c.bf16 %v718_v49, %v715_v48  ;;  %v670_v26 = vld [vmem:[#allocation30 + $0x6b8] sm:$0xff]  ;;  %v768_v54 = vld [vmem:[#allocation30 + $0x9c8] sm:$0xff]  ;;  %v14498_v51 = vpack.c.bf16 %v724_v27, %v721_v9 }
 0xb50   :  { %17385 = vst [vmem:[#allocation241_spill] sm:$0xff] %v14481_v4  ;;  %17386 = vst [vmem:[#allocation242_spill] sm:$0xff] %v14483_v44  ;;  %v14493_v28 = vpack.c.bf16 %v670_v26, %v667_v35  ;;  %v770_v48 = vld [vmem:[#allocation30 + $0x9d8] sm:$0xff]  ;;  %v673_v49 = vld [vmem:[#allocation30 + $0x6d0] sm:$0xff] }
 0xb51   :  { %10557 = vmatpush1.bf16.msra.mxu0 %v14463_v13  ;;  %17387 = vst [vmem:[#allocation243_spill] sm:$0xff] %v14486_v25  ;;  %v771_v13 = vld [vmem:[#allocation30 + $0x9e0] sm:$0xff]  ;;  %17391 = vst [vmem:[#allocation247_spill] sm:$0xff] %v14498_v51  ;;  %v773_v35 = vld [vmem:[#allocation30 + $0x9f0] sm:$0xff] }
 0xb52   :  { %10813 = vmatpush3.bf16.msra.mxu1 %v14468_v15  ;;  %10559 = vmatprep.subr.bf16.mxu0 %v14470_v56  ;;  %v14489_v15 = vpack.c.bf16 %v764_v37, %v761_v14  ;;  %17389 = vst [vmem:[#allocation245_spill] sm:$0xff] %v14493_v28  ;;  %v14495_v3 = vpack.c.bf16 %v771_v13, %v768_v54  ;;  %v676_v56 = vld [vmem:[#allocation30 + $0x6e8] sm:$0xff]  ;;  %v727_v14 = vld [vmem:[#allocation30 + $0x880] sm:$0xff]  ;;  %v730_v37 = vld [vmem:[#allocation30 + $0x898] sm:$0xff] }
 0xb53   :  { %10815 = vmatprep.subr.bf16.mxu1 %v14474_v7  ;;  %v774_v7 = vld [vmem:[#allocation30 + $0x9f8] sm:$0xff]  ;;  %v14505_v54 = vpack.c.bf16 %v676_v56, %v673_v49  ;;  %v776_v26 = vld [vmem:[#allocation30 + $0xa08] sm:$0xff]  ;;  %v679_v9 = vld [vmem:[#allocation30 + $0x700] sm:$0xff]  ;;  %v14510_v27 = vpack.c.bf16 %v730_v37, %v727_v14 }
 0xb54   :  { %17388 = vst [vmem:[#allocation244_spill] sm:$0xff] %v14489_v15  ;;  %17390 = vst [vmem:[#allocation246_spill] sm:$0xff] %v14495_v3  ;;  %v782_v49 = vld [vmem:[#allocation30 + $0xa38] sm:$0xff]  ;;  %v685_v14 = vld [vmem:[#allocation30 + $0x730] sm:$0xff] }
 0xb55   :  { %10561 = vmatpush1.bf16.msra.mxu0 %v14477_v8  ;;  %v777_v8 = vld [vmem:[#allocation30 + $0xa10] sm:$0xff]  ;;  %17393 = vst [vmem:[#allocation249_spill] sm:$0xff] %v14505_v54  ;;  %17395 = vst [vmem:[#allocation251_spill] sm:$0xff] %v14510_v27 }
 0xb56   :  { %10817 = vmatpush3.bf16.msra.mxu1 %v14481_v4  ;;  %10563 = vmatprep.subr.bf16.mxu0 %v14483_v44  ;;  %v14501_v4 = vpack.c.bf16 %v770_v48, %v767_v45  ;;  %v14507_v13 = vpack.c.bf16 %v777_v8, %v774_v7  ;;  %v682_v44 = vld [vmem:[#allocation30 + $0x718] sm:$0xff]  ;;  %v733_v45 = vld [vmem:[#allocation30 + $0x8b0] sm:$0xff]  ;;  %v736_v48 = vld [vmem:[#allocation30 + $0x8c8] sm:$0xff] }
 0xb57   :  { %10819 = vmatprep.subr.bf16.mxu1 %v14486_v25  ;;  %v780_v25 = vld [vmem:[#allocation30 + $0xa28] sm:$0xff]  ;;  %v14517_v7 = vpack.c.bf16 %v682_v44, %v679_v9  ;;  %v779_v8 = vld [vmem:[#allocation30 + $0xa20] sm:$0xff]  ;;  %v14522_v37 = vpack.c.bf16 %v736_v48, %v733_v45 }
 0xb58   :  { %17392 = vst [vmem:[#allocation248_spill] sm:$0xff] %v14501_v4  ;;  %17394 = vst [vmem:[#allocation250_spill] sm:$0xff] %v14507_v13  ;;  %v788_v9 = vld [vmem:[#allocation30 + $0xa68] sm:$0xff]  ;;  %v691_v45 = vld [vmem:[#allocation30 + $0x760] sm:$0xff] }
 0xb59   :  { %10565 = vmatpush1.bf16.msra.mxu0 %v14489_v15  ;;  %v783_v15 = vld [vmem:[#allocation30 + $0xa40] sm:$0xff]  ;;  %17397 = vst [vmem:[#allocation253_spill] sm:$0xff] %v14517_v7  ;;  %17399 = vst [vmem:[#allocation255_spill] sm:$0xff] %v14522_v37 }
 0xb5a   :  { %10821 = vmatpush3.bf16.msra.mxu1 %v14493_v28  ;;  %10567 = vmatprep.subr.bf16.mxu0 %v14495_v3  ;;  %v14513_v28 = vpack.c.bf16 %v776_v26, %v773_v35  ;;  %v14519_v56 = vpack.c.bf16 %v783_v15, %v780_v25  ;;  %v688_v3 = vld [vmem:[#allocation30 + $0x748] sm:$0xff]  ;;  %v739_v35 = vld [vmem:[#allocation30 + $0x8e0] sm:$0xff]  ;;  %v742_v26 = vld [vmem:[#allocation30 + $0x8f8] sm:$0xff] }
 0xb5b   :  { %10823 = vmatprep.subr.bf16.mxu1 %v14498_v51  ;;  %v786_v51 = vld [vmem:[#allocation30 + $0xa58] sm:$0xff]  ;;  %v14529_v15 = vpack.c.bf16 %v688_v3, %v685_v14  ;;  %v785_v25 = vld [vmem:[#allocation30 + $0xa50] sm:$0xff]  ;;  %v14534_v48 = vpack.c.bf16 %v742_v26, %v739_v35 }
 0xb5c   :  { %17396 = vst [vmem:[#allocation252_spill] sm:$0xff] %v14513_v28  ;;  %17398 = vst [vmem:[#allocation254_spill] sm:$0xff] %v14519_v56  ;;  %v794_v14 = vld [vmem:[#allocation30 + $0xa98] sm:$0xff]  ;;  %v745_v26 = vld [vmem:[#allocation30 + $0x910] sm:$0xff] }
 0xb5d   :  { %10569 = vmatpush1.bf16.msra.mxu0 %v14501_v4  ;;  %v789_v4 = vld [vmem:[#allocation30 + $0xa70] sm:$0xff]  ;;  %17401 = vst [vmem:[#allocation257_spill] sm:$0xff] %v14529_v15  ;;  %17403 = vst [vmem:[#allocation259_spill] sm:$0xff] %v14534_v48 }
 0xb5e   :  { %10825 = vmatpush3.bf16.msra.mxu1 %v14505_v54  ;;  %10571 = vmatprep.subr.bf16.mxu0 %v14507_v13  ;;  %v14525_v54 = vpack.c.bf16 %v782_v49, %v779_v8  ;;  %v14531_v44 = vpack.c.bf16 %v789_v4, %v786_v51  ;;  %v694_v13 = vld [vmem:[#allocation30 + $0x778] sm:$0xff]  ;;  %v793_v8 = vld [vmem:[#allocation30 + $0xa90] sm:$0xff]  ;;  %v796_v49 = vld [vmem:[#allocation30 + $0xaa8] sm:$0xff] }
 0xb5f   :  { %10827 = vmatprep.subr.bf16.mxu1 %v14510_v27  ;;  %v792_v27 = vld [vmem:[#allocation30 + $0xa88] sm:$0xff]  ;;  %v14541_v4 = vpack.c.bf16 %v694_v13, %v691_v45  ;;  %v791_v51 = vld [vmem:[#allocation30 + $0xa80] sm:$0xff]  ;;  %v14546_v35 = vpack.c.bf16 %v796_v49, %v793_v8  ;;  %v797_v13 = vld [vmem:[#allocation30 + $0xab0] sm:$0xff] }
 0xb60   :  { %17400 = vst [vmem:[#allocation256_spill] sm:$0xff] %v14525_v54  ;;  %17402 = vst [vmem:[#allocation258_spill] sm:$0xff] %v14531_v44  ;;  %v751_v45 = vld [vmem:[#allocation30 + $0x940] sm:$0xff] }
 0xb61   :  { %10573 = vmatpush1.bf16.msra.mxu0 %v14513_v28  ;;  %v795_v28 = vld [vmem:[#allocation30 + $0xaa0] sm:$0xff]  ;;  %17405 = vst [vmem:[#allocation261_spill] sm:$0xff] %v14541_v4  ;;  %17407 = vst [vmem:[#allocation263_spill] sm:$0xff] %v14546_v35 }
 0xb62   :  { %10829 = vmatpush3.bf16.msra.mxu1 %v14517_v7  ;;  %10575 = vmatprep.subr.bf16.mxu0 %v14519_v56  ;;  %v14537_v7 = vpack.c.bf16 %v788_v9, %v785_v25  ;;  %v14543_v3 = vpack.c.bf16 %v795_v28, %v792_v27  ;;  %v748_v56 = vld [vmem:[#allocation30 + $0x928] sm:$0xff]  ;;  %v799_v25 = vld [vmem:[#allocation30 + $0xac0] sm:$0xff]  ;;  %v802_v9 = vld [vmem:[#allocation30 + $0xad8] sm:$0xff] }
 0xb63   :  { %10831 = vmatprep.subr.bf16.mxu1 %v14522_v37  ;;  %v798_v37 = vld [vmem:[#allocation30 + $0xab8] sm:$0xff]  ;;  %v14553_v28 = vpack.c.bf16 %v748_v56, %v745_v26  ;;  %v800_v27 = vld [vmem:[#allocation30 + $0xac8] sm:$0xff]  ;;  %v14558_v49 = vpack.c.bf16 %v802_v9, %v799_v25  ;;  %v17414_v26 = vmax.f32 %v14440_v40, 0.0  ;;  %v803_v25 = vld [vmem:[#allocation30 + $0xae0] sm:$0xff] }
 0xb64   :  { %17404 = vst [vmem:[#allocation260_spill] sm:$0xff] %v14537_v7  ;;  %17406 = vst [vmem:[#allocation262_spill] sm:$0xff] %v14543_v3  ;;  %v14563_v56 = vpack.c.bf16 %v800_v27, %v797_v13  ;;  %v806_v9 = vld [vmem:[#allocation30 + $0xaf8] sm:$0xff]  ;;  %v813_v27 = vld [vmem:[#allocation30 + $0xb30] sm:$0xff] }
 0xb65   :  { %10577 = vmatpush1.bf16.msra.mxu0 %v14525_v54  ;;  %v801_v54 = vld [vmem:[#allocation30 + $0xad0] sm:$0xff]  ;;  %17409 = vst [vmem:[#allocation265_spill] sm:$0xff] %v14553_v28  ;;  %17411 = vst [vmem:[#allocation267_spill] sm:$0xff] %v14558_v49  ;;  %v810_v13 = vld [vmem:[#allocation30 + $0xb18] sm:$0xff]  ;;  %v14577_v40 = vpack.c.bf16 %v806_v9, %v803_v25 }
 0xb66   :  { %10833 = vmatpush3.bf16.msra.mxu1 %v14529_v15  ;;  %10579 = vmatprep.subr.bf16.mxu0 %v14531_v44  ;;  %v14549_v15 = vpack.c.bf16 %v794_v14, %v791_v51  ;;  %v14556_v8 = vpack.c.bf16 %v801_v54, %v798_v37  ;;  %v754_v44 = vld [vmem:[#allocation30 + $0x958] sm:$0xff]  ;;  %v805_v51 = vld [vmem:[#allocation30 + $0xaf0] sm:$0xff]  ;;  %v808_v14 = vld [vmem:[#allocation30 + $0xb08] sm:$0xff]  ;;  %17413 = vst [vmem:[#allocation268_spill] sm:$0xff] %v14563_v56 }
 0xb67   :  { %10835 = vmatprep.subr.bf16.mxu1 %v14534_v48  ;;  %v804_v48 = vld [vmem:[#allocation30 + $0xae8] sm:$0xff]  ;;  %v14568_v54 = vpack.c.bf16 %v754_v44, %v751_v45  ;;  %17418 = vst [vmem:[#allocation272_spill] sm:$0xff] %v14577_v40  ;;  %v14583_v44 = vpack.c.bf16 %v813_v27, %v810_v13  ;;  %v817_v25 = vld [vmem:[#allocation30 + $0xb50] sm:$0xff]  ;;  %v815_v13 = vld [vmem:[#allocation30 + $0xb40] sm:$0xff] }
 0xb68   :  { %17408 = vst [vmem:[#allocation264_spill] sm:$0xff] %v14549_v15  ;;  %17410 = vst [vmem:[#allocation266_spill] sm:$0xff] %v14556_v8  ;;  %v812_v45 = vld [vmem:[#allocation30 + $0xb28] sm:$0xff] }
 0xb69   :  { %10581 = vmatpush1.bf16.msra.mxu0 %v14537_v7  ;;  %v807_v7 = vld [vmem:[#allocation30 + $0xb00] sm:$0xff]  ;;  %17415 = vst [vmem:[#allocation269_spill] sm:$0xff] %v14568_v54  ;;  %17420 = vst [vmem:[#allocation274_spill] sm:$0xff] %v14583_v44  ;;  %v820_v9 = vld [vmem:[#allocation30 + $0xb68] sm:$0xff] }
 0xb6a   :  { %10837 = vmatpush3.bf16.msra.mxu1 %v14541_v4  ;;  %10583 = vmatprep.subr.bf16.mxu0 %v14543_v3  ;;  %v17412_v4 = vmax.f32 %v14431_v24, 0.0  ;;  %v14570_v37 = vpack.c.bf16 %v807_v7, %v804_v48  ;;  %v757_v3 = vld [vmem:[#allocation30 + $0x970] sm:$0xff]  ;;  %v14574_v24 = vpack.c.bf16 %v808_v14, %v805_v51  ;;  %v763_v51 = vld [vmem:[#allocation30 + $0x9a0] sm:$0xff]  ;;  %v14598_v27 = vpack.c.bf16 %v820_v9, %v817_v25 }
 0xb6b   :  { %10839 = vmatprep.subr.bf16.mxu1 %v14546_v35  ;;  %v809_v48 = vld [vmem:[#allocation30 + $0xb10] sm:$0xff]  ;;  %v775_v25 = vld [vmem:[#allocation30 + $0xa00] sm:$0xff] }
 0xb6c   :  { %17416 = vst [vmem:[#allocation270_spill] sm:$0xff] %v14570_v37  ;;  %17417 = vst [vmem:[#allocation271_spill] sm:$0xff] %v14574_v24 }
 0xb6d   :  { %3343 = vmatmul.mubr.f32.vlgmr.msra.gmra.mrb[34].mxu1 %v17412_v4  ;;  %10585 = vmatpush1.bf16.msra.mxu0 %v14549_v15  ;;  %v760_v4 = vld [vmem:[#allocation30 + $0x988] sm:$0xff]  ;;  %v811_v15 = vld [vmem:[#allocation30 + $0xb20] sm:$0xff]  ;;  %17425 = vst [vmem:[#allocation279_spill] sm:$0xff] %v14598_v27 }
 0xb6e   :  { %10841 = vmatpush3.bf16.msra.mxu1 %v14553_v28  ;;  %3412 = vmatprep.mubr.f32.mxu1 %v17414_v26  ;;  %v814_v28 = vld [vmem:[#allocation30 + $0xb38] sm:$0xff]  ;;  %v14581_v7 = vpack.c.bf16 %v760_v4, %v757_v3 }
 0xb6f   :  { %10587 = vmatprep.subr.bf16.mxu0 %v14556_v8  ;;  %10843 = vmatprep.subr.bf16.mxu1 %v14558_v49  ;;  %v14586_v14 = vpack.c.bf16 %v814_v28, %v811_v15  ;;  %v766_v26 = vld [vmem:[#allocation30 + $0x9b8] sm:$0xff]  ;;  %v816_v8 = vld [vmem:[#allocation30 + $0xb48] sm:$0xff]  ;;  %v769_v28 = vld [vmem:[#allocation30 + $0x9d0] sm:$0xff] }
 0xb70   :  { %17419 = vst [vmem:[#allocation273_spill] sm:$0xff] %v14581_v7  ;;  %v14593_v3 = vpack.c.bf16 %v766_v26, %v763_v51  ;;  %v818_v15 = vld [vmem:[#allocation30 + $0xb58] sm:$0xff]  ;;  %v821_v51 = vld [vmem:[#allocation30 + $0xb70] sm:$0xff]  ;;  %v824_v26 = vld [vmem:[#allocation30 + $0xb88] sm:$0xff] }
 0xb71   :  { %10589 = vmatpush1.bf16.msra.mxu0 %v14563_v56  ;;  %17421 = vst [vmem:[#allocation275_spill] sm:$0xff] %v14586_v14  ;;  %v819_v56 = vld [vmem:[#allocation30 + $0xb60] sm:$0xff] }
 0xb72   :  { %10845 = vmatpush3.bf16.msra.mxu1 %v14568_v54  ;;  %10591 = vmatprep.subr.bf16.mxu0 %v14570_v37  ;;  %v14589_v54 = vpack.c.bf16 %v812_v45, %v809_v48  ;;  %17423 = vst [vmem:[#allocation277_spill] sm:$0xff] %v14593_v3  ;;  %v14595_v4 = vpack.c.bf16 %v819_v56, %v816_v8  ;;  %v772_v37 = vld [vmem:[#allocation30 + $0x9e8] sm:$0xff]  ;;  %v823_v48 = vld [vmem:[#allocation30 + $0xb80] sm:$0xff]  ;;  %v826_v45 = vld [vmem:[#allocation30 + $0xb98] sm:$0xff] }
 0xb73   :  { %10847 = vmatprep.subr.bf16.mxu1 %v14574_v24  ;;  %v822_v24 = vld [vmem:[#allocation30 + $0xb78] sm:$0xff]  ;;  %v14605_v8 = vpack.c.bf16 %v772_v37, %v769_v28  ;;  %v14610_v9 = vpack.c.bf16 %v826_v45, %v823_v48  ;;  %v781_v48 = vld [vmem:[#allocation30 + $0xa30] sm:$0xff] }
 0xb74   :  { %17422 = vst [vmem:[#allocation276_spill] sm:$0xff] %v14589_v54  ;;  %17424 = vst [vmem:[#allocation278_spill] sm:$0xff] %v14595_v4  ;;  %v830_v28 = vld [vmem:[#allocation30 + $0xbb8] sm:$0xff] }
 0xb75   :  { %10593 = vmatpush1.bf16.msra.mxu0 %v14577_v40  ;;  %v825_v40 = vld [vmem:[#allocation30 + $0xb90] sm:$0xff]  ;;  %17427 = vst [vmem:[#allocation281_spill] sm:$0xff] %v14605_v8  ;;  %17429 = vst [vmem:[#allocation283_spill] sm:$0xff] %v14610_v9 }
 0xb76   :  { %10849 = vmatpush3.bf16.msra.mxu1 %v14581_v7  ;;  %10595 = vmatprep.subr.bf16.mxu0 %v14583_v44  ;;  %v14601_v7 = vpack.c.bf16 %v818_v15, %v815_v13  ;;  %v14607_v56 = vpack.c.bf16 %v825_v40, %v822_v24  ;;  %v778_v44 = vld [vmem:[#allocation30 + $0xa18] sm:$0xff]  ;;  %v829_v13 = vld [vmem:[#allocation30 + $0xbb0] sm:$0xff]  ;;  %v832_v15 = vld [vmem:[#allocation30 + $0xbc8] sm:$0xff] }
 0xb77   :  { %10851 = vmatprep.subr.bf16.mxu1 %v14586_v14  ;;  %v828_v14 = vld [vmem:[#allocation30 + $0xba8] sm:$0xff]  ;;  %v14617_v37 = vpack.c.bf16 %v778_v44, %v775_v25  ;;  %v827_v40 = vld [vmem:[#allocation30 + $0xba0] sm:$0xff]  ;;  %v14622_v45 = vpack.c.bf16 %v832_v15, %v829_v13  ;;  %v14628_v44 = vld [vmem:[#allocation29 + $0x8] sm:$0xf] }
 0xb78   :  { %17426 = vst [vmem:[#allocation280_spill] sm:$0xff] %v14601_v7  ;;  %17428 = vst [vmem:[#allocation282_spill] sm:$0xff] %v14607_v56  ;;  %v833_v15 = vld [vmem:[#allocation30 + $0xbd0] sm:$0xff] }
 0xb79   :  { %10597 = vmatpush1.bf16.msra.mxu0 %v14589_v54  ;;  %v831_v54 = vld [vmem:[#allocation30 + $0xbc0] sm:$0xff]  ;;  %17431 = vst [vmem:[#allocation285_spill] sm:$0xff] %v14617_v37  ;;  %17433 = vst [vmem:[#allocation287_spill] sm:$0xff] %v14622_v45 }
 0xb7a   :  { %10853 = vmatpush3.bf16.msra.mxu1 %v14593_v3  ;;  %10599 = vmatprep.subr.bf16.mxu0 %v14595_v4  ;;  %v14613_v3 = vpack.c.bf16 %v824_v26, %v821_v51  ;;  %v14619_v24 = vpack.c.bf16 %v831_v54, %v828_v14  ;;  %v784_v4 = vld [vmem:[#allocation30 + $0xa48] sm:$0xff]  ;;  %v14626_v51 = vrot.slane %v14133_v2, %v14142_v19  ;;  %v835_v26 = vld [vmem:[#allocation30 + $0xbe0] sm:$0xff] }
 0xb7b   :  { %10855 = vmatprep.subr.bf16.mxu1 %v14598_v27  ;;  %v834_v27 = vld [vmem:[#allocation30 + $0xbd8] sm:$0xff]  ;;  %v14631_v54 = vpack.c.bf16 %v830_v28, %v827_v40  ;;  %v2464_v14 = vadd.f32 %v14206_v60, %v14120_v50  ;;  %v14637_v25 = vpack.c.bf16 %v784_v4, %v781_v48  ;;  %v840_v28 = vld [vmem:[#allocation30 + $0xc08] sm:$0xff]  ;;  %v889_v4 = vld [vmem:[#allocation30 + $0xd90] sm:$0xff] }
 0xb7c   :  { %17430 = vst [vmem:[#allocation284_spill] sm:$0xff] %v14613_v3  ;;  %17432 = vst [vmem:[#allocation286_spill] sm:$0xff] %v14619_v24  ;;  %v790_v40 = vld [vmem:[#allocation30 + $0xa78] sm:$0xff]  ;;  %v2537_v60 = vadd.f32 %v14256_v53, %v14626_v51  ;;  %v839_v53 = vld [vmem:[#allocation30 + $0xc00] sm:$0xff] }
 0xb7d   :  { %10601 = vmatpush1.bf16.msra.mxu0 %v14601_v7  ;;  %v837_v7 = vld [vmem:[#allocation30 + $0xbf0] sm:$0xff]  ;;  %17434 = vst [vmem:[#allocation288_spill] sm:$0xff] %v14626_v51  ;;  %17435 = vst [vmem:[#allocation289_spill] sm:$0xff] %v14631_v54  ;;  %v2678_v48 = vadd.f32 %v14127_v23, %v2464_v14  ;;  %v842_v51 = vld [vmem:[#allocation30 + $0xc18] sm:$0xff] }
 0xb7e   :  { %10857 = vmatpush3.bf16.msra.mxu1 %v14605_v8  ;;  %10603 = vmatprep.subr.bf16.mxu0 %v14607_v56  ;;  %v838_v56 = vld [vmem:[#allocation30 + $0xbf8] sm:$0xff]  ;;  %v14639_v13 = vpack.c.bf16 %v837_v7, %v834_v27  ;;  %v787_v8 = vld [vmem:[#allocation30 + $0xa60] sm:$0xff]  ;;  %v892_v7 = vld [vmem:[#allocation30 + $0xda8] sm:$0xff]  ;;  %v14665_v23 = vpack.c.bf16 %v842_v51, %v839_v53 }
 0xb7f   :  { %10859 = vmatprep.subr.bf16.mxu1 %v14610_v9  ;;  %v836_v9 = vld [vmem:[#allocation30 + $0xbe8] sm:$0xff]  ;;  %v14642_v49 = vpack.c.bf16 %v838_v56, %v835_v26  ;;  %v14656_v56 = vpack.c.bf16 %v790_v40, %v787_v8  ;;  %v841_v50 = vld [vmem:[#allocation30 + $0xc10] sm:$0xff]  ;;  %v895_v8 = vld [vmem:[#allocation30 + $0xdc0] sm:$0xff] }
 0xb80   :  { %17436 = vst [vmem:[#allocation290_spill] sm:$0xff] %v14639_v13  ;;  %v14651_v27 = vpack.c.bf16 %v836_v9, %v833_v15  ;;  %v846_v15 = vld [vmem:[#allocation30 + $0xc38] sm:$0xff]  ;;  %v849_v14 = vld [vmem:[#allocation30 + $0xc50] sm:$0xff]  ;;  %17443 = vst [vmem:[#allocation297_spill] sm:$0xff] %v14665_v23 }
 0xb81   :  { %10605 = vmatpush1.bf16.msra.mxu0 %v14613_v3  ;;  %17437 = vst [vmem:[#allocation291_spill] sm:$0xff] %v14642_v49  ;;  %v843_v3 = vld [vmem:[#allocation30 + $0xc20] sm:$0xff]  ;;  %17440 = vst [vmem:[#allocation294_spill] sm:$0xff] %v14656_v56  ;;  %v898_v40 = vld [vmem:[#allocation30 + $0xdd8] sm:$0xff] }
 0xb82   :  { %10861 = vmatpush3.bf16.msra.mxu1 %v14617_v37  ;;  %10607 = vmatprep.subr.bf16.mxu0 %v14619_v24  ;;  %v14648_v24 = vrot.slane %v14628_v44, %v14145_v31  ;;  %17439 = vst [vmem:[#allocation293_spill] sm:$0xff] %v14651_v27  ;;  %v14658_v26 = vpack.c.bf16 %v843_v3, %v840_v28  ;;  %v2690_v3 = vmax.f32 %v2678_v48, 0.0  ;;  %v855_v51 = vld [vmem:[#allocation30 + $0xc80] sm:$0xff]  ;;  %v901_v48 = vld [vmem:[#allocation30 + $0xdf0] sm:$0xff] }
 0xb83   :  { %10863 = vmatprep.subr.bf16.mxu1 %v14622_v45  ;;  %v14661_v45 = vpack.c.bf16 %v892_v7, %v889_v4  ;;  %v845_v4 = vld [vmem:[#allocation30 + $0xc30] sm:$0xff]  ;;  %v848_v7 = vld [vmem:[#allocation30 + $0xc48] sm:$0xff] }
 0xb84   :  { %17438 = vst [vmem:[#allocation292_spill] sm:$0xff] %v14648_v24  ;;  %17441 = vst [vmem:[#allocation295_spill] sm:$0xff] %v14658_v26  ;;  %v2681_v9 = vadd.f32 %v14648_v24, %v2537_v60  ;;  %v14672_v60 = vpack.c.bf16 %v849_v14, %v846_v15  ;;  %v850_v24 = vld [vmem:[#allocation30 + $0xc58] sm:$0xff]  ;;  %v851_v14 = vld [vmem:[#allocation30 + $0xc60] sm:$0xff] }
 0xb85   :  { %10609 = vmatpush1.bf16.msra.mxu0 %v14631_v54  ;;  %17442 = vst [vmem:[#allocation296_spill] sm:$0xff] %v14661_v45  ;;  %v844_v54 = vld [vmem:[#allocation30 + $0xc28] sm:$0xff] }
 0xb86   :  { %10865 = vmatpush3.bf16.msra.mxu1 %v14637_v25  ;;  %10611 = vmatprep.subr.bf16.mxu0 %v14639_v13  ;;  %v14669_v28 = vpack.c.bf16 %v844_v54, %v841_v50  ;;  %v847_v13 = vld [vmem:[#allocation30 + $0xc40] sm:$0xff]  ;;  %17445 = vst [vmem:[#allocation299_spill] sm:$0xff] %v14672_v60  ;;  %v2693_v53 = vmax.f32 %v2681_v9, 0.0  ;;  %v14677_v50 = vpack.c.bf16 %v848_v7, %v845_v4  ;;  %v853_v9 = vld [vmem:[#allocation30 + $0xc70] sm:$0xff]  ;;  %v910_v7 = vld [vmem:[#allocation30 + $0xe38] sm:$0xff] }
 0xb87   :  { %10867 = vmatprep.subr.bf16.mxu1 %v14642_v49  ;;  %v14674_v49 = vpack.c.bf16 %v898_v40, %v895_v8  ;;  %v14680_v54 = vpack.c.bf16 %v850_v24, %v847_v13  ;;  %v856_v40 = vld [vmem:[#allocation30 + $0xc88] sm:$0xff]  ;;  %v907_v4 = vld [vmem:[#allocation30 + $0xe20] sm:$0xff] }
 0xb88   :  { %17444 = vst [vmem:[#allocation298_spill] sm:$0xff] %v14669_v28  ;;  %17447 = vst [vmem:[#allocation301_spill] sm:$0xff] %v14677_v50  ;;  %v14693_v13 = vpack.c.bf16 %v856_v40, %v853_v9  ;;  %v863_v40 = vld [vmem:[#allocation30 + $0xcc0] sm:$0xff] }
 0xb89   :  { %10613 = vmatpush1.bf16.msra.mxu0 %v14651_v27  ;;  %v852_v27 = vld [vmem:[#allocation30 + $0xc68] sm:$0xff]  ;;  %17446 = vst [vmem:[#allocation300_spill] sm:$0xff] %v14674_v49  ;;  %17448 = vst [vmem:[#allocation302_spill] sm:$0xff] %v14680_v54 }
 0xb8a   :  { %10869 = vmatpush3.bf16.msra.mxu1 %v14656_v56  ;;  %10615 = vmatprep.subr.bf16.mxu0 %v14658_v26  ;;  %v904_v56 = vld [vmem:[#allocation30 + $0xe08] sm:$0xff]  ;;  %v14682_v15 = vpack.c.bf16 %v855_v51, %v852_v27  ;;  %v854_v26 = vld [vmem:[#allocation30 + $0xc78] sm:$0xff]  ;;  %17452 = vst [vmem:[#allocation306_spill] sm:$0xff] %v14693_v13 }
 0xb8b   :  { %10871 = vmatprep.subr.bf16.mxu1 %v14661_v45  ;;  %v14685_v8 = vpack.c.bf16 %v904_v56, %v901_v48  ;;  %v14689_v24 = vpack.c.bf16 %v854_v26, %v851_v14  ;;  %v857_v56 = vld [vmem:[#allocation30 + $0xc90] sm:$0xff]  ;;  %v860_v51 = vld [vmem:[#allocation30 + $0xca8] sm:$0xff]  ;;  %v14698_v48 = vpack.c.bf16 %v910_v7, %v907_v4 }
 0xb8c   :  { %2990 = vmatmul.mubr.f32.vlgmr.msra.gmra.mrb[32].mxu0 %v2690_v3  ;;  %17449 = vst [vmem:[#allocation303_spill] sm:$0xff] %v14682_v15  ;;  %v913_v26 = vld [vmem:[#allocation30 + $0xe50] sm:$0xff]  ;;  %v916_v14 = vld [vmem:[#allocation30 + $0xe68] sm:$0xff] }
 0xb8d   :  { %3413 = vmatmul.mubr.f32.vlgmr.msra.gmra.mrb[36].mxu1 %v2690_v3  ;;  %10617 = vmatpush1.bf16.msra.mxu0 %v14665_v23  ;;  %17450 = vst [vmem:[#allocation304_spill] sm:$0xff] %v14685_v8  ;;  %v858_v3 = vld [vmem:[#allocation30 + $0xc98] sm:$0xff]  ;;  %v861_v23 = vld [vmem:[#allocation30 + $0xcb0] sm:$0xff]  ;;  %17451 = vst [vmem:[#allocation305_spill] sm:$0xff] %v14689_v24  ;;  %v14710_v7 = vpack.c.bf16 %v916_v14, %v913_v26 }
 0xb8e   :  { %3060 = vmatprep.mubr.f32.mxu0 %v2693_v53  ;;  %10873 = vmatpush3.bf16.msra.mxu1 %v14669_v28  ;;  %v14695_v27 = vpack.c.bf16 %v861_v23, %v858_v3  ;;  %17454 = vst [vmem:[#allocation308_spill] sm:$0xff] %v14698_v48  ;;  %v866_v3 = vld [vmem:[#allocation30 + $0xcd8] sm:$0xff]  ;;  %v865_v4 = vld [vmem:[#allocation30 + $0xcd0] sm:$0xff]  ;;  %v871_v26 = vld [vmem:[#allocation30 + $0xd00] sm:$0xff] }
 0xb8f   :  { %3482 = vmatprep.mubr.f32.mxu1 %v2693_v53  ;;  %10619 = vmatprep.subr.bf16.mxu0 %v14672_v60  ;;  %v859_v53 = vld [vmem:[#allocation30 + $0xca0] sm:$0xff]  ;;  %v862_v60 = vld [vmem:[#allocation30 + $0xcb8] sm:$0xff]  ;;  %17458 = vst [vmem:[#allocation312_spill] sm:$0xff] %v14710_v7 }
 0xb90   :  { %10875 = vmatprep.subr.bf16.mxu1 %v14674_v49  ;;  %17453 = vst [vmem:[#allocation307_spill] sm:$0xff] %v14695_v27  ;;  %v864_v49 = vld [vmem:[#allocation30 + $0xcc8] sm:$0xff]  ;;  %v14705_v23 = vpack.c.bf16 %v862_v60, %v859_v53 }
 0xb91   :  { %10621 = vmatpush1.bf16.msra.mxu0 %v14677_v50  ;;  %v867_v50 = vld [vmem:[#allocation30 + $0xce0] sm:$0xff]  ;;  %v872_v53 = vld [vmem:[#allocation30 + $0xd08] sm:$0xff] }
 0xb92   :  { %10877 = vmatpush3.bf16.msra.mxu1 %v14680_v54  ;;  %10623 = vmatprep.subr.bf16.mxu0 %v14682_v15  ;;  %v14701_v54 = vpack.c.bf16 %v860_v51, %v857_v56  ;;  %17456 = vst [vmem:[#allocation310_spill] sm:$0xff] %v14705_v23  ;;  %v14707_v9 = vpack.c.bf16 %v867_v50, %v864_v49  ;;  %v868_v15 = vld [vmem:[#allocation30 + $0xce8] sm:$0xff]  ;;  %v919_v56 = vld [vmem:[#allocation30 + $0xe80] sm:$0xff]  ;;  %v922_v51 = vld [vmem:[#allocation30 + $0xe98] sm:$0xff] }
 0xb93   :  { %10879 = vmatprep.subr.bf16.mxu1 %v14685_v8  ;;  %v870_v8 = vld [vmem:[#allocation30 + $0xcf8] sm:$0xff]  ;;  %v14717_v49 = vpack.c.bf16 %v868_v15, %v865_v4  ;;  %v869_v50 = vld [vmem:[#allocation30 + $0xcf0] sm:$0xff]  ;;  %v14722_v14 = vpack.c.bf16 %v922_v51, %v919_v56  ;;  %v14735_v51 = vrot.slane %v14133_v2, %v14139_v22 }
 0xb94   :  { %17455 = vst [vmem:[#allocation309_spill] sm:$0xff] %v14701_v54  ;;  %17457 = vst [vmem:[#allocation311_spill] sm:$0xff] %v14707_v9  ;;  %v878_v4 = vld [vmem:[#allocation30 + $0xd38] sm:$0xff]  ;;  %v877_v56 = vld [vmem:[#allocation30 + $0xd30] sm:$0xff] }
 0xb95   :  { %10625 = vmatpush1.bf16.msra.mxu0 %v14689_v24  ;;  %v873_v24 = vld [vmem:[#allocation30 + $0xd10] sm:$0xff]  ;;  %17460 = vst [vmem:[#allocation314_spill] sm:$0xff] %v14717_v49  ;;  %17462 = vst [vmem:[#allocation316_spill] sm:$0xff] %v14722_v14 }
 0xb96   :  { %10881 = vmatpush3.bf16.msra.mxu1 %v14693_v13  ;;  %10627 = vmatprep.subr.bf16.mxu0 %v14695_v27  ;;  %v14713_v13 = vpack.c.bf16 %v866_v3, %v863_v40  ;;  %v14719_v60 = vpack.c.bf16 %v873_v24, %v870_v8  ;;  %v874_v27 = vld [vmem:[#allocation30 + $0xd18] sm:$0xff]  ;;  %v925_v40 = vld [vmem:[#allocation30 + $0xeb0] sm:$0xff]  ;;  %v928_v3 = vld [vmem:[#allocation30 + $0xec8] sm:$0xff]  ;;  %17466 = vst [vmem:[#allocation320_spill] sm:$0xff] %v14735_v51 }
 0xb97   :  { %10883 = vmatprep.subr.bf16.mxu1 %v14698_v48  ;;  %v876_v48 = vld [vmem:[#allocation30 + $0xd28] sm:$0xff]  ;;  %v14729_v15 = vpack.c.bf16 %v874_v27, %v871_v26  ;;  %v875_v24 = vld [vmem:[#allocation30 + $0xd20] sm:$0xff]  ;;  %v14742_v27 = vrot.slane %v14133_v2, %v14112_v30  ;;  %v2535_v2 = vadd.f32 %v14250_v52, %v14735_v51  ;;  %v14757_v30 = vrot.slane %v14628_v44, %v14139_v22  ;;  %v985_v52 = vld [vmem:[#allocation30 + $0x1090] sm:$0xff] }
 0xb98   :  { %17459 = vst [vmem:[#allocation313_spill] sm:$0xff] %v14713_v13  ;;  %17461 = vst [vmem:[#allocation315_spill] sm:$0xff] %v14719_v60  ;;  %v14745_v26 = vpack.c.bf16 %v878_v4, %v875_v24  ;;  %v886_v4 = vld [vmem:[#allocation30 + $0xd78] sm:$0xff] }
 0xb99   :  { %10629 = vmatpush1.bf16.msra.mxu0 %v14701_v54  ;;  %v879_v54 = vld [vmem:[#allocation30 + $0xd40] sm:$0xff]  ;;  %17464 = vst [vmem:[#allocation318_spill] sm:$0xff] %v14729_v15  ;;  %17468 = vst [vmem:[#allocation322_spill] sm:$0xff] %v14742_v27 }
 0xb9a   :  { %10885 = vmatpush3.bf16.msra.mxu1 %v14705_v23  ;;  %10631 = vmatprep.subr.bf16.mxu0 %v14707_v9  ;;  %v14725_v23 = vpack.c.bf16 %v872_v53, %v869_v50  ;;  %v14731_v8 = vpack.c.bf16 %v879_v54, %v876_v48  ;;  %v880_v50 = vld [vmem:[#allocation30 + $0xd48] sm:$0xff]  ;;  %v882_v53 = vld [vmem:[#allocation30 + $0xd58] sm:$0xff]  ;;  %v885_v9 = vld [vmem:[#allocation30 + $0xd70] sm:$0xff]  ;;  %17469 = vst [vmem:[#allocation323_spill] sm:$0xff] %v14745_v26 }
 0xb9b   :  { %10887 = vmatprep.subr.bf16.mxu1 %v14710_v7  ;;  %v931_v54 = vld [vmem:[#allocation30 + $0xee0] sm:$0xff]  ;;  %v934_v48 = vld [vmem:[#allocation30 + $0xef8] sm:$0xff]  ;;  %17472 = vst [vmem:[#allocation326_spill] sm:$0xff] %v14757_v30 }
 0xb9c   :  { %17463 = vst [vmem:[#allocation317_spill] sm:$0xff] %v14725_v23  ;;  %17465 = vst [vmem:[#allocation319_spill] sm:$0xff] %v14731_v8  ;;  %v14760_v24 = vpack.c.bf16 %v934_v48, %v931_v54 }
 0xb9d   :  { %10633 = vmatpush1.bf16.msra.mxu0 %v14713_v13  ;;  %v14738_v13 = vpack.c.bf16 %v928_v3, %v925_v40  ;;  %v14751_v40 = vpack.c.bf16 %v885_v9, %v882_v53  ;;  %v881_v3 = vld [vmem:[#allocation30 + $0xd50] sm:$0xff]  ;;  %v2608_v9 = vadd.f32 %v14258_v1, %v14742_v27  ;;  %v887_v1 = vld [vmem:[#allocation30 + $0xd80] sm:$0xff]  ;;  %v890_v27 = vld [vmem:[#allocation30 + $0xd98] sm:$0xff] }
 0xb9e   :  { %10889 = vmatpush3.bf16.msra.mxu1 %v14717_v49  ;;  %10635 = vmatprep.subr.bf16.mxu0 %v14719_v60  ;;  %v14749_v60 = vpack.c.bf16 %v880_v50, %v877_v56  ;;  %v883_v49 = vld [vmem:[#allocation30 + $0xd60] sm:$0xff]  ;;  %17473 = vst [vmem:[#allocation327_spill] sm:$0xff] %v14760_v24  ;;  %v17474_v50 = vsub.s32 3, %v14090_v63  ;;  %v14779_v63 = vadd.f32 %v14757_v30, %v2535_v2  ;;  %v997_v30 = vld [vmem:[#allocation30 + $0x10f0] sm:$0xff] }
 0xb9f   :  { %10891 = vmatprep.subr.bf16.mxu1 %v14722_v14  ;;  %17467 = vst [vmem:[#allocation321_spill] sm:$0xff] %v14738_v13  ;;  %17471 = vst [vmem:[#allocation325_spill] sm:$0xff] %v14751_v40  ;;  %v884_v14 = vld [vmem:[#allocation30 + $0xd68] sm:$0xff]  ;;  %v891_v56 = vld [vmem:[#allocation30 + $0xda0] sm:$0xff]  ;;  %v14774_v54 = vpack.c.bf16 %v886_v4, %v883_v49 }
 0xba0   :  { %17470 = vst [vmem:[#allocation324_spill] sm:$0xff] %v14749_v60  ;;  %v14767_v53 = vrot.slane %v14628_v44, %v17474_v50  ;;  %v14770_v51 = vpack.c.bf16 %v884_v14, %v881_v3  ;;  %v940_v14 = vld [vmem:[#allocation30 + $0xf28] sm:$0xff]  ;;  %v894_v3 = vld [vmem:[#allocation30 + $0xdb8] sm:$0xff]  ;;  %v991_v49 = vld [vmem:[#allocation30 + $0x10c0] sm:$0xff] }
 0xba1   :  { %10637 = vmatpush1.bf16.msra.mxu0 %v14725_v23  ;;  %v988_v23 = vld [vmem:[#allocation30 + $0x10a8] sm:$0xff]  ;;  %17477 = vst [vmem:[#allocation330_spill] sm:$0xff] %v14774_v54  ;;  %v994_v4 = vld [vmem:[#allocation30 + $0x10d8] sm:$0xff] }
 0xba2   :  { %10893 = vmatpush3.bf16.msra.mxu1 %v14729_v15  ;;  %10639 = vmatprep.subr.bf16.mxu0 %v14731_v8  ;;  %v888_v8 = vld [vmem:[#allocation30 + $0xd88] sm:$0xff]  ;;  %17475 = vst [vmem:[#allocation328_spill] sm:$0xff] %v14767_v53  ;;  %17476 = vst [vmem:[#allocation329_spill] sm:$0xff] %v14770_v51  ;;  %v14782_v50 = vpack.c.bf16 %v988_v23, %v985_v52  ;;  %v893_v23 = vld [vmem:[#allocation30 + $0xdb0] sm:$0xff] }
 0xba3   :  { %10895 = vmatprep.subr.bf16.mxu1 %v14738_v13  ;;  %v14776_v48 = vpack.c.bf16 %v891_v56, %v888_v8  ;;  %v14788_v8 = vpack.c.bf16 %v890_v27, %v887_v1  ;;  %v896_v56 = vld [vmem:[#allocation30 + $0xdc8] sm:$0xff]  ;;  %v943_v52 = vld [vmem:[#allocation30 + $0xf40] sm:$0xff] }
 0xba4   :  { %17479 = vst [vmem:[#allocation332_spill] sm:$0xff] %v14782_v50  ;;  %v900_v27 = vld [vmem:[#allocation30 + $0xde8] sm:$0xff]  ;;  %v903_v1 = vld [vmem:[#allocation30 + $0xe00] sm:$0xff] }
 0xba5   :  { %10641 = vmatpush1.bf16.msra.mxu0 %v14745_v26  ;;  %17478 = vst [vmem:[#allocation331_spill] sm:$0xff] %v14776_v48  ;;  %v937_v26 = vld [vmem:[#allocation30 + $0xf10] sm:$0xff]  ;;  %17480 = vst [vmem:[#allocation333_spill] sm:$0xff] %v14788_v8 }
 0xba6   :  { %10897 = vmatpush3.bf16.msra.mxu1 %v14749_v60  ;;  %10643 = vmatprep.subr.bf16.mxu0 %v14751_v40  ;;  %v14785_v60 = vadd.f32 %v14767_v53, %v2608_v9  ;;  %v897_v40 = vld [vmem:[#allocation30 + $0xdd0] sm:$0xff]  ;;  %v14792_v2 = vpack.c.bf16 %v940_v14, %v937_v26  ;;  %v14798_v53 = vpack.c.bf16 %v994_v4, %v991_v49  ;;  %v902_v49 = vld [vmem:[#allocation30 + $0xdf8] sm:$0xff] }
 0xba7   :  { %10899 = vmatprep.subr.bf16.mxu1 %v14760_v24  ;;  %v16960_v24 = vmax.f32 %v14779_v63, 0.0  ;;  %v14796_v9 = vpack.c.bf16 %v897_v40, %v894_v3  ;;  %v14804_v26 = vpack.c.bf16 %v896_v56, %v893_v23  ;;  %v14811_v14 = vpack.c.bf16 %v903_v1, %v900_v27  ;;  %v899_v3 = vld [vmem:[#allocation30 + $0xde0] sm:$0xff]  ;;  %v949_v4 = vld [vmem:[#allocation30 + $0xf70] sm:$0xff]  ;;  %v952_v23 = vld [vmem:[#allocation30 + $0xf88] sm:$0xff] }
 0xba8   :  { %17481 = vst [vmem:[#allocation334_spill] sm:$0xff] %v14792_v2  ;;  %17483 = vst [vmem:[#allocation336_spill] sm:$0xff] %v14798_v53  ;;  %v906_v56 = vld [vmem:[#allocation30 + $0xe18] sm:$0xff]  ;;  %v905_v1 = vld [vmem:[#allocation30 + $0xe10] sm:$0xff] }
 0xba9   :  { %10645 = vmatpush1.bf16.msra.mxu0 %v14770_v51  ;;  %17482 = vst [vmem:[#allocation335_spill] sm:$0xff] %v14796_v9  ;;  %v946_v51 = vld [vmem:[#allocation30 + $0xf58] sm:$0xff]  ;;  %17484 = vst [vmem:[#allocation337_spill] sm:$0xff] %v14804_v26 }
 0xbaa   :  { %10901 = vmatpush3.bf16.msra.mxu1 %v14774_v54  ;;  %10647 = vmatprep.subr.bf16.mxu0 %v14776_v48  ;;  %v16967_v54 = vmax.f32 %v14785_v60, 0.0  ;;  %v1000_v48 = vld [vmem:[#allocation30 + $0x1108] sm:$0xff]  ;;  %v14809_v40 = vpack.c.bf16 %v946_v51, %v943_v52  ;;  %17486 = vst [vmem:[#allocation339_spill] sm:$0xff] %v14811_v14  ;;  %v14818_v51 = vpack.c.bf16 %v902_v49, %v899_v3  ;;  %v1009_v3 = vld [vmem:[#allocation30 + $0x1150] sm:$0xff] }
 0xbab   :  { %10903 = vmatprep.subr.bf16.mxu1 %v14782_v50  ;;  %v1006_v50 = vld [vmem:[#allocation30 + $0x1138] sm:$0xff]  ;;  %v14822_v52 = vpack.c.bf16 %v952_v23, %v949_v4  ;;  %v1012_v49 = vld [vmem:[#allocation30 + $0x1168] sm:$0xff]  ;;  %v911_v23 = vld [vmem:[#allocation30 + $0xe40] sm:$0xff] }
 0xbac   :  { %17485 = vst [vmem:[#allocation338_spill] sm:$0xff] %v14809_v40  ;;  %17488 = vst [vmem:[#allocation341_spill] sm:$0xff] %v14818_v51 }
 0xbad   :  { %3483 = vmatmul.mubr.f32.vlgmr.msra.gmra.mrb[38].mxu1 %v16960_v24  ;;  %10649 = vmatpush1.bf16.msra.mxu0 %v14788_v8  ;;  %v14815_v24 = vpack.c.bf16 %v1000_v48, %v997_v30  ;;  %v909_v8 = vld [vmem:[#allocation30 + $0xe30] sm:$0xff]  ;;  %17489 = vst [vmem:[#allocation342_spill] sm:$0xff] %v14822_v52  ;;  %v908_v30 = vld [vmem:[#allocation30 + $0xe28] sm:$0xff]  ;;  %v955_v48 = vld [vmem:[#allocation30 + $0xfa0] sm:$0xff] }
 0xbae   :  { %10905 = vmatpush3.bf16.msra.mxu1 %v14792_v2  ;;  %3552 = vmatprep.mubr.f32.mxu1 %v16967_v54  ;;  %v1003_v2 = vld [vmem:[#allocation30 + $0x1120] sm:$0xff]  ;;  %v14824_v27 = vpack.c.bf16 %v909_v8, %v906_v56  ;;  %v14839_v56 = vpack.c.bf16 %v1012_v49, %v1009_v3 }
 0xbaf   :  { %10651 = vmatprep.subr.bf16.mxu0 %v14796_v9  ;;  %10907 = vmatprep.subr.bf16.mxu1 %v14798_v53  ;;  %17487 = vst [vmem:[#allocation340_spill] sm:$0xff] %v14815_v24  ;;  %v14827_v54 = vpack.c.bf16 %v1006_v50, %v1003_v2  ;;  %v958_v9 = vld [vmem:[#allocation30 + $0xfb8] sm:$0xff]  ;;  %v912_v53 = vld [vmem:[#allocation30 + $0xe48] sm:$0xff]  ;;  %v961_v2 = vld [vmem:[#allocation30 + $0xfd0] sm:$0xff] }
 0xbb0   :  { %17490 = vst [vmem:[#allocation343_spill] sm:$0xff] %v14824_v27  ;;  %v14834_v8 = vpack.c.bf16 %v958_v9, %v955_v48  ;;  %v914_v50 = vld [vmem:[#allocation30 + $0xe58] sm:$0xff]  ;;  %17495 = vst [vmem:[#allocation348_spill] sm:$0xff] %v14839_v56  ;;  %v920_v48 = vld [vmem:[#allocation30 + $0xe88] sm:$0xff] }
 0xbb1   :  { %10653 = vmatpush1.bf16.msra.mxu0 %v14804_v26  ;;  %17491 = vst [vmem:[#allocation344_spill] sm:$0xff] %v14827_v54  ;;  %v915_v26 = vld [vmem:[#allocation30 + $0xe60] sm:$0xff] }
 0xbb2   :  { %10909 = vmatpush3.bf16.msra.mxu1 %v14809_v40  ;;  %10655 = vmatprep.subr.bf16.mxu0 %v14811_v14  ;;  %v14830_v40 = vpack.c.bf16 %v908_v30, %v905_v1  ;;  %17493 = vst [vmem:[#allocation346_spill] sm:$0xff] %v14834_v8  ;;  %v14836_v4 = vpack.c.bf16 %v915_v26, %v912_v53  ;;  %v964_v14 = vld [vmem:[#allocation30 + $0xfe8] sm:$0xff]  ;;  %v1015_v1 = vld [vmem:[#allocation30 + $0x1180] sm:$0xff]  ;;  %v1018_v30 = vld [vmem:[#allocation30 + $0x1198] sm:$0xff] }
 0xbb3   :  { %10911 = vmatprep.subr.bf16.mxu1 %v14815_v24  ;;  %v918_v24 = vld [vmem:[#allocation30 + $0xe78] sm:$0xff]  ;;  %v14846_v53 = vpack.c.bf16 %v964_v14, %v961_v2  ;;  %v917_v26 = vld [vmem:[#allocation30 + $0xe70] sm:$0xff]  ;;  %v967_v3 = vld [vmem:[#allocation30 + $0x1000] sm:$0xff]  ;;  %v14851_v49 = vpack.c.bf16 %v1018_v30, %v1015_v1 }
 0xbb4   :  { %17492 = vst [vmem:[#allocation345_spill] sm:$0xff] %v14830_v40  ;;  %17494 = vst [vmem:[#allocation347_spill] sm:$0xff] %v14836_v4  ;;  %v926_v2 = vld [vmem:[#allocation30 + $0xeb8] sm:$0xff]  ;;  %v973_v1 = vld [vmem:[#allocation30 + $0x1030] sm:$0xff] }
 0xbb5   :  { %10657 = vmatpush1.bf16.msra.mxu0 %v14818_v51  ;;  %v921_v51 = vld [vmem:[#allocation30 + $0xe90] sm:$0xff]  ;;  %17497 = vst [vmem:[#allocation350_spill] sm:$0xff] %v14846_v53 }
 0xbb6   :  { %10913 = vmatpush3.bf16.msra.mxu1 %v14822_v52  ;;  %10659 = vmatprep.subr.bf16.mxu0 %v14824_v27  ;;  %v14842_v52 = vpack.c.bf16 %v914_v50, %v911_v23  ;;  %v14848_v9 = vpack.c.bf16 %v921_v51, %v918_v24  ;;  %v970_v27 = vld [vmem:[#allocation30 + $0x1018] sm:$0xff]  ;;  %v1021_v23 = vld [vmem:[#allocation30 + $0x11b0] sm:$0xff]  ;;  %v1024_v50 = vld [vmem:[#allocation30 + $0x11c8] sm:$0xff] }
 0xbb7   :  { %10915 = vmatprep.subr.bf16.mxu1 %v14827_v54  ;;  %v924_v54 = vld [vmem:[#allocation30 + $0xea8] sm:$0xff]  ;;  %v14858_v24 = vpack.c.bf16 %v970_v27, %v967_v3  ;;  %v923_v51 = vld [vmem:[#allocation30 + $0xea0] sm:$0xff]  ;;  %v14863_v30 = vpack.c.bf16 %v1024_v50, %v1021_v23  ;;  %v929_v27 = vld [vmem:[#allocation30 + $0xed0] sm:$0xff]  ;;  %v2606_v50 = vadd.f32 %v14252_v58, %v14136_v47 }
 0xbb8   :  { %17496 = vst [vmem:[#allocation349_spill] sm:$0xff] %v14842_v52  ;;  %17498 = vst [vmem:[#allocation351_spill] sm:$0xff] %v14848_v9  ;;  %v932_v3 = vld [vmem:[#allocation30 + $0xee8] sm:$0xff]  ;;  %v979_v23 = vld [vmem:[#allocation30 + $0x1060] sm:$0xff] }
 0xbb9   :  { %10661 = vmatpush1.bf16.msra.mxu0 %v14830_v40  ;;  %v927_v40 = vld [vmem:[#allocation30 + $0xec0] sm:$0xff]  ;;  %17500 = vst [vmem:[#allocation353_spill] sm:$0xff] %v14858_v24 }
 0xbba   :  { %10917 = vmatpush3.bf16.msra.mxu1 %v14834_v8  ;;  %10663 = vmatprep.subr.bf16.mxu0 %v14836_v4  ;;  %v14854_v8 = vpack.c.bf16 %v920_v48, %v917_v26  ;;  %v14860_v14 = vpack.c.bf16 %v927_v40, %v924_v54  ;;  %v976_v4 = vld [vmem:[#allocation30 + $0x1048] sm:$0xff]  ;;  %v1027_v26 = vld [vmem:[#allocation30 + $0x11e0] sm:$0xff]  ;;  %v1030_v48 = vld [vmem:[#allocation30 + $0x11f8] sm:$0xff] }
 0xbbb   :  { %10919 = vmatprep.subr.bf16.mxu1 %v14839_v56  ;;  %v930_v56 = vld [vmem:[#allocation30 + $0xed8] sm:$0xff]  ;;  %v14870_v54 = vpack.c.bf16 %v976_v4, %v973_v1  ;;  %v939_v4 = vld [vmem:[#allocation30 + $0xf20] sm:$0xff] }
 0xbbc   :  { %17499 = vst [vmem:[#allocation352_spill] sm:$0xff] %v14854_v8  ;;  %17501 = vst [vmem:[#allocation354_spill] sm:$0xff] %v14860_v14  ;;  %v938_v1 = vld [vmem:[#allocation30 + $0xf18] sm:$0xff] }
 0xbbd   :  { %10665 = vmatpush1.bf16.msra.mxu0 %v14842_v52  ;;  %v933_v52 = vld [vmem:[#allocation30 + $0xef0] sm:$0xff]  ;;  %17503 = vst [vmem:[#allocation356_spill] sm:$0xff] %v14870_v54 }
 0xbbe   :  { %10921 = vmatpush3.bf16.msra.mxu1 %v14846_v53  ;;  %10667 = vmatprep.subr.bf16.mxu0 %v14848_v9  ;;  %v14866_v53 = vpack.c.bf16 %v926_v2, %v923_v51  ;;  %v14872_v40 = vpack.c.bf16 %v933_v52, %v930_v56  ;;  %v14878_v9 = vrot.slane %v14628_v44, %v14142_v19  ;;  %v982_v2 = vld [vmem:[#allocation30 + $0x1078] sm:$0xff]  ;;  %v935_v44 = vld [vmem:[#allocation30 + $0xf00] sm:$0xff] }
 0xbbf   :  { %10923 = vmatprep.subr.bf16.mxu1 %v14851_v49  ;;  %v14881_v51 = vpack.c.bf16 %v1030_v48, %v1027_v26  ;;  %v14884_v52 = vpack.c.bf16 %v932_v3, %v929_v27  ;;  %v14888_v58 = vpack.c.bf16 %v982_v2, %v979_v23  ;;  %v942_v48 = vld [vmem:[#allocation30 + $0xf38] sm:$0xff]  ;;  %v14897_v27 = vpack.c.bf16 %v938_v1, %v935_v44  ;;  %v944_v23 = vld [vmem:[#allocation30 + $0xf48] sm:$0xff] }
 0xbc0   :  { %17502 = vst [vmem:[#allocation355_spill] sm:$0xff] %v14866_v53  ;;  %17504 = vst [vmem:[#allocation357_spill] sm:$0xff] %v14872_v40  ;;  %v14893_v26 = vadd.f32 %v14878_v9, %v2606_v50  ;;  %v948_v50 = vld [vmem:[#allocation30 + $0xf68] sm:$0xff]  ;;  %v17514_v1 = vmax.f32 %v14785_v60, 0.0 }
 0xbc1   :  { %10669 = vmatpush1.bf16.msra.mxu0 %v14854_v8  ;;  %17505 = vst [vmem:[#allocation358_spill] sm:$0xff] %v14878_v9  ;;  %17506 = vst [vmem:[#allocation359_spill] sm:$0xff] %v14881_v51  ;;  %v945_v8 = vld [vmem:[#allocation30 + $0xf50] sm:$0xff]  ;;  %v960_v60 = vld [vmem:[#allocation30 + $0xfc8] sm:$0xff] }
 0xbc2   :  { %10925 = vmatpush3.bf16.msra.mxu1 %v14858_v24  ;;  %10671 = vmatprep.subr.bf16.mxu0 %v14860_v14  ;;  %v936_v14 = vld [vmem:[#allocation30 + $0xf08] sm:$0xff]  ;;  %17507 = vst [vmem:[#allocation360_spill] sm:$0xff] %v14884_v52  ;;  %17508 = vst [vmem:[#allocation361_spill] sm:$0xff] %v14888_v58  ;;  %v14901_v3 = vpack.c.bf16 %v945_v8, %v942_v48  ;;  %v17014_v2 = vmax.f32 %v14893_v26, 0.0  ;;  %v947_v48 = vld [vmem:[#allocation30 + $0xf60] sm:$0xff] }
 0xbc3   :  { %10927 = vmatprep.subr.bf16.mxu1 %v14863_v30  ;;  %v14890_v56 = vpack.c.bf16 %v939_v4, %v936_v14  ;;  %17510 = vst [vmem:[#allocation363_spill] sm:$0xff] %v14897_v27  ;;  %v941_v14 = vld [vmem:[#allocation30 + $0xf30] sm:$0xff]  ;;  %v951_v4 = vld [vmem:[#allocation30 + $0xf80] sm:$0xff] }
 0xbc4   :  { %17511 = vst [vmem:[#allocation364_spill] sm:$0xff] %v14901_v3  ;;  %v14909_v44 = vpack.c.bf16 %v944_v23, %v941_v14  ;;  %v14914_v8 = vpack.c.bf16 %v951_v4, %v948_v50  ;;  %v953_v14 = vld [vmem:[#allocation30 + $0xf90] sm:$0xff]  ;;  %v956_v23 = vld [vmem:[#allocation30 + $0xfa8] sm:$0xff] }
 0xbc5   :  { %10673 = vmatpush1.bf16.msra.mxu0 %v14866_v53  ;;  %17509 = vst [vmem:[#allocation362_spill] sm:$0xff] %v14890_v56  ;;  %v957_v53 = vld [vmem:[#allocation30 + $0xfb0] sm:$0xff]  ;;  %v14923_v50 = vpack.c.bf16 %v956_v23, %v953_v14  ;;  %v972_v14 = vld [vmem:[#allocation30 + $0x1028] sm:$0xff]  ;;  %v975_v23 = vld [vmem:[#allocation30 + $0x1040] sm:$0xff] }
 0xbc6   :  { %10929 = vmatpush3.bf16.msra.mxu1 %v14870_v54  ;;  %10675 = vmatprep.subr.bf16.mxu0 %v14872_v40  ;;  %v17512_v40 = vmax.f32 %v14779_v63, 0.0  ;;  %17513 = vst [vmem:[#allocation365_spill] sm:$0xff] %v14909_v44  ;;  %17515 = vst [vmem:[#allocation366_spill] sm:$0xff] %v14914_v8 }
 0xbc7   :  { %10931 = vmatprep.subr.bf16.mxu1 %v14881_v51  ;;  %17518 = vst [vmem:[#allocation369_spill] sm:$0xff] %v14923_v50 }
 0xbc9   :  { %10677 = vmatpush1.bf16.msra.mxu0 %v14884_v52  ;;  %v954_v52 = vld [vmem:[#allocation30 + $0xf98] sm:$0xff] }
 0xbca   :  { %10933 = vmatpush3.bf16.msra.mxu1 %v14888_v58  ;;  %10679 = vmatprep.subr.bf16.mxu0 %v14890_v56  ;;  %v950_v56 = vld [vmem:[#allocation30 + $0xf78] sm:$0xff]  ;;  %v1029_v58 = vld [vmem:[#allocation30 + $0x11f0] sm:$0xff] }
 0xbcb   :  { %v14917_v63 = vpack.c.bf16 %v950_v56, %v947_v48  ;;  %v966_v56 = vld [vmem:[#allocation30 + $0xff8] sm:$0xff]  ;;  %v969_v48 = vld [vmem:[#allocation30 + $0x1010] sm:$0xff] }
 0xbcc   :  { %3061 = vmatmul.mubr.f32.vlgmr.msra.gmra.mrb[32].mxu0 %v17512_v40  ;;  %v14920_v40 = vpack.c.bf16 %v957_v53, %v954_v52  ;;  %v14932_v52 = vpack.c.bf16 %v969_v48, %v966_v56 }
 0xbcd   :  { %3553 = vmatmul.mubr.f32.vlgmr.msra.gmra.mrb[40].mxu1 %v17014_v2  ;;  %10681 = vmatpush1.bf16.msra.mxu0 %v14897_v27  ;;  %17516 = vst [vmem:[#allocation367_spill] sm:$0xff] %v14917_v63  ;;  %v959_v2 = vld [vmem:[#allocation30 + $0xfc0] sm:$0xff] }
 0xbce   :  { %3131 = vmatprep.mubr.f32.mxu0 %v17514_v1  ;;  %10683 = vmatprep.subr.bf16.mxu0 %v14901_v3  ;;  %17517 = vst [vmem:[#allocation368_spill] sm:$0xff] %v14920_v40  ;;  %v963_v1 = vld [vmem:[#allocation30 + $0xfe0] sm:$0xff]  ;;  %17521 = vst [vmem:[#allocation372_spill] sm:$0xff] %v14932_v52 }
 0xbcf   :  { %v14926_v4 = vpack.c.bf16 %v963_v1, %v960_v60  ;;  %v14938_v1 = vpack.c.bf16 %v975_v23, %v972_v14  ;;  %v984_v14 = vld [vmem:[#allocation30 + $0x1088] sm:$0xff]  ;;  %v987_v23 = vld [vmem:[#allocation30 + $0x10a0] sm:$0xff] }
 0xbd0   :  { %v14954_v3 = vpack.c.bf16 %v987_v23, %v984_v14  ;;  %v983_v27 = vld [vmem:[#allocation30 + $0x1080] sm:$0xff] }
 0xbd1   :  { %10685 = vmatpush1.bf16.msra.mxu0 %v14909_v44  ;;  %17519 = vst [vmem:[#allocation370_spill] sm:$0xff] %v14926_v4  ;;  %v962_v44 = vld [vmem:[#allocation30 + $0xfd8] sm:$0xff]  ;;  %17523 = vst [vmem:[#allocation374_spill] sm:$0xff] %v14938_v1 }
 0xbd2   :  { %10687 = vmatprep.subr.bf16.mxu0 %v14914_v8  ;;  %v14929_v53 = vpack.c.bf16 %v962_v44, %v959_v2  ;;  %v965_v8 = vld [vmem:[#allocation30 + $0xff0] sm:$0xff]  ;;  %v978_v44 = vld [vmem:[#allocation30 + $0x1058] sm:$0xff]  ;;  %17527 = vst [vmem:[#allocation378_spill] sm:$0xff] %v14954_v3 }
 0xbd4   :  { %17520 = vst [vmem:[#allocation371_spill] sm:$0xff] %v14929_v53 }
 0xbd5   :  { %10689 = vmatpush1.bf16.msra.mxu0 %v14917_v63  ;;  %v968_v63 = vld [vmem:[#allocation30 + $0x1008] sm:$0xff] }
 0xbd6   :  { %10691 = vmatprep.subr.bf16.mxu0 %v14920_v40  ;;  %v14935_v60 = vpack.c.bf16 %v968_v63, %v965_v8  ;;  %v971_v40 = vld [vmem:[#allocation30 + $0x1020] sm:$0xff]  ;;  %v977_v63 = vld [vmem:[#allocation30 + $0x1050] sm:$0xff] }
 0xbd8   :  { %17522 = vst [vmem:[#allocation373_spill] sm:$0xff] %v14935_v60 }
 0xbd9   :  { %10693 = vmatpush1.bf16.msra.mxu0 %v14923_v50  ;;  %v974_v50 = vld [vmem:[#allocation30 + $0x1038] sm:$0xff] }
 0xbda   :  { %10695 = vmatprep.subr.bf16.mxu0 %v14926_v4  ;;  %v981_v4 = vld [vmem:[#allocation30 + $0x1070] sm:$0xff]  ;;  %v14945_v48 = vpack.c.bf16 %v974_v50, %v971_v40  ;;  %v990_v40 = vld [vmem:[#allocation30 + $0x10b8] sm:$0xff] }
 0xbdb   :  { %v14948_v8 = vpack.c.bf16 %v981_v4, %v978_v44  ;;  %v993_v50 = vld [vmem:[#allocation30 + $0x10d0] sm:$0xff] }
 0xbdc   :  { %17524 = vst [vmem:[#allocation375_spill] sm:$0xff] %v14945_v48  ;;  %v14960_v44 = vpack.c.bf16 %v993_v50, %v990_v40 }
 0xbdd   :  { %10697 = vmatpush1.bf16.msra.mxu0 %v14929_v53  ;;  %17525 = vst [vmem:[#allocation376_spill] sm:$0xff] %v14948_v8 }
 0xbde   :  { %10699 = vmatprep.subr.bf16.mxu0 %v14932_v52  ;;  %v980_v52 = vld [vmem:[#allocation30 + $0x1068] sm:$0xff]  ;;  %17529 = vst [vmem:[#allocation380_spill] sm:$0xff] %v14960_v44 }
 0xbdf   :  { %v14940_v2 = vpop.f32.mrb[28].mxu1  ;;  %v14951_v53 = vpack.c.bf16 %v980_v52, %v977_v63  ;;  %v996_v52 = vld [vmem:[#allocation30 + $0x10e8] sm:$0xff]  ;;  %v999_v63 = vld [vmem:[#allocation30 + $0x1100] sm:$0xff] }
 0xbe0   :  { %v14942_v56 = vpop.f32.mrb[29].mxu1  ;;  %v14966_v23 = vpack.c.bf16 %v999_v63, %v996_v52 }
 0xbe1   :  { %10701 = vmatpush1.bf16.msra.mxu0 %v14935_v60  ;;  %17526 = vst [vmem:[#allocation377_spill] sm:$0xff] %v14951_v53  ;;  %v986_v60 = vld [vmem:[#allocation30 + $0x1098] sm:$0xff] }
 0xbe2   :  { %10703 = vmatprep.subr.bf16.mxu0 %v14938_v1  ;;  %v14957_v4 = vpack.c.bf16 %v986_v60, %v983_v27  ;;  %v989_v1 = vld [vmem:[#allocation30 + $0x10b0] sm:$0xff]  ;;  %17531 = vst [vmem:[#allocation382_spill] sm:$0xff] %v14966_v23  ;;  %v1002_v27 = vld [vmem:[#allocation30 + $0x1118] sm:$0xff] }
 0xbe3   :  { %v1005_v60 = vld [vmem:[#allocation30 + $0x1130] sm:$0xff] }
 0xbe4   :  { %17528 = vst [vmem:[#allocation379_spill] sm:$0xff] %v14957_v4  ;;  %v14972_v50 = vpack.c.bf16 %v1005_v60, %v1002_v27 }
 0xbe5   :  { %10705 = vmatpush1.bf16.msra.mxu0 %v14945_v48  ;;  %v992_v48 = vld [vmem:[#allocation30 + $0x10c8] sm:$0xff] }
 0xbe6   :  { %10707 = vmatprep.subr.bf16.mxu0 %v14948_v8  ;;  %v14963_v14 = vpack.c.bf16 %v992_v48, %v989_v1  ;;  %v995_v8 = vld [vmem:[#allocation30 + $0x10e0] sm:$0xff]  ;;  %17533 = vst [vmem:[#allocation384_spill] sm:$0xff] %v14972_v50  ;;  %v1008_v1 = vld [vmem:[#allocation30 + $0x1148] sm:$0xff] }
 0xbe7   :  { %v1011_v48 = vld [vmem:[#allocation30 + $0x1160] sm:$0xff] }
 0xbe8   :  { %17530 = vst [vmem:[#allocation381_spill] sm:$0xff] %v14963_v14  ;;  %v14978_v63 = vpack.c.bf16 %v1011_v48, %v1008_v1 }
 0xbe9   :  { %10709 = vmatpush1.bf16.msra.mxu0 %v14951_v53  ;;  %v998_v53 = vld [vmem:[#allocation30 + $0x10f8] sm:$0xff] }
 0xbea   :  { %10711 = vmatprep.subr.bf16.mxu0 %v14954_v3  ;;  %v14969_v40 = vpack.c.bf16 %v998_v53, %v995_v8  ;;  %v1001_v3 = vld [vmem:[#allocation30 + $0x1110] sm:$0xff]  ;;  %17535 = vst [vmem:[#allocation386_spill] sm:$0xff] %v14978_v63  ;;  %v1014_v53 = vld [vmem:[#allocation30 + $0x1178] sm:$0xff] }
 0xbeb   :  { %v1017_v8 = vld [vmem:[#allocation30 + $0x1190] sm:$0xff] }
 0xbec   :  { %17532 = vst [vmem:[#allocation383_spill] sm:$0xff] %v14969_v40  ;;  %v14984_v60 = vpack.c.bf16 %v1017_v8, %v1014_v53 }
 0xbed   :  { %10713 = vmatpush1.bf16.msra.mxu0 %v14957_v4  ;;  %v1004_v4 = vld [vmem:[#allocation30 + $0x1128] sm:$0xff] }
 0xbee   :  { %10715 = vmatprep.subr.bf16.mxu0 %v14960_v44  ;;  %v14975_v52 = vpack.c.bf16 %v1004_v4, %v1001_v3  ;;  %v1007_v44 = vld [vmem:[#allocation30 + $0x1140] sm:$0xff]  ;;  %17537 = vst [vmem:[#allocation388_spill] sm:$0xff] %v14984_v60  ;;  %v1020_v3 = vld [vmem:[#allocation30 + $0x11a8] sm:$0xff] }
 0xbef   :  { %v1023_v4 = vld [vmem:[#allocation30 + $0x11c0] sm:$0xff] }
 0xbf0   :  { %17534 = vst [vmem:[#allocation385_spill] sm:$0xff] %v14975_v52  ;;  %v14990_v48 = vpack.c.bf16 %v1023_v4, %v1020_v3 }
 0xbf1   :  { %10717 = vmatpush1.bf16.msra.mxu0 %v14963_v14  ;;  %v1010_v14 = vld [vmem:[#allocation30 + $0x1158] sm:$0xff] }
 0xbf2   :  { %10719 = vmatprep.subr.bf16.mxu0 %v14966_v23  ;;  %v14981_v27 = vpack.c.bf16 %v1010_v14, %v1007_v44  ;;  %v1013_v23 = vld [vmem:[#allocation30 + $0x1170] sm:$0xff]  ;;  %17539 = vst [vmem:[#allocation390_spill] sm:$0xff] %v14990_v48  ;;  %v1026_v14 = vld [vmem:[#allocation30 + $0x11d8] sm:$0xff] }
 0xbf4   :  { %17536 = vst [vmem:[#allocation387_spill] sm:$0xff] %v14981_v27 }
 0xbf5   :  { %10721 = vmatpush1.bf16.msra.mxu0 %v14969_v40  ;;  %v1016_v40 = vld [vmem:[#allocation30 + $0x1188] sm:$0xff] }
 0xbf6   :  { %10723 = vmatprep.subr.bf16.mxu0 %v14972_v50  ;;  %v14987_v1 = vpack.c.bf16 %v1016_v40, %v1013_v23  ;;  %v1019_v50 = vld [vmem:[#allocation30 + $0x11a0] sm:$0xff]  ;;  %v1025_v23 = vld [vmem:[#allocation30 + $0x11d0] sm:$0xff]  ;;  %v1028_v40 = vld [vmem:[#allocation30 + $0x11e8] sm:$0xff] }
 0xbf7   :  { %v14999_v3 = vpack.c.bf16 %v1028_v40, %v1025_v23  ;;  %v1048_v40 = vld [vmem:[#allocation33 + $0x80] sm:$0xff] }
 0xbf8   :  { %17538 = vst [vmem:[#allocation389_spill] sm:$0xff] %v14987_v1 }
 0xbf9   :  { %10725 = vmatpush1.bf16.msra.mxu0 %v14975_v52  ;;  %v1022_v52 = vld [vmem:[#allocation30 + $0x11b8] sm:$0xff]  ;;  %17542 = vst [vmem:[#allocation393_spill] sm:$0xff] %v14999_v3 }
 0xbfa   :  { %10727 = vmatprep.subr.bf16.mxu0 %v14978_v63  ;;  %v14993_v8 = vpack.c.bf16 %v1022_v52, %v1019_v50  ;;  %v17544_v50 = vmov 0.0  }
 0xbfc   :  { %17540 = vst [vmem:[#allocation391_spill] sm:$0xff] %v14993_v8 }
 0xbfd   :  { %10729 = vmatpush1.bf16.msra.mxu0 %v14981_v27  ;;  %v14996_v27 = vpack.c.bf16 %v1029_v58, %v1026_v14  ;;  %v15011_v58 = vld [vmem:[#allocation32] sm:$0x7] }
 0xbfe   :  { %10731 = vmatprep.subr.bf16.mxu0 %v14984_v60  ;;  %v15015_v52 = vrot.slane %v15011_v58, %v14142_v19  ;;  %v1034_v19 = vld [vmem:[#allocation33 + $0x10] sm:$0xff]  ;;  %v1041_v60 = vld [vmem:[#allocation33 + $0x48] sm:$0xff] }
 0xbff   :  { %v8842_v44 = vpop.f32.mrb[30].mxu1  ;;  %17541 = vst [vmem:[#allocation392_spill] sm:$0xff] %v14996_v27 }
 0xc00   :  { %v8843_v63 = vpop.f32.mrb[31].mxu1  ;;  %17545 = vst [vmem:[#allocation394_spill] sm:$0xff] %v15015_v52 }
 0xc01   :  { %v8844_v53 = vadd.f32 %v8843_v63, %v8842_v44  ;;  %10733 = vmatpush1.bf16.msra.mxu0 %v14987_v1  ;;  %v17543_v63 = vmax.f32 %v14893_v26, 0.0  ;;  %v1040_v1 = vld [vmem:[#allocation33 + $0x40] sm:$0xff] }
 0xc02   :  { %10735 = vmatprep.subr.bf16.mxu0 %v14990_v48  ;;  %v1052_v48 = vld [vmem:[#allocation33 + $0xa0] sm:$0xff] }
 0xc03   :  { %v3205_v26 = vadd.f32 %v8844_v53, %v15015_v52  ;;  %v1053_v53 = vld [vmem:[#allocation33 + $0xa8] sm:$0xff]  ;;  %v1042_v52 = vld [vmem:[#allocation33 + $0x50] sm:$0xff] }
 0xc05   :  { %10737 = vmatpush1.bf16.msra.mxu0 %v14993_v8  ;;  %v1035_v8 = vld [vmem:[#allocation33 + $0x18] sm:$0xff] }
 0xc06   :  { %10739 = vmatprep.subr.bf16.mxu0 %v14996_v27 }
 0xc09   :  { %10741 = vmatpush1.bf16.msra.mxu0 %v14999_v3 }
 0xc0a   :  { %11075 = vmatprep.subr.bf16.mxu0 %v13850_v57  ;;  %v1050_v57 = vld [vmem:[#allocation33 + $0x90] sm:$0xff] }
 0xc0c   :  { %3132 = vmatmul.mubr.f32.vlgmr.msra.gmra.mrb[32].mxu0 %v17543_v63  ;;  %v1049_v63 = vld [vmem:[#allocation33 + $0x88] sm:$0xff] }
 0xc0d   :  { %11077 = vmatpush1.bf16.msra.mxu0 %v13856_v10  ;;  %4970 = vmatprep.mubr.f32.mxu0 %v17544_v50  ;;  %v1032_v10 = vld [vmem:[#allocation33] sm:$0xff] }
 0xc0e   :  { %11079 = vmatprep.subr.bf16.mxu0 %v13860_v17  ;;  %v15018_v17 = vpack.c.bf16 %v1049_v63, %v1048_v40  ;;  %v1038_v40 = vld [vmem:[#allocation33 + $0x30] sm:$0xff]  ;;  %v1039_v63 = vld [vmem:[#allocation33 + $0x38] sm:$0xff] }
 0xc10   :  { %17546 = vst [vmem:[#allocation395_spill] sm:$0xff] %v15018_v17  ;;  %10935 = vmatprep.subr.bf16.mxu1 %v15018_v17 }
 0xc11   :  { %11081 = vmatpush1.bf16.msra.mxu0 %v13872_v29  ;;  %v1033_v29 = vld [vmem:[#allocation33 + $0x8] sm:$0xff] }
 0xc12   :  { %11091 = vmatprep.subr.bf16.mxu0 %v13878_v38  ;;  %v1051_v38 = vld [vmem:[#allocation33 + $0x98] sm:$0xff]  ;;  %v15020_v3 = vpack.c.bf16 %v1033_v29, %v1032_v10  ;;  %v1054_v10 = vld [vmem:[#allocation33 + $0xb0] sm:$0xff] }
 0xc13   :  { %v15022_v27 = vpack.c.bf16 %v1051_v38, %v1050_v57  ;;  %v1055_v29 = vld [vmem:[#allocation33 + $0xb8] sm:$0xff] }
 0xc14   :  { %17547 = vst [vmem:[#allocation396_spill] sm:$0xff] %v15020_v3  ;;  %10937 = vmatpush3.bf16.msra.mxu1 %v15020_v3  ;;  %v15035_v38 = vpack.c.bf16 %v1055_v29, %v1054_v10  ;;  %v15044_v10 = vpack.c.bf16 %v1041_v60, %v1040_v1 }
 0xc15   :  { %17548 = vst [vmem:[#allocation397_spill] sm:$0xff] %v15022_v27  ;;  %10939 = vmatprep.subr.bf16.mxu1 %v15022_v27 }
 0xc16   :  { %17552 = vst [vmem:[#allocation401_spill] sm:$0xff] %v15035_v38  ;;  %17555 = vst [vmem:[#allocation404_spill] sm:$0xff] %v15044_v10 }
 0xc1f   :  { %v8877_v4 = vpop.f32.mrb[32].mxu1 }
 0xc20   :  { %v8878_v44 = vpop.f32.mrb[33].mxu1 }
 0xc21   :  { %v8879_v14 = vadd.f32 %v8878_v44, %v8877_v4  ;;  %v15026_v4 = vpack.c.bf16 %v1035_v8, %v1034_v19  ;;  %v15029_v44 = vpack.c.bf16 %v1053_v53, %v1052_v48  ;;  %v1056_v8 = vld [vmem:[#allocation33 + $0xc0] sm:$0xff]  ;;  %v1057_v19 = vld [vmem:[#allocation33 + $0xc8] sm:$0xff]  ;;  %v15038_v48 = vpack.c.bf16 %v1039_v63, %v1038_v40 }
 0xc22   :  { %v15041_v53 = vpack.c.bf16 %v1057_v19, %v1056_v8  ;;  %v1060_v40 = vld [vmem:[#allocation33 + $0xe0] sm:$0xff]  ;;  %v1061_v63 = vld [vmem:[#allocation33 + $0xe8] sm:$0xff] }
 0xc23   :  { %v3275_v23 = vadd.f32 %v8879_v14, %v3205_v26  ;;  %17549 = vst [vmem:[#allocation398_spill] sm:$0xff] %v15026_v4  ;;  %17550 = vst [vmem:[#allocation399_spill] sm:$0xff] %v15029_v44  ;;  %v1036_v26 = vld [vmem:[#allocation33 + $0x20] sm:$0xff]  ;;  %v1037_v14 = vld [vmem:[#allocation33 + $0x28] sm:$0xff]  ;;  %10941 = vmatpush3.bf16.msra.mxu1 %v15026_v4  ;;  %v15053_v19 = vpack.c.bf16 %v1061_v63, %v1060_v40 }
 0xc24   :  { %v15032_v57 = vpack.c.bf16 %v1037_v14, %v1036_v26  ;;  %10943 = vmatprep.subr.bf16.mxu1 %v15029_v44  ;;  %17553 = vst [vmem:[#allocation402_spill] sm:$0xff] %v15038_v48  ;;  %17554 = vst [vmem:[#allocation403_spill] sm:$0xff] %v15041_v53  ;;  %v1058_v26 = vld [vmem:[#allocation33 + $0xd0] sm:$0xff]  ;;  %v1059_v14 = vld [vmem:[#allocation33 + $0xd8] sm:$0xff] }
 0xc25   :  { %v15047_v29 = vpack.c.bf16 %v1059_v14, %v1058_v26  ;;  %17558 = vst [vmem:[#allocation407_spill] sm:$0xff] %v15053_v19  ;;  %v1046_v63 = vld [vmem:[#allocation33 + $0x70] sm:$0xff]  ;;  %v1047_v44 = vld [vmem:[#allocation33 + $0x78] sm:$0xff] }
 0xc26   :  { %17551 = vst [vmem:[#allocation400_spill] sm:$0xff] %v15032_v57 }
 0xc27   :  { %10945 = vmatpush3.bf16.msra.mxu1 %v15032_v57  ;;  %17556 = vst [vmem:[#allocation405_spill] sm:$0xff] %v15047_v29  ;;  %v1043_v57 = vld [vmem:[#allocation33 + $0x58] sm:$0xff] }
 0xc28   :  { %10947 = vmatprep.subr.bf16.mxu1 %v15035_v38  ;;  %v15050_v8 = vpack.c.bf16 %v1043_v57, %v1042_v52  ;;  %v1044_v38 = vld [vmem:[#allocation33 + $0x60] sm:$0xff]  ;;  %v1062_v57 = vld [vmem:[#allocation33 + $0xf0] sm:$0xff] }
 0xc2a   :  { %17557 = vst [vmem:[#allocation406_spill] sm:$0xff] %v15050_v8 }
 0xc2b   :  { %10949 = vmatpush3.bf16.msra.mxu1 %v15038_v48  ;;  %v1045_v48 = vld [vmem:[#allocation33 + $0x68] sm:$0xff] }
 0xc2c   :  { %10951 = vmatprep.subr.bf16.mxu1 %v15041_v53  ;;  %v15056_v60 = vpack.c.bf16 %v1045_v48, %v1044_v38  ;;  %v1063_v53 = vld [vmem:[#allocation33 + $0xf8] sm:$0xff]  ;;  %v17562_v48 = vmov 0.0|0.0  }
 0xc2d   :  { %v15060_v40 = vpack.c.bf16 %v1063_v53, %v1062_v57 }
 0xc2e   :  { %17559 = vst [vmem:[#allocation408_spill] sm:$0xff] %v15056_v60 }
 0xc2f   :  { %10953 = vmatpush3.bf16.msra.mxu1 %v15044_v10  ;;  %17560 = vst [vmem:[#allocation409_spill] sm:$0xff] %v15060_v40 }
 0xc30   :  { %10955 = vmatprep.subr.bf16.mxu1 %v15047_v29 }
 0xc33   :  { %10957 = vmatpush3.bf16.msra.mxu1 %v15050_v8  ;;  %v15062_v8 = vpack.c.bf16 %v1047_v44, %v1046_v63  ;;  %v15073_v44 = vrot.slane %v15011_v58, %v14145_v31 }
 0xc34   :  { %10959 = vmatprep.subr.bf16.mxu1 %v15053_v19 }
 0xc35   :  { %17561 = vst [vmem:[#allocation410_spill] sm:$0xff] %v15062_v8  ;;  %17564 = vst [vmem:[#allocation412_spill] sm:$0xff] %v15073_v44 }
 0xc37   :  { %10961 = vmatpush3.bf16.msra.mxu1 %v15056_v60 }
 0xc38   :  { %10963 = vmatprep.subr.bf16.mxu1 %v15060_v40 }
 0xc3b   :  { %10965 = vmatpush3.bf16.msra.mxu1 %v15062_v8 }
 0xc3c   :  { %10966 = vmatprep.subr.bf16.mxu1 %v17562_v48 }
 0xc40   :  { %v8912_v1 = vpop.f32.mrb[34].mxu1 }
 0xc41   :  { %v8913_v26 = vpop.f32.mrb[35].mxu1 }
 0xc42   :  { %v8914_v14 = vadd.f32 %v8913_v26, %v8912_v1 }
 0xc44   :  { %v3345_v10 = vadd.f32 %v8914_v14, %v3275_v23 }
 0xc60   :  { %v8947_v52 = vpop.f32.mrb[36].mxu1 }
 0xc61   :  { %v8948_v29 = vpop.f32.mrb[37].mxu1 }
 0xc62   :  { %v8949_v4 = vadd.f32 %v8948_v29, %v8947_v52  ;;  %v15069_v29 = vrot.slane %v15011_v58, %v14139_v22 }
 0xc64   :  { %v3415_v38 = vadd.f32 %v8949_v4, %v3345_v10  ;;  %17563 = vst [vmem:[#allocation411_spill] sm:$0xff] %v15069_v29  ;;  %v2779_v4 = vadd.f32 %v14940_v2, %v15069_v29  ;;  %v2781_v10 = vadd.f32 %v14942_v56, %v15073_v44  ;;  %v1068_v2 = vld [vmem:[#allocation33 + $0x120] sm:$0xff]  ;;  %v1069_v56 = vld [vmem:[#allocation33 + $0x128] sm:$0xff] }
 0xc65   :  { %v15088_v58 = vpack.c.bf16 %v1069_v56, %v1068_v2  ;;  %v1078_v2 = vld [vmem:[#allocation33 + $0x170] sm:$0xff]  ;;  %v1079_v56 = vld [vmem:[#allocation33 + $0x178] sm:$0xff] }
 0xc67   :  { %17567 = vst [vmem:[#allocation415_spill] sm:$0xff] %v15088_v58 }
 0xc80   :  { %v8982_v1 = vpop.f32.mrb[38].mxu1 }
 0xc81   :  { %v8983_v23 = vpop.f32.mrb[39].mxu1 }
 0xc82   :  { %v8984_v26 = vadd.f32 %v8983_v23, %v8982_v1  ;;  %v1064_v1 = vld [vmem:[#allocation33 + $0x100] sm:$0xff] }
 0xc84   :  { %v3485_v14 = vadd.f32 %v8984_v26, %v3415_v38 }
 0xca0   :  { %v9017_v60 = vpop.f32.mrb[40].mxu1 }
 0xca1   :  { %v9018_v19 = vpop.f32.mrb[41].mxu1 }
 0xca2   :  { %v9019_v53 = vadd.f32 %v9018_v19, %v9017_v60  ;;  %v1065_v19 = vld [vmem:[#allocation33 + $0x108] sm:$0xff] }
 0xca3   :  { %v15079_v26 = vpack.c.bf16 %v1065_v19, %v1064_v1  ;;  %v1074_v19 = vld [vmem:[#allocation33 + $0x150] sm:$0xff] }
 0xca4   :  { %v3555_v57 = vadd.f32 %v9019_v53, %v3485_v14  ;;  %v1066_v14 = vld [vmem:[#allocation33 + $0x110] sm:$0xff]  ;;  %v1067_v53 = vld [vmem:[#allocation33 + $0x118] sm:$0xff] }
 0xca5   :  { %17565 = vst [vmem:[#allocation413_spill] sm:$0xff] %v15079_v26  ;;  %v15082_v31 = vpack.c.bf16 %v1067_v53, %v1066_v14  ;;  %v1077_v14 = vld [vmem:[#allocation33 + $0x168] sm:$0xff] }
 0xca7   :  { %17566 = vst [vmem:[#allocation414_spill] sm:$0xff] %v15082_v31 }
 0xcdf   :  { %v3133_v52 = vpop.f32.mrb[32].mxu0 }
 0xce0   :  { %v12473_v63 = vadd.f32 %v3133_v52, %v2779_v4  ;;  %v3135_v38 = vpop.f32.mrb[33].mxu0  ;;  %v1070_v4 = vld [vmem:[#allocation33 + $0x130] sm:$0xff] }
 0xce1   :  { %v12475_v60 = vadd.f32 %v3135_v38, %v2781_v10  ;;  %v1071_v10 = vld [vmem:[#allocation33 + $0x138] sm:$0xff]  ;;  %v1073_v38 = vld [vmem:[#allocation33 + $0x148] sm:$0xff] }
 0xce2   :  { %v3558_v22 = vmax.f32 %v12473_v63, 0.0  ;;  %v15092_v52 = vpack.c.bf16 %v1071_v10, %v1070_v4  ;;  %v1072_v63 = vld [vmem:[#allocation33 + $0x140] sm:$0xff]  ;;  %v398_v4 = vld [vmem:[#allocation23] sm:$0xff] }
 0xce3   :  { %v3559_v23 = vmax.f32 %v12475_v60, 0.0  ;;  %v15096_v1 = vpack.c.bf16 %v1073_v38, %v1072_v63  ;;  %v1075_v60 = vld [vmem:[#allocation33 + $0x158] sm:$0xff]  ;;  %v15108_v63 = vpack.c.bf16 %v1079_v56, %v1078_v2 }
 0xce4   :  { %17568 = vst [vmem:[#allocation416_spill] sm:$0xff] %v15092_v52  ;;  %v399_v10 = vld [vmem:[#allocation23 + $0x8] sm:$0xff] }
 0xce5   :  { %3625 = vmatprep.mubr.f32.mxu1 %v3559_v23  ;;  %17569 = vst [vmem:[#allocation417_spill] sm:$0xff] %v15096_v1  ;;  %v15100_v23 = vpack.c.bf16 %v1075_v60, %v1074_v19  ;;  %17572 = vst [vmem:[#allocation420_spill] sm:$0xff] %v15108_v63  ;;  %v15111_v38 = vpack.c.bf16 %v399_v10, %v398_v4  ;;  %v400_v19 = vld [vmem:[#allocation23 + $0x10] sm:$0xff]  ;;  %v401_v60 = vld [vmem:[#allocation23 + $0x18] sm:$0xff] }
 0xce6   :  { %3626 = vmatmul.mubr.f32.vlgmr.msra.gmra.mrb[42].mxu1 %v3558_v22  ;;  %v1076_v22 = vld [vmem:[#allocation33 + $0x160] sm:$0xff] }
 0xce7   :  { %10968 = vmatpush3.bf16.msra.mxu1 %v15079_v26  ;;  %9899 = vmatprep.mubr.msk.f32.mxu1 %vm13180_vm1, %v17544_v50  ;;  %17570 = vst [vmem:[#allocation418_spill] sm:$0xff] %v15100_v23  ;;  %v15104_v53 = vpack.c.bf16 %v1077_v14, %v1076_v22  ;;  %17573 = vst [vmem:[#allocation421_spill] sm:$0xff] %v15111_v38  ;;  %v3560_v22 = vmax.f32 %v3555_v57, 0.0  ;;  %v15115_v14 = vpack.c.bf16 %v401_v60, %v400_v19  ;;  %v1080_v4 = vld [vmem:[#allocation35] sm:$0x1] }
 0xce8   :  { %10969 = vmatprep.subr.bf16.mxu1 %v17562_v48 }
 0xce9   :  { %17571 = vst [vmem:[#allocation419_spill] sm:$0xff] %v15104_v53  ;;  %17574 = vst [vmem:[#allocation422_spill] sm:$0xff] %v15115_v14 }
 0xceb   :  { %10971 = vmatpush3.bf16.msra.mxu1 %v15082_v31 }
 0xcec   :  { %10972 = vmatprep.subr.bf16.mxu1 %v17562_v48 }
 0xcef   :  { %10974 = vmatpush3.bf16.msra.mxu1 %v15088_v58 }
 0xcf0   :  { %10975 = vmatprep.subr.bf16.mxu1 %v17562_v48 }
 0xcf3   :  { %10977 = vmatpush3.bf16.msra.mxu1 %v15092_v52 }
 0xcf4   :  { %10978 = vmatprep.subr.bf16.mxu1 %v17562_v48 }
 0xcf7   :  { %10980 = vmatpush3.bf16.msra.mxu1 %v15096_v1 }
 0xcf8   :  { %10981 = vmatprep.subr.bf16.mxu1 %v17562_v48 }
 0xcfb   :  { %10983 = vmatpush3.bf16.msra.mxu1 %v15100_v23 }
 0xcfc   :  { %10984 = vmatprep.subr.bf16.mxu1 %v17562_v48 }
 0xcff   :  { %10986 = vmatpush3.bf16.msra.mxu1 %v15104_v53 }
 0xd00   :  { %10987 = vmatprep.subr.bf16.mxu1 %v17562_v48 }
 0xd03   :  { %10989 = vmatpush3.bf16.msra.mxu1 %v15108_v63 }
 0xd04   :  { %10991 = vmatprep.subr.bf16.mxu1 %v15111_v38 }
 0xd06   :  { %9900 = vmatmul.mubr.f32.vlgmr.msra.gmra.mrb[44].mxu1 %v3560_v22 }
 0xd07   :  { %10993 = vmatpush3.bf16.msra.mxu1 %v15111_v38  ;;  %9910 = vmatprep.mubr.msk.f32.mxu1 %vm1322_vm6, %v13828_v33 }
 0xd08   :  { %10995 = vmatprep.subr.bf16.mxu1 %v15115_v14 }
 0xd0b   :  { %10997 = vmatpush3.bf16.msra.mxu1 %v15115_v14  ;;  %v8634_v14 = vld [vmem:[#allocation24] ss:$0 sm:$0xff] }
 0xd0c   :  { %10998 = vmatprep.subr.bf16.mxu1 %v17562_v48 }
 0xd0e   :  { %9911 = vmatmul.mubr.msk.f32.vlgmr.msra.gmra.mrb[46].mxu1 %vm1322_vm6, %v13826_v32 }
 0xd0f   :  { %9917 = vmatprep.mubr.msk.f32.mxu1 %vm13180_vm1, %v17544_v50 }
 0xdb9   :  { %v9052_v57 = vpop.f32.mrb[42].mxu1 }
 0xdba   :  { %v9053_v2 = vpop.f32.mrb[43].mxu1 }
 0xdbb   :  { %v9054_v56 = vadd.f32 %v9053_v2, %v9052_v57 }
 0xdbd   :  { %v3628_v10 = vadd.f32 %v9054_v56, %v1080_v4 }
 0xdd9   :  { %v3697_v19 = vpop.f32.mrb[44].mxu1 }
 0xdda   :  { %v15127_v60 = vadd.f32 %v3697_v19, %v3628_v10  ;;  %v9901_v22 = vpop.f32.mrb[45].mxu1 }
 0xddc   :  { %17575 = vst [vmem:[#allocation423_spill] sm:$0xff] %v15127_v60  ;;  %3701 = vst [vmem:[#allocation39] sm:$0x1] %v15127_v60 }
 0xde1   :  { %v9912_v38 = vpop.f32.mrb[46].mxu1 }
 0xde2   :  { %v3823_v63 = vadd.f32 %v9912_v38, %v8634_v14  ;;  %v3817_v53 = vpop.f32.mrb[47].mxu1 }
 0xde3   :  { %v3818_v23 = vadd.f32 %v8634_v14, %v3817_v53 }
 0xde4   :  { %12549 = vtanh.f32 %v3823_v63 }
 0xde5   :  { %12551 = vtanh.f32 %v3818_v23 }
 0xdee   :  { %v12550_v1 = vpop.eup %12549 }
 0xdef   :  { %v12552_v52 = vpop.eup %12551  ;;  %v3829_v58 = vmul.f32 %v12550_v1, %v13826_v32  ;;  %v12569_v1 = vld [vmem:[%s17194_s9] sm:$0xff] }
 0xdf0   :  { %v3828_v57 = vmul.f32 %v12552_v52, %v13828_v33 }
 0xdf1   :  { %v15133_v2 = vadd.f32 %v3829_v58, %v13826_v32  ;;  %v12570_v32 = vld [vmem:[%s17194_s9 + $0x8] sm:$0xff] }
 0xdf2   :  { %v15136_v56 = vadd.f32 %v3828_v57, %v13828_v33  ;;  %v12571_v33 = vld [vmem:[%s17194_s9 + $0x10] sm:$0xff] }
 0xdf4   :  { %v10999_v4 = vpack.c.bf16 %v15133_v2, %v15136_v56 }
 0xdf6   :  { %11001 = vmatpush3.bf16.msk.msra.mxu1 %vm13650_vm4, %v10999_v4 }
 0xdf7   :  { %11002 = vmatprep.subr.bf16.mxu1 %v17562_v48 }
 0xdf9   :  { %9918 = vmatmul.mubr.msk.f32.vlgmr.msra.gmra.mrb[48].mxu1 %vm1228_vm5, %v12569_v1 }
 0xdfa   :  { %9920 = vmatprep.mubr.msk.f32.mxu1 %vm13180_vm1, %v17544_v50  ;;  %11004 = vmatpush3.bf16.msra.mxu1 %v13667_v12 }
 0xdfb   :  { %11005 = vmatprep.subr.bf16.mxu1 %v17562_v48 }
 0xdfd   :  { %9921 = vmatmul.mubr.msk.f32.gmra.mrb[50].mxu1 %vm1228_vm5, %v12570_v32 }
 0xdfe   :  { %9923 = vmatprep.mubr.msk.f32.mxu1 %vm13180_vm1, %v17544_v50  ;;  %11007 = vmatpush3.bf16.msra.mxu1 %v13699_v18 }
 0xdff   :  { %11008 = vmatprep.subr.bf16.mxu1 %v17562_v48 }
 0xe01   :  { %9924 = vmatmul.mubr.msk.f32.gmra.mrb[52].mxu1 %vm1228_vm5, %v12571_v33 }
 0xe02   :  { %9934 = vmatprep.mubr.msk.f32.mxu1 %vm13180_vm1, %v17544_v50 }
 0xecc   :  { %v3901_v58 = vpop.f32.mrb[48].mxu1 }
 0xecd   :  { %v9919_v52 = vpop.f32.mrb[49].mxu1  ;;  %9935 = vmatmul.mubr.msk.f32.vlgmr.msra.gmra.mrb[54].mxu1 %vm1322_vm6, %v3901_v58 }
 0xece   :  { %9937 = vmatprep.mubr.msk.f32.mxu1 %vm13180_vm1, %v17544_v50 }
 0xed0   :  { %v3906_v23 = vpop.f32.mrb[50].mxu1 }
 0xed1   :  { %v9922_v53 = vpop.f32.mrb[51].mxu1  ;;  %9938 = vmatmul.mubr.msk.f32.gmra.mrb[56].mxu1 %vm1322_vm6, %v3906_v23 }
 0xed2   :  { %9940 = vmatprep.mubr.msk.f32.mxu1 %vm13180_vm1, %v17544_v50 }
 0xed4   :  { %v3911_v63 = vpop.f32.mrb[52].mxu1 }
 0xed5   :  { %9941 = vmatmul.mubr.msk.f32.gmra.mrb[58].mxu1 %vm1322_vm6, %v3911_v63  ;;  %v9925_v38 = vpop.f32.mrb[53].mxu1  ;;  %v12572_v63 = vld [vmem:[#allocation6] sm:$0xff] }
 0xed6   :  { %9949 = vmatprep.mubr.msk.f32.mxu1 %vm13180_vm1, %v17544_v50  ;;  %v12573_v38 = vld [vmem:[#allocation6 + $0x8] sm:$0xff] }
 0xfa0   :  { %v3990_v14 = vpop.f32.mrb[54].mxu1 }
 0xfa1   :  { %v9936_v10 = vpop.f32.mrb[55].mxu1  ;;  %v15175_v19 = vadd.f32 %v3990_v14, %v13720_v39  ;;  %v12574_v14 = vld [vmem:[#allocation6 + $0x10] sm:$0xff] }
 0xfa3   :  { %v4004_v1 = vmax.f32 %v15175_v19, 0.0 }
 0xfa4   :  { %v3995_v22 = vpop.f32.mrb[56].mxu1 }
 0xfa5   :  { %v15178_v57 = vadd.f32 %v3995_v22, %v13722_v41  ;;  %v9939_v4 = vpop.f32.mrb[57].mxu1 }
 0xfa7   :  { %v4005_v32 = vmax.f32 %v15178_v57, 0.0 }
 0xfa8   :  { %v4000_v33 = vpop.f32.mrb[58].mxu1 }
 0xfa9   :  { %v11009_v58 = vpack.c.bf16 %v4005_v32, %v4004_v1  ;;  %v15183_v52 = vadd.f32 %v4000_v33, %v13730_v46  ;;  %v9942_v23 = vpop.f32.mrb[59].mxu1 }
 0xfab   :  { %11010 = vmatpush3.bf16.msra.mxu1 %v11009_v58  ;;  %v4006_v53 = vmax.f32 %v15183_v52, 0.0 }
 0xfac   :  { %9947 = vmatprep.subr.mxu1 %v17544_v50 }
 0xfaf   :  { %9948 = vmatpush3.msra.mxu1 %v4006_v53 }
 0xfb0   :  { %9950 = vmatmul.mubr.msk.f32.vlgmr.msra.gmra.mrb[60].mxu1 %vm1415_vm7, %v12572_v63  ;;  %11011 = vmatprep.subr.bf16.mxu1 %v17562_v48 }
 0xfb1   :  { %9952 = vmatprep.mubr.msk.f32.mxu1 %vm13180_vm1, %v17544_v50  ;;  %11013 = vmatpush3.bf16.msra.mxu1 %v13712_v34 }
 0xfb2   :  { %11014 = vmatprep.subr.bf16.mxu1 %v17562_v48 }
 0xfb4   :  { %9953 = vmatmul.mubr.msk.f32.gmra.mrb[62].mxu1 %vm1415_vm7, %v12573_v38 }
 0xfb5   :  { %9955 = vmatprep.mubr.msk.f32.mxu1 %vm13180_vm1, %v17544_v50  ;;  %11016 = vmatpush3.bf16.msra.mxu1 %v13715_v36 }
 0xfb6   :  { %11017 = vmatprep.subr.bf16.mxu1 %v17562_v48 }
 0xfb8   :  { %9956 = vmatmul.mubr.msk.f32.gmra.mrb[64].mxu1 %vm1415_vm7, %v12574_v14 }
 0xfb9   :  { %9966 = vmatprep.mubr.msk.f32.mxu1 %vm13180_vm1, %v17544_v50 }
0x1083   :  { %v4073_v10 = vpop.f32.mrb[60].mxu1 }
0x1084   :  { %v9951_v22 = vpop.f32.mrb[61].mxu1  ;;  %9967 = vmatmul.mubr.msk.f32.vlgmr.msra.gmra.mrb[66].mxu1 %vm1322_vm6, %v4073_v10 }
0x1085   :  { %9969 = vmatprep.mubr.msk.f32.mxu1 %vm13180_vm1, %v17544_v50  ;;  %v12575_v22 = vld [vmem:[#allocation17] ss:$0 sm:$0xff] }
0x1087   :  { %v4078_v4 = vpop.f32.mrb[62].mxu1 }
0x1088   :  { %v9954_v1 = vpop.f32.mrb[63].mxu1  ;;  %9970 = vmatmul.mubr.msk.f32.gmra.mrb[68].mxu1 %vm1322_vm6, %v4078_v4 }
0x1089   :  { %9972 = vmatprep.mubr.msk.f32.mxu1 %vm13180_vm1, %v17544_v50 }
0x108b   :  { %v4083_v32 = vpop.f32.mrb[64].mxu1 }
0x108c   :  { %9973 = vmatmul.mubr.msk.f32.gmra.mrb[70].mxu1 %vm1322_vm6, %v4083_v32  ;;  %v9957_v33 = vpop.f32.mrb[65].mxu1 }
0x108d   :  { %9981 = vmatprep.mubr.msk.f32.mxu1 %vm13180_vm1, %v17544_v50 }
0x1157   :  { %v4162_v58 = vpop.f32.mrb[66].mxu1 }
0x1158   :  { %v4176_v23 = vadd.f32 %v4162_v58, %v15175_v19  ;;  %v9968_v53 = vpop.f32.mrb[67].mxu1 }
0x115a   :  { %v4179_v60 = vadd.f32 %v12575_v22, %v4176_v23 }
0x115b   :  { %v4167_v10 = vpop.f32.mrb[68].mxu1 }
0x115c   :  { %v4177_v1 = vadd.f32 %v4167_v10, %v15178_v57  ;;  %v9971_v4 = vpop.f32.mrb[69].mxu1  ;;  %v4182_v39 = vmax.f32 %v4179_v60, 0.0  ;;  %v12576_v60 = vld [vmem:[#allocation8] sm:$0xff] }
0x115e   :  { %v4180_v46 = vadd.f32 %v12575_v22, %v4177_v1 }
0x115f   :  { %v4172_v41 = vpop.f32.mrb[70].mxu1 }
0x1160   :  { %v4183_v18 = vmax.f32 %v4180_v46, 0.0  ;;  %v4178_v32 = vadd.f32 %v4172_v41, %v15183_v52  ;;  %v9974_v33 = vpop.f32.mrb[71].mxu1 }
0x1162   :  { %v11018_v12 = vpack.c.bf16 %v4183_v18, %v4182_v39  ;;  %v4181_v31 = vadd.f32 %v12575_v22, %v4178_v32 }
0x1164   :  { %11019 = vmatpush3.bf16.msra.mxu1 %v11018_v12  ;;  %v4184_v58 = vmax.f32 %v4181_v31, 0.0 }
0x1165   :  { %9979 = vmatprep.subr.mxu1 %v17544_v50 }
0x1168   :  { %9980 = vmatpush3.msra.mxu1 %v4184_v58 }
0x1169   :  { %9982 = vmatmul.mubr.msk.f32.vlgmr.msra.gmra.mrb[72].mxu1 %vm1415_vm7, %v12572_v63  ;;  %11020 = vmatprep.subr.bf16.mxu1 %v17562_v48 }
0x116a   :  { %9984 = vmatprep.mubr.msk.f32.mxu1 %vm13180_vm1, %v17544_v50  ;;  %11022 = vmatpush3.bf16.msra.mxu1 %v13712_v34 }
0x116b   :  { %11023 = vmatprep.subr.bf16.mxu1 %v17562_v48 }
0x116d   :  { %9985 = vmatmul.mubr.msk.f32.gmra.mrb[74].mxu1 %vm1415_vm7, %v12573_v38 }
0x116e   :  { %9987 = vmatprep.mubr.msk.f32.mxu1 %vm13180_vm1, %v17544_v50  ;;  %11025 = vmatpush3.bf16.msra.mxu1 %v13715_v36 }
0x1171   :  { %9988 = vmatmul.mubr.msk.f32.gmra.mrb[76].mxu1 %vm1415_vm7, %v12574_v14 }
0x1172   :  { %9998 = vmatprep.mubr.msk.f32.mxu1 %vm13180_vm1, %v17544_v50 }
0x123c   :  { %v4251_v12 = vpop.f32.mrb[72].mxu1 }
0x123d   :  { %v9983_v18 = vpop.f32.mrb[73].mxu1  ;;  %9999 = vmatmul.mubr.msk.f32.vlgmr.msra.gmra.mrb[78].mxu1 %vm1322_vm6, %v4251_v12 }
0x123e   :  { %10001 = vmatprep.mubr.msk.f32.mxu1 %vm13180_vm1, %v17544_v50 }
0x1240   :  { %v4256_v39 = vpop.f32.mrb[74].mxu1 }
0x1241   :  { %v9986_v41 = vpop.f32.mrb[75].mxu1  ;;  %10002 = vmatmul.mubr.msk.f32.gmra.mrb[80].mxu1 %vm1322_vm6, %v4256_v39 }
0x1242   :  { %10004 = vmatprep.mubr.msk.f32.mxu1 %vm13180_vm1, %v17544_v50 }
0x1244   :  { %v4261_v46 = vpop.f32.mrb[76].mxu1 }
0x1245   :  { %10005 = vmatmul.mubr.msk.f32.gmra.mrb[82].mxu1 %vm1322_vm6, %v4261_v46  ;;  %v9989_v31 = vpop.f32.mrb[77].mxu1 }
0x1246   :  { %10013 = vmatprep.mubr.msk.f32.mxu1 %vm1415_vm7, %v12576_v60 }
0x1310   :  { %v4340_v63 = vpop.f32.mrb[78].mxu1 }
0x1311   :  { %v4354_v38 = vadd.f32 %v4340_v63, %v15175_v19  ;;  %v10000_v14 = vpop.f32.mrb[79].mxu1  ;;  %v12577_v19 = vld [vmem:[#allocation8 + $0x8] sm:$0xf] }
0x1313   :  { %v4357_v53 = vadd.f32 %v12575_v22, %v4354_v38 }
0x1314   :  { %v4345_v23 = vpop.f32.mrb[80].mxu1 }
0x1315   :  { %v4355_v10 = vadd.f32 %v4345_v23, %v15178_v57  ;;  %v10003_v1 = vpop.f32.mrb[81].mxu1  ;;  %v4360_v33 = vmax.f32 %v4357_v53, 0.0  ;;  %v12578_v53 = vld [vmem:[#allocation21] ss:$0 sm:$0xff] }
0x1317   :  { %v4358_v4 = vadd.f32 %v12575_v22, %v4355_v10 }
0x1318   :  { %v4350_v32 = vpop.f32.mrb[82].mxu1 }
0x1319   :  { %v4361_v58 = vmax.f32 %v4358_v4, 0.0  ;;  %v4356_v12 = vadd.f32 %v4350_v32, %v15183_v52  ;;  %v10006_v18 = vpop.f32.mrb[83].mxu1 }
0x131a   :  { %v17578_v18 = vld [vmem:[#allocation68_spill] sm:$0xff] }
0x131b   :  { %v4359_v39 = vadd.f32 %v12575_v22, %v4356_v12  ;;  %v11026_v41 = vpack.c.bf16 %v4361_v58, %v4360_v33  ;;  %v17576_v58 = vld [vmem:[#allocation66_spill] sm:$0xff]  ;;  %v17577_v12 = vld [vmem:[#allocation67_spill] sm:$0xff] }
0x131d   :  { %v4362_v46 = vmax.f32 %v4359_v39, 0.0  ;;  %11027 = vmatprep.subr.bf16.mxu1 %v11026_v41  ;;  %v17579_v39 = vld [vmem:[#allocation69_spill] sm:$0xff] }
0x131e   :  { %11029 = vmatpush3.bf16.msra.mxu1 %v11026_v41  ;;  %v17580_v41 = vld [vmem:[#allocation62_spill] sm:$0xff] }
0x131f   :  { %10011 = vmatprep.subr.mxu1 %v4362_v46 }
0x1322   :  { %10012 = vmatpush3.msra.mxu1 %v4362_v46 }
0x1323   :  { %10014 = vmatmul.mubr.msk.f32.vlgmr.msra.gmra.mrb[84].mxu1 %vm1415_vm7, %v12577_v19  ;;  %11031 = vmatprep.subr.bf16.mxu1 %v13787_v55 }
0x1324   :  { %11033 = vmatpush3.bf16.msra.mxu1 %v13787_v55 }
0x1325   :  { %11035 = vmatprep.subr.bf16.mxu1 %v13793_v61 }
0x1328   :  { %11037 = vmatpush3.bf16.msra.mxu1 %v13793_v61 }
0x1329   :  { %11039 = vmatprep.subr.bf16.mxu1 %v13797_v0 }
0x13f6   :  { %v10015_v57 = vpop.f32.mrb[84].mxu1 }
0x13f7   :  { %v4429_v52 = vpop.f32.mrb[85].mxu1  ;;  %v4441_v31 = vsel %vm1865_vm8, %v10015_v57, 0.0 }
0x13f8   :  { %v4438_v22 = vsel %vm1322_vm6, %v4429_v52, 0.0 }
0x13f9   :  { %4439 = vadd.xlane.f32.xlu1 %v4438_v22  ;;  %v17583_v22 = vld [vmem:[#allocation64_spill] sm:$0xff] }
0x13fd   :  { %4442 = vadd.xlane.f32.xlu1 %v4441_v31  ;;  %v17584_v31 = vld [vmem:[#allocation83_spill] sm:$0xff] }
0x1486   :  { %v4440_v60 = vpop.xlane.xlu1 %4439 }
0x1487   :  { %vm4444_vm11 = vcmp.eq.f32.partialorder %v4440_v60, 0.0  ;;  %v17585_v60 = vld [vmem:[#allocation65_spill] sm:$0xff] }
0x1488   :  { %v4450_v63 = vsel %vm4444_vm11, %v15136_v56, %v4429_v52  ;;  %v17582_v52 = vld [vmem:[#allocation81_spill] sm:$0xff] }
0x1489   :  { %10024 = vmatprep.mubr.msk.f32.mxu1 %vm1322_vm6, %v4450_v63  ;;  %v17586_v63 = vld [vmem:[#allocation85_spill] sm:$0xff] }
0x148a   :  { %v4443_v38 = vpop.xlane.xlu1 %4442 }
0x148b   :  { %vm4445_vm12 = vcmp.eq.f32.partialorder %v4443_v38, 0.0  ;;  %v17587_v38 = vld [vmem:[#allocation70_spill] sm:$0xff] }
0x148c   :  { %v4451_v14 = vsel %vm4445_vm12, %v15133_v2, %v10015_v57  ;;  %v17581_v57 = vld [vmem:[#allocation63_spill] sm:$0xff] }
0x148d   :  { %10025 = vmatmul.mubr.msk.f32.vlgmr.msra.gmra.mrb[86].mxu1 %vm1322_vm6, %v4451_v14  ;;  %v17588_v14 = vld [vmem:[#allocation154_spill] sm:$0xff] }
0x148e   :  { %11041 = vmatpush3.bf16.msra.mxu1 %v13797_v0  ;;  %10035 = vmatprep.mubr.msk.f32.mxu1 %vm1322_vm6, %v15136_v56 }
0x148f   :  { %11043 = vmatprep.subr.bf16.mxu1 %v13802_v11 }
0x1492   :  { %11045 = vmatpush3.bf16.msra.mxu1 %v13802_v11 }
0x1493   :  { %11046 = vmatprep.subr.bf16.mxu1 %v17562_v48 }
0x1495   :  { %10036 = vmatmul.mubr.msk.f32.vlgmr.msra.gmra.mrb[86].mxu1 %vm1322_vm6, %v15133_v2  ;;  %v12579_v2 = vld [vmem:[#allocation9] sm:$0x1] }
0x1496   :  { %10042 = vmatprep.mubr.msk.f32.mxu1 %vm13180_vm1, %v17544_v50 }
0x1568   :  { %v10037_v23 = vpop.f32.mrb[86].mxu1 }
0x1569   :  { %v4614_v10 = vadd.f32 %v12578_v53, %v10037_v23  ;;  %v4604_v1 = vpop.f32.mrb[87].mxu1  ;;  %v17589_v23 = vld [vmem:[#allocation72_spill] sm:$0xff] }
0x156a   :  { %v4613_v4 = vadd.f32 %v12578_v53, %v4604_v1  ;;  %v17590_v53 = vld [vmem:[#allocation74_spill] sm:$0xff]  ;;  %v17592_v1 = vld [vmem:[#allocation168_spill] sm:$0xff] }
0x156b   :  { %v15260_v32 = vmax.f32 %v4614_v10, 0.0  ;;  %v17591_v10 = vld [vmem:[#allocation165_spill] sm:$0xff] }
0x156c   :  { %v15262_v56 = vmax.f32 %v4613_v4, 0.0  ;;  %v17593_v4 = vld [vmem:[#allocation76_spill] sm:$0xff] }
0x156e   :  { %v11047_v33 = vpack.c.bf16 %v15260_v32, %v15262_v56 }
0x1570   :  { %11049 = vmatpush3.bf16.msk.msra.mxu1 %vm13650_vm4, %v11047_v33  ;;  %v17594_v33 = vld [vmem:[#allocation78_spill] sm:$0xff] }
0x1571   :  { %11051 = vmatprep.subr.bf16.mxu1 %v17576_v58 }
0x1573   :  { %10043 = vmatmul.mubr.msk.f32.vlgmr.msra.gmra.mrb[88].mxu1 %vm1228_vm5, %v12579_v2  ;;  %v17595_v2 = vld [vmem:[#allocation170_spill] sm:$0xff] }
0x1574   :  { %11053 = vmatpush1.bf16.msra.mxu1 %v17577_v12  ;;  %4757 = vmatprep.mubr.f32.mxu1 %v17544_v50 }
0x1575   :  { %11055 = vmatprep.subr.bf16.mxu1 %v17578_v18 }
0x1578   :  { %11057 = vmatpush1.bf16.msra.mxu1 %v17579_v39  ;;  %v17674_v39 = vld [vmem:[#allocation113_spill] sm:$0xff] }
0x1579   :  { %11059 = vmatprep.subr.bf16.mxu1 %v17580_v41  ;;  %v17649_v41 = vld [vmem:[#allocation89_spill] sm:$0xff] }
0x1646   :  { %v4686_v46 = vpop.f32.mrb[88].mxu1 }
0x1647   :  { %v10044_v19 = vpop.f32.mrb[89].mxu1  ;;  %8705 = vmatmul.mubr.msk.f32.vlgmr.msra.gmra.mrb[90].mxu1 %vm1322_vm6, %v4686_v46  ;;  %8708 = vmatmul.mubr.msk.f32.vlgmr.msra.gmra.mrb[34].mxu0 %vm1322_vm6, %v4686_v46 }
0x1648   :  { %11061 = vmatpush1.bf16.msra.mxu1 %v17581_v57  ;;  %11093 = vmatpush1.bf16.msra.mxu0 %v17582_v52  ;;  %v17596_v19 = vld [vmem:[#allocation172_spill] sm:$0xff] }
0x1649   :  { %11063 = vmatprep.subr.bf16.mxu1 %v17583_v22  ;;  %11095 = vmatprep.subr.bf16.mxu0 %v17584_v31  ;;  %v17647_v31 = vld [vmem:[#allocation161_spill] sm:$0xff] }
0x164a   :  { %4828 = vmatprep.mubr.f32.mxu1 %v17544_v50  ;;  %5112 = vmatprep.mubr.f32.mxu0 %v17544_v50 }
0x164c   :  { %11065 = vmatpush1.bf16.msra.mxu1 %v17585_v60  ;;  %11097 = vmatpush1.bf16.msra.mxu0 %v17586_v63  ;;  %v17646_v60 = vld [vmem:[#allocation159_spill] sm:$0xff] }
0x164d   :  { %11067 = vmatprep.subr.bf16.mxu1 %v17587_v38  ;;  %11483 = vmatprep.subr.bf16.mxu0 %v17588_v14  ;;  %v17597_v14 = vld [vmem:[#allocation80_spill] sm:$0xff]  ;;  %v17607_v38 = vld [vmem:[#allocation182_spill] sm:$0xff] }
0x164f   :  { %8706 = vmatmul.mubr.msk.f32.vlgmr.msra.gmra.mrb[92].mxu1 %vm1322_vm6, %v4686_v46  ;;  %8710 = vmatmul.mubr.msk.f32.vlgmr.msra.gmra.mrb[36].mxu0 %vm1322_vm6, %v4686_v46 }
0x1650   :  { %11069 = vmatpush1.bf16.msra.mxu1 %v17589_v23  ;;  %4899 = vmatprep.mubr.f32.mxu1 %v17544_v50  ;;  %v17598_v23 = vld [vmem:[#allocation82_spill] sm:$0xff] }
0x1651   :  { %11071 = vmatprep.subr.bf16.mxu1 %v17590_v53  ;;  %11485 = vmatpush3.bf16.msra.mxu0 %v17591_v10  ;;  %v17599_v53 = vld [vmem:[#allocation174_spill] sm:$0xff]  ;;  %v17600_v10 = vld [vmem:[#allocation176_spill] sm:$0xff] }
0x1652   :  { %11487 = vmatprep.subr.bf16.mxu0 %v17592_v1  ;;  %v17601_v1 = vld [vmem:[#allocation84_spill] sm:$0xff] }
0x1654   :  { %11073 = vmatpush1.bf16.msra.mxu1 %v17593_v4  ;;  %v17602_v4 = vld [vmem:[#allocation86_spill] sm:$0xff] }
0x1655   :  { %11083 = vmatprep.subr.bf16.mxu1 %v17594_v33  ;;  %11489 = vmatpush3.bf16.msra.mxu0 %v17595_v2  ;;  %v17603_v33 = vld [vmem:[#allocation178_spill] sm:$0xff]  ;;  %v17604_v2 = vld [vmem:[#allocation180_spill] sm:$0xff] }
0x1656   :  { %11491 = vmatprep.subr.bf16.mxu0 %v17596_v19  ;;  %v17605_v19 = vld [vmem:[#allocation88_spill] sm:$0xff] }
0x1657   :  { %8707 = vmatmul.mubr.msk.f32.vlgmr.msra.gmra.mrb[94].mxu1 %vm1322_vm6, %v4686_v46 }
0x1658   :  { %11085 = vmatpush1.bf16.msra.mxu1 %v17597_v14  ;;  %5041 = vmatprep.mubr.f32.mxu1 %v17544_v50  ;;  %v17606_v14 = vld [vmem:[#allocation90_spill] sm:$0xff] }
0x1659   :  { %11087 = vmatprep.subr.bf16.mxu1 %v17598_v23  ;;  %11493 = vmatpush3.bf16.msra.mxu0 %v17599_v53  ;;  %v17608_v23 = vld [vmem:[#allocation184_spill] sm:$0xff] }
0x165a   :  { %11495 = vmatprep.subr.bf16.mxu0 %v17600_v10  ;;  %v17609_v53 = vld [vmem:[#allocation92_spill] sm:$0xff]  ;;  %v17610_v10 = vld [vmem:[#allocation94_spill] sm:$0xff] }
0x165c   :  { %11089 = vmatpush1.bf16.msra.mxu1 %v17601_v1  ;;  %v17611_v1 = vld [vmem:[#allocation186_spill] sm:$0xff] }
0x165d   :  { %11099 = vmatprep.subr.bf16.mxu1 %v17602_v4  ;;  %11497 = vmatpush3.bf16.msra.mxu0 %v17603_v33  ;;  %v17612_v4 = vld [vmem:[#allocation188_spill] sm:$0xff] }
0x165e   :  { %11499 = vmatprep.subr.bf16.mxu0 %v17604_v2  ;;  %v17613_v33 = vld [vmem:[#allocation96_spill] sm:$0xff]  ;;  %v17614_v2 = vld [vmem:[#allocation98_spill] sm:$0xff] }
0x165f   :  { %8709 = vmatmul.mubr.msk.f32.vlgmr.msra.gmra.mrb[96].mxu1 %vm1322_vm6, %v4686_v46  ;;  %v17615_v46 = vld [vmem:[#allocation190_spill] sm:$0xff] }
0x1660   :  { %11101 = vmatpush1.bf16.msra.mxu1 %v17605_v19  ;;  %v17616_v19 = vld [vmem:[#allocation192_spill] sm:$0xff] }
0x1661   :  { %11103 = vmatprep.subr.bf16.mxu1 %v17606_v14  ;;  %11501 = vmatpush3.bf16.msra.mxu0 %v17607_v38  ;;  %v17617_v14 = vld [vmem:[#allocation100_spill] sm:$0xff]  ;;  %v17618_v38 = vld [vmem:[#allocation102_spill] sm:$0xff] }
0x1662   :  { %11503 = vmatprep.subr.bf16.mxu0 %v17608_v23  ;;  %v17619_v23 = vld [vmem:[#allocation194_spill] sm:$0xff] }
0x1664   :  { %11105 = vmatpush1.bf16.msra.mxu1 %v17609_v53 }
0x1665   :  { %11107 = vmatprep.subr.bf16.mxu1 %v17610_v10  ;;  %11505 = vmatpush3.bf16.msra.mxu0 %v17611_v1  ;;  %v17620_v10 = vld [vmem:[#allocation104_spill] sm:$0xff]  ;;  %v17621_v1 = vld [vmem:[#allocation106_spill] sm:$0xff] }
0x1666   :  { %11507 = vmatprep.subr.bf16.mxu0 %v17612_v4  ;;  %v17622_v4 = vld [vmem:[#allocation108_spill] sm:$0xff] }
0x1668   :  { %11109 = vmatpush1.bf16.msra.mxu1 %v17613_v33  ;;  %v17623_v33 = vld [vmem:[#allocation110_spill] sm:$0xff] }
0x1669   :  { %11111 = vmatprep.subr.bf16.mxu1 %v17614_v2  ;;  %11509 = vmatpush3.bf16.msra.mxu0 %v17615_v46  ;;  %v17624_v2 = vld [vmem:[#allocation112_spill] sm:$0xff]  ;;  %v17625_v46 = vld [vmem:[#allocation114_spill] sm:$0xff] }
0x166a   :  { %11511 = vmatprep.subr.bf16.mxu0 %v17616_v19  ;;  %v17626_v19 = vld [vmem:[#allocation116_spill] sm:$0xff] }
0x166c   :  { %11113 = vmatpush1.bf16.msra.mxu1 %v17617_v14  ;;  %v17627_v14 = vld [vmem:[#allocation118_spill] sm:$0xff] }
0x166d   :  { %11115 = vmatprep.subr.bf16.mxu1 %v17618_v38  ;;  %11513 = vmatpush3.bf16.msra.mxu0 %v17619_v23  ;;  %v17628_v38 = vld [vmem:[#allocation120_spill] sm:$0xff]  ;;  %v17629_v23 = vld [vmem:[#allocation122_spill] sm:$0xff] }
0x166e   :  { %11515 = vmatprep.subr.bf16.mxu0 %v14318_v16  ;;  %v17630_v16 = vld [vmem:[#allocation124_spill] sm:$0xff] }
0x1670   :  { %11117 = vmatpush1.bf16.msra.mxu1 %v17620_v10  ;;  %v17631_v10 = vld [vmem:[#allocation126_spill] sm:$0xff] }
0x1671   :  { %11119 = vmatprep.subr.bf16.mxu1 %v17621_v1  ;;  %v17632_v1 = vld [vmem:[#allocation128_spill] sm:$0xff] }
0x1674   :  { %11121 = vmatpush1.bf16.msra.mxu1 %v17622_v4  ;;  %v17633_v4 = vld [vmem:[#allocation130_spill] sm:$0xff] }
0x1675   :  { %11123 = vmatprep.subr.bf16.mxu1 %v17623_v33  ;;  %v17634_v33 = vld [vmem:[#allocation132_spill] sm:$0xff] }
0x1678   :  { %11125 = vmatpush1.bf16.msra.mxu1 %v17624_v2  ;;  %v17635_v2 = vld [vmem:[#allocation134_spill] sm:$0xff] }
0x1679   :  { %11127 = vmatprep.subr.bf16.mxu1 %v17625_v46  ;;  %v17636_v46 = vld [vmem:[#allocation136_spill] sm:$0xff] }
0x167c   :  { %11129 = vmatpush1.bf16.msra.mxu1 %v17626_v19  ;;  %v17637_v19 = vld [vmem:[#allocation138_spill] sm:$0xff] }
0x167d   :  { %11131 = vmatprep.subr.bf16.mxu1 %v17627_v14  ;;  %v17638_v14 = vld [vmem:[#allocation140_spill] sm:$0xff] }
0x1680   :  { %11133 = vmatpush1.bf16.msra.mxu1 %v17628_v38  ;;  %v17639_v38 = vld [vmem:[#allocation142_spill] sm:$0xff] }
0x1681   :  { %11135 = vmatprep.subr.bf16.mxu1 %v17629_v23  ;;  %v17640_v23 = vld [vmem:[#allocation144_spill] sm:$0xff] }
0x1684   :  { %11137 = vmatpush1.bf16.msra.mxu1 %v17630_v16  ;;  %v17641_v16 = vld [vmem:[#allocation146_spill] sm:$0xff] }
0x1685   :  { %11139 = vmatprep.subr.bf16.mxu1 %v17631_v10  ;;  %v17642_v10 = vld [vmem:[#allocation148_spill] sm:$0xff] }
0x1688   :  { %11141 = vmatpush1.bf16.msra.mxu1 %v17632_v1  ;;  %v17643_v1 = vld [vmem:[#allocation87_spill] sm:$0xff] }
0x1689   :  { %11143 = vmatprep.subr.bf16.mxu1 %v17633_v4 }
0x168c   :  { %11145 = vmatpush1.bf16.msra.mxu1 %v17634_v33 }
0x168d   :  { %11147 = vmatprep.subr.bf16.mxu1 %v17635_v2  ;;  %v17644_v2 = vld [vmem:[#allocation155_spill] sm:$0xff] }
0x1690   :  { %11149 = vmatpush1.bf16.msra.mxu1 %v17636_v46 }
0x1691   :  { %11151 = vmatprep.subr.bf16.mxu1 %v17637_v19  ;;  %v17645_v19 = vld [vmem:[#allocation157_spill] sm:$0xff] }
0x1694   :  { %11153 = vmatpush1.bf16.msra.mxu1 %v17638_v14 }
0x1695   :  { %11155 = vmatprep.subr.bf16.mxu1 %v17639_v38 }
0x1698   :  { %11157 = vmatpush1.bf16.msra.mxu1 %v17640_v23 }
0x1699   :  { %11159 = vmatprep.subr.bf16.mxu1 %v17641_v16 }
0x169c   :  { %11161 = vmatpush1.bf16.msra.mxu1 %v17642_v10 }
0x169d   :  { %11163 = vmatprep.subr.bf16.mxu1 %v17643_v1 }
0x171a   :  { %v4759_v4 = vpop.f32.mrb[90].mxu1  ;;  %v15349_v33 = vpop.f32.mrb[34].mxu0 }
0x171b   :  { %v4760_v53 = vadd.f32 %v4759_v4, %v17644_v2  ;;  %v4761_v46 = vpop.f32.mrb[91].mxu1  ;;  %v15352_v63 = vpop.f32.mrb[35].mxu0  ;;  %v17648_v4 = vld [vmem:[#allocation158_spill] sm:$0xff] }
0x171c   :  { %v4762_v14 = vadd.f32 %v4761_v46, %v17645_v19 }
0x171d   :  { %v5119_v38 = vadd.f32 %v4760_v53, %v17646_v60  ;;  %v17650_v53 = vld [vmem:[#allocation91_spill] sm:$0xff] }
0x171e   :  { %v5120_v23 = vadd.f32 %v4762_v14, %v17647_v31  ;;  %v17651_v14 = vld [vmem:[#allocation200_spill] sm:$0xff]  ;;  %v17653_v31 = vld [vmem:[#allocation93_spill] sm:$0xff]  ;;  %v17655_v60 = vld [vmem:[#allocation95_spill] sm:$0xff] }
0x171f   :  { %v5131_v16 = vmax.f32 %v5119_v38, 0.0  ;;  %v17652_v38 = vld [vmem:[#allocation162_spill] sm:$0xff] }
0x1720   :  { %v5132_v22 = vmax.f32 %v5120_v23, 0.0 }
0x1722   :  { %v4830_v52 = vpop.f32.mrb[92].mxu1  ;;  %v15357_v10 = vpop.f32.mrb[36].mxu0  ;;  %5207 = vmatprep.mubr.f32.mxu1 %v5132_v22  ;;  %5633 = vmatprep.mubr.f32.mxu0 %v5132_v22  ;;  %v17654_v22 = vld [vmem:[#allocation202_spill] sm:$0xff] }
0x1723   :  { %v4832_v1 = vpop.f32.mrb[93].mxu1  ;;  %v15359_v57 = vpop.f32.mrb[37].mxu0  ;;  %5208 = vmatmul.mubr.f32.vlgmr.msra.gmra.mrb[98].mxu1 %v5131_v16  ;;  %5634 = vmatmul.mubr.f32.vlgmr.msra.gmra.mrb[38].mxu0 %v5131_v16  ;;  %v17656_v16 = vld [vmem:[#allocation204_spill] sm:$0xff] }
0x1724   :  { %v4833_v2 = vadd.f32 %v4832_v1, %v17648_v4  ;;  %11165 = vmatpush1.bf16.msra.mxu1 %v17649_v41  ;;  %11517 = vmatpush3.bf16.msra.mxu0 %v14324_v20  ;;  %v17657_v20 = vld [vmem:[#allocation97_spill] sm:$0xff]  ;;  %v17672_v4 = vld [vmem:[#allocation111_spill] sm:$0xff] }
0x1725   :  { %11167 = vmatprep.subr.bf16.mxu1 %v17650_v53  ;;  %11519 = vmatprep.subr.bf16.mxu0 %v17651_v14  ;;  %v17658_v53 = vld [vmem:[#allocation206_spill] sm:$0xff]  ;;  %v17659_v14 = vld [vmem:[#allocation99_spill] sm:$0xff] }
0x1726   :  { %v5122_v23 = vadd.f32 %v4833_v2, %v17652_v38  ;;  %v17660_v2 = vld [vmem:[#allocation208_spill] sm:$0xff]  ;;  %v17665_v38 = vld [vmem:[#allocation105_spill] sm:$0xff] }
0x1728   :  { %v5134_v46 = vmax.f32 %v5122_v23, 0.0  ;;  %11169 = vmatpush1.bf16.msra.mxu1 %v17653_v31  ;;  %11521 = vmatpush3.bf16.msra.mxu0 %v17654_v22  ;;  %v17661_v23 = vld [vmem:[#allocation101_spill] sm:$0xff]  ;;  %v17662_v31 = vld [vmem:[#allocation210_spill] sm:$0xff]  ;;  %v17663_v22 = vld [vmem:[#allocation103_spill] sm:$0xff] }
0x1729   :  { %11171 = vmatprep.subr.bf16.mxu1 %v17655_v60  ;;  %11523 = vmatprep.subr.bf16.mxu0 %v17656_v16  ;;  %v17664_v60 = vld [vmem:[#allocation212_spill] sm:$0xff] }
0x172a   :  { %v4901_v1 = vpop.f32.mrb[94].mxu1  ;;  %5278 = vmatprep.mubr.f32.mxu1 %v5134_v46  ;;  %5703 = vmatprep.mubr.f32.mxu0 %v5134_v46 }
0x172b   :  { %v4903_v41 = vpop.f32.mrb[95].mxu1 }
0x172c   :  { %11173 = vmatpush1.bf16.msra.mxu1 %v17657_v20  ;;  %11525 = vmatpush3.bf16.msra.mxu0 %v17658_v53  ;;  %v17666_v20 = vld [vmem:[#allocation214_spill] sm:$0xff]  ;;  %v17667_v53 = vld [vmem:[#allocation107_spill] sm:$0xff] }
0x172d   :  { %11175 = vmatprep.subr.bf16.mxu1 %v17659_v14  ;;  %11527 = vmatprep.subr.bf16.mxu0 %v17660_v2  ;;  %v17668_v14 = vld [vmem:[#allocation216_spill] sm:$0xff]  ;;  %v17669_v2 = vld [vmem:[#allocation109_spill] sm:$0xff] }
0x1730   :  { %11177 = vmatpush1.bf16.msra.mxu1 %v17661_v23  ;;  %11529 = vmatpush3.bf16.msra.mxu0 %v17662_v31  ;;  %v17670_v23 = vld [vmem:[#allocation218_spill] sm:$0xff]  ;;  %v17671_v31 = vld [vmem:[#allocation156_spill] sm:$0xff] }
0x1731   :  { %11179 = vmatprep.subr.bf16.mxu1 %v17663_v22  ;;  %11531 = vmatprep.subr.bf16.mxu0 %v17664_v60  ;;  %v4831_v22 = vadd.f32 %v4830_v52, %v17671_v31  ;;  %v17673_v60 = vld [vmem:[#allocation163_spill] sm:$0xff] }
0x1732   :  { %v15379_v16 = vpop.f32.mrb[96].mxu1  ;;  %v4904_v19 = vadd.f32 %v4903_v41, %v17673_v60 }
0x1733   :  { %v15381_v46 = vpop.f32.mrb[97].mxu1 }
0x1734   :  { %11181 = vmatpush1.bf16.msra.mxu1 %v17665_v38  ;;  %11533 = vmatpush3.bf16.msra.mxu0 %v17666_v20  ;;  %v17675_v20 = vld [vmem:[#allocation160_spill] sm:$0xff]  ;;  %v17676_v38 = vld [vmem:[#allocation115_spill] sm:$0xff] }
0x1735   :  { %11183 = vmatprep.subr.bf16.mxu1 %v17667_v53  ;;  %11535 = vmatprep.subr.bf16.mxu0 %v17668_v14  ;;  %v5121_v53 = vadd.f32 %v4831_v22, %v17675_v20  ;;  %v17678_v14 = vld [vmem:[#allocation117_spill] sm:$0xff] }
0x1736   :  { %v17681_v22 = vld [vmem:[#allocation233_spill] sm:$0xff] }
0x1737   :  { %v5133_v52 = vmax.f32 %v5121_v53, 0.0  ;;  %v17685_v53 = vld [vmem:[#allocation127_spill] sm:$0xff] }
0x1738   :  { %11185 = vmatpush1.bf16.msra.mxu1 %v17669_v2  ;;  %11537 = vmatpush3.bf16.msra.mxu0 %v17670_v23  ;;  %v17677_v2 = vld [vmem:[#allocation167_spill] sm:$0xff] }
0x1739   :  { %11187 = vmatprep.subr.bf16.mxu1 %v17672_v4  ;;  %11539 = vmatprep.subr.bf16.mxu0 %v14398_v5  ;;  %v5124_v23 = vadd.f32 %v4904_v19, %v17677_v2  ;;  %v17679_v5 = vld [vmem:[#allocation119_spill] sm:$0xff]  ;;  %v17683_v19 = vld [vmem:[#allocation125_spill] sm:$0xff] }
0x173a   :  { %v17702_v2 = vld [vmem:[#allocation143_spill] sm:$0xff] }
0x173b   :  { %v5136_v41 = vmax.f32 %v5124_v23, 0.0  ;;  %v17688_v23 = vld [vmem:[#allocation241_spill] sm:$0xff] }
0x173c   :  { %11189 = vmatpush1.bf16.msra.mxu1 %v17674_v39  ;;  %11541 = vmatpush3.bf16.msra.mxu0 %v14409_v59  ;;  %v17680_v59 = vld [vmem:[#allocation121_spill] sm:$0xff] }
0x173d   :  { %11191 = vmatprep.subr.bf16.mxu1 %v17676_v38  ;;  %11543 = vmatprep.subr.bf16.mxu0 %v14417_v43  ;;  %v17682_v38 = vld [vmem:[#allocation123_spill] sm:$0xff] }
0x1740   :  { %11193 = vmatpush1.bf16.msra.mxu1 %v17678_v14  ;;  %11545 = vmatpush3.bf16.msra.mxu0 %v14428_v62  ;;  %v17684_v14 = vld [vmem:[#allocation237_spill] sm:$0xff] }
0x1741   :  { %11195 = vmatprep.subr.bf16.mxu1 %v17679_v5  ;;  %11547 = vmatprep.subr.bf16.mxu0 %v14437_v21  ;;  %v17686_v5 = vld [vmem:[#allocation239_spill] sm:$0xff]  ;;  %v17687_v21 = vld [vmem:[#allocation129_spill] sm:$0xff] }
0x1742   :  { %v17691_v62 = vld [vmem:[#allocation133_spill] sm:$0xff] }
0x1743   :  { %5704 = vmatmul.mubr.f32.vlgmr.msra.gmra.mrb[40].mxu0 %v5133_v52 }
0x1744   :  { %11197 = vmatpush1.bf16.msra.mxu1 %v17680_v59  ;;  %11549 = vmatpush3.bf16.msra.mxu0 %v17681_v22  ;;  %v17689_v59 = vld [vmem:[#allocation131_spill] sm:$0xff] }
0x1745   :  { %5773 = vmatprep.mubr.f32.mxu0 %v5136_v41  ;;  %11199 = vmatprep.subr.bf16.mxu1 %v17682_v38  ;;  %v17690_v22 = vld [vmem:[#allocation243_spill] sm:$0xff]  ;;  %v17692_v38 = vld [vmem:[#allocation245_spill] sm:$0xff] }
0x1746   :  { %11551 = vmatprep.subr.bf16.mxu0 %v14454_v42  ;;  %v17693_v42 = vld [vmem:[#allocation135_spill] sm:$0xff] }
0x1748   :  { %11201 = vmatpush1.bf16.msra.mxu1 %v17683_v19  ;;  %11553 = vmatpush3.bf16.msra.mxu0 %v17684_v14  ;;  %v17694_v19 = vld [vmem:[#allocation247_spill] sm:$0xff]  ;;  %v17695_v14 = vld [vmem:[#allocation137_spill] sm:$0xff] }
0x1749   :  { %11203 = vmatprep.subr.bf16.mxu1 %v17685_v53  ;;  %11555 = vmatprep.subr.bf16.mxu0 %v17686_v5  ;;  %v17696_v53 = vld [vmem:[#allocation249_spill] sm:$0xff]  ;;  %v17697_v5 = vld [vmem:[#allocation139_spill] sm:$0xff] }
0x174c   :  { %11205 = vmatpush1.bf16.msra.mxu1 %v17687_v21  ;;  %11557 = vmatpush3.bf16.msra.mxu0 %v17688_v23  ;;  %v17698_v21 = vld [vmem:[#allocation251_spill] sm:$0xff]  ;;  %v17699_v23 = vld [vmem:[#allocation141_spill] sm:$0xff] }
0x174d   :  { %11207 = vmatprep.subr.bf16.mxu1 %v17689_v59  ;;  %11559 = vmatprep.subr.bf16.mxu0 %v17690_v22  ;;  %v17700_v59 = vld [vmem:[#allocation253_spill] sm:$0xff]  ;;  %v17701_v22 = vld [vmem:[#allocation219_spill] sm:$0xff] }
0x1750   :  { %11209 = vmatpush1.bf16.msra.mxu1 %v17691_v62  ;;  %11561 = vmatpush3.bf16.msra.mxu0 %v17692_v38  ;;  %v4902_v62 = vadd.f32 %v4901_v1, %v17701_v22  ;;  %v17703_v38 = vld [vmem:[#allocation255_spill] sm:$0xff] }
0x1751   :  { %11211 = vmatprep.subr.bf16.mxu1 %v17693_v42  ;;  %11563 = vmatprep.subr.bf16.mxu0 %v17694_v19  ;;  %v17704_v42 = vld [vmem:[#allocation222_spill] sm:$0xff] }
0x1752   :  { %v4975_v19 = vadd.f32 %v15352_v63, %v17704_v42  ;;  %v17713_v42 = vld [vmem:[#allocation150_spill] sm:$0xff] }
0x1754   :  { %11213 = vmatpush1.bf16.msra.mxu1 %v17695_v14  ;;  %11565 = vmatpush3.bf16.msra.mxu0 %v17696_v53  ;;  %v17705_v14 = vld [vmem:[#allocation145_spill] sm:$0xff] }
0x1755   :  { %11215 = vmatprep.subr.bf16.mxu1 %v17697_v5  ;;  %11567 = vmatprep.subr.bf16.mxu0 %v17698_v21  ;;  %v17706_v53 = vld [vmem:[#allocation257_spill] sm:$0xff]  ;;  %v17707_v5 = vld [vmem:[#allocation152_spill] sm:$0xff]  ;;  %v17708_v21 = vld [vmem:[#allocation147_spill] sm:$0xff] }
0x1756   :  { %v15433_v43 = vadd.f32 %v4902_v62, %v17707_v5 }
0x1758   :  { %11217 = vmatpush1.bf16.msra.mxu1 %v17699_v23  ;;  %11569 = vmatpush3.bf16.msra.mxu0 %v17700_v59  ;;  %v17709_v23 = vld [vmem:[#allocation259_spill] sm:$0xff]  ;;  %v17142_v63 = vmax.f32 %v15433_v43, 0.0 }
0x1759   :  { %11219 = vmatprep.subr.bf16.mxu1 %v17702_v2  ;;  %11571 = vmatprep.subr.bf16.mxu0 %v17703_v38  ;;  %v17710_v59 = vld [vmem:[#allocation227_spill] sm:$0xff]  ;;  %v17711_v2 = vld [vmem:[#allocation149_spill] sm:$0xff] }
0x175a   :  { %v15438_v1 = vadd.f32 %v4975_v19, %v17710_v59  ;;  %v17712_v38 = vld [vmem:[#allocation261_spill] sm:$0xff]  ;;  %v17721_v59 = vld [vmem:[#allocation271_spill] sm:$0xff] }
0x175b   :  { %v17715_v19 = vld [vmem:[#allocation265_spill] sm:$0xff] }
0x175c   :  { %11221 = vmatpush1.bf16.msra.mxu1 %v17705_v14  ;;  %11573 = vmatpush3.bf16.msra.mxu0 %v17706_v53  ;;  %v17143_v62 = vmax.f32 %v15438_v1, 0.0 }
0x175d   :  { %11223 = vmatprep.subr.bf16.mxu1 %v17708_v21  ;;  %11575 = vmatprep.subr.bf16.mxu0 %v17709_v23  ;;  %v17714_v23 = vld [vmem:[#allocation164_spill] sm:$0xff] }
0x1760   :  { %11225 = vmatpush1.bf16.msra.mxu1 %v17711_v2  ;;  %11577 = vmatpush3.bf16.msra.mxu0 %v17712_v38  ;;  %v17716_v38 = vld [vmem:[#allocation166_spill] sm:$0xff]  ;;  %v17717_v2 = vld [vmem:[#allocation267_spill] sm:$0xff] }
0x1761   :  { %11227 = vmatprep.subr.bf16.mxu1 %v17713_v42  ;;  %11579 = vmatprep.subr.bf16.mxu0 %v14546_v35  ;;  %v17718_v42 = vld [vmem:[#allocation169_spill] sm:$0xff] }
0x1762   :  { %v17719_v35 = vld [vmem:[#allocation269_spill] sm:$0xff] }
0x1763   :  { %5279 = vmatmul.mubr.f32.vlgmr.msra.gmra.mrb[98].mxu1 %v5133_v52  ;;  %5774 = vmatmul.mubr.f32.vlgmr.msra.gmra.mrb[42].mxu0 %v17142_v63  ;;  %v17720_v52 = vld [vmem:[#allocation171_spill] sm:$0xff]  ;;  %v17722_v63 = vld [vmem:[#allocation173_spill] sm:$0xff] }
0x1764   :  { %11229 = vmatpush1.bf16.msra.mxu1 %v17714_v23  ;;  %5349 = vmatprep.mubr.f32.mxu1 %v5136_v41  ;;  %v17723_v41 = vld [vmem:[#allocation273_spill] sm:$0xff]  ;;  %v17725_v23 = vld [vmem:[#allocation275_spill] sm:$0xff] }
0x1765   :  { %11581 = vmatpush3.bf16.msra.mxu0 %v17715_v19  ;;  %5843 = vmatprep.mubr.f32.mxu0 %v17143_v62  ;;  %v17724_v19 = vld [vmem:[#allocation175_spill] sm:$0xff]  ;;  %v17726_v62 = vld [vmem:[#allocation177_spill] sm:$0xff] }
0x1766   :  { %11231 = vmatprep.subr.bf16.mxu1 %v17716_v38  ;;  %11583 = vmatprep.subr.bf16.mxu0 %v17717_v2  ;;  %v17727_v38 = vld [vmem:[#allocation277_spill] sm:$0xff]  ;;  %v17728_v2 = vld [vmem:[#allocation179_spill] sm:$0xff] }
0x1768   :  { %11233 = vmatpush1.bf16.msra.mxu1 %v17718_v42  ;;  %v17729_v42 = vld [vmem:[#allocation279_spill] sm:$0xff] }
0x1769   :  { %11585 = vmatpush3.bf16.msra.mxu0 %v17719_v35  ;;  %11235 = vmatprep.subr.bf16.mxu1 %v17720_v52  ;;  %v17730_v35 = vld [vmem:[#allocation181_spill] sm:$0xff] }
0x176a   :  { %11587 = vmatprep.subr.bf16.mxu0 %v17721_v59  ;;  %v17731_v52 = vld [vmem:[#allocation281_spill] sm:$0xff]  ;;  %v17732_v59 = vld [vmem:[#allocation183_spill] sm:$0xff] }
0x176c   :  { %11237 = vmatpush1.bf16.msra.mxu1 %v17722_v63  ;;  %v17733_v63 = vld [vmem:[#allocation283_spill] sm:$0xff] }
0x176d   :  { %11589 = vmatpush3.bf16.msra.mxu0 %v17723_v41  ;;  %11239 = vmatprep.subr.bf16.mxu1 %v17724_v19  ;;  %v17734_v41 = vld [vmem:[#allocation185_spill] sm:$0xff] }
0x176e   :  { %11591 = vmatprep.subr.bf16.mxu0 %v17725_v23  ;;  %v17735_v23 = vld [vmem:[#allocation187_spill] sm:$0xff]  ;;  %v17739_v19 = vld [vmem:[#allocation189_spill] sm:$0xff] }
0x1770   :  { %11241 = vmatpush1.bf16.msra.mxu1 %v17726_v62  ;;  %v17736_v62 = vld [vmem:[#allocation151_spill] sm:$0xff] }
0x1771   :  { %11593 = vmatpush3.bf16.msra.mxu0 %v17727_v38  ;;  %11243 = vmatprep.subr.bf16.mxu1 %v17728_v2  ;;  %v4973_v38 = vadd.f32 %v15349_v33, %v17736_v62  ;;  %v17737_v2 = vld [vmem:[#allocation287_spill] sm:$0xff]  ;;  %v17744_v33 = vld [vmem:[#allocation193_spill] sm:$0xff] }
0x1772   :  { %11595 = vmatprep.subr.bf16.mxu0 %v17729_v42  ;;  %v17738_v42 = vld [vmem:[#allocation288_spill] sm:$0xff]  ;;  %v17746_v62 = vld [vmem:[#allocation195_spill] sm:$0xff] }
0x1774   :  { %11245 = vmatpush1.bf16.msra.mxu1 %v17730_v35  ;;  %v5046_v35 = vadd.f32 %v15381_v46, %v17738_v42 }
0x1775   :  { %11597 = vmatpush3.bf16.msra.mxu0 %v17731_v52  ;;  %11247 = vmatprep.subr.bf16.mxu1 %v17732_v59  ;;  %v17740_v59 = vld [vmem:[#allocation191_spill] sm:$0xff] }
0x1776   :  { %11599 = vmatprep.subr.bf16.mxu0 %v17733_v63  ;;  %v17741_v63 = vld [vmem:[#allocation153_spill] sm:$0xff] }
0x1778   :  { %11249 = vmatpush1.bf16.msra.mxu1 %v17734_v41  ;;  %v15482_v41 = vadd.f32 %v4973_v38, %v17741_v63  ;;  %v17747_v38 = vld [vmem:[#allocation197_spill] sm:$0xff] }
0x1779   :  { %11601 = vmatpush3.bf16.msra.mxu0 %v14617_v37  ;;  %11251 = vmatprep.subr.bf16.mxu1 %v17735_v23  ;;  %v17742_v37 = vld [vmem:[#allocation291_spill] sm:$0xff]  ;;  %v17743_v23 = vld [vmem:[#allocation292_spill] sm:$0xff] }
0x177a   :  { %11603 = vmatprep.subr.bf16.mxu0 %v17737_v2  ;;  %v15486_v52 = vadd.f32 %v5046_v35, %v17743_v23  ;;  %v17745_v2 = vld [vmem:[#allocation294_spill] sm:$0xff]  ;;  %v17146_v46 = vmax.f32 %v15482_v41, 0.0  ;;  %v17748_v35 = vld [vmem:[#allocation199_spill] sm:$0xff]  ;;  %v17753_v23 = vld [vmem:[#allocation304_spill] sm:$0xff] }
0x177c   :  { %11253 = vmatpush1.bf16.msra.mxu1 %v17739_v19 }
0x177d   :  { %11605 = vmatpush3.bf16.msra.mxu0 %v14637_v25  ;;  %11255 = vmatprep.subr.bf16.mxu1 %v17740_v59  ;;  %v17148_v59 = vmax.f32 %v15486_v52, 0.0 }
0x177e   :  { %11607 = vmatprep.subr.bf16.mxu0 %v17742_v37  ;;  %v17757_v37 = vld [vmem:[#allocation308_spill] sm:$0xff] }
0x1780   :  { %11257 = vmatpush1.bf16.msra.mxu1 %v17744_v33  ;;  %v17751_v33 = vld [vmem:[#allocation302_spill] sm:$0xff] }
0x1781   :  { %11609 = vmatpush3.bf16.msra.mxu0 %v17745_v2  ;;  %11259 = vmatprep.subr.bf16.mxu1 %v17746_v62  ;;  %v17749_v2 = vld [vmem:[#allocation300_spill] sm:$0xff]  ;;  %v17750_v62 = vld [vmem:[#allocation201_spill] sm:$0xff] }
0x1782   :  { %11611 = vmatprep.subr.bf16.mxu0 %v14661_v45  ;;  %v17752_v45 = vld [vmem:[#allocation203_spill] sm:$0xff] }
0x1784   :  { %5844 = vmatmul.mubr.f32.vlgmr.msra.gmra.mrb[44].mxu0 %v17146_v46  ;;  %11261 = vmatpush1.bf16.msra.mxu1 %v17747_v38  ;;  %v17754_v46 = vld [vmem:[#allocation205_spill] sm:$0xff]  ;;  %v17755_v38 = vld [vmem:[#allocation306_spill] sm:$0xff] }
0x1785   :  { %11613 = vmatpush3.bf16.msra.mxu0 %v14669_v28  ;;  %5913 = vmatprep.mubr.f32.mxu0 %v17148_v59  ;;  %v17756_v28 = vld [vmem:[#allocation207_spill] sm:$0xff]  ;;  %v17758_v59 = vld [vmem:[#allocation209_spill] sm:$0xff] }
0x1786   :  { %11263 = vmatprep.subr.bf16.mxu1 %v17748_v35  ;;  %11615 = vmatprep.subr.bf16.mxu0 %v17749_v2  ;;  %v17759_v35 = vld [vmem:[#allocation310_spill] sm:$0xff]  ;;  %v17760_v2 = vld [vmem:[#allocation211_spill] sm:$0xff] }
0x1788   :  { %11265 = vmatpush1.bf16.msra.mxu1 %v17750_v62 }
0x1789   :  { %11617 = vmatpush3.bf16.msra.mxu0 %v17751_v33  ;;  %11267 = vmatprep.subr.bf16.mxu1 %v17752_v45  ;;  %v17761_v33 = vld [vmem:[#allocation213_spill] sm:$0xff]  ;;  %v17762_v45 = vld [vmem:[#allocation314_spill] sm:$0xff] }
0x178a   :  { %11619 = vmatprep.subr.bf16.mxu0 %v17753_v23  ;;  %v17763_v23 = vld [vmem:[#allocation215_spill] sm:$0xff] }
0x178c   :  { %11269 = vmatpush1.bf16.msra.mxu1 %v17754_v46  ;;  %v17764_v46 = vld [vmem:[#allocation316_spill] sm:$0xff] }
0x178d   :  { %11621 = vmatpush3.bf16.msra.mxu0 %v17755_v38  ;;  %11271 = vmatprep.subr.bf16.mxu1 %v17756_v28  ;;  %v17765_v38 = vld [vmem:[#allocation217_spill] sm:$0xff] }
0x178e   :  { %11623 = vmatprep.subr.bf16.mxu0 %v17757_v37  ;;  %v17766_v37 = vld [vmem:[#allocation220_spill] sm:$0xff] }
0x1790   :  { %11273 = vmatpush1.bf16.msra.mxu1 %v17758_v59  ;;  %v17767_v59 = vld [vmem:[#allocation320_spill] sm:$0xff] }
0x1791   :  { %11625 = vmatpush3.bf16.msra.mxu0 %v17759_v35  ;;  %11275 = vmatprep.subr.bf16.mxu1 %v17760_v2  ;;  %v5044_v35 = vadd.f32 %v15379_v16, %v17767_v59  ;;  %v17769_v2 = vld [vmem:[#allocation223_spill] sm:$0xff]  ;;  %v17775_v16 = vld [vmem:[#allocation228_spill] sm:$0xff]  ;;  %v17777_v59 = vld [vmem:[#allocation230_spill] sm:$0xff] }
0x1792   :  { %11627 = vmatprep.subr.bf16.mxu0 %v14710_v7  ;;  %v17768_v7 = vld [vmem:[#allocation322_spill] sm:$0xff] }
0x1794   :  { %11277 = vmatpush1.bf16.msra.mxu1 %v17761_v33  ;;  %v5117_v33 = vadd.f32 %v15359_v57, %v17768_v7 }
0x1795   :  { %11629 = vmatpush3.bf16.msra.mxu0 %v17762_v45  ;;  %11279 = vmatprep.subr.bf16.mxu1 %v17763_v23  ;;  %v17770_v45 = vld [vmem:[#allocation324_spill] sm:$0xff]  ;;  %v17771_v23 = vld [vmem:[#allocation225_spill] sm:$0xff] }
0x1796   :  { %11631 = vmatprep.subr.bf16.mxu0 %v17764_v46  ;;  %v17772_v46 = vld [vmem:[#allocation326_spill] sm:$0xff] }
0x1798   :  { %11281 = vmatpush1.bf16.msra.mxu1 %v17765_v38  ;;  %v15530_v38 = vadd.f32 %v5044_v35, %v17772_v46 }
0x1799   :  { %11633 = vmatpush3.bf16.msra.mxu0 %v14729_v15  ;;  %11283 = vmatprep.subr.bf16.mxu1 %v17766_v37  ;;  %v17773_v15 = vld [vmem:[#allocation327_spill] sm:$0xff]  ;;  %v17774_v37 = vld [vmem:[#allocation328_spill] sm:$0xff] }
0x179a   :  { %11635 = vmatprep.subr.bf16.mxu0 %v14738_v13  ;;  %v15534_v28 = vadd.f32 %v5117_v33, %v17774_v37  ;;  %v17776_v13 = vld [vmem:[#allocation330_spill] sm:$0xff]  ;;  %v17152_v57 = vmax.f32 %v15530_v38, 0.0  ;;  %v17780_v33 = vld [vmem:[#allocation232_spill] sm:$0xff] }
0x179b   :  { %v17787_v37 = vld [vmem:[#allocation238_spill] sm:$0xff] }
0x179c   :  { %11285 = vmatpush1.bf16.msra.mxu1 %v17769_v2  ;;  %v17778_v2 = vld [vmem:[#allocation332_spill] sm:$0xff]  ;;  %v17153_v35 = vmax.f32 %v15534_v28, 0.0 }
0x179d   :  { %11637 = vmatpush3.bf16.msra.mxu0 %v17770_v45  ;;  %11287 = vmatprep.subr.bf16.mxu1 %v17771_v23  ;;  %v17779_v23 = vmax.f32 %v15433_v43, 0.0  ;;  %v17785_v43 = vld [vmem:[#allocation236_spill] sm:$0xff] }
0x179e   :  { %11639 = vmatprep.subr.bf16.mxu0 %v17773_v15 }
0x17a0   :  { %11289 = vmatpush1.bf16.msra.mxu1 %v17775_v16  ;;  %v17781_v16 = vmax.f32 %v15438_v1, 0.0  ;;  %v17790_v1 = vld [vmem:[#allocation342_spill] sm:$0xff] }
0x17a1   :  { %11641 = vmatpush3.bf16.msra.mxu0 %v17776_v13  ;;  %11291 = vmatprep.subr.bf16.mxu1 %v17777_v59  ;;  %v17782_v13 = vld [vmem:[#allocation334_spill] sm:$0xff] }
0x17a2   :  { %11643 = vmatprep.subr.bf16.mxu0 %v17778_v2  ;;  %v17783_v59 = vld [vmem:[#allocation234_spill] sm:$0xff]  ;;  %v17784_v2 = vld [vmem:[#allocation336_spill] sm:$0xff] }
0x17a3   :  { %5350 = vmatmul.mubr.f32.vlgmr.msra.gmra.mrb[98].mxu1 %v17779_v23  ;;  %v17786_v23 = vld [vmem:[#allocation338_spill] sm:$0xff] }
0x17a4   :  { %5914 = vmatmul.mubr.f32.vlgmr.msra.gmra.mrb[46].mxu0 %v17152_v57  ;;  %11293 = vmatpush1.bf16.msra.mxu1 %v17780_v33  ;;  %v17788_v57 = vld [vmem:[#allocation340_spill] sm:$0xff] }
0x17a5   :  { %5420 = vmatprep.mubr.f32.mxu1 %v17781_v16  ;;  %11645 = vmatpush3.bf16.msra.mxu0 %v17782_v13  ;;  %v17789_v33 = vld [vmem:[#allocation240_spill] sm:$0xff]  ;;  %v17791_v16 = vld [vmem:[#allocation242_spill] sm:$0xff] }
0x17a6   :  { %5983 = vmatprep.mubr.f32.mxu0 %v17153_v35  ;;  %11295 = vmatprep.subr.bf16.mxu1 %v17783_v59  ;;  %v17792_v13 = vld [vmem:[#allocation344_spill] sm:$0xff]  ;;  %v17794_v59 = vld [vmem:[#allocation346_spill] sm:$0xff] }
0x17a7   :  { %11647 = vmatprep.subr.bf16.mxu0 %v17784_v2  ;;  %v17793_v35 = vld [vmem:[#allocation244_spill] sm:$0xff]  ;;  %v17795_v2 = vld [vmem:[#allocation246_spill] sm:$0xff] }
0x17a8   :  { %11297 = vmatpush1.bf16.msra.mxu1 %v17785_v43  ;;  %v17796_v43 = vld [vmem:[#allocation348_spill] sm:$0xff] }
0x17a9   :  { %11649 = vmatpush3.bf16.msra.mxu0 %v17786_v23  ;;  %11299 = vmatprep.subr.bf16.mxu1 %v17787_v37  ;;  %v17797_v23 = vld [vmem:[#allocation248_spill] sm:$0xff]  ;;  %v17798_v37 = vld [vmem:[#allocation350_spill] sm:$0xff] }
0x17aa   :  { %11651 = vmatprep.subr.bf16.mxu0 %v17788_v57  ;;  %v17799_v57 = vld [vmem:[#allocation250_spill] sm:$0xff] }
0x17ac   :  { %11301 = vmatpush1.bf16.msra.mxu1 %v17789_v33 }
0x17ad   :  { %11653 = vmatpush3.bf16.msra.mxu0 %v17790_v1  ;;  %11303 = vmatprep.subr.bf16.mxu1 %v17791_v16  ;;  %v17800_v1 = vld [vmem:[#allocation252_spill] sm:$0xff] }
0x17ae   :  { %11655 = vmatprep.subr.bf16.mxu0 %v17792_v13  ;;  %v17801_v13 = vld [vmem:[#allocation254_spill] sm:$0xff] }
0x17b0   :  { %11305 = vmatpush1.bf16.msra.mxu1 %v17793_v35 }
0x17b1   :  { %11657 = vmatpush3.bf16.msra.mxu0 %v17794_v59  ;;  %11307 = vmatprep.subr.bf16.mxu1 %v17795_v2  ;;  %v5115_v59 = vadd.f32 %v15357_v10, %v14136_v47 }
0x17b2   :  { %11659 = vmatprep.subr.bf16.mxu0 %v17796_v43  ;;  %v17802_v43 = vld [vmem:[#allocation256_spill] sm:$0xff] }
0x17b4   :  { %11309 = vmatpush1.bf16.msra.mxu1 %v17797_v23 }
0x17b5   :  { %11661 = vmatpush3.bf16.msra.mxu0 %v17798_v37  ;;  %11311 = vmatprep.subr.bf16.mxu1 %v17799_v57  ;;  %v17803_v37 = vld [vmem:[#allocation258_spill] sm:$0xff]  ;;  %v15580_v57 = vadd.f32 %v5115_v59, %v14878_v9  ;;  %v17809_v59 = vld [vmem:[#allocation268_spill] sm:$0xff] }
0x17b6   :  { %11663 = vmatprep.subr.bf16.mxu0 %v14851_v49 }
0x17b7   :  { %v17158_v10 = vmax.f32 %v15580_v57, 0.0 }
0x17b8   :  { %11313 = vmatpush1.bf16.msra.mxu1 %v17800_v1  ;;  %v17804_v1 = vld [vmem:[#allocation260_spill] sm:$0xff] }
0x17b9   :  { %11665 = vmatpush3.bf16.msra.mxu0 %v14858_v24  ;;  %11315 = vmatprep.subr.bf16.mxu1 %v17801_v13  ;;  %v17805_v24 = vld [vmem:[#allocation361_spill] sm:$0xff]  ;;  %v17806_v13 = vld [vmem:[#allocation262_spill] sm:$0xff] }
0x17ba   :  { %11667 = vmatprep.subr.bf16.mxu0 %v14863_v30 }
0x17bc   :  { %11317 = vmatpush1.bf16.msra.mxu1 %v17802_v43 }
0x17bd   :  { %11669 = vmatpush3.bf16.msra.mxu0 %v14870_v54  ;;  %11319 = vmatprep.subr.bf16.mxu1 %v17803_v37  ;;  %v17807_v54 = vld [vmem:[#allocation264_spill] sm:$0xff]  ;;  %v17808_v37 = vld [vmem:[#allocation266_spill] sm:$0xff] }
0x17be   :  { %11671 = vmatprep.subr.bf16.mxu0 %v14881_v51  ;;  %v17814_v51 = vld [vmem:[#allocation274_spill] sm:$0xff] }
0x17c0   :  { %11321 = vmatpush1.bf16.msra.mxu1 %v17804_v1  ;;  %v17812_v1 = vld [vmem:[#allocation399_spill] sm:$0xff] }
0x17c1   :  { %11673 = vmatpush3.bf16.msra.mxu0 %v17805_v24  ;;  %11323 = vmatprep.subr.bf16.mxu1 %v17806_v13  ;;  %v17810_v24 = vld [vmem:[#allocation270_spill] sm:$0xff] }
0x17c2   :  { %11675 = vmatprep.subr.bf16.mxu0 %v15018_v17  ;;  %v17811_v13 = vld [vmem:[#allocation398_spill] sm:$0xff]  ;;  %v17813_v17 = vld [vmem:[#allocation272_spill] sm:$0xff] }
0x17c4   :  { %5984 = vmatmul.mubr.f32.vlgmr.msra.gmra.mrb[48].mxu0 %v17158_v10  ;;  %11325 = vmatpush1.bf16.msra.mxu1 %v17807_v54  ;;  %v17815_v10 = vld [vmem:[#allocation400_spill] sm:$0xff]  ;;  %v17816_v54 = vld [vmem:[#allocation401_spill] sm:$0xff] }
0x17c5   :  { %11327 = vmatprep.subr.bf16.mxu1 %v17808_v37  ;;  %11677 = vmatpush3.bf16.msra.mxu0 %v15020_v3  ;;  %v17817_v37 = vld [vmem:[#allocation276_spill] sm:$0xff]  ;;  %v17818_v3 = vld [vmem:[#allocation278_spill] sm:$0xff] }
0x17c6   :  { %11679 = vmatprep.subr.bf16.mxu0 %v15022_v27  ;;  %v17819_v27 = vld [vmem:[#allocation402_spill] sm:$0xff] }
0x17c8   :  { %11329 = vmatpush1.bf16.msra.mxu1 %v17809_v59  ;;  %v17820_v59 = vld [vmem:[#allocation403_spill] sm:$0xff] }
0x17c9   :  { %11331 = vmatprep.subr.bf16.mxu1 %v17810_v24  ;;  %11681 = vmatpush3.bf16.msra.mxu0 %v17811_v13  ;;  %v17821_v24 = vld [vmem:[#allocation280_spill] sm:$0xff]  ;;  %v17822_v13 = vld [vmem:[#allocation282_spill] sm:$0xff] }
0x17ca   :  { %11683 = vmatprep.subr.bf16.mxu0 %v17812_v1  ;;  %v17823_v1 = vld [vmem:[#allocation404_spill] sm:$0xff] }
0x17cc   :  { %11333 = vmatpush1.bf16.msra.mxu1 %v17813_v17  ;;  %v17824_v17 = vld [vmem:[#allocation405_spill] sm:$0xff] }
0x17cd   :  { %11335 = vmatprep.subr.bf16.mxu1 %v17814_v51  ;;  %11685 = vmatpush3.bf16.msra.mxu0 %v17815_v10  ;;  %v17825_v51 = vld [vmem:[#allocation284_spill] sm:$0xff]  ;;  %v17826_v10 = vld [vmem:[#allocation286_spill] sm:$0xff] }
0x17ce   :  { %11687 = vmatprep.subr.bf16.mxu0 %v17816_v54  ;;  %v17827_v54 = vld [vmem:[#allocation406_spill] sm:$0xff] }
0x17d0   :  { %11337 = vmatpush1.bf16.msra.mxu1 %v17817_v37  ;;  %v17828_v37 = vld [vmem:[#allocation407_spill] sm:$0xff] }
0x17d1   :  { %11339 = vmatprep.subr.bf16.mxu1 %v17818_v3  ;;  %11689 = vmatpush3.bf16.msra.mxu0 %v17819_v27  ;;  %v17829_v3 = vld [vmem:[#allocation289_spill] sm:$0xff]  ;;  %v17830_v27 = vld [vmem:[#allocation290_spill] sm:$0xff] }
0x17d2   :  { %11691 = vmatprep.subr.bf16.mxu0 %v17820_v59  ;;  %v17831_v59 = vld [vmem:[#allocation408_spill] sm:$0xff] }
0x17d4   :  { %11341 = vmatpush1.bf16.msra.mxu1 %v17821_v24  ;;  %v17865_v24 = vld [vmem:[#allocation355_spill] sm:$0xff] }
0x17d5   :  { %11343 = vmatprep.subr.bf16.mxu1 %v17822_v13  ;;  %11693 = vmatpush3.bf16.msra.mxu0 %v17823_v1  ;;  %v17832_v13 = vld [vmem:[#allocation293_spill] sm:$0xff]  ;;  %v17833_v1 = vld [vmem:[#allocation295_spill] sm:$0xff] }
0x17d6   :  { %11695 = vmatprep.subr.bf16.mxu0 %v17824_v17 }
0x17d8   :  { %11345 = vmatpush1.bf16.msra.mxu1 %v17825_v51  ;;  %v17855_v51 = vld [vmem:[#allocation339_spill] sm:$0xff] }
0x17d9   :  { %11347 = vmatprep.subr.bf16.mxu1 %v17826_v10  ;;  %11697 = vmatpush3.bf16.msra.mxu0 %v17827_v54  ;;  %v17834_v54 = vmax.f32 %v15482_v41, 0.0  ;;  %v17843_v10 = vld [vmem:[#allocation311_spill] sm:$0xff] }
0x17da   :  { %11699 = vmatprep.subr.bf16.mxu0 %v17828_v37  ;;  %v17835_v37 = vld [vmem:[#allocation297_spill] sm:$0xff]  ;;  %v17845_v41 = vld [vmem:[#allocation315_spill] sm:$0xff] }
0x17dc   :  { %11349 = vmatpush1.bf16.msra.mxu1 %v17829_v3  ;;  %v17836_v3 = vmax.f32 %v15486_v52, 0.0 }
0x17dd   :  { %11351 = vmatprep.subr.bf16.mxu1 %v17830_v27  ;;  %11701 = vmatpush3.bf16.msra.mxu0 %v17831_v59  ;;  %v17837_v27 = vld [vmem:[#allocation299_spill] sm:$0xff]  ;;  %v17838_v59 = vld [vmem:[#allocation301_spill] sm:$0xff] }
0x17de   :  { %11703 = vmatprep.subr.bf16.mxu0 %v15060_v40  ;;  %v17839_v40 = vld [vmem:[#allocation303_spill] sm:$0xff] }
0x17e0   :  { %11353 = vmatpush1.bf16.msra.mxu1 %v17832_v13  ;;  %v17840_v13 = vld [vmem:[#allocation305_spill] sm:$0xff] }
0x17e1   :  { %11355 = vmatprep.subr.bf16.mxu1 %v17833_v1  ;;  %11705 = vmatpush3.bf16.msra.mxu0 %v15062_v8  ;;  %v17841_v1 = vld [vmem:[#allocation307_spill] sm:$0xff]  ;;  %v17842_v8 = vld [vmem:[#allocation309_spill] sm:$0xff] }
0x17e2   :  { %11706 = vmatprep.subr.bf16.mxu0 %v17562_v48 }
0x17e3   :  { %5421 = vmatmul.mubr.f32.vlgmr.msra.gmra.mrb[98].mxu1 %v17834_v54  ;;  %v17844_v54 = vld [vmem:[#allocation313_spill] sm:$0xff] }
0x17e4   :  { %11357 = vmatpush1.bf16.msra.mxu1 %v17835_v37  ;;  %5491 = vmatprep.mubr.f32.mxu1 %v17836_v3  ;;  %v17846_v37 = vld [vmem:[#allocation317_spill] sm:$0xff] }
0x17e5   :  { %11359 = vmatprep.subr.bf16.mxu1 %v17837_v27 }
0x17e8   :  { %11361 = vmatpush1.bf16.msra.mxu1 %v17838_v59  ;;  %v17847_v59 = vld [vmem:[#allocation319_spill] sm:$0xff] }
0x17e9   :  { %11363 = vmatprep.subr.bf16.mxu1 %v17839_v40  ;;  %v17848_v40 = vld [vmem:[#allocation323_spill] sm:$0xff] }
0x17ec   :  { %11365 = vmatpush1.bf16.msra.mxu1 %v17840_v13  ;;  %v17849_v13 = vld [vmem:[#allocation325_spill] sm:$0xff] }
0x17ed   :  { %11367 = vmatprep.subr.bf16.mxu1 %v17841_v1  ;;  %v17850_v1 = vld [vmem:[#allocation329_spill] sm:$0xff] }
0x17f0   :  { %11369 = vmatpush1.bf16.msra.mxu1 %v17842_v8  ;;  %v17851_v8 = vld [vmem:[#allocation331_spill] sm:$0xff] }
0x17f1   :  { %11371 = vmatprep.subr.bf16.mxu1 %v17843_v10  ;;  %v17852_v10 = vld [vmem:[#allocation333_spill] sm:$0xff] }
0x17f4   :  { %11373 = vmatpush1.bf16.msra.mxu1 %v17844_v54  ;;  %v17853_v54 = vld [vmem:[#allocation335_spill] sm:$0xff] }
0x17f5   :  { %11375 = vmatprep.subr.bf16.mxu1 %v17845_v41  ;;  %v17854_v41 = vld [vmem:[#allocation337_spill] sm:$0xff] }
0x17f6   :  { %v9168_v52 = vpop.f32.mrb[38].mxu0 }
0x17f7   :  { %v9169_v3 = vpop.f32.mrb[39].mxu0 }
0x17f8   :  { %11377 = vmatpush1.bf16.msra.mxu1 %v17846_v37  ;;  %v9170_v27 = vadd.f32 %v9169_v3, %v9168_v52  ;;  %v17856_v37 = vld [vmem:[#allocation341_spill] sm:$0xff]  ;;  %v17857_v52 = vld [vmem:[#allocation343_spill] sm:$0xff] }
0x17f9   :  { %11379 = vmatprep.subr.bf16.mxu1 %v17847_v59  ;;  %v17858_v3 = vld [vmem:[#allocation345_spill] sm:$0xff]  ;;  %v17862_v59 = vld [vmem:[#allocation394_spill] sm:$0xff] }
0x17fc   :  { %11381 = vmatpush1.bf16.msra.mxu1 %v17848_v40  ;;  %v17859_v40 = vld [vmem:[#allocation347_spill] sm:$0xff] }
0x17fd   :  { %11383 = vmatprep.subr.bf16.mxu1 %v17849_v13  ;;  %v17860_v13 = vld [vmem:[#allocation349_spill] sm:$0xff] }
0x1800   :  { %11385 = vmatpush1.bf16.msra.mxu1 %v17850_v1  ;;  %v17861_v1 = vld [vmem:[#allocation351_spill] sm:$0xff] }
0x1801   :  { %11387 = vmatprep.subr.bf16.mxu1 %v17851_v8 }
0x1804   :  { %11389 = vmatpush1.bf16.msra.mxu1 %v17852_v10 }
0x1805   :  { %11391 = vmatprep.subr.bf16.mxu1 %v17853_v54  ;;  %v5636_v54 = vadd.f32 %v9170_v27, %v17862_v59  ;;  %v17871_v27 = vmax.f32 %v15534_v28, 0.0 }
0x1808   :  { %11393 = vmatpush1.bf16.msra.mxu1 %v17854_v41  ;;  %v17863_v41 = vld [vmem:[#allocation352_spill] sm:$0xff] }
0x1809   :  { %11395 = vmatprep.subr.bf16.mxu1 %v17855_v51  ;;  %v17864_v51 = vld [vmem:[#allocation354_spill] sm:$0xff] }
0x180c   :  { %11397 = vmatpush1.bf16.msra.mxu1 %v17856_v37 }
0x180d   :  { %11399 = vmatprep.subr.bf16.mxu1 %v17857_v52  ;;  %v17866_v52 = vld [vmem:[#allocation357_spill] sm:$0xff] }
0x1810   :  { %11401 = vmatpush1.bf16.msra.mxu1 %v17858_v3  ;;  %v17867_v3 = vld [vmem:[#allocation360_spill] sm:$0xff] }
0x1811   :  { %11403 = vmatprep.subr.bf16.mxu1 %v17859_v40  ;;  %v17868_v40 = vld [vmem:[#allocation362_spill] sm:$0xff] }
0x1814   :  { %11405 = vmatpush1.bf16.msra.mxu1 %v17860_v13  ;;  %v17870_v13 = vld [vmem:[#allocation363_spill] sm:$0xff] }
0x1815   :  { %11407 = vmatprep.subr.bf16.mxu1 %v17861_v1  ;;  %v17869_v1 = vmax.f32 %v15530_v38, 0.0  ;;  %v17879_v38 = vld [vmem:[#allocation371_spill] sm:$0xff] }
0x1816   :  { %v9203_v8 = vpop.f32.mrb[40].mxu0 }
0x1817   :  { %v9204_v10 = vpop.f32.mrb[41].mxu0 }
0x1818   :  { %v9205_v17 = vadd.f32 %v9204_v10, %v9203_v8  ;;  %11409 = vmatpush1.bf16.msra.mxu1 %v17863_v41  ;;  %v17872_v8 = vld [vmem:[#allocation364_spill] sm:$0xff]  ;;  %v17873_v10 = vld [vmem:[#allocation365_spill] sm:$0xff] }
0x1819   :  { %11411 = vmatprep.subr.bf16.mxu1 %v17864_v51 }
0x181a   :  { %v5706_v37 = vadd.f32 %v9205_v17, %v5636_v54  ;;  %v17874_v17 = vld [vmem:[#allocation366_spill] sm:$0xff]  ;;  %v17875_v54 = vld [vmem:[#allocation367_spill] sm:$0xff] }
0x181c   :  { %11413 = vmatpush1.bf16.msra.mxu1 %v17865_v24  ;;  %v17883_v24 = vld [vmem:[#allocation375_spill] sm:$0xff] }
0x181d   :  { %11415 = vmatprep.subr.bf16.mxu1 %v17866_v52  ;;  %v17876_v52 = vld [vmem:[#allocation368_spill] sm:$0xff] }
0x1820   :  { %11417 = vmatpush1.bf16.msra.mxu1 %v17867_v3  ;;  %v17877_v3 = vld [vmem:[#allocation369_spill] sm:$0xff] }
0x1821   :  { %11419 = vmatprep.subr.bf16.mxu1 %v17868_v40  ;;  %v17878_v40 = vld [vmem:[#allocation370_spill] sm:$0xff] }
0x1823   :  { %5492 = vmatmul.mubr.f32.vlgmr.msra.gmra.mrb[98].mxu1 %v17869_v1  ;;  %v17880_v1 = vld [vmem:[#allocation372_spill] sm:$0xff] }
0x1824   :  { %11421 = vmatpush1.bf16.msra.mxu1 %v17870_v13  ;;  %5562 = vmatprep.mubr.f32.mxu1 %v17871_v27 }
0x1825   :  { %11423 = vmatprep.subr.bf16.mxu1 %v17872_v8  ;;  %v17881_v8 = vld [vmem:[#allocation373_spill] sm:$0xff] }
0x1828   :  { %11425 = vmatpush1.bf16.msra.mxu1 %v17873_v10  ;;  %v17882_v10 = vld [vmem:[#allocation374_spill] sm:$0xff] }
0x1829   :  { %11427 = vmatprep.subr.bf16.mxu1 %v17874_v17 }
0x182c   :  { %11429 = vmatpush1.bf16.msra.mxu1 %v17875_v54  ;;  %v17884_v54 = vld [vmem:[#allocation376_spill] sm:$0xff] }
0x182d   :  { %11431 = vmatprep.subr.bf16.mxu1 %v17876_v52  ;;  %v17885_v52 = vld [vmem:[#allocation377_spill] sm:$0xff] }
0x1830   :  { %11433 = vmatpush1.bf16.msra.mxu1 %v17877_v3  ;;  %v17886_v3 = vld [vmem:[#allocation378_spill] sm:$0xff] }
0x1831   :  { %11435 = vmatprep.subr.bf16.mxu1 %v17878_v40  ;;  %v17887_v40 = vld [vmem:[#allocation379_spill] sm:$0xff] }
0x1834   :  { %11437 = vmatpush1.bf16.msra.mxu1 %v17879_v38  ;;  %v17888_v38 = vld [vmem:[#allocation380_spill] sm:$0xff] }
0x1835   :  { %11439 = vmatprep.subr.bf16.mxu1 %v17880_v1  ;;  %v17889_v1 = vld [vmem:[#allocation381_spill] sm:$0xff] }
0x1836   :  { %v9238_v28 = vpop.f32.mrb[42].mxu0 }
0x1837   :  { %v9239_v27 = vpop.f32.mrb[43].mxu0 }
0x1838   :  { %v9240_v13 = vadd.f32 %v9239_v27, %v9238_v28  ;;  %11441 = vmatpush1.bf16.msra.mxu1 %v17881_v8  ;;  %v17890_v28 = vld [vmem:[#allocation382_spill] sm:$0xff]  ;;  %v17891_v27 = vld [vmem:[#allocation383_spill] sm:$0xff] }
0x1839   :  { %11443 = vmatprep.subr.bf16.mxu1 %v17882_v10  ;;  %v17892_v10 = vld [vmem:[#allocation384_spill] sm:$0xff]  ;;  %v17899_v8 = vld [vmem:[#allocation391_spill] sm:$0xff] }
0x183a   :  { %v5776_v17 = vadd.f32 %v9240_v13, %v5706_v37  ;;  %v17893_v37 = vld [vmem:[#allocation385_spill] sm:$0xff]  ;;  %v17894_v13 = vld [vmem:[#allocation386_spill] sm:$0xff] }
0x183c   :  { %11445 = vmatpush1.bf16.msra.mxu1 %v17883_v24  ;;  %v17897_v24 = vld [vmem:[#allocation389_spill] sm:$0xff] }
0x183d   :  { %11447 = vmatprep.subr.bf16.mxu1 %v17884_v54  ;;  %v17895_v54 = vld [vmem:[#allocation387_spill] sm:$0xff] }
0x1840   :  { %11449 = vmatpush1.bf16.msra.mxu1 %v17885_v52  ;;  %v17896_v52 = vld [vmem:[#allocation388_spill] sm:$0xff] }
0x1841   :  { %11451 = vmatprep.subr.bf16.mxu1 %v17886_v3 }
0x1844   :  { %11453 = vmatpush1.bf16.msra.mxu1 %v17887_v40 }
0x1845   :  { %11455 = vmatprep.subr.bf16.mxu1 %v17888_v38 }
0x1848   :  { %11457 = vmatpush1.bf16.msra.mxu1 %v17889_v1  ;;  %v17898_v1 = vld [vmem:[#allocation390_spill] sm:$0xff] }
0x1849   :  { %11459 = vmatprep.subr.bf16.mxu1 %v17890_v28 }
0x184c   :  { %11461 = vmatpush1.bf16.msra.mxu1 %v17891_v27  ;;  %v17900_v27 = vld [vmem:[#allocation392_spill] sm:$0xff] }
0x184d   :  { %11463 = vmatprep.subr.bf16.mxu1 %v17892_v10  ;;  %v17901_v10 = vld [vmem:[#allocation393_spill] sm:$0xff] }
0x1850   :  { %11465 = vmatpush1.bf16.msra.mxu1 %v17893_v37  ;;  %v17902_v37 = vld [vmem:[#allocation71_spill] sm:$0xff] }
0x1851   :  { %11467 = vmatprep.subr.bf16.mxu1 %v17894_v13 }
0x1854   :  { %11469 = vmatpush1.bf16.msra.mxu1 %v17895_v54  ;;  %v17903_v54 = vmax.f32 %v15580_v57, 0.0 }
0x1855   :  { %11471 = vmatprep.subr.bf16.mxu1 %v17896_v52  ;;  %v17904_v52 = vld [vmem:[#allocation73_spill] sm:$0xff] }
0x1857   :  { %v9273_v3 = vpop.f32.mrb[44].mxu0 }
0x1858   :  { %v9274_v40 = vpop.f32.mrb[45].mxu0  ;;  %11473 = vmatpush1.bf16.msra.mxu1 %v17897_v24  ;;  %v17905_v24 = vld [vmem:[#allocation75_spill] sm:$0xff] }
0x1859   :  { %v9275_v38 = vadd.f32 %v9274_v40, %v9273_v3  ;;  %11475 = vmatprep.subr.bf16.mxu1 %v17898_v1  ;;  %v17906_v40 = vld [vmem:[#allocation77_spill] sm:$0xff]  ;;  %v17907_v3 = vld [vmem:[#allocation79_spill] sm:$0xff] }
0x185b   :  { %v5846_v28 = vadd.f32 %v9275_v38, %v5776_v17 }
0x185c   :  { %11477 = vmatpush1.bf16.msra.mxu1 %v17899_v8 }
0x185d   :  { %11479 = vmatprep.subr.bf16.mxu1 %v17900_v27 }
0x1860   :  { %11481 = vmatpush1.bf16.msra.mxu1 %v17901_v10 }
0x1861   :  { %11815 = vmatprep.subr.bf16.mxu1 %v17902_v37 }
0x1863   :  { %5563 = vmatmul.mubr.f32.vlgmr.msra.gmra.mrb[98].mxu1 %v17903_v54 }
0x1864   :  { %11817 = vmatpush1.bf16.msra.mxu1 %v17904_v52  ;;  %7400 = vmatprep.mubr.f32.mxu1 %v17544_v50 }
0x1865   :  { %11819 = vmatprep.subr.bf16.mxu1 %v17905_v24 }
0x1868   :  { %11821 = vmatpush1.bf16.msra.mxu1 %v17906_v40 }
0x1869   :  { %11831 = vmatprep.subr.bf16.mxu1 %v17907_v3  ;;  %v17915_v3 = vld [vmem:[#allocation421_spill] sm:$0xff] }
0x1877   :  { %v9308_v17 = vpop.f32.mrb[46].mxu0 }
0x1878   :  { %v9309_v38 = vpop.f32.mrb[47].mxu0 }
0x1879   :  { %v9310_v27 = vadd.f32 %v9309_v38, %v9308_v17  ;;  %v17916_v17 = vld [vmem:[#allocation422_spill] sm:$0xff] }
0x187b   :  { %v5916_v8 = vadd.f32 %v9310_v27, %v5846_v28  ;;  %v17908_v28 = vld [vmem:[#allocation414_spill] sm:$0xff]  ;;  %v17914_v27 = vld [vmem:[#allocation420_spill] sm:$0xff] }
0x1897   :  { %v9343_v10 = vpop.f32.mrb[48].mxu0 }
0x1898   :  { %v9344_v1 = vpop.f32.mrb[49].mxu0 }
0x1899   :  { %v9345_v37 = vadd.f32 %v9344_v1, %v9343_v10  ;;  %v17910_v10 = vld [vmem:[#allocation416_spill] sm:$0xff]  ;;  %v17913_v1 = vld [vmem:[#allocation419_spill] sm:$0xff] }
0x189b   :  { %v5986_v13 = vadd.f32 %v9345_v37, %v5916_v8  ;;  %v17909_v8 = vld [vmem:[#allocation415_spill] sm:$0xff] }
0x189d   :  { %v5991_v40 = vmax.f32 %v5986_v13, 0.0 }
0x1936   :  { %v5564_v57 = vpop.f32.mrb[98].mxu1 }
0x1937   :  { %v12476_v54 = vadd.f32 %v5564_v57, %v15069_v29  ;;  %v5566_v52 = vpop.f32.mrb[99].mxu1  ;;  %v12580_v57 = vld [vmem:[#allocation35] sm:$0x1] }
0x1938   :  { %v12477_v51 = vadd.f32 %v5566_v52, %v15073_v44 }
0x1939   :  { %v5989_v24 = vmax.f32 %v12476_v54, 0.0 }
0x193a   :  { %v5990_v41 = vmax.f32 %v12477_v51, 0.0  ;;  %v17911_v51 = vld [vmem:[#allocation417_spill] sm:$0xff] }
0x193c   :  { %6056 = vmatprep.mubr.f32.mxu0 %v5990_v41  ;;  %v17912_v41 = vld [vmem:[#allocation418_spill] sm:$0xff] }
0x193d   :  { %6057 = vmatmul.mubr.f32.vlgmr.msra.gmra.mrb[50].mxu0 %v5989_v24 }
0x193e   :  { %11708 = vmatpush3.bf16.msra.mxu0 %v15079_v26  ;;  %10077 = vmatprep.mubr.msk.f32.mxu0 %vm13180_vm1, %v17544_v50 }
0x193f   :  { %11709 = vmatprep.subr.bf16.mxu0 %v17562_v48 }
0x1942   :  { %11711 = vmatpush3.bf16.msra.mxu0 %v17908_v28 }
0x1943   :  { %11712 = vmatprep.subr.bf16.mxu0 %v17562_v48 }
0x1946   :  { %11714 = vmatpush3.bf16.msra.mxu0 %v17909_v8 }
0x1947   :  { %11715 = vmatprep.subr.bf16.mxu0 %v17562_v48 }
0x194a   :  { %11717 = vmatpush3.bf16.msra.mxu0 %v17910_v10 }
0x194b   :  { %11718 = vmatprep.subr.bf16.mxu0 %v17562_v48 }
0x194e   :  { %11720 = vmatpush3.bf16.msra.mxu0 %v17911_v51 }
0x194f   :  { %11721 = vmatprep.subr.bf16.mxu0 %v17562_v48 }
0x1952   :  { %11723 = vmatpush3.bf16.msra.mxu0 %v17912_v41 }
0x1953   :  { %11724 = vmatprep.subr.bf16.mxu0 %v17562_v48 }
0x1956   :  { %11726 = vmatpush3.bf16.msra.mxu0 %v17913_v1 }
0x1957   :  { %11727 = vmatprep.subr.bf16.mxu0 %v17562_v48 }
0x195a   :  { %11729 = vmatpush3.bf16.msra.mxu0 %v17914_v27 }
0x195b   :  { %11731 = vmatprep.subr.bf16.mxu0 %v17915_v3 }
0x195d   :  { %10078 = vmatmul.mubr.f32.vlgmr.msra.gmra.mrb[52].mxu0 %v5991_v40 }
0x195e   :  { %11733 = vmatpush3.bf16.msra.mxu0 %v17915_v3  ;;  %10088 = vmatprep.mubr.msk.f32.mxu0 %vm1322_vm6, %v15262_v56 }
0x195f   :  { %11735 = vmatprep.subr.bf16.mxu0 %v17916_v17 }
0x1962   :  { %11737 = vmatpush3.bf16.msra.mxu0 %v17916_v17  ;;  %v12581_v17 = vld [vmem:[#allocation24] ss:$0 sm:$0xff] }
0x1963   :  { %11738 = vmatprep.subr.bf16.mxu0 %v17562_v48 }
0x1965   :  { %10089 = vmatmul.mubr.msk.f32.vlgmr.msra.gmra.mrb[54].mxu0 %vm1322_vm6, %v15260_v32 }
0x1966   :  { %10095 = vmatprep.mubr.msk.f32.mxu0 %vm13180_vm1, %v17544_v50 }
0x1a10   :  { %v9378_v13 = vpop.f32.mrb[50].mxu0 }
0x1a11   :  { %v9379_v38 = vpop.f32.mrb[51].mxu0 }
0x1a12   :  { %v9380_v37 = vadd.f32 %v9379_v38, %v9378_v13 }
0x1a14   :  { %v6059_v54 = vadd.f32 %v12580_v57, %v9380_v37 }
0x1a30   :  { %v6128_v52 = vpop.f32.mrb[52].mxu0 }
0x1a31   :  { %v15732_v24 = vadd.f32 %v6128_v52, %v6059_v54  ;;  %v10079_v40 = vpop.f32.mrb[53].mxu0 }
0x1a33   :  { %6132 = vst [vmem:[#allocation39 + $0x1] sm:$0x1] %v15732_v24 }
0x1a38   :  { %v10090_v3 = vpop.f32.mrb[54].mxu0 }
0x1a39   :  { %v6253_v27 = vadd.f32 %v12581_v17, %v10090_v3  ;;  %v6247_v1 = vpop.f32.mrb[55].mxu0 }
0x1a3a   :  { %v6248_v41 = vadd.f32 %v12581_v17, %v6247_v1 }
0x1a3b   :  { %12553 = vtanh.f32 %v6253_v27 }
0x1a3c   :  { %12555 = vtanh.f32 %v6248_v41 }
0x1a45   :  { %v12554_v51 = vpop.eup %12553 }
0x1a46   :  { %v12556_v10 = vpop.eup %12555  ;;  %v6259_v8 = vmul.f32 %v12554_v51, %v15260_v32  ;;  %v12582_v51 = vld [vmem:[%s17194_s9] sm:$0xff] }
0x1a47   :  { %v6258_v13 = vmul.f32 %v12556_v10, %v15262_v56  ;;  %v12584_v10 = vld [vmem:[%s17194_s9 + $0x10] sm:$0xff] }
0x1a48   :  { %v15738_v38 = vadd.f32 %v6259_v8, %v15260_v32  ;;  %v17917_v32 = vld [vmem:[#allocation57_spill] sm:$0xff]  ;;  %v17918_v8 = vld [vmem:[#allocation58_spill] sm:$0xff] }
0x1a49   :  { %v15741_v37 = vadd.f32 %v6258_v13, %v15262_v56  ;;  %v12583_v56 = vld [vmem:[%s17194_s9 + $0x8] sm:$0xff] }
0x1a4a   :  { %v17919_v13 = vld [vmem:[#allocation59_spill] sm:$0xff] }
0x1a4b   :  { %v11739_v57 = vpack.c.bf16 %v15738_v38, %v15741_v37 }
0x1a4d   :  { %11741 = vmatpush3.bf16.msk.msra.mxu0 %vm13650_vm4, %v11739_v57 }
0x1a4e   :  { %11742 = vmatprep.subr.bf16.mxu0 %v17562_v48 }
0x1a50   :  { %10096 = vmatmul.mubr.msk.f32.vlgmr.msra.gmra.mrb[56].mxu0 %vm1228_vm5, %v12582_v51 }
0x1a51   :  { %10098 = vmatprep.mubr.msk.f32.mxu0 %vm13180_vm1, %v17544_v50  ;;  %11744 = vmatpush3.bf16.msra.mxu0 %v17917_v32  ;;  %v17920_v32 = vld [vmem:[#allocation60_spill] sm:$0xff] }
0x1a52   :  { %11745 = vmatprep.subr.bf16.mxu0 %v17562_v48 }
0x1a54   :  { %10099 = vmatmul.mubr.msk.f32.gmra.mrb[58].mxu0 %vm1228_vm5, %v12583_v56 }
0x1a55   :  { %10101 = vmatprep.mubr.msk.f32.mxu0 %vm13180_vm1, %v17544_v50  ;;  %11747 = vmatpush3.bf16.msra.mxu0 %v17918_v8 }
0x1a56   :  { %11748 = vmatprep.subr.bf16.mxu0 %v17562_v48 }
0x1a58   :  { %10102 = vmatmul.mubr.msk.f32.gmra.mrb[60].mxu0 %vm1228_vm5, %v12584_v10 }
0x1a59   :  { %10112 = vmatprep.mubr.msk.f32.mxu0 %vm13180_vm1, %v17544_v50 }
0x1b23   :  { %v6331_v41 = vpop.f32.mrb[56].mxu0 }
0x1b24   :  { %v10097_v1 = vpop.f32.mrb[57].mxu0  ;;  %10113 = vmatmul.mubr.msk.f32.vlgmr.msra.gmra.mrb[62].mxu0 %vm1322_vm6, %v6331_v41 }
0x1b25   :  { %10115 = vmatprep.mubr.msk.f32.mxu0 %vm13180_vm1, %v17544_v50 }
0x1b27   :  { %v6336_v27 = vpop.f32.mrb[58].mxu0 }
0x1b28   :  { %v10100_v54 = vpop.f32.mrb[59].mxu0  ;;  %10116 = vmatmul.mubr.msk.f32.gmra.mrb[64].mxu0 %vm1322_vm6, %v6336_v27 }
0x1b29   :  { %10118 = vmatprep.mubr.msk.f32.mxu0 %vm13180_vm1, %v17544_v50  ;;  %v17921_v54 = vld [vmem:[#allocation61_spill] sm:$0xff] }
0x1b2b   :  { %v6341_v52 = vpop.f32.mrb[60].mxu0 }
0x1b2c   :  { %10119 = vmatmul.mubr.msk.f32.gmra.mrb[66].mxu0 %vm1322_vm6, %v6341_v52  ;;  %v10103_v40 = vpop.f32.mrb[61].mxu0 }
0x1b2d   :  { %10127 = vmatprep.mubr.msk.f32.mxu0 %vm13180_vm1, %v17544_v50 }
0x1bf7   :  { %v6420_v3 = vpop.f32.mrb[62].mxu0 }
0x1bf8   :  { %v10114_v17 = vpop.f32.mrb[63].mxu0  ;;  %v15780_v57 = vadd.f32 %v6420_v3, %v17919_v13  ;;  %v12586_v13 = vld [vmem:[#allocation6 + $0x8] sm:$0xff] }
0x1bf9   :  { %v12585_v17 = vld [vmem:[#allocation6] sm:$0xff] }
0x1bfa   :  { %v6434_v10 = vmax.f32 %v15780_v57, 0.0 }
0x1bfb   :  { %v6425_v51 = vpop.f32.mrb[64].mxu0 }
0x1bfc   :  { %v15783_v56 = vadd.f32 %v6425_v51, %v17920_v32  ;;  %v10117_v8 = vpop.f32.mrb[65].mxu0  ;;  %v12587_v51 = vld [vmem:[#allocation6 + $0x10] sm:$0xff] }
0x1bfe   :  { %v6435_v41 = vmax.f32 %v15783_v56, 0.0 }
0x1bff   :  { %v6430_v1 = vpop.f32.mrb[66].mxu0 }
0x1c00   :  { %v11749_v27 = vpack.c.bf16 %v6435_v41, %v6434_v10  ;;  %v15788_v52 = vadd.f32 %v6430_v1, %v17921_v54  ;;  %v10120_v40 = vpop.f32.mrb[67].mxu0 }
0x1c02   :  { %11750 = vmatpush3.bf16.msra.mxu0 %v11749_v27  ;;  %v6436_v3 = vmax.f32 %v15788_v52, 0.0 }
0x1c03   :  { %10125 = vmatprep.subr.mxu0 %v17544_v50 }
0x1c06   :  { %10126 = vmatpush3.msra.mxu0 %v6436_v3 }
0x1c07   :  { %10128 = vmatmul.mubr.msk.f32.vlgmr.msra.gmra.mrb[68].mxu0 %vm1415_vm7, %v12585_v17  ;;  %11751 = vmatprep.subr.bf16.mxu0 %v17562_v48 }
0x1c08   :  { %10130 = vmatprep.mubr.msk.f32.mxu0 %vm13180_vm1, %v17544_v50  ;;  %11753 = vmatpush3.bf16.msra.mxu0 %v13712_v34 }
0x1c09   :  { %11754 = vmatprep.subr.bf16.mxu0 %v17562_v48 }
0x1c0b   :  { %10131 = vmatmul.mubr.msk.f32.gmra.mrb[70].mxu0 %vm1415_vm7, %v12586_v13 }
0x1c0c   :  { %10133 = vmatprep.mubr.msk.f32.mxu0 %vm13180_vm1, %v17544_v50  ;;  %11756 = vmatpush3.bf16.msra.mxu0 %v13715_v36 }
0x1c0d   :  { %11757 = vmatprep.subr.bf16.mxu0 %v17562_v48 }
0x1c0f   :  { %10134 = vmatmul.mubr.msk.f32.gmra.mrb[72].mxu0 %vm1415_vm7, %v12587_v51 }
0x1c10   :  { %10144 = vmatprep.mubr.msk.f32.mxu0 %vm13180_vm1, %v17544_v50 }
0x1cda   :  { %v6503_v32 = vpop.f32.mrb[68].mxu0 }
0x1cdb   :  { %v10129_v8 = vpop.f32.mrb[69].mxu0  ;;  %10145 = vmatmul.mubr.msk.f32.vlgmr.msra.gmra.mrb[74].mxu0 %vm1322_vm6, %v6503_v32 }
0x1cdc   :  { %10147 = vmatprep.mubr.msk.f32.mxu0 %vm13180_vm1, %v17544_v50  ;;  %v12588_v8 = vld [vmem:[#allocation17] ss:$0 sm:$0xff] }
0x1cde   :  { %v6508_v10 = vpop.f32.mrb[70].mxu0 }
0x1cdf   :  { %v10132_v41 = vpop.f32.mrb[71].mxu0  ;;  %10148 = vmatmul.mubr.msk.f32.gmra.mrb[76].mxu0 %vm1322_vm6, %v6508_v10 }
0x1ce0   :  { %10150 = vmatprep.mubr.msk.f32.mxu0 %vm13180_vm1, %v17544_v50 }
0x1ce2   :  { %v6513_v1 = vpop.f32.mrb[72].mxu0 }
0x1ce3   :  { %10151 = vmatmul.mubr.msk.f32.gmra.mrb[78].mxu0 %vm1322_vm6, %v6513_v1  ;;  %v10135_v27 = vpop.f32.mrb[73].mxu0 }
0x1ce4   :  { %10159 = vmatprep.mubr.msk.f32.mxu0 %vm13180_vm1, %v17544_v50 }
0x1dae   :  { %v6592_v54 = vpop.f32.mrb[74].mxu0 }
0x1daf   :  { %v6606_v40 = vadd.f32 %v6592_v54, %v15780_v57  ;;  %v10146_v3 = vpop.f32.mrb[75].mxu0 }
0x1db1   :  { %v6609_v28 = vadd.f32 %v12588_v8, %v6606_v40 }
0x1db2   :  { %v6597_v32 = vpop.f32.mrb[76].mxu0 }
0x1db3   :  { %v6607_v41 = vadd.f32 %v6597_v32, %v15783_v56  ;;  %v10149_v10 = vpop.f32.mrb[77].mxu0  ;;  %v6612_v29 = vmax.f32 %v6609_v28, 0.0 }
0x1db5   :  { %v6610_v26 = vadd.f32 %v12588_v8, %v6607_v41 }
0x1db6   :  { %v6602_v44 = vpop.f32.mrb[78].mxu0 }
0x1db7   :  { %v6613_v59 = vmax.f32 %v6610_v26, 0.0  ;;  %v6608_v1 = vadd.f32 %v6602_v44, %v15788_v52  ;;  %v10152_v27 = vpop.f32.mrb[79].mxu0 }
0x1db9   :  { %v11758_v9 = vpack.c.bf16 %v6613_v59, %v6612_v29  ;;  %v6611_v43 = vadd.f32 %v12588_v8, %v6608_v1 }
0x1dbb   :  { %11759 = vmatpush3.bf16.msra.mxu0 %v11758_v9  ;;  %v6614_v54 = vmax.f32 %v6611_v43, 0.0  ;;  %v12589_v43 = vld [vmem:[#allocation8] sm:$0xff] }
0x1dbc   :  { %10157 = vmatprep.subr.mxu0 %v17544_v50 }
0x1dbf   :  { %10158 = vmatpush3.msra.mxu0 %v6614_v54 }
0x1dc0   :  { %10160 = vmatmul.mubr.msk.f32.vlgmr.msra.gmra.mrb[80].mxu0 %vm1415_vm7, %v12585_v17  ;;  %11760 = vmatprep.subr.bf16.mxu0 %v17562_v48 }
0x1dc1   :  { %10162 = vmatprep.mubr.msk.f32.mxu0 %vm13180_vm1, %v17544_v50  ;;  %11762 = vmatpush3.bf16.msra.mxu0 %v13712_v34 }
0x1dc2   :  { %11763 = vmatprep.subr.bf16.mxu0 %v17562_v48 }
0x1dc4   :  { %10163 = vmatmul.mubr.msk.f32.gmra.mrb[82].mxu0 %vm1415_vm7, %v12586_v13 }
0x1dc5   :  { %10165 = vmatprep.mubr.msk.f32.mxu0 %vm13180_vm1, %v17544_v50  ;;  %11765 = vmatpush3.bf16.msra.mxu0 %v13715_v36 }
0x1dc8   :  { %10166 = vmatmul.mubr.msk.f32.gmra.mrb[84].mxu0 %vm1415_vm7, %v12587_v51 }
0x1dc9   :  { %10176 = vmatprep.mubr.msk.f32.mxu0 %vm13180_vm1, %v17544_v50 }
0x1e93   :  { %v6681_v9 = vpop.f32.mrb[80].mxu0 }
0x1e94   :  { %v10161_v29 = vpop.f32.mrb[81].mxu0  ;;  %10177 = vmatmul.mubr.msk.f32.vlgmr.msra.gmra.mrb[86].mxu0 %vm1322_vm6, %v6681_v9 }
0x1e95   :  { %10179 = vmatprep.mubr.msk.f32.mxu0 %vm13180_vm1, %v17544_v50 }
0x1e97   :  { %v6686_v34 = vpop.f32.mrb[82].mxu0 }
0x1e98   :  { %v10164_v44 = vpop.f32.mrb[83].mxu0  ;;  %10180 = vmatmul.mubr.msk.f32.gmra.mrb[88].mxu0 %vm1322_vm6, %v6686_v34 }
0x1e99   :  { %10182 = vmatprep.mubr.msk.f32.mxu0 %vm13180_vm1, %v17544_v50 }
0x1e9b   :  { %v6691_v36 = vpop.f32.mrb[84].mxu0 }
0x1e9c   :  { %10183 = vmatmul.mubr.msk.f32.gmra.mrb[90].mxu0 %vm1322_vm6, %v6691_v36  ;;  %v10167_v26 = vpop.f32.mrb[85].mxu0 }
0x1e9d   :  { %10191 = vmatprep.mubr.msk.f32.mxu0 %vm1415_vm7, %v12589_v43 }
0x1f67   :  { %v6770_v59 = vpop.f32.mrb[86].mxu0 }
0x1f68   :  { %v6784_v28 = vadd.f32 %v6770_v59, %v15780_v57  ;;  %v10178_v17 = vpop.f32.mrb[87].mxu0  ;;  %v12590_v57 = vld [vmem:[#allocation8 + $0x8] sm:$0xf] }
0x1f6a   :  { %v6787_v51 = vadd.f32 %v12588_v8, %v6784_v28 }
0x1f6b   :  { %v6775_v13 = vpop.f32.mrb[88].mxu0 }
0x1f6c   :  { %v6785_v40 = vadd.f32 %v6775_v13, %v15783_v56  ;;  %v10181_v3 = vpop.f32.mrb[89].mxu0  ;;  %v6790_v10 = vmax.f32 %v6787_v51, 0.0  ;;  %v17922_v56 = vlaneseq }
0x1f6e   :  { %v6788_v32 = vadd.f32 %v12588_v8, %v6785_v40 }
0x1f6f   :  { %v6780_v41 = vpop.f32.mrb[90].mxu0 }
0x1f70   :  { %v6791_v1 = vmax.f32 %v6788_v32, 0.0  ;;  %v6786_v27 = vadd.f32 %v6780_v41, %v15788_v52  ;;  %v10184_v54 = vpop.f32.mrb[91].mxu0  ;;  %v15850_v52 = vand.u32 127, %v17922_v56  ;;  %v17925_v56 = vld [vmem:[#allocation62_spill] sm:$0xff] }
0x1f72   :  { %v6789_v9 = vadd.f32 %v12588_v8, %v6786_v27  ;;  %v11766_v29 = vpack.c.bf16 %v6791_v1, %v6790_v10  ;;  %vm3704_vm13 = vcmp.lt.s32.totalorder %v15850_v52, 5  ;;  %vm3733_vm2 = vcmp.eq.s32.totalorder %v15850_v52, 6 }
0x1f73   :  { %vm8576_vm3 = vcmp.eq.s32.totalorder %v15850_v52, 0 }
0x1f74   :  { %v6792_v34 = vmax.f32 %v6789_v9, 0.0  ;;  %11767 = vmatprep.subr.bf16.mxu0 %v11766_v29 }
0x1f75   :  { %11769 = vmatpush3.bf16.msra.mxu0 %v11766_v29 }
0x1f76   :  { %10189 = vmatprep.subr.mxu0 %v6792_v34 }
0x1f79   :  { %10190 = vmatpush3.msra.mxu0 %v6792_v34 }
0x1f7a   :  { %10192 = vmatmul.mubr.msk.f32.vlgmr.msra.gmra.mrb[92].mxu0 %vm1415_vm7, %v12590_v57  ;;  %11771 = vmatprep.subr.bf16.mxu0 %v13787_v55  ;;  %v17924_v57 = vld [vmem:[#allocation69_spill] sm:$0xff] }
0x1f7b   :  { %11773 = vmatpush3.bf16.msra.mxu0 %v13787_v55  ;;  %v15858_v55 = vsel %vm3704_vm13, %v15732_v24, -1e+30 }
0x1f7c   :  { %11775 = vmatprep.subr.bf16.mxu0 %v13793_v61  ;;  %v6136_v59 = vsel %vm3706_vm14, %v15858_v55, -inf }
0x1f7f   :  { %11777 = vmatpush3.bf16.msra.mxu0 %v13793_v61  ;;  %v17923_v61 = vld [vmem:[#allocation423_spill] sm:$0xff] }
0x1f80   :  { %11779 = vmatprep.subr.bf16.mxu0 %v13797_v0  ;;  %v3705_v43 = vsel %vm3704_vm13, %v17923_v61, -1e+30 }
0x1f81   :  { %v3707_v28 = vsel %vm3706_vm14, %v3705_v43, -inf }
0x204d   :  { %v10193_v8 = vpop.f32.mrb[92].mxu0 }
0x204e   :  { %v6859_v44 = vpop.f32.mrb[93].mxu0  ;;  %v6871_v36 = vsel %vm1865_vm8, %v10193_v8, 0.0 }
0x204f   :  { %6872 = vadd.xlane.f32.xlu1 %v6871_v36  ;;  %v6868_v26 = vsel %vm1322_vm6, %v6859_v44, 0.0  ;;  %v17928_v36 = vld [vmem:[#allocation64_spill] sm:$0xff] }
0x2050   :  { %6869 = vadd.xlane.f32.xlu0 %v6868_v26  ;;  %v17931_v26 = vld [vmem:[#allocation85_spill] sm:$0xff] }
0x2053   :  { %6137 = vmax.xlane.f32.xlu1 %v6136_v59  ;;  %v17933_v59 = vld [vmem:[#allocation154_spill] sm:$0xff] }
0x2054   :  { %3708 = vmax.xlane.f32.xlu0 %v3707_v28  ;;  %v17934_v28 = vld [vmem:[#allocation72_spill] sm:$0xff] }
0x20dc   :  { %v6873_v17 = vpop.xlane.xlu1 %6872 }
0x20dd   :  { %vm6875_vm15 = vcmp.eq.f32.partialorder %v6873_v17, 0.0  ;;  %v6870_v13 = vpop.xlane.xlu0 %6869  ;;  %v17935_v17 = vld [vmem:[#allocation74_spill] sm:$0xff] }
0x20de   :  { %vm6874_vm0 = vcmp.eq.f32.partialorder %v6870_v13, 0.0  ;;  %v6881_v40 = vsel %vm6875_vm15, %v15738_v38, %v10193_v8  ;;  %v17936_v13 = vld [vmem:[#allocation165_spill] sm:$0xff] }
0x20df   :  { %v6880_v51 = vsel %vm6874_vm0, %v15741_v37, %v6859_v44  ;;  %v17927_v44 = vld [vmem:[#allocation81_spill] sm:$0xff] }
0x20e0   :  { %10202 = vmatprep.mubr.msk.f32.mxu0 %vm1322_vm6, %v6880_v51  ;;  %v17937_v51 = vld [vmem:[#allocation168_spill] sm:$0xff] }
0x20e1   :  { %10203 = vmatmul.mubr.msk.f32.vlgmr.msra.gmra.mrb[94].mxu0 %vm1322_vm6, %v6881_v40  ;;  %v15870_v3 = vpop.xlane.xlu0 %3708  ;;  %v17938_v40 = vld [vmem:[#allocation76_spill] sm:$0xff] }
0x20e2   :  { %v3710_v32 = vsub.f32 %v3705_v43, %v15870_v3  ;;  %11781 = vmatpush3.bf16.msra.mxu0 %v13797_v0  ;;  %10213 = vmatprep.mubr.msk.f32.mxu0 %vm1322_vm6, %v15741_v37  ;;  %v12591_v37 = vld [vmem:[#allocation21] ss:$0 sm:$0xff] }
0x20e3   :  { %11783 = vmatprep.subr.bf16.mxu0 %v13802_v11  ;;  %v17932_v43 = vld [vmem:[#allocation70_spill] sm:$0xff] }
0x20e4   :  { %v3711_v41 = vmul.f32 1.442695, %v3710_v32  ;;  %v17939_v32 = vld [vmem:[#allocation78_spill] sm:$0xff] }
0x20e6   :  { %12557 = vpow2.f32 %v3711_v41  ;;  %11785 = vmatpush3.bf16.msra.mxu0 %v13802_v11  ;;  %v17940_v41 = vld [vmem:[#allocation170_spill] sm:$0xff] }
0x20e7   :  { %11786 = vmatprep.subr.bf16.mxu0 %v17562_v48 }
0x20e9   :  { %10214 = vmatmul.mubr.msk.f32.vlgmr.msra.gmra.mrb[94].mxu0 %vm1322_vm6, %v15738_v38  ;;  %v12592_v38 = vld [vmem:[#allocation9] sm:$0x1] }
0x20ea   :  { %10220 = vmatprep.mubr.msk.f32.mxu0 %vm13180_vm1, %v17544_v50 }
0x20f0   :  { %v12558_v10 = vpop.eup %12557 }
0x20f1   :  { %v3713_v0 = vsel %vm3706_vm14, %v12558_v10, 0.0  ;;  %v17941_v10 = vld [vmem:[#allocation172_spill] sm:$0xff] }
0x20f2   :  { %3714 = vadd.xlane.f32.xlu1 %v3713_v0  ;;  %v17942_v0 = vld [vmem:[#allocation80_spill] sm:$0xff] }
0x21bc   :  { %v10215_v1 = vpop.f32.mrb[94].mxu0 }
0x21bd   :  { %v7044_v27 = vadd.f32 %v12591_v37, %v10215_v1  ;;  %v7034_v54 = vpop.f32.mrb[95].mxu0  ;;  %v17943_v1 = vld [vmem:[#allocation82_spill] sm:$0xff] }
0x21be   :  { %v7043_v9 = vadd.f32 %v12591_v37, %v7034_v54  ;;  %v17944_v37 = vld [vmem:[#allocation174_spill] sm:$0xff]  ;;  %v17946_v54 = vld [vmem:[#allocation84_spill] sm:$0xff] }
0x21bf   :  { %v7046_v29 = vmax.f32 %v7044_v27, 0.0  ;;  %v17945_v27 = vld [vmem:[#allocation176_spill] sm:$0xff] }
0x21c0   :  { %v7045_v34 = vmax.f32 %v7043_v9, 0.0  ;;  %v17947_v9 = vld [vmem:[#allocation86_spill] sm:$0xff] }
0x21c2   :  { %v11787_v11 = vpack.c.bf16 %v7046_v29, %v7045_v34  ;;  %v17948_v29 = vld [vmem:[#allocation178_spill] sm:$0xff]  ;;  %v17949_v34 = vld [vmem:[#allocation180_spill] sm:$0xff] }
0x21c4   :  { %11789 = vmatpush3.bf16.msk.msra.mxu0 %vm13650_vm4, %v11787_v11  ;;  %v17950_v11 = vld [vmem:[#allocation88_spill] sm:$0xff]  ;;  %vm3719_vm4 = vcmp.eq.s32.totalorder %v15850_v52, 2 }
0x21c5   :  { %11791 = vmatprep.subr.bf16.mxu0 %v17576_v58  ;;  %v17926_v58 = vld [vmem:[#allocation63_spill] sm:$0xff] }
0x21c7   :  { %10221 = vmatmul.mubr.msk.f32.vlgmr.msra.gmra.mrb[96].mxu0 %vm1228_vm5, %v12592_v38  ;;  %v17951_v38 = vld [vmem:[#allocation90_spill] sm:$0xff]  ;;  %vm6148_vm5 = vcmp.eq.s32.totalorder %v15850_v52, 1 }
0x21c8   :  { %11793 = vmatpush1.bf16.msra.mxu0 %v17577_v12  ;;  %7187 = vmatprep.mubr.f32.mxu0 %v17544_v50  ;;  %v17929_v12 = vld [vmem:[#allocation83_spill] sm:$0xff] }
0x21c9   :  { %11795 = vmatprep.subr.bf16.mxu0 %v17578_v18  ;;  %v17930_v18 = vld [vmem:[#allocation65_spill] sm:$0xff] }
0x21cc   :  { %11797 = vmatpush1.bf16.msra.mxu0 %v17924_v57  ;;  %v17952_v57 = vld [vmem:[#allocation182_spill] sm:$0xff] }
0x21cd   :  { %11799 = vmatprep.subr.bf16.mxu0 %v17925_v56  ;;  %v17953_v56 = vld [vmem:[#allocation184_spill] sm:$0xff] }
0x229a   :  { %v7116_v8 = vpop.f32.mrb[96].mxu0 }
0x229b   :  { %8742 = vmatmul.mubr.msk.f32.vlgmr.msra.gmra.mrb[98].mxu0 %vm1322_vm6, %v7116_v8  ;;  %8745 = vmatmul.mubr.msk.f32.vlgmr.msra.gmra.mrb[100].mxu1 %vm1322_vm6, %v7116_v8  ;;  %v10222_v6 = vpop.f32.mrb[97].mxu0 }
0x229c   :  { %11801 = vmatpush1.bf16.msra.mxu0 %v17926_v58  ;;  %11833 = vmatpush1.bf16.msra.mxu1 %v17927_v44  ;;  %v17954_v6 = vld [vmem:[#allocation92_spill] sm:$0xff]  ;;  %v17955_v58 = vld [vmem:[#allocation94_spill] sm:$0xff] }
0x229d   :  { %11803 = vmatprep.subr.bf16.mxu0 %v17928_v36  ;;  %11835 = vmatprep.subr.bf16.mxu1 %v17929_v12  ;;  %v17956_v44 = vld [vmem:[#allocation186_spill] sm:$0xff]  ;;  %v17957_v36 = vld [vmem:[#allocation188_spill] sm:$0xff] }
0x229e   :  { %7258 = vmatprep.mubr.f32.mxu0 %v17544_v50  ;;  %7542 = vmatprep.mubr.f32.mxu1 %v17544_v50  ;;  %v17958_v12 = vld [vmem:[#allocation96_spill] sm:$0xff] }
0x22a0   :  { %11805 = vmatpush1.bf16.msra.mxu0 %v17930_v18  ;;  %11837 = vmatpush1.bf16.msra.mxu1 %v17931_v26  ;;  %v17959_v18 = vld [vmem:[#allocation98_spill] sm:$0xff]  ;;  %v17961_v26 = vld [vmem:[#allocation192_spill] sm:$0xff] }
0x22a1   :  { %11807 = vmatprep.subr.bf16.mxu0 %v17932_v43  ;;  %12223 = vmatprep.subr.bf16.mxu1 %v17933_v59  ;;  %v17962_v43 = vld [vmem:[#allocation100_spill] sm:$0xff]  ;;  %v17963_v59 = vld [vmem:[#allocation102_spill] sm:$0xff] }
0x22a3   :  { %8743 = vmatmul.mubr.msk.f32.vlgmr.msra.gmra.mrb[100].mxu0 %vm1322_vm6, %v7116_v8  ;;  %8747 = vmatmul.mubr.msk.f32.vlgmr.msra.gmra.mrb[102].mxu1 %vm1322_vm6, %v7116_v8 }
0x22a4   :  { %11809 = vmatpush1.bf16.msra.mxu0 %v17934_v28  ;;  %7329 = vmatprep.mubr.f32.mxu0 %v17544_v50  ;;  %v17964_v28 = vld [vmem:[#allocation194_spill] sm:$0xff] }
0x22a5   :  { %11811 = vmatprep.subr.bf16.mxu0 %v17935_v17  ;;  %12225 = vmatpush3.bf16.msra.mxu1 %v17936_v13  ;;  %v17965_v17 = vld [vmem:[#allocation196_spill] sm:$0xff] }
0x22a6   :  { %12227 = vmatprep.subr.bf16.mxu1 %v17937_v51  ;;  %v17966_v13 = vld [vmem:[#allocation104_spill] sm:$0xff]  ;;  %v17967_v51 = vld [vmem:[#allocation106_spill] sm:$0xff] }
0x22a8   :  { %11813 = vmatpush1.bf16.msra.mxu0 %v17938_v40  ;;  %v17968_v40 = vld [vmem:[#allocation108_spill] sm:$0xff] }
0x22a9   :  { %11823 = vmatprep.subr.bf16.mxu0 %v17939_v32  ;;  %12229 = vmatpush3.bf16.msra.mxu1 %v17940_v41  ;;  %v17969_v32 = vld [vmem:[#allocation110_spill] sm:$0xff]  ;;  %v17970_v41 = vld [vmem:[#allocation112_spill] sm:$0xff] }
0x22aa   :  { %12231 = vmatprep.subr.bf16.mxu1 %v17941_v10  ;;  %v17971_v10 = vld [vmem:[#allocation114_spill] sm:$0xff] }
0x22ab   :  { %8744 = vmatmul.mubr.msk.f32.vlgmr.msra.gmra.mrb[102].mxu0 %vm1322_vm6, %v7116_v8 }
0x22ac   :  { %11825 = vmatpush1.bf16.msra.mxu0 %v17942_v0  ;;  %7471 = vmatprep.mubr.f32.mxu0 %v17544_v50  ;;  %v17972_v0 = vld [vmem:[#allocation116_spill] sm:$0xff] }
0x22ad   :  { %11827 = vmatprep.subr.bf16.mxu0 %v17943_v1  ;;  %12233 = vmatpush3.bf16.msra.mxu1 %v17944_v37  ;;  %v17973_v1 = vld [vmem:[#allocation118_spill] sm:$0xff]  ;;  %v17974_v37 = vld [vmem:[#allocation120_spill] sm:$0xff] }
0x22ae   :  { %12235 = vmatprep.subr.bf16.mxu1 %v17945_v27  ;;  %v17975_v27 = vld [vmem:[#allocation122_spill] sm:$0xff] }
0x22b0   :  { %11829 = vmatpush1.bf16.msra.mxu0 %v17946_v54  ;;  %v17976_v54 = vld [vmem:[#allocation124_spill] sm:$0xff] }
0x22b1   :  { %11839 = vmatprep.subr.bf16.mxu0 %v17947_v9  ;;  %12237 = vmatpush3.bf16.msra.mxu1 %v17948_v29  ;;  %v17977_v9 = vld [vmem:[#allocation126_spill] sm:$0xff]  ;;  %v17978_v29 = vld [vmem:[#allocation128_spill] sm:$0xff] }
0x22b2   :  { %12239 = vmatprep.subr.bf16.mxu1 %v17949_v34  ;;  %v17979_v34 = vld [vmem:[#allocation130_spill] sm:$0xff] }
0x22b3   :  { %8746 = vmatmul.mubr.msk.f32.vlgmr.msra.gmra.mrb[104].mxu0 %vm1322_vm6, %v7116_v8  ;;  %v17960_v8 = vld [vmem:[#allocation190_spill] sm:$0xff] }
0x22b4   :  { %11841 = vmatpush1.bf16.msra.mxu0 %v17950_v11  ;;  %v17980_v11 = vld [vmem:[#allocation132_spill] sm:$0xff] }
0x22b5   :  { %11843 = vmatprep.subr.bf16.mxu0 %v17951_v38  ;;  %12241 = vmatpush3.bf16.msra.mxu1 %v17952_v57  ;;  %v17981_v38 = vld [vmem:[#allocation134_spill] sm:$0xff]  ;;  %v17982_v57 = vld [vmem:[#allocation136_spill] sm:$0xff] }
0x22b6   :  { %12243 = vmatprep.subr.bf16.mxu1 %v17953_v56  ;;  %v17983_v56 = vld [vmem:[#allocation138_spill] sm:$0xff] }
0x22b8   :  { %11845 = vmatpush1.bf16.msra.mxu0 %v17954_v6  ;;  %v17984_v6 = vld [vmem:[#allocation140_spill] sm:$0xff] }
0x22b9   :  { %11847 = vmatprep.subr.bf16.mxu0 %v17955_v58  ;;  %12245 = vmatpush3.bf16.msra.mxu1 %v17956_v44  ;;  %v17985_v58 = vld [vmem:[#allocation142_spill] sm:$0xff]  ;;  %v17986_v44 = vld [vmem:[#allocation144_spill] sm:$0xff] }
0x22ba   :  { %12247 = vmatprep.subr.bf16.mxu1 %v17957_v36  ;;  %v17987_v36 = vld [vmem:[#allocation146_spill] sm:$0xff] }
0x22bc   :  { %11849 = vmatpush1.bf16.msra.mxu0 %v17958_v12  ;;  %v17988_v12 = vld [vmem:[#allocation148_spill] sm:$0xff] }
0x22bd   :  { %11851 = vmatprep.subr.bf16.mxu0 %v17959_v18  ;;  %12249 = vmatpush3.bf16.msra.mxu1 %v17960_v8  ;;  %v17989_v18 = vld [vmem:[#allocation87_spill] sm:$0xff] }
0x22be   :  { %12251 = vmatprep.subr.bf16.mxu1 %v17961_v26 }
0x22c0   :  { %11853 = vmatpush1.bf16.msra.mxu0 %v17962_v43  ;;  %v17990_v43 = vld [vmem:[#allocation155_spill] sm:$0xff] }
0x22c1   :  { %11855 = vmatprep.subr.bf16.mxu0 %v17963_v59  ;;  %12253 = vmatpush3.bf16.msra.mxu1 %v17964_v28 }
0x22c2   :  { %12255 = vmatprep.subr.bf16.mxu1 %v17965_v17 }
0x22c4   :  { %11857 = vmatpush1.bf16.msra.mxu0 %v17966_v13  ;;  %v17991_v13 = vld [vmem:[#allocation157_spill] sm:$0xff] }
0x22c5   :  { %11859 = vmatprep.subr.bf16.mxu0 %v17967_v51 }
0x22c8   :  { %11861 = vmatpush1.bf16.msra.mxu0 %v17968_v40  ;;  %v17992_v40 = vld [vmem:[#allocation159_spill] sm:$0xff] }
0x22c9   :  { %11863 = vmatprep.subr.bf16.mxu0 %v17969_v32 }
0x22cc   :  { %11865 = vmatpush1.bf16.msra.mxu0 %v17970_v41  ;;  %v17993_v41 = vld [vmem:[#allocation161_spill] sm:$0xff] }
0x22cd   :  { %11867 = vmatprep.subr.bf16.mxu0 %v17971_v10 }
0x22d0   :  { %11869 = vmatpush1.bf16.msra.mxu0 %v17972_v0 }
0x22d1   :  { %11871 = vmatprep.subr.bf16.mxu0 %v17973_v1 }
0x22d4   :  { %11873 = vmatpush1.bf16.msra.mxu0 %v17974_v37 }
0x22d5   :  { %11875 = vmatprep.subr.bf16.mxu0 %v17975_v27 }
0x22d8   :  { %11877 = vmatpush1.bf16.msra.mxu0 %v17976_v54 }
0x22d9   :  { %11879 = vmatprep.subr.bf16.mxu0 %v17977_v9 }
0x22dc   :  { %11881 = vmatpush1.bf16.msra.mxu0 %v17978_v29  ;;  %v17994_v29 = vld [vmem:[#allocation158_spill] sm:$0xff] }
0x22dd   :  { %11883 = vmatprep.subr.bf16.mxu0 %v17979_v34 }
0x22e0   :  { %11885 = vmatpush1.bf16.msra.mxu0 %v17980_v11  ;;  %v17995_v11 = vld [vmem:[#allocation89_spill] sm:$0xff] }
0x22e1   :  { %11887 = vmatprep.subr.bf16.mxu0 %v17981_v38  ;;  %v17996_v38 = vld [vmem:[#allocation198_spill] sm:$0xff] }
0x22e4   :  { %11889 = vmatpush1.bf16.msra.mxu0 %v17982_v57  ;;  %v17997_v57 = vld [vmem:[#allocation91_spill] sm:$0xff] }
0x22e5   :  { %11891 = vmatprep.subr.bf16.mxu0 %v17983_v56  ;;  %v17998_v56 = vld [vmem:[#allocation200_spill] sm:$0xff] }
0x22e8   :  { %11893 = vmatpush1.bf16.msra.mxu0 %v17984_v6  ;;  %v17999_v6 = vld [vmem:[#allocation162_spill] sm:$0xff] }
0x22e9   :  { %11895 = vmatprep.subr.bf16.mxu0 %v17985_v58 }
0x22ec   :  { %11897 = vmatpush1.bf16.msra.mxu0 %v17986_v44 }
0x22ed   :  { %11899 = vmatprep.subr.bf16.mxu0 %v17987_v36  ;;  %v18000_v36 = vld [vmem:[#allocation93_spill] sm:$0xff] }
0x22f0   :  { %11901 = vmatpush1.bf16.msra.mxu0 %v17988_v12  ;;  %v18001_v12 = vld [vmem:[#allocation202_spill] sm:$0xff] }
0x22f1   :  { %11903 = vmatprep.subr.bf16.mxu0 %v17989_v18  ;;  %v18002_v18 = vld [vmem:[#allocation95_spill] sm:$0xff] }
0x236e   :  { %v7189_v8 = vpop.f32.mrb[98].mxu0  ;;  %v15967_v26 = vpop.f32.mrb[100].mxu1 }
0x236f   :  { %v7190_v59 = vadd.f32 %v7189_v8, %v17990_v43  ;;  %v7191_v28 = vpop.f32.mrb[99].mxu0  ;;  %v15970_v17 = vpop.f32.mrb[101].mxu1  ;;  %v18003_v8 = vld [vmem:[#allocation204_spill] sm:$0xff] }
0x2370   :  { %v7192_v51 = vadd.f32 %v7191_v28, %v17991_v13  ;;  %v18004_v28 = vld [vmem:[#allocation97_spill] sm:$0xff]  ;;  %v18005_v13 = vld [vmem:[#allocation206_spill] sm:$0xff] }
0x2371   :  { %v7549_v32 = vadd.f32 %v7190_v59, %v17992_v40  ;;  %v18007_v40 = vld [vmem:[#allocation208_spill] sm:$0xff] }
0x2372   :  { %v7550_v10 = vadd.f32 %v7192_v51, %v17993_v41  ;;  %v18006_v51 = vld [vmem:[#allocation99_spill] sm:$0xff]  ;;  %v18009_v41 = vld [vmem:[#allocation210_spill] sm:$0xff] }
0x2373   :  { %v7561_v1 = vmax.f32 %v7549_v32, 0.0  ;;  %v18008_v32 = vld [vmem:[#allocation101_spill] sm:$0xff] }
0x2374   :  { %v7562_v0 = vmax.f32 %v7550_v10, 0.0  ;;  %v18010_v10 = vld [vmem:[#allocation103_spill] sm:$0xff] }
0x2376   :  { %v7260_v37 = vpop.f32.mrb[100].mxu0  ;;  %v15975_v27 = vpop.f32.mrb[102].mxu1  ;;  %7637 = vmatprep.mubr.f32.mxu0 %v7562_v0  ;;  %8063 = vmatprep.mubr.f32.mxu1 %v7562_v0  ;;  %v18011_v0 = vld [vmem:[#allocation212_spill] sm:$0xff] }
0x2377   :  { %v7262_v54 = vpop.f32.mrb[101].mxu0  ;;  %v15977_v9 = vpop.f32.mrb[103].mxu1  ;;  %7638 = vmatmul.mubr.f32.vlgmr.msra.gmra.mrb[106].mxu0 %v7561_v1  ;;  %8064 = vmatmul.mubr.f32.vlgmr.msra.gmra.mrb[104].mxu1 %v7561_v1 }
0x2378   :  { %v7263_v34 = vadd.f32 %v7262_v54, %v17994_v29  ;;  %11905 = vmatpush1.bf16.msra.mxu0 %v17995_v11  ;;  %12257 = vmatpush3.bf16.msra.mxu1 %v17996_v38  ;;  %v18012_v29 = vld [vmem:[#allocation105_spill] sm:$0xff]  ;;  %v18014_v11 = vld [vmem:[#allocation107_spill] sm:$0xff]  ;;  %v18015_v38 = vld [vmem:[#allocation216_spill] sm:$0xff] }
0x2379   :  { %11907 = vmatprep.subr.bf16.mxu0 %v17997_v57  ;;  %12259 = vmatprep.subr.bf16.mxu1 %v17998_v56  ;;  %v18016_v57 = vld [vmem:[#allocation109_spill] sm:$0xff]  ;;  %v18017_v56 = vld [vmem:[#allocation218_spill] sm:$0xff] }
0x237a   :  { %v7552_v58 = vadd.f32 %v7263_v34, %v17999_v6  ;;  %v18013_v34 = vld [vmem:[#allocation214_spill] sm:$0xff]  ;;  %v7261_v6 = vadd.f32 %v7260_v37, %v17671_v31  ;;  %v18024_v31 = vld [vmem:[#allocation229_spill] sm:$0xff]  ;;  %v18025_v37 = vld [vmem:[#allocation119_spill] sm:$0xff] }
0x237c   :  { %v7564_v44 = vmax.f32 %v7552_v58, 0.0  ;;  %11909 = vmatpush1.bf16.msra.mxu0 %v18000_v36  ;;  %12261 = vmatpush3.bf16.msra.mxu1 %v18001_v12  ;;  %v18018_v58 = vld [vmem:[#allocation221_spill] sm:$0xff]  ;;  %v18019_v36 = vld [vmem:[#allocation224_spill] sm:$0xff]  ;;  %v7551_v12 = vadd.f32 %v7261_v6, %v17675_v20 }
0x237d   :  { %11911 = vmatprep.subr.bf16.mxu0 %v18002_v18  ;;  %12263 = vmatprep.subr.bf16.mxu1 %v18003_v8  ;;  %v18020_v18 = vld [vmem:[#allocation115_spill] sm:$0xff]  ;;  %v18021_v8 = vld [vmem:[#allocation226_spill] sm:$0xff]  ;;  %v18028_v20 = vld [vmem:[#allocation233_spill] sm:$0xff] }
0x237e   :  { %v7331_v43 = vpop.f32.mrb[102].mxu0  ;;  %7708 = vmatprep.mubr.f32.mxu0 %v7564_v44  ;;  %8133 = vmatprep.mubr.f32.mxu1 %v7564_v44  ;;  %v18040_v6 = vld [vmem:[#allocation245_spill] sm:$0xff] }
0x237f   :  { %v7333_v59 = vpop.f32.mrb[103].mxu0 }
0x2380   :  { %11913 = vmatpush1.bf16.msra.mxu0 %v18004_v28  ;;  %12265 = vmatpush3.bf16.msra.mxu1 %v18005_v13  ;;  %v7334_v44 = vadd.f32 %v7333_v59, %v17673_v60  ;;  %v18022_v28 = vld [vmem:[#allocation167_spill] sm:$0xff]  ;;  %v18027_v59 = vld [vmem:[#allocation121_spill] sm:$0xff] }
0x2381   :  { %11915 = vmatprep.subr.bf16.mxu0 %v18006_v51  ;;  %12267 = vmatprep.subr.bf16.mxu1 %v18007_v40  ;;  %v18023_v51 = vld [vmem:[#allocation117_spill] sm:$0xff]  ;;  %v18026_v60 = vld [vmem:[#allocation231_spill] sm:$0xff] }
0x2382   :  { %v7554_v13 = vadd.f32 %v7334_v44, %v18022_v28  ;;  %v18029_v40 = vld [vmem:[#allocation123_spill] sm:$0xff]  ;;  %v18047_v28 = vld [vmem:[#allocation141_spill] sm:$0xff] }
0x2383   :  { %v18042_v44 = vld [vmem:[#allocation247_spill] sm:$0xff] }
0x2384   :  { %11917 = vmatpush1.bf16.msra.mxu0 %v18008_v32  ;;  %12269 = vmatpush3.bf16.msra.mxu1 %v18009_v41  ;;  %v18030_v32 = vld [vmem:[#allocation235_spill] sm:$0xff]  ;;  %v18031_v41 = vld [vmem:[#allocation125_spill] sm:$0xff] }
0x2385   :  { %11919 = vmatprep.subr.bf16.mxu0 %v18010_v10  ;;  %12271 = vmatprep.subr.bf16.mxu1 %v18011_v0  ;;  %v18032_v10 = vld [vmem:[#allocation237_spill] sm:$0xff]  ;;  %v18033_v0 = vld [vmem:[#allocation127_spill] sm:$0xff] }
0x2386   :  { %v15997_v1 = vpop.f32.mrb[104].mxu0 }
0x2387   :  { %v15999_v54 = vpop.f32.mrb[105].mxu0 }
0x2388   :  { %11921 = vmatpush1.bf16.msra.mxu0 %v18012_v29  ;;  %12273 = vmatpush3.bf16.msra.mxu1 %v18013_v34  ;;  %v18034_v29 = vld [vmem:[#allocation239_spill] sm:$0xff]  ;;  %v18035_v34 = vld [vmem:[#allocation129_spill] sm:$0xff] }
0x2389   :  { %11923 = vmatprep.subr.bf16.mxu0 %v18014_v11  ;;  %12275 = vmatprep.subr.bf16.mxu1 %v18015_v38  ;;  %v18036_v11 = vld [vmem:[#allocation241_spill] sm:$0xff]  ;;  %v18037_v38 = vld [vmem:[#allocation131_spill] sm:$0xff] }
0x238c   :  { %11925 = vmatpush1.bf16.msra.mxu0 %v18016_v57  ;;  %12277 = vmatpush3.bf16.msra.mxu1 %v18017_v56  ;;  %v18038_v57 = vld [vmem:[#allocation243_spill] sm:$0xff]  ;;  %v18039_v56 = vld [vmem:[#allocation133_spill] sm:$0xff] }
0x238d   :  { %11927 = vmatprep.subr.bf16.mxu0 %v17672_v4  ;;  %12279 = vmatprep.subr.bf16.mxu1 %v18018_v58  ;;  %v7563_v4 = vmax.f32 %v7551_v12, 0.0  ;;  %v18041_v58 = vld [vmem:[#allocation135_spill] sm:$0xff]  ;;  %v18044_v12 = vld [vmem:[#allocation249_spill] sm:$0xff] }
0x2390   :  { %11929 = vmatpush1.bf16.msra.mxu0 %v17674_v39  ;;  %12281 = vmatpush3.bf16.msra.mxu1 %v18019_v36  ;;  %v7566_v39 = vmax.f32 %v7554_v13, 0.0  ;;  %v18043_v36 = vld [vmem:[#allocation137_spill] sm:$0xff] }
0x2391   :  { %11931 = vmatprep.subr.bf16.mxu0 %v18020_v18  ;;  %12283 = vmatprep.subr.bf16.mxu1 %v18021_v8  ;;  %v18045_v18 = vld [vmem:[#allocation139_spill] sm:$0xff]  ;;  %v18048_v13 = vld [vmem:[#allocation253_spill] sm:$0xff] }
0x2392   :  { %v18046_v8 = vld [vmem:[#allocation251_spill] sm:$0xff] }
0x2394   :  { %11933 = vmatpush1.bf16.msra.mxu0 %v18023_v51  ;;  %12285 = vmatpush3.bf16.msra.mxu1 %v18024_v31  ;;  %v7332_v51 = vadd.f32 %v7331_v43, %v17701_v22  ;;  %v18049_v31 = vld [vmem:[#allocation143_spill] sm:$0xff]  ;;  %v18054_v43 = vld [vmem:[#allocation149_spill] sm:$0xff] }
0x2395   :  { %11935 = vmatprep.subr.bf16.mxu0 %v18025_v37  ;;  %12287 = vmatprep.subr.bf16.mxu1 %v18026_v60  ;;  %v18050_v37 = vld [vmem:[#allocation255_spill] sm:$0xff]  ;;  %v18051_v60 = vld [vmem:[#allocation222_spill] sm:$0xff] }
0x2397   :  { %8134 = vmatmul.mubr.f32.vlgmr.msra.gmra.mrb[106].mxu1 %v7563_v4 }
0x2398   :  { %11937 = vmatpush1.bf16.msra.mxu0 %v18027_v59  ;;  %12289 = vmatpush3.bf16.msra.mxu1 %v18028_v20  ;;  %v7405_v59 = vadd.f32 %v15970_v17, %v18051_v60  ;;  %v16051_v20 = vadd.f32 %v7332_v51, %v17707_v5  ;;  %v18078_v51 = vld [vmem:[#allocation185_spill] sm:$0xff]  ;;  %v18081_v60 = vld [vmem:[#allocation151_spill] sm:$0xff] }
0x2399   :  { %8203 = vmatprep.mubr.f32.mxu1 %v7566_v39  ;;  %11939 = vmatprep.subr.bf16.mxu0 %v18029_v40  ;;  %v18052_v40 = vld [vmem:[#allocation259_spill] sm:$0xff] }
0x239a   :  { %12291 = vmatprep.subr.bf16.mxu1 %v18030_v32  ;;  %v18053_v32 = vld [vmem:[#allocation227_spill] sm:$0xff]  ;;  %v7565_v17 = vmax.f32 %v16051_v20, 0.0  ;;  %v18125_v20 = vld [vmem:[#allocation236_spill] sm:$0xff] }
0x239b   :  { %v16056_v22 = vadd.f32 %v7405_v59, %v18053_v32  ;;  %v7403_v59 = vadd.f32 %v15967_v26, %v18081_v60  ;;  %v7476_v32 = vadd.f32 %v15999_v54, %v17738_v42  ;;  %v18086_v26 = vld [vmem:[#allocation193_spill] sm:$0xff]  ;;  %v18091_v54 = vld [vmem:[#allocation298_spill] sm:$0xff] }
0x239c   :  { %11941 = vmatpush1.bf16.msra.mxu0 %v18031_v41  ;;  %12293 = vmatpush3.bf16.msra.mxu1 %v18032_v10  ;;  %v18055_v41 = vld [vmem:[#allocation261_spill] sm:$0xff]  ;;  %v18056_v10 = vld [vmem:[#allocation150_spill] sm:$0xff] }
0x239d   :  { %11943 = vmatprep.subr.bf16.mxu0 %v18033_v0  ;;  %12295 = vmatprep.subr.bf16.mxu1 %v18034_v29  ;;  %v7568_v5 = vmax.f32 %v16056_v22, 0.0  ;;  %v18060_v0 = vld [vmem:[#allocation166_spill] sm:$0xff]  ;;  %v18061_v29 = vld [vmem:[#allocation267_spill] sm:$0xff] }
0x239e   :  { %v18129_v22 = vld [vmem:[#allocation342_spill] sm:$0xff] }
0x23a0   :  { %11945 = vmatpush1.bf16.msra.mxu0 %v18035_v34  ;;  %12297 = vmatpush3.bf16.msra.mxu1 %v18036_v11  ;;  %v18062_v34 = vld [vmem:[#allocation169_spill] sm:$0xff] }
0x23a1   :  { %11947 = vmatprep.subr.bf16.mxu0 %v18037_v38  ;;  %12299 = vmatprep.subr.bf16.mxu1 %v18038_v57  ;;  %v18063_v11 = vld [vmem:[#allocation269_spill] sm:$0xff]  ;;  %v18065_v38 = vld [vmem:[#allocation271_spill] sm:$0xff] }
0x23a2   :  { %v18066_v57 = vld [vmem:[#allocation173_spill] sm:$0xff] }
0x23a4   :  { %11949 = vmatpush1.bf16.msra.mxu0 %v18039_v56  ;;  %12301 = vmatpush3.bf16.msra.mxu1 %v18040_v6  ;;  %v18068_v56 = vld [vmem:[#allocation175_spill] sm:$0xff] }
0x23a5   :  { %11951 = vmatprep.subr.bf16.mxu0 %v18041_v58  ;;  %12303 = vmatprep.subr.bf16.mxu1 %v18042_v44  ;;  %v18069_v6 = vld [vmem:[#allocation275_spill] sm:$0xff]  ;;  %v18070_v58 = vld [vmem:[#allocation177_spill] sm:$0xff] }
0x23a6   :  { %v18071_v44 = vld [vmem:[#allocation277_spill] sm:$0xff] }
0x23a8   :  { %11953 = vmatpush1.bf16.msra.mxu0 %v18043_v36  ;;  %12305 = vmatpush3.bf16.msra.mxu1 %v18044_v12  ;;  %v18072_v36 = vld [vmem:[#allocation179_spill] sm:$0xff] }
0x23a9   :  { %11955 = vmatprep.subr.bf16.mxu0 %v18045_v18  ;;  %12307 = vmatprep.subr.bf16.mxu1 %v18046_v8  ;;  %v18073_v12 = vld [vmem:[#allocation279_spill] sm:$0xff]  ;;  %v18074_v18 = vld [vmem:[#allocation181_spill] sm:$0xff] }
0x23aa   :  { %v18075_v8 = vld [vmem:[#allocation281_spill] sm:$0xff] }
0x23ac   :  { %11957 = vmatpush1.bf16.msra.mxu0 %v18047_v28  ;;  %12309 = vmatpush3.bf16.msra.mxu1 %v18048_v13  ;;  %v18076_v28 = vld [vmem:[#allocation183_spill] sm:$0xff] }
0x23ad   :  { %11959 = vmatprep.subr.bf16.mxu0 %v18049_v31  ;;  %12311 = vmatprep.subr.bf16.mxu1 %v18050_v37  ;;  %v18077_v13 = vld [vmem:[#allocation283_spill] sm:$0xff]  ;;  %v18079_v31 = vld [vmem:[#allocation285_spill] sm:$0xff] }
0x23ae   :  { %v18080_v37 = vld [vmem:[#allocation187_spill] sm:$0xff] }
0x23b0   :  { %11961 = vmatpush1.bf16.msra.mxu0 %v17705_v14  ;;  %12313 = vmatpush3.bf16.msra.mxu1 %v17706_v53  ;;  %v18057_v14 = vld [vmem:[#allocation263_spill] sm:$0xff]  ;;  %v18059_v53 = vld [vmem:[#allocation265_spill] sm:$0xff] }
0x23b1   :  { %11963 = vmatprep.subr.bf16.mxu0 %v17708_v21  ;;  %12315 = vmatprep.subr.bf16.mxu1 %v18052_v40  ;;  %v18058_v21 = vld [vmem:[#allocation164_spill] sm:$0xff]  ;;  %v18082_v40 = vld [vmem:[#allocation287_spill] sm:$0xff] }
0x23b4   :  { %11965 = vmatpush1.bf16.msra.mxu0 %v18054_v43  ;;  %12317 = vmatpush3.bf16.msra.mxu1 %v18055_v41  ;;  %v18083_v43 = vld [vmem:[#allocation191_spill] sm:$0xff]  ;;  %v16100_v41 = vadd.f32 %v7403_v59, %v17741_v63  ;;  %v18090_v63 = vld [vmem:[#allocation197_spill] sm:$0xff] }
0x23b5   :  { %11967 = vmatprep.subr.bf16.mxu0 %v18056_v10  ;;  %12319 = vmatprep.subr.bf16.mxu1 %v18057_v14  ;;  %v18084_v10 = vld [vmem:[#allocation291_spill] sm:$0xff]  ;;  %v18085_v14 = vld [vmem:[#allocation292_spill] sm:$0xff]  ;;  %v18113_v59 = vld [vmem:[#allocation321_spill] sm:$0xff] }
0x23b6   :  { %v7567_v42 = vmax.f32 %v16100_v41, 0.0  ;;  %v18186_v41 = vld [vmem:[#allocation313_spill] sm:$0xff] }
0x23b7   :  { %7709 = vmatmul.mubr.f32.vlgmr.msra.gmra.mrb[106].mxu0 %v7563_v4  ;;  %8204 = vmatmul.mubr.f32.vlgmr.msra.gmra.mrb[108].mxu1 %v7565_v17  ;;  %v18064_v4 = vld [vmem:[#allocation171_spill] sm:$0xff] }
0x23b8   :  { %11969 = vmatpush1.bf16.msra.mxu0 %v18058_v21  ;;  %7779 = vmatprep.mubr.f32.mxu0 %v7566_v39  ;;  %v18067_v39 = vld [vmem:[#allocation273_spill] sm:$0xff]  ;;  %v16104_v21 = vadd.f32 %v7476_v32, %v18085_v14  ;;  %v18114_v32 = vld [vmem:[#allocation223_spill] sm:$0xff]  ;;  %v18116_v14 = vld [vmem:[#allocation328_spill] sm:$0xff] }
0x23b9   :  { %12321 = vmatpush3.bf16.msra.mxu1 %v18059_v53  ;;  %8273 = vmatprep.mubr.f32.mxu1 %v7568_v5  ;;  %v18087_v53 = vld [vmem:[#allocation294_spill] sm:$0xff] }
0x23ba   :  { %11971 = vmatprep.subr.bf16.mxu0 %v18060_v0  ;;  %12323 = vmatprep.subr.bf16.mxu1 %v18061_v29  ;;  %v18088_v0 = vld [vmem:[#allocation195_spill] sm:$0xff] }
0x23bb   :  { %v18092_v29 = vld [vmem:[#allocation199_spill] sm:$0xff] }
0x23bc   :  { %11973 = vmatpush1.bf16.msra.mxu0 %v18062_v34  ;;  %v18093_v34 = vld [vmem:[#allocation300_spill] sm:$0xff] }
0x23bd   :  { %12325 = vmatpush3.bf16.msra.mxu1 %v18063_v11  ;;  %11975 = vmatprep.subr.bf16.mxu0 %v18064_v4  ;;  %v18094_v11 = vld [vmem:[#allocation302_spill] sm:$0xff]  ;;  %v18095_v4 = vld [vmem:[#allocation203_spill] sm:$0xff] }
0x23be   :  { %12327 = vmatprep.subr.bf16.mxu1 %v18065_v38  ;;  %v18096_v38 = vld [vmem:[#allocation304_spill] sm:$0xff] }
0x23c0   :  { %11977 = vmatpush1.bf16.msra.mxu0 %v18066_v57  ;;  %v18097_v57 = vld [vmem:[#allocation205_spill] sm:$0xff] }
0x23c1   :  { %12329 = vmatpush3.bf16.msra.mxu1 %v18067_v39  ;;  %11979 = vmatprep.subr.bf16.mxu0 %v18068_v56  ;;  %v18098_v39 = vld [vmem:[#allocation306_spill] sm:$0xff]  ;;  %v18099_v56 = vld [vmem:[#allocation207_spill] sm:$0xff] }
0x23c2   :  { %12331 = vmatprep.subr.bf16.mxu1 %v18069_v6  ;;  %v18100_v6 = vld [vmem:[#allocation308_spill] sm:$0xff] }
0x23c4   :  { %11981 = vmatpush1.bf16.msra.mxu0 %v18070_v58  ;;  %v18101_v58 = vld [vmem:[#allocation209_spill] sm:$0xff] }
0x23c5   :  { %12333 = vmatpush3.bf16.msra.mxu1 %v18071_v44  ;;  %11983 = vmatprep.subr.bf16.mxu0 %v18072_v36  ;;  %v18102_v44 = vld [vmem:[#allocation310_spill] sm:$0xff]  ;;  %v18103_v36 = vld [vmem:[#allocation211_spill] sm:$0xff] }
0x23c6   :  { %12335 = vmatprep.subr.bf16.mxu1 %v18073_v12  ;;  %v18105_v12 = vld [vmem:[#allocation213_spill] sm:$0xff] }
0x23c8   :  { %11985 = vmatpush1.bf16.msra.mxu0 %v18074_v18  ;;  %v18106_v18 = vld [vmem:[#allocation314_spill] sm:$0xff] }
0x23c9   :  { %12337 = vmatpush3.bf16.msra.mxu1 %v18075_v8  ;;  %11987 = vmatprep.subr.bf16.mxu0 %v18076_v28  ;;  %v18107_v8 = vld [vmem:[#allocation215_spill] sm:$0xff]  ;;  %v18108_v28 = vld [vmem:[#allocation316_spill] sm:$0xff] }
0x23ca   :  { %12339 = vmatprep.subr.bf16.mxu1 %v18077_v13  ;;  %v18109_v13 = vld [vmem:[#allocation217_spill] sm:$0xff] }
0x23cc   :  { %11989 = vmatpush1.bf16.msra.mxu0 %v18078_v51  ;;  %v18110_v51 = vld [vmem:[#allocation318_spill] sm:$0xff] }
0x23cd   :  { %12341 = vmatpush3.bf16.msra.mxu1 %v18079_v31  ;;  %11991 = vmatprep.subr.bf16.mxu0 %v18080_v37  ;;  %v18111_v31 = vld [vmem:[#allocation220_spill] sm:$0xff] }
0x23ce   :  { %12343 = vmatprep.subr.bf16.mxu1 %v18082_v40  ;;  %v18112_v37 = vld [vmem:[#allocation320_spill] sm:$0xff]  ;;  %v7547_v40 = vadd.f32 %v15977_v9, %v17768_v7 }
0x23cf   :  { %v7474_v60 = vadd.f32 %v15997_v1, %v18112_v37  ;;  %v18117_v1 = vld [vmem:[#allocation228_spill] sm:$0xff]  ;;  %v18156_v37 = vld [vmem:[#allocation274_spill] sm:$0xff] }
0x23d0   :  { %11993 = vmatpush1.bf16.msra.mxu0 %v17739_v19  ;;  %v18089_v19 = vld [vmem:[#allocation296_spill] sm:$0xff] }
0x23d1   :  { %12345 = vmatpush3.bf16.msra.mxu1 %v14637_v25  ;;  %11995 = vmatprep.subr.bf16.mxu0 %v18083_v43  ;;  %v7570_v25 = vmax.f32 %v16104_v21, 0.0  ;;  %v18115_v43 = vld [vmem:[#allocation225_spill] sm:$0xff]  ;;  %v18120_v9 = vld [vmem:[#allocation332_spill] sm:$0xff] }
0x23d2   :  { %12347 = vmatprep.subr.bf16.mxu1 %v18084_v10  ;;  %v16148_v10 = vadd.f32 %v7474_v60, %v17772_v46  ;;  %v18122_v46 = vld [vmem:[#allocation334_spill] sm:$0xff]  ;;  %v18157_v60 = vld [vmem:[#allocation400_spill] sm:$0xff] }
0x23d4   :  { %11997 = vmatpush1.bf16.msra.mxu0 %v18086_v26  ;;  %v16152_v26 = vadd.f32 %v7547_v40, %v18116_v14  ;;  %v7569_v7 = vmax.f32 %v16148_v10, 0.0  ;;  %v18159_v40 = vld [vmem:[#allocation276_spill] sm:$0xff]  ;;  %v18162_v14 = vld [vmem:[#allocation403_spill] sm:$0xff] }
0x23d5   :  { %12349 = vmatpush3.bf16.msra.mxu1 %v18087_v53  ;;  %11999 = vmatprep.subr.bf16.mxu0 %v18088_v0  ;;  %v18118_v53 = vld [vmem:[#allocation330_spill] sm:$0xff]  ;;  %v18219_v10 = vld [vmem:[#allocation371_spill] sm:$0xff] }
0x23d6   :  { %12351 = vmatprep.subr.bf16.mxu1 %v18089_v19  ;;  %v18119_v0 = vld [vmem:[#allocation230_spill] sm:$0xff] }
0x23d7   :  { %v18123_v19 = vld [vmem:[#allocation234_spill] sm:$0xff] }
0x23d8   :  { %8274 = vmatmul.mubr.f32.vlgmr.msra.gmra.mrb[110].mxu1 %v7567_v42  ;;  %12001 = vmatpush1.bf16.msra.mxu0 %v18090_v63  ;;  %v18124_v63 = vld [vmem:[#allocation336_spill] sm:$0xff] }
0x23d9   :  { %12353 = vmatpush3.bf16.msra.mxu1 %v18091_v54  ;;  %8343 = vmatprep.mubr.f32.mxu1 %v7570_v25  ;;  %v18127_v54 = vld [vmem:[#allocation238_spill] sm:$0xff] }
0x23da   :  { %12003 = vmatprep.subr.bf16.mxu0 %v18092_v29  ;;  %12355 = vmatprep.subr.bf16.mxu1 %v18093_v34  ;;  %v18128_v29 = vld [vmem:[#allocation340_spill] sm:$0xff]  ;;  %v18131_v34 = vld [vmem:[#allocation346_spill] sm:$0xff] }
0x23dc   :  { %12005 = vmatpush1.bf16.msra.mxu0 %v17750_v62  ;;  %v18104_v62 = vld [vmem:[#allocation312_spill] sm:$0xff] }
0x23dd   :  { %12357 = vmatpush3.bf16.msra.mxu1 %v18094_v11  ;;  %12007 = vmatprep.subr.bf16.mxu0 %v18095_v4  ;;  %v18132_v11 = vld [vmem:[#allocation348_spill] sm:$0xff]  ;;  %v18133_v4 = vld [vmem:[#allocation350_spill] sm:$0xff] }
0x23de   :  { %12359 = vmatprep.subr.bf16.mxu1 %v18096_v38  ;;  %v18134_v38 = vld [vmem:[#allocation250_spill] sm:$0xff] }
0x23e0   :  { %12009 = vmatpush1.bf16.msra.mxu0 %v18097_v57  ;;  %v18137_v57 = vld [vmem:[#allocation254_spill] sm:$0xff] }
0x23e1   :  { %12361 = vmatpush3.bf16.msra.mxu1 %v18098_v39  ;;  %12011 = vmatprep.subr.bf16.mxu0 %v18099_v56  ;;  %v18140_v39 = vld [vmem:[#allocation258_spill] sm:$0xff] }
0x23e2   :  { %12363 = vmatprep.subr.bf16.mxu1 %v18100_v6  ;;  %v18141_v56 = vld [vmem:[#allocation358_spill] sm:$0xff] }
0x23e4   :  { %12013 = vmatpush1.bf16.msra.mxu0 %v18101_v58  ;;  %v18143_v58 = vld [vmem:[#allocation260_spill] sm:$0xff] }
0x23e5   :  { %12365 = vmatpush3.bf16.msra.mxu1 %v18102_v44  ;;  %12015 = vmatprep.subr.bf16.mxu0 %v18103_v36  ;;  %v18144_v44 = vld [vmem:[#allocation361_spill] sm:$0xff]  ;;  %v18145_v36 = vld [vmem:[#allocation262_spill] sm:$0xff] }
0x23e6   :  { %12367 = vmatprep.subr.bf16.mxu1 %v18104_v62  ;;  %v18148_v62 = vld [vmem:[#allocation266_spill] sm:$0xff] }
0x23e8   :  { %12017 = vmatpush1.bf16.msra.mxu0 %v18105_v12  ;;  %v18149_v12 = vld [vmem:[#allocation396_spill] sm:$0xff] }
0x23e9   :  { %12369 = vmatpush3.bf16.msra.mxu1 %v18106_v18  ;;  %12019 = vmatprep.subr.bf16.mxu0 %v18107_v8  ;;  %v18150_v18 = vld [vmem:[#allocation397_spill] sm:$0xff]  ;;  %v18151_v8 = vld [vmem:[#allocation268_spill] sm:$0xff] }
0x23ea   :  { %12371 = vmatprep.subr.bf16.mxu1 %v18108_v28  ;;  %v18152_v28 = vld [vmem:[#allocation270_spill] sm:$0xff] }
0x23ec   :  { %12021 = vmatpush1.bf16.msra.mxu0 %v18109_v13  ;;  %v18153_v13 = vld [vmem:[#allocation398_spill] sm:$0xff] }
0x23ed   :  { %12373 = vmatpush3.bf16.msra.mxu1 %v18110_v51  ;;  %12023 = vmatprep.subr.bf16.mxu0 %v18111_v31  ;;  %v18154_v51 = vld [vmem:[#allocation399_spill] sm:$0xff]  ;;  %v18155_v31 = vld [vmem:[#allocation272_spill] sm:$0xff] }
0x23ee   :  { %12375 = vmatprep.subr.bf16.mxu1 %v18113_v59  ;;  %v18158_v59 = vld [vmem:[#allocation401_spill] sm:$0xff] }
0x23f0   :  { %12025 = vmatpush1.bf16.msra.mxu0 %v18114_v32  ;;  %v18160_v32 = vld [vmem:[#allocation278_spill] sm:$0xff] }
0x23f1   :  { %12377 = vmatpush3.bf16.msra.mxu1 %v17770_v45  ;;  %12027 = vmatprep.subr.bf16.mxu0 %v18115_v43  ;;  %v7572_v45 = vmax.f32 %v16152_v26, 0.0  ;;  %v18161_v43 = vld [vmem:[#allocation402_spill] sm:$0xff] }
0x23f2   :  { %12379 = vmatprep.subr.bf16.mxu1 %v17773_v15  ;;  %v18121_v15 = vld [vmem:[#allocation232_spill] sm:$0xff] }
0x23f4   :  { %12029 = vmatpush1.bf16.msra.mxu0 %v18117_v1  ;;  %v18163_v1 = vld [vmem:[#allocation280_spill] sm:$0xff] }
0x23f5   :  { %12381 = vmatpush3.bf16.msra.mxu1 %v18118_v53  ;;  %12031 = vmatprep.subr.bf16.mxu0 %v18119_v0  ;;  %v18164_v53 = vld [vmem:[#allocation282_spill] sm:$0xff]  ;;  %v18165_v0 = vld [vmem:[#allocation404_spill] sm:$0xff] }
0x23f6   :  { %12383 = vmatprep.subr.bf16.mxu1 %v18120_v9  ;;  %v18166_v9 = vld [vmem:[#allocation405_spill] sm:$0xff] }
0x23f7   :  { %7780 = vmatmul.mubr.f32.vlgmr.msra.gmra.mrb[106].mxu0 %v7565_v17  ;;  %v18126_v17 = vld [vmem:[#allocation338_spill] sm:$0xff] }
0x23f8   :  { %8344 = vmatmul.mubr.f32.vlgmr.msra.gmra.mrb[112].mxu1 %v7569_v7  ;;  %12033 = vmatpush1.bf16.msra.mxu0 %v18121_v15  ;;  %v18167_v15 = vld [vmem:[#allocation284_spill] sm:$0xff] }
0x23f9   :  { %7850 = vmatprep.mubr.f32.mxu0 %v7568_v5  ;;  %12385 = vmatpush3.bf16.msra.mxu1 %v18122_v46  ;;  %v18130_v5 = vld [vmem:[#allocation344_spill] sm:$0xff]  ;;  %v18168_v46 = vld [vmem:[#allocation286_spill] sm:$0xff] }
0x23fa   :  { %8413 = vmatprep.mubr.f32.mxu1 %v7572_v45  ;;  %12035 = vmatprep.subr.bf16.mxu0 %v18123_v19  ;;  %v18169_v19 = vld [vmem:[#allocation406_spill] sm:$0xff] }
0x23fb   :  { %12387 = vmatprep.subr.bf16.mxu1 %v18124_v63  ;;  %v18170_v63 = vld [vmem:[#allocation407_spill] sm:$0xff] }
0x23fc   :  { %12037 = vmatpush1.bf16.msra.mxu0 %v18125_v20  ;;  %v18171_v20 = vld [vmem:[#allocation289_spill] sm:$0xff] }
0x23fd   :  { %12389 = vmatpush3.bf16.msra.mxu1 %v18126_v17  ;;  %12039 = vmatprep.subr.bf16.mxu0 %v18127_v54  ;;  %v18172_v17 = vld [vmem:[#allocation290_spill] sm:$0xff]  ;;  %v18173_v54 = vld [vmem:[#allocation408_spill] sm:$0xff] }
0x23fe   :  { %12391 = vmatprep.subr.bf16.mxu1 %v18128_v29  ;;  %v18174_v29 = vld [vmem:[#allocation409_spill] sm:$0xff] }
0x2400   :  { %12041 = vmatpush1.bf16.msra.mxu0 %v17789_v33  ;;  %v18135_v33 = vld [vmem:[#allocation252_spill] sm:$0xff] }
0x2401   :  { %12393 = vmatpush3.bf16.msra.mxu1 %v18129_v22  ;;  %12043 = vmatprep.subr.bf16.mxu0 %v17791_v16  ;;  %v18136_v16 = vld [vmem:[#allocation353_spill] sm:$0xff] }
0x2402   :  { %12395 = vmatprep.subr.bf16.mxu1 %v18130_v5  ;;  %v18175_v22 = vld [vmem:[#allocation293_spill] sm:$0xff]  ;;  %v18176_v5 = vld [vmem:[#allocation295_spill] sm:$0xff] }
0x2404   :  { %12045 = vmatpush1.bf16.msra.mxu0 %v17793_v35  ;;  %v7545_v35 = vadd.f32 %v15975_v27, %v14136_v47  ;;  %v18147_v27 = vld [vmem:[#allocation264_spill] sm:$0xff] }
0x2405   :  { %12397 = vmatpush3.bf16.msra.mxu1 %v18131_v34  ;;  %12047 = vmatprep.subr.bf16.mxu0 %v17795_v2  ;;  %v18138_v2 = vld [vmem:[#allocation256_spill] sm:$0xff]  ;;  %v18177_v34 = vld [vmem:[#allocation410_spill] sm:$0xff] }
0x2406   :  { %12399 = vmatprep.subr.bf16.mxu1 %v18132_v11  ;;  %v16198_v6 = vadd.f32 %v7545_v35, %v18141_v56  ;;  %v18178_v11 = vld [vmem:[#allocation297_spill] sm:$0xff]  ;;  %v18189_v56 = vld [vmem:[#allocation319_spill] sm:$0xff] }
0x2407   :  { %v18184_v35 = vld [vmem:[#allocation309_spill] sm:$0xff] }
0x2408   :  { %12049 = vmatpush1.bf16.msra.mxu0 %v17797_v23  ;;  %v18139_v23 = vld [vmem:[#allocation356_spill] sm:$0xff]  ;;  %v7571_v47 = vmax.f32 %v16198_v6, 0.0  ;;  %v18244_v6 = vld [vmem:[#allocation413_spill] sm:$0xff] }
0x2409   :  { %12401 = vmatpush3.bf16.msra.mxu1 %v18133_v4  ;;  %12051 = vmatprep.subr.bf16.mxu0 %v18134_v38  ;;  %v18179_v4 = vld [vmem:[#allocation299_spill] sm:$0xff]  ;;  %v18180_v38 = vld [vmem:[#allocation301_spill] sm:$0xff] }
0x240a   :  { %12403 = vmatprep.subr.bf16.mxu1 %v14851_v49  ;;  %v18142_v49 = vld [vmem:[#allocation359_spill] sm:$0xff] }
0x240c   :  { %12053 = vmatpush1.bf16.msra.mxu0 %v18135_v33  ;;  %v18181_v33 = vld [vmem:[#allocation303_spill] sm:$0xff] }
0x240d   :  { %12405 = vmatpush3.bf16.msra.mxu1 %v18136_v16  ;;  %12055 = vmatprep.subr.bf16.mxu0 %v18137_v57  ;;  %v18182_v16 = vld [vmem:[#allocation305_spill] sm:$0xff]  ;;  %v18183_v57 = vld [vmem:[#allocation307_spill] sm:$0xff] }
0x240e   :  { %12407 = vmatprep.subr.bf16.mxu1 %v14863_v30  ;;  %v18146_v30 = vld [vmem:[#allocation395_spill] sm:$0xff] }
0x2410   :  { %12057 = vmatpush1.bf16.msra.mxu0 %v18138_v2  ;;  %v18185_v2 = vld [vmem:[#allocation311_spill] sm:$0xff] }
0x2411   :  { %12409 = vmatpush3.bf16.msra.mxu1 %v18139_v23  ;;  %12059 = vmatprep.subr.bf16.mxu0 %v18140_v39  ;;  %v18188_v23 = vld [vmem:[#allocation317_spill] sm:$0xff] }
0x2412   :  { %12411 = vmatprep.subr.bf16.mxu1 %v18142_v49  ;;  %v18190_v49 = vld [vmem:[#allocation323_spill] sm:$0xff] }
0x2414   :  { %12061 = vmatpush1.bf16.msra.mxu0 %v18143_v58  ;;  %v18191_v58 = vld [vmem:[#allocation325_spill] sm:$0xff] }
0x2415   :  { %12413 = vmatpush3.bf16.msra.mxu1 %v18144_v44  ;;  %12063 = vmatprep.subr.bf16.mxu0 %v18145_v36  ;;  %v18192_v44 = vld [vmem:[#allocation329_spill] sm:$0xff]  ;;  %v18193_v36 = vld [vmem:[#allocation331_spill] sm:$0xff] }
0x2416   :  { %12415 = vmatprep.subr.bf16.mxu1 %v18146_v30  ;;  %v18194_v30 = vld [vmem:[#allocation333_spill] sm:$0xff] }
0x2418   :  { %8414 = vmatmul.mubr.f32.vlgmr.msra.gmra.mrb[114].mxu1 %v7571_v47  ;;  %12065 = vmatpush1.bf16.msra.mxu0 %v18147_v27  ;;  %v18195_v27 = vld [vmem:[#allocation335_spill] sm:$0xff] }
0x2419   :  { %12067 = vmatprep.subr.bf16.mxu0 %v18148_v62  ;;  %12417 = vmatpush3.bf16.msra.mxu1 %v18149_v12  ;;  %v18196_v62 = vld [vmem:[#allocation337_spill] sm:$0xff]  ;;  %v18197_v12 = vld [vmem:[#allocation339_spill] sm:$0xff] }
0x241a   :  { %12419 = vmatprep.subr.bf16.mxu1 %v18150_v18  ;;  %v18198_v18 = vld [vmem:[#allocation341_spill] sm:$0xff] }
0x241c   :  { %12069 = vmatpush1.bf16.msra.mxu0 %v18151_v8  ;;  %v18199_v8 = vld [vmem:[#allocation343_spill] sm:$0xff] }
0x241d   :  { %12071 = vmatprep.subr.bf16.mxu0 %v18152_v28  ;;  %12421 = vmatpush3.bf16.msra.mxu1 %v18153_v13  ;;  %v18200_v28 = vld [vmem:[#allocation345_spill] sm:$0xff]  ;;  %v18201_v13 = vld [vmem:[#allocation347_spill] sm:$0xff] }
0x241e   :  { %12423 = vmatprep.subr.bf16.mxu1 %v18154_v51  ;;  %v18202_v51 = vld [vmem:[#allocation349_spill] sm:$0xff] }
0x2420   :  { %12073 = vmatpush1.bf16.msra.mxu0 %v18155_v31  ;;  %v18203_v31 = vld [vmem:[#allocation351_spill] sm:$0xff] }
0x2421   :  { %12075 = vmatprep.subr.bf16.mxu0 %v18156_v37  ;;  %12425 = vmatpush3.bf16.msra.mxu1 %v18157_v60 }
0x2422   :  { %12427 = vmatprep.subr.bf16.mxu1 %v18158_v59  ;;  %v18204_v59 = vld [vmem:[#allocation394_spill] sm:$0xff] }
0x2424   :  { %12077 = vmatpush1.bf16.msra.mxu0 %v18159_v40 }
0x2425   :  { %12079 = vmatprep.subr.bf16.mxu0 %v18160_v32  ;;  %12429 = vmatpush3.bf16.msra.mxu1 %v18161_v43  ;;  %v18205_v43 = vld [vmem:[#allocation352_spill] sm:$0xff] }
0x2426   :  { %12431 = vmatprep.subr.bf16.mxu1 %v18162_v14  ;;  %v18206_v14 = vld [vmem:[#allocation354_spill] sm:$0xff] }
0x2428   :  { %12081 = vmatpush1.bf16.msra.mxu0 %v18163_v1 }
0x2429   :  { %12083 = vmatprep.subr.bf16.mxu0 %v18164_v53  ;;  %12433 = vmatpush3.bf16.msra.mxu1 %v18165_v0  ;;  %v18207_v53 = vld [vmem:[#allocation355_spill] sm:$0xff]  ;;  %v18208_v0 = vld [vmem:[#allocation357_spill] sm:$0xff] }
0x242a   :  { %12435 = vmatprep.subr.bf16.mxu1 %v18166_v9  ;;  %v18209_v9 = vld [vmem:[#allocation360_spill] sm:$0xff] }
0x242c   :  { %12085 = vmatpush1.bf16.msra.mxu0 %v18167_v15  ;;  %v18210_v15 = vld [vmem:[#allocation362_spill] sm:$0xff] }
0x242d   :  { %12087 = vmatprep.subr.bf16.mxu0 %v18168_v46  ;;  %12437 = vmatpush3.bf16.msra.mxu1 %v18169_v19  ;;  %v18211_v46 = vld [vmem:[#allocation363_spill] sm:$0xff]  ;;  %v18212_v19 = vld [vmem:[#allocation364_spill] sm:$0xff] }
0x242e   :  { %12439 = vmatprep.subr.bf16.mxu1 %v18170_v63  ;;  %v18213_v63 = vld [vmem:[#allocation365_spill] sm:$0xff] }
0x2430   :  { %12089 = vmatpush1.bf16.msra.mxu0 %v18171_v20  ;;  %v18214_v20 = vld [vmem:[#allocation366_spill] sm:$0xff] }
0x2431   :  { %12091 = vmatprep.subr.bf16.mxu0 %v18172_v17  ;;  %12441 = vmatpush3.bf16.msra.mxu1 %v18173_v54  ;;  %v18215_v17 = vld [vmem:[#allocation367_spill] sm:$0xff]  ;;  %v18216_v54 = vld [vmem:[#allocation368_spill] sm:$0xff] }
0x2432   :  { %12443 = vmatprep.subr.bf16.mxu1 %v18174_v29  ;;  %v18217_v29 = vld [vmem:[#allocation369_spill] sm:$0xff] }
0x2434   :  { %12093 = vmatpush1.bf16.msra.mxu0 %v18175_v22  ;;  %v18218_v22 = vld [vmem:[#allocation370_spill] sm:$0xff] }
0x2435   :  { %12095 = vmatprep.subr.bf16.mxu0 %v18176_v5  ;;  %12445 = vmatpush3.bf16.msra.mxu1 %v18177_v34  ;;  %v18221_v34 = vld [vmem:[#allocation373_spill] sm:$0xff] }
0x2436   :  { %12446 = vmatprep.subr.bf16.mxu1 %v17562_v48 }
0x2437   :  { %7851 = vmatmul.mubr.f32.vlgmr.msra.gmra.mrb[106].mxu0 %v7567_v42  ;;  %v18187_v42 = vld [vmem:[#allocation315_spill] sm:$0xff] }
0x2438   :  { %12097 = vmatpush1.bf16.msra.mxu0 %v18178_v11  ;;  %7921 = vmatprep.mubr.f32.mxu0 %v7570_v25  ;;  %v18222_v11 = vld [vmem:[#allocation374_spill] sm:$0xff] }
0x2439   :  { %12099 = vmatprep.subr.bf16.mxu0 %v18179_v4 }
0x243c   :  { %12101 = vmatpush1.bf16.msra.mxu0 %v18180_v38  ;;  %v18223_v38 = vld [vmem:[#allocation375_spill] sm:$0xff] }
0x243d   :  { %12103 = vmatprep.subr.bf16.mxu0 %v18181_v33  ;;  %v18224_v33 = vld [vmem:[#allocation376_spill] sm:$0xff] }
0x2440   :  { %12105 = vmatpush1.bf16.msra.mxu0 %v18182_v16  ;;  %v18225_v16 = vld [vmem:[#allocation377_spill] sm:$0xff] }
0x2441   :  { %12107 = vmatprep.subr.bf16.mxu0 %v18183_v57  ;;  %v18226_v57 = vld [vmem:[#allocation378_spill] sm:$0xff] }
0x2444   :  { %12109 = vmatpush1.bf16.msra.mxu0 %v18184_v35  ;;  %v18227_v35 = vld [vmem:[#allocation379_spill] sm:$0xff] }
0x2445   :  { %12111 = vmatprep.subr.bf16.mxu0 %v18185_v2  ;;  %v18228_v2 = vld [vmem:[#allocation380_spill] sm:$0xff] }
0x2448   :  { %12113 = vmatpush1.bf16.msra.mxu0 %v18186_v41  ;;  %v18229_v41 = vld [vmem:[#allocation381_spill] sm:$0xff] }
0x2449   :  { %12115 = vmatprep.subr.bf16.mxu0 %v18187_v42  ;;  %v18230_v42 = vld [vmem:[#allocation382_spill] sm:$0xff] }
0x244a   :  { %v9494_v21 = vpop.f32.mrb[104].mxu1 }
0x244b   :  { %v9495_v25 = vpop.f32.mrb[105].mxu1 }
0x244c   :  { %12117 = vmatpush1.bf16.msra.mxu0 %v18188_v23  ;;  %v9496_v39 = vadd.f32 %v9495_v25, %v9494_v21  ;;  %v18231_v21 = vld [vmem:[#allocation383_spill] sm:$0xff]  ;;  %v18232_v25 = vld [vmem:[#allocation384_spill] sm:$0xff]  ;;  %v18233_v23 = vld [vmem:[#allocation385_spill] sm:$0xff] }
0x244d   :  { %12119 = vmatprep.subr.bf16.mxu0 %v18189_v56  ;;  %v18235_v56 = vld [vmem:[#allocation387_spill] sm:$0xff] }
0x244e   :  { %v8066_v40 = vadd.f32 %v9496_v39, %v18204_v59  ;;  %v18234_v39 = vld [vmem:[#allocation386_spill] sm:$0xff] }
0x2450   :  { %12121 = vmatpush1.bf16.msra.mxu0 %v18190_v49  ;;  %v18236_v49 = vld [vmem:[#allocation388_spill] sm:$0xff] }
0x2451   :  { %12123 = vmatprep.subr.bf16.mxu0 %v18191_v58 }
0x2454   :  { %12125 = vmatpush1.bf16.msra.mxu0 %v18192_v44 }
0x2455   :  { %12127 = vmatprep.subr.bf16.mxu0 %v18193_v36  ;;  %v18237_v36 = vld [vmem:[#allocation389_spill] sm:$0xff] }
0x2458   :  { %12129 = vmatpush1.bf16.msra.mxu0 %v18194_v30 }
0x2459   :  { %12131 = vmatprep.subr.bf16.mxu0 %v18195_v27  ;;  %v18238_v27 = vld [vmem:[#allocation390_spill] sm:$0xff] }
0x245c   :  { %12133 = vmatpush1.bf16.msra.mxu0 %v18196_v62 }
0x245d   :  { %12135 = vmatprep.subr.bf16.mxu0 %v18197_v12  ;;  %v18239_v12 = vld [vmem:[#allocation391_spill] sm:$0xff] }
0x2460   :  { %12137 = vmatpush1.bf16.msra.mxu0 %v18198_v18  ;;  %v18240_v18 = vld [vmem:[#allocation392_spill] sm:$0xff] }
0x2461   :  { %12139 = vmatprep.subr.bf16.mxu0 %v18199_v8  ;;  %v18241_v8 = vld [vmem:[#allocation393_spill] sm:$0xff] }
0x2464   :  { %12141 = vmatpush1.bf16.msra.mxu0 %v18200_v28 }
0x2465   :  { %12143 = vmatprep.subr.bf16.mxu0 %v18201_v13 }
0x2468   :  { %12145 = vmatpush1.bf16.msra.mxu0 %v18202_v51 }
0x2469   :  { %12147 = vmatprep.subr.bf16.mxu0 %v18203_v31 }
0x246a   :  { %v9529_v37 = vpop.f32.mrb[106].mxu1 }
0x246b   :  { %v9530_v60 = vpop.f32.mrb[107].mxu1 }
0x246c   :  { %v9531_v32 = vadd.f32 %v9530_v60, %v9529_v37  ;;  %12149 = vmatpush1.bf16.msra.mxu0 %v18205_v43  ;;  %v18242_v43 = vld [vmem:[#allocation411_spill] sm:$0xff] }
0x246d   :  { %12151 = vmatprep.subr.bf16.mxu0 %v18206_v14 }
0x246e   :  { %v8136_v1 = vadd.f32 %v9531_v32, %v8066_v40 }
0x2470   :  { %12153 = vmatpush1.bf16.msra.mxu0 %v18207_v53  ;;  %v18243_v53 = vld [vmem:[#allocation412_spill] sm:$0xff] }
0x2471   :  { %12155 = vmatprep.subr.bf16.mxu0 %v18208_v0 }
0x2474   :  { %12157 = vmatpush1.bf16.msra.mxu0 %v18209_v9 }
0x2475   :  { %12159 = vmatprep.subr.bf16.mxu0 %v18210_v15 }
0x2477   :  { %7922 = vmatmul.mubr.f32.vlgmr.msra.gmra.mrb[106].mxu0 %v7569_v7  ;;  %v18220_v7 = vld [vmem:[#allocation372_spill] sm:$0xff] }
0x2478   :  { %12161 = vmatpush1.bf16.msra.mxu0 %v18211_v46  ;;  %7992 = vmatprep.mubr.f32.mxu0 %v7572_v45  ;;  %v18246_v46 = vld [vmem:[#allocation415_spill] sm:$0xff] }
0x2479   :  { %12163 = vmatprep.subr.bf16.mxu0 %v18212_v19  ;;  %v18247_v19 = vld [vmem:[#allocation416_spill] sm:$0xff] }
0x247c   :  { %12165 = vmatpush1.bf16.msra.mxu0 %v18213_v63  ;;  %v18248_v63 = vld [vmem:[#allocation417_spill] sm:$0xff] }
0x247d   :  { %12167 = vmatprep.subr.bf16.mxu0 %v18214_v20  ;;  %v18249_v20 = vld [vmem:[#allocation418_spill] sm:$0xff] }
0x2480   :  { %12169 = vmatpush1.bf16.msra.mxu0 %v18215_v17  ;;  %v18251_v17 = vld [vmem:[#allocation420_spill] sm:$0xff] }
0x2481   :  { %12171 = vmatprep.subr.bf16.mxu0 %v18216_v54 }
0x2484   :  { %12173 = vmatpush1.bf16.msra.mxu0 %v18217_v29 }
0x2485   :  { %12175 = vmatprep.subr.bf16.mxu0 %v18218_v22 }
0x2488   :  { %12177 = vmatpush1.bf16.msra.mxu0 %v18219_v10 }
0x2489   :  { %12179 = vmatprep.subr.bf16.mxu0 %v18220_v7  ;;  %v16333_v7 = vpop.xlane.xlu1 %6137 }
0x248a   :  { %v9564_v26 = vpop.f32.mrb[108].mxu1 }
0x248b   :  { %v9565_v45 = vpop.f32.mrb[109].mxu1 }
0x248c   :  { %v9566_v5 = vadd.f32 %v9565_v45, %v9564_v26  ;;  %12181 = vmatpush1.bf16.msra.mxu0 %v18221_v34  ;;  %v6139_v26 = vsub.f32 %v15858_v55, %v16333_v7 }
0x248d   :  { %12183 = vmatprep.subr.bf16.mxu0 %v18222_v11 }
0x248e   :  { %v8206_v4 = vadd.f32 %v9566_v5, %v8136_v1  ;;  %v6140_v45 = vmul.f32 1.442695, %v6139_v26  ;;  %v12593_v5 = vld [vmem:[#allocation35] sm:$0x1] }
0x2490   :  { %12185 = vmatpush1.bf16.msra.mxu0 %v18223_v38  ;;  %12559 = vpow2.f32 %v6140_v45 }
0x2491   :  { %12187 = vmatprep.subr.bf16.mxu0 %v18224_v33 }
0x2494   :  { %12189 = vmatpush1.bf16.msra.mxu0 %v18225_v16 }
0x2495   :  { %12191 = vmatprep.subr.bf16.mxu0 %v18226_v57 }
0x2498   :  { %12193 = vmatpush1.bf16.msra.mxu0 %v18227_v35 }
0x2499   :  { %12195 = vmatprep.subr.bf16.mxu0 %v18228_v2  ;;  %v3734_v2 = vsel %vm3733_vm2, %v17923_v61, 0.0 }
0x249a   :  { %v12560_v16 = vpop.eup %12559 }
0x249b   :  { %v6142_v57 = vsel %vm3706_vm14, %v12560_v16, 0.0 }
0x249c   :  { %12197 = vmatpush1.bf16.msra.mxu0 %v18229_v41  ;;  %v3735_v41 = vsel %vm3706_vm14, %v3734_v2, 0.0 }
0x249d   :  { %12199 = vmatprep.subr.bf16.mxu0 %v18230_v42 }
0x24a0   :  { %12201 = vmatpush1.bf16.msra.mxu0 %v18231_v21 }
0x24a1   :  { %12203 = vmatprep.subr.bf16.mxu0 %v18232_v25 }
0x24a4   :  { %12205 = vmatpush1.bf16.msra.mxu0 %v18233_v23 }
0x24a5   :  { %12207 = vmatprep.subr.bf16.mxu0 %v18234_v39 }
0x24a8   :  { %12209 = vmatpush1.bf16.msra.mxu0 %v18235_v56 }
0x24a9   :  { %12211 = vmatprep.subr.bf16.mxu0 %v18236_v49 }
0x24ab   :  { %v9599_v58 = vpop.f32.mrb[110].mxu1 }
0x24ac   :  { %v9600_v44 = vpop.f32.mrb[111].mxu1  ;;  %12213 = vmatpush1.bf16.msra.mxu0 %v18237_v36  ;;  %v3720_v36 = vsel %vm3719_vm4, %v17923_v61, 0.0 }
0x24ad   :  { %v9601_v30 = vadd.f32 %v9600_v44, %v9599_v58  ;;  %12215 = vmatprep.subr.bf16.mxu0 %v18238_v27  ;;  %v6149_v27 = vsel %vm6148_vm5, %v15732_v24, 0.0 }
0x24af   :  { %v8276_v62 = vadd.f32 %v9601_v30, %v8206_v4  ;;  %v3721_v30 = vsel %vm3706_vm14, %v3720_v36, 0.0 }
0x24b0   :  { %12217 = vmatpush1.bf16.msra.mxu0 %v18239_v12  ;;  %v6161_v12 = vsel %vm3733_vm2, %v15732_v24, 0.0 }
0x24b1   :  { %12219 = vmatprep.subr.bf16.mxu0 %v18240_v18  ;;  %v6162_v18 = vsel %vm3706_vm14, %v6161_v12, 0.0 }
0x24b4   :  { %12221 = vmatpush1.bf16.msra.mxu0 %v18241_v8 }
0x24b7   :  { %7993 = vmatmul.mubr.f32.vlgmr.msra.gmra.mrb[106].mxu0 %v7571_v47  ;;  %v18245_v47 = vld [vmem:[#allocation414_spill] sm:$0xff] }
0x24cb   :  { %v9634_v28 = vpop.f32.mrb[112].mxu1 }
0x24cc   :  { %v9635_v13 = vpop.f32.mrb[113].mxu1 }
0x24cd   :  { %v9636_v51 = vadd.f32 %v9635_v13, %v9634_v28 }
0x24cf   :  { %v8346_v31 = vadd.f32 %v9636_v51, %v8276_v62  ;;  %v6150_v62 = vsel %vm3706_vm14, %v6149_v27, 0.0 }
0x24eb   :  { %v9669_v37 = vpop.f32.mrb[114].mxu1 }
0x24ec   :  { %v9670_v60 = vpop.f32.mrb[115].mxu1 }
0x24ed   :  { %v9671_v59 = vadd.f32 %v9670_v60, %v9669_v37 }
0x24ef   :  { %v8416_v40 = vadd.f32 %v9671_v59, %v8346_v31 }
0x24f1   :  { %v8421_v54 = vmax.f32 %v8416_v40, 0.0 }
0x258a   :  { %v7994_v32 = vpop.f32.mrb[106].mxu0 }
0x258b   :  { %v12478_v14 = vadd.f32 %v7994_v32, %v18242_v43  ;;  %v7996_v1 = vpop.f32.mrb[107].mxu0 }
0x258c   :  { %v12479_v0 = vadd.f32 %v7996_v1, %v18243_v53 }
0x258d   :  { %v8419_v15 = vmax.f32 %v12478_v14, 0.0 }
0x258e   :  { %v8420_v9 = vmax.f32 %v12479_v0, 0.0 }
0x2590   :  { %8486 = vmatprep.mubr.f32.mxu1 %v8420_v9 }
0x2591   :  { %8487 = vmatmul.mubr.f32.vlgmr.msra.gmra.mrb[116].mxu1 %v8419_v15 }
0x2592   :  { %12448 = vmatpush3.bf16.msra.mxu1 %v18244_v6  ;;  %10255 = vmatprep.mubr.msk.f32.mxu1 %vm13180_vm1, %v17544_v50  ;;  %v18250_v50 = vld [vmem:[#allocation419_spill] sm:$0xff]  ;;  %vm3725_vm1 = vcmp.eq.s32.totalorder %v15850_v52, 5 }
0x2593   :  { %12449 = vmatprep.subr.bf16.mxu1 %v17562_v48  ;;  %v3726_v55 = vsel %vm3725_vm1, %v17923_v61, 0.0  ;;  %v6154_v42 = vsel %vm3725_vm1, %v15732_v24, 0.0 }
0x2594   :  { %v3727_v35 = vsel %vm3706_vm14, %v3726_v55, 0.0  ;;  %v6155_v21 = vsel %vm3706_vm14, %v6154_v42, 0.0 }
0x2596   :  { %12451 = vmatpush3.bf16.msra.mxu1 %v18245_v47 }
0x2597   :  { %12452 = vmatprep.subr.bf16.mxu1 %v17562_v48 }
0x259a   :  { %12454 = vmatpush3.bf16.msra.mxu1 %v18246_v46 }
0x259b   :  { %12455 = vmatprep.subr.bf16.mxu1 %v17562_v48 }
0x259e   :  { %12457 = vmatpush3.bf16.msra.mxu1 %v18247_v19 }
0x259f   :  { %12458 = vmatprep.subr.bf16.mxu1 %v17562_v48 }
0x25a2   :  { %12460 = vmatpush3.bf16.msra.mxu1 %v18248_v63 }
0x25a3   :  { %12461 = vmatprep.subr.bf16.mxu1 %v17562_v48 }
0x25a6   :  { %12463 = vmatpush3.bf16.msra.mxu1 %v18249_v20 }
0x25a7   :  { %12464 = vmatprep.subr.bf16.mxu1 %v17562_v48 }
0x25aa   :  { %12466 = vmatpush3.bf16.msra.mxu1 %v18250_v50 }
0x25ab   :  { %12467 = vmatprep.subr.bf16.mxu1 %v17562_v48 }
0x25ae   :  { %12469 = vmatpush3.bf16.msra.mxu1 %v18251_v17 }
0x25b1   :  { %10256 = vmatmul.mubr.f32.vlgmr.msra.gmra.mrb[118].mxu1 %v8421_v54 }
0x2664   :  { %v9704_v29 = vpop.f32.mrb[116].mxu1 }
0x2665   :  { %v9705_v22 = vpop.f32.mrb[117].mxu1 }
0x2666   :  { %v9706_v10 = vadd.f32 %v9705_v22, %v9704_v29 }
0x2668   :  { %v8489_v34 = vadd.f32 %v12593_v5, %v9706_v10 }
0x2684   :  { %v8558_v11 = vpop.f32.mrb[118].mxu1 }
0x2685   :  { %v8559_v4 = vadd.f32 %v8558_v11, %v8489_v34  ;;  %v10257_v38 = vpop.f32.mrb[119].mxu1 }
0x2687   :  { %8562 = vst [vmem:[#allocation39 + $0x2] sm:$0x1] %v8559_v4  ;;  %v8563_v48 = vsel %vm3704_vm13, %v8559_v4, -1e+30  ;;  %v8577_v25 = vsel %vm8576_vm3, %v8559_v4, 0.0 }
0x2688   :  { %v8564_v33 = vsel %vm3706_vm14, %v8563_v48, -inf  ;;  %v8578_v23 = vsel %vm3706_vm14, %v8577_v25, 0.0 }
0x2689   :  { %8565 = vmax.xlane.f32.xlu0 %v8564_v33 }
0x268d   :  { %6143 = vadd.xlane.f32.xlu0 %v6142_v57 }
0x2691   :  { %3728 = vadd.xlane.f32.xlu0 %v3727_v35 }
0x2695   :  { %3736 = vadd.xlane.f32.xlu0 %v3735_v41 }
0x2699   :  { %6156 = vadd.xlane.f32.xlu0 %v6155_v21 }
0x269d   :  { %8579 = vadd.xlane.f32.xlu0 %v8578_v23 }
0x2716   :  { %v16355_v39 = vpop.xlane.xlu0 %8565 }
0x2717   :  { %v8567_v56 = vsub.f32 %v8563_v48, %v16355_v39 }
0x2719   :  { %v8568_v49 = vmul.f32 1.442695, %v8567_v56 }
0x271b   :  { %12561 = vpow2.f32 %v8568_v49 }
0x2725   :  { %v12562_v58 = vpop.eup %12561 }
0x2726   :  { %v8570_v44 = vsel %vm3706_vm14, %v12562_v58, 0.0 }
0x2727   :  { %8571 = vadd.xlane.f32.xlu1 %v8570_v44 }
0x272b   :  { %3722 = vadd.xlane.f32.xlu1 %v3721_v30 }
0x272f   :  { %6151 = vadd.xlane.f32.xlu1 %v6150_v62 }
0x2733   :  { %6163 = vadd.xlane.f32.xlu1 %v6162_v18 }
0x2734   :  { %13087 = shalt.err (!%p13084_p10)
}
0x2735   :  { %s18252_s11 = sld [smem:[#allocation435_spill]] }
0x273b   :  { %s13088_s3 = scalar_lea.hbm %s18252_s11, 64 }
0x273c   :  { %p13089_p11 = scmp.ne.s32.totalorder %s18252_s11, %s13088_s3  ;;  %p13092_p12 = scmp.lt.u32.totalorder %s13088_s3, %s18252_s11 }
0x273e   :  { %p13094_p13 = pnand %p13092_p12, %p13089_p11 }
0x2740   :  { %13097 = shalt.err (!%p13094_p13)
}
0x2741   :  { %8599 = dma.vmem_to_hbm [thread:$0]  %s8597_s1, 64, %s18252_s11, [#allocation4]   ;;  %v3715_v24 = vpop.xlane.xlu1 %3714  ;;  %v6144_v61 = vpop.xlane.xlu0 %6143 }
0x2742   :  { %12563 = vlog2.f32 %v3715_v24  ;;  %s8675_s12 = sld [smem:[#allocation37 + $0x80]]  ;;  %s8711_s0 = sld [smem:[#allocation37 + $0x1]] }
0x2743   :  { %12565 = vlog2.f32 %v6144_v61  ;;  %s3702_s28 = sld [smem:[#allocation37]]  ;;  %s8712_s8 = sld [smem:[#allocation37 + $0x81]] }
0x2744   :  { %s13184_s21 = smov [#allocation40]  }
0x2745   :  { %v3729_v8 = vpop.xlane.xlu0 %3728  ;;  %s8606_s25 = sshll.u32 %s13184_s21, 4  ;;  %s8607_s25 = int_to_ptr.vmem [resolvable:$true] %s8606_s25 }
0x2746   :  { %s13098_s2 = scalar_lea.vmem %s8607_s25, 16  ;;  %s13102_s13 = scalar_lea.vmem %s8607_s25, 32 }
0x2747   :  { %p13099_p0 = scmp.ne.s32.totalorder %s8607_s25, %s13098_s2  ;;  %p13103_p1 = scmp.lt.s32.totalorder %s8607_s25, %s8607_s25 }
0x2748   :  { %v6158_v9 = vstv %s8711_s0  ;;  %p13104_p2 = scmp.lt.s32.totalorder %s13102_s13, %s13098_s2 }
0x2749   :  { %s3738_s16 = ssub.f32 %s3702_s28, %s8675_s12  ;;  %v3730_v13 = vstv %s3702_s28  ;;  %v3737_v60 = vpop.xlane.xlu0 %3736 }
0x274a   :  { %v3731_v40 = vsub.f32 %v3729_v8, %v3730_v13  ;;  %s6165_s7 = ssub.f32 %s8711_s0, %s8712_s8  ;;  %p13105_p3 = por %p13104_p2, %p13103_p1 }
0x274b   :  { %v3739_v37 = vstv %s3738_s16 }
0x274c   :  { %v12564_v28 = vpop.eup %12563  ;;  %v3740_v43 = vsub.f32 %v3737_v60, %v3739_v37  ;;  %v3732_v53 = vmul.f32 %v3731_v40, %v3731_v40  ;;  %v6166_v17 = vstv %s6165_s7  ;;  %p13106_p4 = pnand %p13105_p3, %p13099_p0 }
0x274d   :  { %v3717_v51 = vmul.f32 0.6931472, %v12564_v28  ;;  %v12566_v31 = vpop.eup %12565  ;;  %v6157_v15 = vpop.xlane.xlu0 %6156 }
0x274e   :  { %v6146_v32 = vmul.f32 0.6931472, %v12566_v31  ;;  %v3741_v6 = vmul.f32 %v3740_v43, %v3740_v43  ;;  %v6159_v63 = vsub.f32 %v6157_v15, %v6158_v9 }
0x274f   :  { %v3718_v14 = vadd.f32 %v3717_v51, %v15870_v3 }
0x2750   :  { %v6147_v46 = vadd.f32 %v6146_v32, %v16333_v7  ;;  %v6160_v3 = vmul.f32 %v6159_v63, %v6159_v63  ;;  %v6174_v7 = vadd.f32 %v3732_v53, %v3732_v53 }
0x2751   :  { %v8580_v34 = vpop.xlane.xlu0 %8579 }
0x2752   :  { %v6175_v57 = vadd.f32 %v6174_v7, %v6160_v3 }
0x2754   :  { %v8587_v42 = vsel %vm3719_vm4, %v6175_v57, 0.0 }
0x27b4   :  { %v8572_v59 = vpop.xlane.xlu1 %8571 }
0x27b5   :  { %12567 = vlog2.f32 %v8572_v59 }
0x27b8   :  { %v3723_v1 = vpop.xlane.xlu1 %3722 }
0x27b9   :  { %v3724_v0 = vsub.f32 %v3718_v14, %v3723_v1 }
0x27bb   :  { %v3743_v47 = vadd.f32 %v3732_v53, %v3724_v0  ;;  %v6172_v5 = vadd.f32 %v3724_v0, %v3724_v0 }
0x27bc   :  { %v6152_v19 = vpop.xlane.xlu1 %6151 }
0x27bd   :  { %v3744_v20 = vadd.f32 %v3743_v47, %v3741_v6  ;;  %v6153_v50 = vsub.f32 %v6147_v46, %v6152_v19 }
0x27bf   :  { %v12568_v54 = vpop.eup %12567  ;;  %v6169_v29 = vadd.f32 %v6153_v50, %v3744_v20  ;;  %v6173_v38 = vadd.f32 %v6172_v5, %v6153_v50 }
0x27c0   :  { %v8574_v22 = vmul.f32 0.6931472, %v12568_v54  ;;  %v6164_v10 = vpop.xlane.xlu1 %6163 }
0x27c1   :  { %v6167_v26 = vsub.f32 %v6164_v10, %v6166_v17  ;;  %v6170_v11 = vadd.f32 %v6169_v29, %v6160_v3 }
0x27c2   :  { %v8575_v45 = vadd.f32 %v8574_v22, %v16355_v39 }
0x27c3   :  { %v6168_v4 = vmul.f32 %v6167_v26, %v6167_v26 }
0x27c4   :  { %v8581_v48 = vsub.f32 %v8575_v45, %v8580_v34 }
0x27c5   :  { %v6171_v33 = vadd.f32 %v6170_v11, %v6168_v4 }
0x27c6   :  { %v8583_v16 = vadd.f32 %v8581_v48, %v6173_v38 }
0x27c7   :  { %v8582_v55 = vadd.f32 %v8581_v48, %v6171_v33 }
0x27c8   :  { %v8585_v35 = vsel %vm6148_vm5, %v8583_v16, 0.0 }
0x27c9   :  { %v8584_v2 = vsel %vm8576_vm3, %v8582_v55, 0.0 }
0x27ca   :  { %v8586_v41 = vadd.f32 %v8585_v35, %v8584_v2 }
0x27cc   :  { %v8588_v21 = vadd.f32 %v8587_v42, %v8586_v41 }
0x27ce   :  { %8589 = vst [vmem:[#allocation40] sm:$0x1] %v8588_v21 }
0x27cf   :  { %13109 = shalt.err (!%p13106_p4)
}
0x27d0   :  { %s18253_s29 = sld [smem:[#allocation436_spill]] }
0x27d6   :  { %s13110_s6 = scalar_lea.hbm %s18253_s29, 16 }
0x27d7   :  { %p13111_p5 = scmp.ne.s32.totalorder %s18253_s29, %s13110_s6  ;;  %p13114_p6 = scmp.lt.u32.totalorder %s13110_s6, %s18253_s29 }
0x27d9   :  { %p13116_p7 = pnand %p13114_p6, %p13111_p5 }
0x27db   :  { %13119 = shalt.err (!%p13116_p7)
}
0x27dc   :  { %8609 = dma.vmem_to_hbm [thread:$0]  %s8607_s25, 16, %s18253_s29, [#allocation41]  }
0x27dd   :  { %13146 = dma.done.wait [#allocation4], 64  }
0x27de   :  { %13147 = vsyncadd [#allocation4], 4294967232 }
0x27df   :  { %13148 = dma.done.wait [#allocation41], 16  }
0x27e0   :  { %13149 = vsyncadd [#allocation41], 4294967280 }
0x27e1   :  { %8616 = vsyncpa [#allocation3], 1 }
0x27e2   :  { %8617 = vsyncpa [#allocation7], 1 }
0x27e3   :  { %8618 = vsyncpa [#allocation10], 1 }
0x27e4   :  { %8619 = vsyncpa [#allocation13], 1 }
0x27e5   :  { %8620 = vsyncpa [#allocation16], 1 }
0x27e6   :  { %8621 = vsyncpa [#allocation19], 1 }
0x27e7   :  { %8622 = vsyncpa [#allocation22], 1 }
0x27e8   :  { %8623 = vsyncpa [#allocation25], 1 }
0x27e9   :  { %8624 = vsyncpa [#allocation28], 1 }
0x27ea   :  { %8625 = vsyncpa [#allocation31], 1 }
0x27eb   :  { %8626 = vsyncpa [#allocation34], 1 }
0x27ec   :  { %8627 = vsyncpa [#allocation4], 1 }
0x27ed   :  { %8628 = vsyncpa [#allocation41], 1 }
0x27ee   :  { %8629 = vsyncpa [#allocation5], 1 }
0x27ef   :  { %8630 = vsyncpa [#allocation38], 1 }

</bundles_post_ra>
